<compile_context>
chip_gen: v7x
topology: tpu7x:2x2x1
jax: 0.10.0
libtpu: 0.0.40
codegen_flags: <defaults>
</compile_context>

<pallas_src>
import functools

import jax
import jax.numpy as jnp
from jax.experimental import pallas as pl
from jax.experimental.pallas import tpu as pltpu


LANE = 128
_VMEM_LIMIT = 32 * 1024 * 1024


def _round_up(x, m):
    return ((x + m - 1) // m) * m


# ----------------------------------------------------------------------------
# Pallas kernels
# ----------------------------------------------------------------------------

def _conv_tap_kernel(a0_ref, a1_ref, w_ref, b_ref, o_ref, *, offsets, act, tm):
    """Fused im2col conv tile:  out = act( sum_t A[off_t : off_t+tm] @ W[t] + b ).

    a0/a1 are two consecutive tm-row tiles of the flattened, spatially padded
    activation (bf16, channel-padded to 128 lanes); the conv taps are static
    row shifts inside their concatenation.  Accumulation is f32; MXU operands
    are bf16.  (The shifted slices are taken in f32 to keep sublane-unaligned
    slicing on the best-supported 32-bit layout path.)
    """
    a = jnp.concatenate([a0_ref[...], a1_ref[...]], axis=0).astype(jnp.float32)
    coutp = o_ref.shape[-1]
    acc = jnp.zeros((tm, coutp), jnp.float32)
    for t, off in enumerate(offsets):
        at = a[off:off + tm, :].astype(jnp.bfloat16)
        acc = acc + jnp.dot(at, w_ref[t], preferred_element_type=jnp.float32)
    y = acc + b_ref[...]
    if act == "relu":
        y = jnp.maximum(y, 0.0)
    elif act == "sigmoid":
        # exp on the EUP; exact divide keeps the result in [0, 1] even when
        # exp(-y) overflows to inf (-> 0.0, no NaN).
        y = 1.0 / (1.0 + jnp.exp(-y))
    o_ref[...] = y.astype(o_ref.dtype)


def _matmul_bias_kernel(a_ref, w_ref, b_ref, o_ref):
    acc = jnp.dot(a_ref[...], w_ref[...], preferred_element_type=jnp.float32)
    o_ref[...] = (acc + b_ref[...]).astype(o_ref.dtype)


def _maxpool_kernel(x_ref, o_ref, *, w_half, cp):
    x = x_ref[...]                                    # (tb, 2*W*Cp)
    half = x.shape[-1] // 2
    r = jnp.maximum(x[:, :half], x[:, half:])         # vertical 2-max
    parts = [jnp.maximum(r[:, (2 * j) * cp:(2 * j + 1) * cp],
                         r[:, (2 * j + 1) * cp:(2 * j + 2) * cp])
             for j in range(w_half)]                  # horizontal 2-max (lane-aligned)
    o_ref[...] = parts[0] if len(parts) == 1 else jnp.concatenate(parts, axis=1)


# ----------------------------------------------------------------------------
# Layer wrappers
# ----------------------------------------------------------------------------

def conv3x3_fused(x, w9, bias, act):
    """3x3 conv (padding=1) + folded-BN bias + activation, fused in one kernel.

    x:    (N, H, W, Cp)   bf16, channel-padded
    w9:   (9, Cp, Coutp)  bf16  (BN scale folded in)
    bias: (1, Coutp)      f32   (conv bias + BN shift folded)
    """
    n, h, w, cp = x.shape
    coutp = w9.shape[-1]
    hp, wp = h + 2, w + 2
    m = n * hp * wp                       # output rows live on the padded grid

    tm = min(128, _round_up(m, 8))
    tm = max(tm, _round_up(2 * wp + 2, 8))        # taps must fit in 2 tiles
    nt = pl.cdiv(m, tm)

    xp = jnp.pad(x, ((0, 0), (1, 1), (1, 1), (0, 0)))
    a = xp.reshape(m, cp)
    a = jnp.pad(a, ((0, (nt + 1) * tm - m), (0, 0)))   # extra tile for the shift

    offsets = tuple(dy * wp + dx for dy in range(3) for dx in range(3))

    out = pl.pallas_call(
        functools.partial(_conv_tap_kernel, offsets=offsets, act=act, tm=tm),
        out_shape=jax.ShapeDtypeStruct((nt * tm, coutp), jnp.bfloat16),
        grid_spec=pltpu.PrefetchScalarGridSpec(
            num_scalar_prefetch=0,
            grid=(nt,),
            in_specs=[
                pl.BlockSpec((tm, cp), lambda i: (i, 0)),
                pl.BlockSpec((tm, cp), lambda i: (i + 1, 0)),
                pl.BlockSpec((9, cp, coutp), lambda i: (0, 0, 0)),
                pl.BlockSpec((1, coutp), lambda i: (0, 0)),
            ],
            out_specs=pl.BlockSpec((tm, coutp), lambda i: (i, 0)),
        ),
        compiler_params=pltpu.CompilerParams(
            dimension_semantics=("parallel",),
            vmem_limit_bytes=_VMEM_LIMIT),
    )(a, a, w9, bias)

    out = out[:m].reshape(n, hp, wp, coutp)[:, :h, :w, :]
    return out


def conv_t_2x2_fused(x, wm, bias):
    """ConvTranspose2d(kernel=2, stride=2) + bias as one fused bf16 matmul."""
    n, h, w, cp = x.shape
    cout4 = wm.shape[-1]
    coutp = cout4 // 4
    m = n * h * w

    tm = min(128, _round_up(m, 8))
    nt = pl.cdiv(m, tm)

    a = x.reshape(m, cp)
    if nt * tm != m:
        a = jnp.pad(a, ((0, nt * tm - m), (0, 0)))

    out = pl.pallas_call(
        _matmul_bias_kernel,
        out_shape=jax.ShapeDtypeStruct((nt * tm, cout4), jnp.bfloat16),
        grid_spec=pltpu.PrefetchScalarGridSpec(
            num_scalar_prefetch=0,
            grid=(nt,),
            in_specs=[
                pl.BlockSpec((tm, cp), lambda i: (i, 0)),
                pl.BlockSpec((cp, cout4), lambda i: (0, 0)),
                pl.BlockSpec((1, cout4), lambda i: (0, 0)),
            ],
            out_specs=pl.BlockSpec((tm, cout4), lambda i: (i, 0)),
        ),
        compiler_params=pltpu.CompilerParams(
            dimension_semantics=("parallel",),
            vmem_limit_bytes=_VMEM_LIMIT),
    )(a, wm, bias)

    out = out[:m].reshape(n, h, w, 2, 2, coutp)
    # TODO(synk): subpixel interleave left to XLA as one small transpose pass.
    out = jnp.transpose(out, (0, 1, 3, 2, 4, 5)).reshape(n, 2 * h, 2 * w, coutp)
    return out


def maxpool2x2(x):
    """2x2 max pool, stride 2 — tiled, lane-dense (last dim = W*Cp)."""
    n, h, w, cp = x.shape
    rows = n * (h // 2)
    xr = x.reshape(rows, 2 * w * cp)                  # pure row-major regroup
    tb = rows
    for cand in (512, 256, 128, 64, 32, 16, 8):
        if rows >= cand and rows % cand == 0:
            tb = cand
            break
    nt = rows // tb
    out = pl.pallas_call(
        functools.partial(_maxpool_kernel, w_half=w // 2, cp=cp),
        out_shape=jax.ShapeDtypeStruct((rows, (w // 2) * cp), x.dtype),
        grid_spec=pltpu.PrefetchScalarGridSpec(
            num_scalar_prefetch=0,
            grid=(nt,),
            in_specs=[pl.BlockSpec((tb, 2 * w * cp), lambda i: (i, 0))],
            out_specs=pl.BlockSpec((tb, (w // 2) * cp), lambda i: (i, 0)),
        ),
        compiler_params=pltpu.CompilerParams(
            dimension_semantics=("parallel",),
            vmem_limit_bytes=_VMEM_LIMIT),
    )(xr)
    return out.reshape(n, h // 2, w // 2, cp)


# ----------------------------------------------------------------------------
# One-time weight preparation (torch layout -> kernel layout)
# ----------------------------------------------------------------------------

def _fold_bn(gamma, beta, mean, var, eps=1e-5):
    scale = gamma / jnp.sqrt(var + eps)
    shift = beta - mean * scale
    return scale, shift


def _prep_conv3x3(w, b, bn, cp):
    """w: torch (Cout, Cin, 3, 3) -> (9, Cp, Cp) bf16 with BN scale folded."""
    cout, cin = int(w.shape[0]), int(w.shape[1])
    if bn is not None:
        scale, shift = _fold_bn(*bn)
    else:
        scale = jnp.ones((cout,), jnp.float32)
        shift = jnp.zeros((cout,), jnp.float32)
    wt = jnp.transpose(w, (2, 3, 1, 0)).reshape(9, cin, cout)   # (t, cin, cout)
    wt = wt * scale[None, None, :]                               # fold BN scale
    bias = scale * b + shift                                     # fold bias+shift
    w9 = jnp.zeros((9, cp, cp), jnp.float32).at[:, :cin, :cout].set(wt)
    b9 = jnp.zeros((1, cp), jnp.float32).at[0, :cout].set(bias)
    return w9.astype(jnp.bfloat16), b9


def _prep_convt(w, b, cp):
    """w: torch ConvTranspose2d (Cin, Cout, 2, 2) -> (Cp, 4*Cp) bf16."""
    cin, cout = int(w.shape[0]), int(w.shape[1])
    wt = jnp.transpose(w, (0, 2, 3, 1))                          # (cin, a, b, cout)
    wp = jnp.zeros((cp, 2, 2, cp), jnp.float32).at[:cin, :, :, :cout].set(wt)
    bp = jnp.zeros((1, 2, 2, cp), jnp.float32).at[0, :, :, :cout].set(
        jnp.broadcast_to(b, (2, 2, cout)))
    return wp.reshape(cp, 4 * cp).astype(jnp.bfloat16), bp.reshape(1, 4 * cp)


def prepare_params(params, cp):
    prep = {"enc": [], "dec": []}
    for blk in params["enc"]:
        w1, b1 = _prep_conv3x3(blk["w1"], blk["b1"], blk["bn1"], cp)
        w2, b2 = _prep_conv3x3(blk["w2"], blk["b2"], blk["bn2"], cp)
        prep["enc"].append({"w1": w1, "b1": b1, "w2": w2, "b2": b2})
    for blk in params["dec"]:
        tw, tb = _prep_convt(blk["t_w"], blk["t_b"], cp)
        cb = blk["cb"]
        w1, b1 = _prep_conv3x3(cb["w1"], cb["b1"], cb["bn1"], cp)
        w2, b2 = _prep_conv3x3(cb["w2"], cb["b2"], cb["bn2"], cp)
        prep["dec"].append({"tw": tw, "tb": tb,
                            "w1": w1, "b1": b1, "w2": w2, "b2": b2})
    lw, lb = _prep_conv3x3(params["last_w"], params["last_b"], None, cp)
    prep["last_w"], prep["last_b"] = lw, lb
    return prep


# ----------------------------------------------------------------------------
# Parameter init (deterministic, PyTorch-like uniform fan-in init)
# ----------------------------------------------------------------------------

def _init_conv(key, cin, cout, k):
    k1, k2 = jax.random.split(key)
    bound = 1.0 / jnp.sqrt(float(cin * k * k))
    w = jax.random.uniform(k1, (cout, cin, k, k), jnp.float32, -bound, bound)
    b = jax.random.uniform(k2, (cout,), jnp.float32, -bound, bound)
    return w, b


def _init_convt(key, cin, cout):
    k1, k2 = jax.random.split(key)
    bound = 1.0 / jnp.sqrt(float(cin * 4))
    w = jax.random.uniform(k1, (cin, cout, 2, 2), jnp.float32, -bound, bound)
    b = jax.random.uniform(k2, (cout,), jnp.float32, -bound, bound)
    return w, b


def _init_bn(key, c):
    k1, k2, k3, k4 = jax.random.split(key, 4)
    gamma = 1.0 + 0.1 * jax.random.normal(k1, (c,), jnp.float32)
    beta = 0.1 * jax.random.normal(k2, (c,), jnp.float32)
    mean = 0.1 * jax.random.normal(k3, (c,), jnp.float32)
    var = jnp.abs(1.0 + 0.1 * jax.random.normal(k4, (c,), jnp.float32))
    return gamma, beta, mean, var


def _init_conv_block(key, cin, cout):
    k = jax.random.split(key, 4)
    w1, b1 = _init_conv(k[0], cin, cout, 3)
    w2, b2 = _init_conv(k[2], cout, cout, 3)
    return {"w1": w1, "b1": b1, "bn1": _init_bn(k[1], cout),
            "w2": w2, "b2": b2, "bn2": _init_bn(k[3], cout)}


def init_unet_params(key, size_model):
    s = size_model
    enc_ch = [(3, s), (s, 2 * s), (2 * s, 4 * s), (4 * s, 8 * s), (8 * s, 16 * s)]
    dec_ch = [(16 * s, 8 * s), (8 * s, 4 * s), (4 * s, 2 * s), (2 * s, s), (s, 3)]
    keys = jax.random.split(key, len(enc_ch) + 2 * len(dec_ch) + 1)
    params = {"enc": [], "dec": []}
    ki = 0
    for cin, cout in enc_ch:
        params["enc"].append(_init_conv_block(keys[ki], cin, cout)); ki += 1
    for cin, cout in dec_ch:
        t_w, t_b = _init_convt(keys[ki], cin, cin); ki += 1
        cb = _init_conv_block(keys[ki], cin, cout); ki += 1
        params["dec"].append({"t_w": t_w, "t_b": t_b, "cb": cb})
    lw, lb = _init_conv(keys[ki], 3, 3, 3)
    params["last_w"], params["last_b"] = lw, lb
    return params


# ----------------------------------------------------------------------------
# Full UNet forward
# ----------------------------------------------------------------------------

def unet_forward(prep, x_nchw):
    cp = prep["enc"][0]["w1"].shape[1]
    c_in = x_nchw.shape[1]
    x = jnp.transpose(x_nchw, (0, 2, 3, 1))                        # NCHW -> NHWC
    x = jnp.pad(x, ((0, 0), (0, 0), (0, 0), (0, cp - c_in))).astype(jnp.bfloat16)

    e = x
    for blk in prep["enc"]:                    # ConvBlock -> MaxPool2x2
        e = conv3x3_fused(e, blk["w1"], blk["b1"], act="relu")
        e = conv3x3_fused(e, blk["w2"], blk["b2"], act="relu")
        e = maxpool2x2(e)

    d = e                                      # skip connections unused,
    for blk in prep["dec"]:                    # matching DecoderBlock.forward
        d = conv_t_2x2_fused(d, blk["tw"], blk["tb"])
        d = conv3x3_fused(d, blk["w1"], blk["b1"], act="relu")
        d = conv3x3_fused(d, blk["w2"], blk["b2"], act="relu")

    out = conv3x3_fused(d, prep["last_w"], prep["last_b"], act="sigmoid")
    out = out[..., :c_in].astype(jnp.float32)
    return jnp.transpose(out, (0, 3, 1, 2))                        # NHWC -> NCHW


if __name__ == "__main__":
    key = jax.random.PRNGKey(0)
    k_params, k_x = jax.random.split(key)

    size_model = 4
    # spatial must be divisible by 2**5 = 32 for the 5 encoder poolings
    x = jax.random.normal(k_x, (2, 3, 32, 32), jnp.float32)        # NCHW

    params = init_unet_params(k_params, size_model)
    cp = _round_up(max(16 * size_model, 3), LANE)                  # lane-dense C
    prep = prepare_params(params, cp)                              # one-time prep

    fwd = jax.jit(unet_forward)
    out = jax.block_until_ready(fwd(prep, x))

    assert out.shape == (2, 3, 32, 32), out.shape
    assert bool(jnp.all(jnp.isfinite(out)))
    assert bool(jnp.all((out >= 0.0) & (out <= 1.0)))              # sigmoid range
    print("KERNEL_OK")
</pallas_src>

<mosaic_0001>
module attributes {stable_mosaic.version = 11 : i64} {
  func.func @_conv_tap_kernel(%arg0: i32, %arg1: memref<128x128xbf16, #tpu.memory_space<vmem>>, %arg2: memref<128x128xbf16, #tpu.memory_space<vmem>>, %arg3: memref<9x128x128xbf16, #tpu.memory_space<vmem>>, %arg4: memref<1x128xf32, #tpu.memory_space<vmem>>, %arg5: memref<128x128xbf16, #tpu.memory_space<vmem>>) attributes {dimension_semantics = [#tpu.dimension_semantics<parallel>], iteration_bounds = array<i64: 19>, scalar_prefetch = 0 : i64, scratch_operands = 0 : i64, tpu.core_type = #tpu.core_type<tc>, window_params = [{transform_indices = @transform_0, window_bounds = array<i64: 128, 128>}, {transform_indices = @transform_1, window_bounds = array<i64: 128, 128>}, {pipeline_mode = #tpu.pipeline_mode<synchronous>, transform_indices = @transform_2, window_bounds = array<i64: 9, 128, 128>}, {pipeline_mode = #tpu.pipeline_mode<synchronous>, transform_indices = @transform_3, window_bounds = array<i64: 1, 128>}, {transform_indices = @transform_4, window_bounds = array<i64: 128, 128>}]} {
    %c0 = arith.constant 0 : index
    %c0_0 = arith.constant 0 : index
    %0 = vector.load %arg1[%c0, %c0_0] : memref<128x128xbf16, #tpu.memory_space<vmem>>, vector<128x128xbf16>
    %c0_1 = arith.constant 0 : index
    %c0_2 = arith.constant 0 : index
    %1 = vector.load %arg2[%c0_1, %c0_2] : memref<128x128xbf16, #tpu.memory_space<vmem>>, vector<128x128xbf16>
    %2 = tpu.concatenate %0, %1 in 0 : vector<128x128xbf16>, vector<128x128xbf16> -> vector<256x128xbf16>
    %3 = arith.extf %2 : vector<256x128xbf16> to vector<256x128xf32>
    %cst = arith.constant 0.000000e+00 : f32
    %4 = vector.broadcast %cst : f32 to vector<128x128xf32>
    %5 = vector.extract_strided_slice %3 {offsets = [0, 0], sizes = [128, 128], strides = [1, 1]} : vector<256x128xf32> to vector<128x128xf32>
    %6 = arith.truncf %5 : vector<128x128xf32> to vector<128x128xbf16>
    %c0_3 = arith.constant 0 : index
    %c0_4 = arith.constant 0 : index
    %c0_5 = arith.constant 0 : index
    %7 = vector.load %arg3[%c0_3, %c0_4, %c0_5] : memref<9x128x128xbf16, #tpu.memory_space<vmem>>, vector<1x128x128xbf16>
    %8 = vector.shape_cast %7 : vector<1x128x128xbf16> to vector<128x128xbf16>
    %cst_6 = arith.constant dense<0.000000e+00> : vector<128x128xf32>
    %9 = tpu.matmul %6, %8, %cst_6 {dimension_numbers = #tpu.dot_dimension_numbers<[1], [0], [0], [1], [0, 0, 1, 1], [], []>} : vector<128x128xbf16>, vector<128x128xbf16>, vector<128x128xf32> -> vector<128x128xf32>
    %10 = arith.addf %4, %9 : vector<128x128xf32>
    %11 = vector.extract_strided_slice %3 {offsets = [1, 0], sizes = [128, 128], strides = [1, 1]} : vector<256x128xf32> to vector<128x128xf32>
    %12 = arith.truncf %11 : vector<128x128xf32> to vector<128x128xbf16>
    %c1 = arith.constant 1 : index
    %c0_7 = arith.constant 0 : index
    %c0_8 = arith.constant 0 : index
    %13 = vector.load %arg3[%c1, %c0_7, %c0_8] : memref<9x128x128xbf16, #tpu.memory_space<vmem>>, vector<1x128x128xbf16>
    %14 = vector.shape_cast %13 : vector<1x128x128xbf16> to vector<128x128xbf16>
    %cst_9 = arith.constant dense<0.000000e+00> : vector<128x128xf32>
    %15 = tpu.matmul %12, %14, %cst_9 {dimension_numbers = #tpu.dot_dimension_numbers<[1], [0], [0], [1], [0, 0, 1, 1], [], []>} : vector<128x128xbf16>, vector<128x128xbf16>, vector<128x128xf32> -> vector<128x128xf32>
    %16 = arith.addf %10, %15 : vector<128x128xf32>
    %17 = vector.extract_strided_slice %3 {offsets = [2, 0], sizes = [128, 128], strides = [1, 1]} : vector<256x128xf32> to vector<128x128xf32>
    %18 = arith.truncf %17 : vector<128x128xf32> to vector<128x128xbf16>
    %c2 = arith.constant 2 : index
    %c0_10 = arith.constant 0 : index
    %c0_11 = arith.constant 0 : index
    %19 = vector.load %arg3[%c2, %c0_10, %c0_11] : memref<9x128x128xbf16, #tpu.memory_space<vmem>>, vector<1x128x128xbf16>
    %20 = vector.shape_cast %19 : vector<1x128x128xbf16> to vector<128x128xbf16>
    %cst_12 = arith.constant dense<0.000000e+00> : vector<128x128xf32>
    %21 = tpu.matmul %18, %20, %cst_12 {dimension_numbers = #tpu.dot_dimension_numbers<[1], [0], [0], [1], [0, 0, 1, 1], [], []>} : vector<128x128xbf16>, vector<128x128xbf16>, vector<128x128xf32> -> vector<128x128xf32>
    %22 = arith.addf %16, %21 : vector<128x128xf32>
    %23 = vector.extract_strided_slice %3 {offsets = [34, 0], sizes = [128, 128], strides = [1, 1]} : vector<256x128xf32> to vector<128x128xf32>
    %24 = arith.truncf %23 : vector<128x128xf32> to vector<128x128xbf16>
    %c3 = arith.constant 3 : index
    %c0_13 = arith.constant 0 : index
    %c0_14 = arith.constant 0 : index
    %25 = vector.load %arg3[%c3, %c0_13, %c0_14] : memref<9x128x128xbf16, #tpu.memory_space<vmem>>, vector<1x128x128xbf16>
    %26 = vector.shape_cast %25 : vector<1x128x128xbf16> to vector<128x128xbf16>
    %cst_15 = arith.constant dense<0.000000e+00> : vector<128x128xf32>
    %27 = tpu.matmul %24, %26, %cst_15 {dimension_numbers = #tpu.dot_dimension_numbers<[1], [0], [0], [1], [0, 0, 1, 1], [], []>} : vector<128x128xbf16>, vector<128x128xbf16>, vector<128x128xf32> -> vector<128x128xf32>
    %28 = arith.addf %22, %27 : vector<128x128xf32>
    %29 = vector.extract_strided_slice %3 {offsets = [35, 0], sizes = [128, 128], strides = [1, 1]} : vector<256x128xf32> to vector<128x128xf32>
    %30 = arith.truncf %29 : vector<128x128xf32> to vector<128x128xbf16>
    %c4 = arith.constant 4 : index
    %c0_16 = arith.constant 0 : index
    %c0_17 = arith.constant 0 : index
    %31 = vector.load %arg3[%c4, %c0_16, %c0_17] : memref<9x128x128xbf16, #tpu.memory_space<vmem>>, vector<1x128x128xbf16>
    %32 = vector.shape_cast %31 : vector<1x128x128xbf16> to vector<128x128xbf16>
    %cst_18 = arith.constant dense<0.000000e+00> : vector<128x128xf32>
    %33 = tpu.matmul %30, %32, %cst_18 {dimension_numbers = #tpu.dot_dimension_numbers<[1], [0], [0], [1], [0, 0, 1, 1], [], []>} : vector<128x128xbf16>, vector<128x128xbf16>, vector<128x128xf32> -> vector<128x128xf32>
    %34 = arith.addf %28, %33 : vector<128x128xf32>
    %35 = vector.extract_strided_slice %3 {offsets = [36, 0], sizes = [128, 128], strides = [1, 1]} : vector<256x128xf32> to vector<128x128xf32>
    %36 = arith.truncf %35 : vector<128x128xf32> to vector<128x128xbf16>
    %c5 = arith.constant 5 : index
    %c0_19 = arith.constant 0 : index
    %c0_20 = arith.constant 0 : index
    %37 = vector.load %arg3[%c5, %c0_19, %c0_20] : memref<9x128x128xbf16, #tpu.memory_space<vmem>>, vector<1x128x128xbf16>
    %38 = vector.shape_cast %37 : vector<1x128x128xbf16> to vector<128x128xbf16>
    %cst_21 = arith.constant dense<0.000000e+00> : vector<128x128xf32>
    %39 = tpu.matmul %36, %38, %cst_21 {dimension_numbers = #tpu.dot_dimension_numbers<[1], [0], [0], [1], [0, 0, 1, 1], [], []>} : vector<128x128xbf16>, vector<128x128xbf16>, vector<128x128xf32> -> vector<128x128xf32>
    %40 = arith.addf %34, %39 : vector<128x128xf32>
    %41 = vector.extract_strided_slice %3 {offsets = [68, 0], sizes = [128, 128], strides = [1, 1]} : vector<256x128xf32> to vector<128x128xf32>
    %42 = arith.truncf %41 : vector<128x128xf32> to vector<128x128xbf16>
    %c6 = arith.constant 6 : index
    %c0_22 = arith.constant 0 : index
    %c0_23 = arith.constant 0 : index
    %43 = vector.load %arg3[%c6, %c0_22, %c0_23] : memref<9x128x128xbf16, #tpu.memory_space<vmem>>, vector<1x128x128xbf16>
    %44 = vector.shape_cast %43 : vector<1x128x128xbf16> to vector<128x128xbf16>
    %cst_24 = arith.constant dense<0.000000e+00> : vector<128x128xf32>
    %45 = tpu.matmul %42, %44, %cst_24 {dimension_numbers = #tpu.dot_dimension_numbers<[1], [0], [0], [1], [0, 0, 1, 1], [], []>} : vector<128x128xbf16>, vector<128x128xbf16>, vector<128x128xf32> -> vector<128x128xf32>
    %46 = arith.addf %40, %45 : vector<128x128xf32>
    %47 = vector.extract_strided_slice %3 {offsets = [69, 0], sizes = [128, 128], strides = [1, 1]} : vector<256x128xf32> to vector<128x128xf32>
    %48 = arith.truncf %47 : vector<128x128xf32> to vector<128x128xbf16>
    %c7 = arith.constant 7 : index
    %c0_25 = arith.constant 0 : index
    %c0_26 = arith.constant 0 : index
    %49 = vector.load %arg3[%c7, %c0_25, %c0_26] : memref<9x128x128xbf16, #tpu.memory_space<vmem>>, vector<1x128x128xbf16>
    %50 = vector.shape_cast %49 : vector<1x128x128xbf16> to vector<128x128xbf16>
    %cst_27 = arith.constant dense<0.000000e+00> : vector<128x128xf32>
    %51 = tpu.matmul %48, %50, %cst_27 {dimension_numbers = #tpu.dot_dimension_numbers<[1], [0], [0], [1], [0, 0, 1, 1], [], []>} : vector<128x128xbf16>, vector<128x128xbf16>, vector<128x128xf32> -> vector<128x128xf32>
    %52 = arith.addf %46, %51 : vector<128x128xf32>
    %53 = vector.extract_strided_slice %3 {offsets = [70, 0], sizes = [128, 128], strides = [1, 1]} : vector<256x128xf32> to vector<128x128xf32>
    %54 = arith.truncf %53 : vector<128x128xf32> to vector<128x128xbf16>
    %c8 = arith.constant 8 : index
    %c0_28 = arith.constant 0 : index
    %c0_29 = arith.constant 0 : index
    %55 = vector.load %arg3[%c8, %c0_28, %c0_29] : memref<9x128x128xbf16, #tpu.memory_space<vmem>>, vector<1x128x128xbf16>
    %56 = vector.shape_cast %55 : vector<1x128x128xbf16> to vector<128x128xbf16>
    %cst_30 = arith.constant dense<0.000000e+00> : vector<128x128xf32>
    %57 = tpu.matmul %54, %56, %cst_30 {dimension_numbers = #tpu.dot_dimension_numbers<[1], [0], [0], [1], [0, 0, 1, 1], [], []>} : vector<128x128xbf16>, vector<128x128xbf16>, vector<128x128xf32> -> vector<128x128xf32>
    %58 = arith.addf %52, %57 : vector<128x128xf32>
    %c0_31 = arith.constant 0 : index
    %c0_32 = arith.constant 0 : index
    %59 = vector.load %arg4[%c0_31, %c0_32] : memref<1x128xf32, #tpu.memory_space<vmem>>, vector<1x128xf32>
    %60 = vector.broadcast %59 : vector<1x128xf32> to vector<128x128xf32>
    %61 = arith.addf %58, %60 : vector<128x128xf32>
    %cst_33 = arith.constant 0.000000e+00 : f32
    %62 = vector.broadcast %cst_33 : f32 to vector<128x128xf32>
    %63 = arith.maximumf %61, %62 : vector<128x128xf32>
    %64 = arith.truncf %63 : vector<128x128xf32> to vector<128x128xbf16>
    %c0_34 = arith.constant 0 : index
    %c0_35 = arith.constant 0 : index
    %65 = vector.load %arg5[%c0_34, %c0_35] : memref<128x128xbf16, #tpu.memory_space<vmem>>, vector<128x128xbf16>
    tpu.vector_store %arg5[%c0_34, %c0_35], %64 {strides = array<i32>} : memref<128x128xbf16, #tpu.memory_space<vmem>>, vector<128x128xbf16>,
    return
  }
  func.func @transform_0(%arg0: i32) -> (i32, i32) {
    %c0_i32 = arith.constant 0 : i32
    %c0_i32_0 = arith.constant 0 : i32
    return %arg0, %c0_i32 : i32, i32
  }
  func.func @transform_1(%arg0: i32) -> (i32, i32) {
    %c1_i32 = arith.constant 1 : i32
    %0 = arith.addi %arg0, %c1_i32 : i32
    %c0_i32 = arith.constant 0 : i32
    %c0_i32_0 = arith.constant 0 : i32
    return %0, %c0_i32 : i32, i32
  }
  func.func @transform_2(%arg0: i32) -> (i32, i32, i32) {
    %c0_i32 = arith.constant 0 : i32
    %c0_i32_0 = arith.constant 0 : i32
    %c0_i32_1 = arith.constant 0 : i32
    %c0_i32_2 = arith.constant 0 : i32
    return %c0_i32, %c0_i32_0, %c0_i32_1 : i32, i32, i32
  }
  func.func @transform_3(%arg0: i32) -> (i32, i32) {
    %c0_i32 = arith.constant 0 : i32
    %c0_i32_0 = arith.constant 0 : i32
    %c0_i32_1 = arith.constant 0 : i32
    return %c0_i32, %c0_i32_0 : i32, i32
  }
  func.func @transform_4(%arg0: i32) -> (i32, i32) {
    %c0_i32 = arith.constant 0 : i32
    %c0_i32_0 = arith.constant 0 : i32
    return %arg0, %c0_i32 : i32, i32
  }
}

module attributes {stable_mosaic.version = 11 : i64} {
  func.func @_maxpool_kernel(%arg0: i32, %arg1: memref<32x8192xbf16, #tpu.memory_space<vmem>>, %arg2: memref<32x2048xbf16, #tpu.memory_space<vmem>>) attributes {dimension_semantics = [#tpu.dimension_semantics<parallel>], iteration_bounds = array<i64: 1>, scalar_prefetch = 0 : i64, scratch_operands = 0 : i64, tpu.core_type = #tpu.core_type<tc>, window_params = [{transform_indices = @transform_0, window_bounds = array<i64: 32, 8192>}, {transform_indices = @transform_1, window_bounds = array<i64: 32, 2048>}]} {
    %c0 = arith.constant 0 : index
    %c0_0 = arith.constant 0 : index
    %0 = vector.load %arg1[%c0, %c0_0] : memref<32x8192xbf16, #tpu.memory_space<vmem>>, vector<32x8192xbf16>
    %1 = vector.extract_strided_slice %0 {offsets = [0, 0], sizes = [32, 4096], strides = [1, 1]} : vector<32x8192xbf16> to vector<32x4096xbf16>
    %2 = vector.extract_strided_slice %0 {offsets = [0, 4096], sizes = [32, 4096], strides = [1, 1]} : vector<32x8192xbf16> to vector<32x4096xbf16>
    %3 = arith.maximumf %1, %2 : vector<32x4096xbf16>
    %4 = vector.extract_strided_slice %3 {offsets = [0, 0], sizes = [32, 128], strides = [1, 1]} : vector<32x4096xbf16> to vector<32x128xbf16>
    %5 = vector.extract_strided_slice %3 {offsets = [0, 128], sizes = [32, 128], strides = [1, 1]} : vector<32x4096xbf16> to vector<32x128xbf16>
    %6 = arith.maximumf %4, %5 : vector<32x128xbf16>
    %7 = vector.extract_strided_slice %3 {offsets = [0, 256], sizes = [32, 128], strides = [1, 1]} : vector<32x4096xbf16> to vector<32x128xbf16>
    %8 = vector.extract_strided_slice %3 {offsets = [0, 384], sizes = [32, 128], strides = [1, 1]} : vector<32x4096xbf16> to vector<32x128xbf16>
    %9 = arith.maximumf %7, %8 : vector<32x128xbf16>
    %10 = vector.extract_strided_slice %3 {offsets = [0, 512], sizes = [32, 128], strides = [1, 1]} : vector<32x4096xbf16> to vector<32x128xbf16>
    %11 = vector.extract_strided_slice %3 {offsets = [0, 640], sizes = [32, 128], strides = [1, 1]} : vector<32x4096xbf16> to vector<32x128xbf16>
    %12 = arith.maximumf %10, %11 : vector<32x128xbf16>
    %13 = vector.extract_strided_slice %3 {offsets = [0, 768], sizes = [32, 128], strides = [1, 1]} : vector<32x4096xbf16> to vector<32x128xbf16>
    %14 = vector.extract_strided_slice %3 {offsets = [0, 896], sizes = [32, 128], strides = [1, 1]} : vector<32x4096xbf16> to vector<32x128xbf16>
    %15 = arith.maximumf %13, %14 : vector<32x128xbf16>
    %16 = vector.extract_strided_slice %3 {offsets = [0, 1024], sizes = [32, 128], strides = [1, 1]} : vector<32x4096xbf16> to vector<32x128xbf16>
    %17 = vector.extract_strided_slice %3 {offsets = [0, 1152], sizes = [32, 128], strides = [1, 1]} : vector<32x4096xbf16> to vector<32x128xbf16>
    %18 = arith.maximumf %16, %17 : vector<32x128xbf16>
    %19 = vector.extract_strided_slice %3 {offsets = [0, 1280], sizes = [32, 128], strides = [1, 1]} : vector<32x4096xbf16> to vector<32x128xbf16>
    %20 = vector.extract_strided_slice %3 {offsets = [0, 1408], sizes = [32, 128], strides = [1, 1]} : vector<32x4096xbf16> to vector<32x128xbf16>
    %21 = arith.maximumf %19, %20 : vector<32x128xbf16>
    %22 = vector.extract_strided_slice %3 {offsets = [0, 1536], sizes = [32, 128], strides = [1, 1]} : vector<32x4096xbf16> to vector<32x128xbf16>
    %23 = vector.extract_strided_slice %3 {offsets = [0, 1664], sizes = [32, 128], strides = [1, 1]} : vector<32x4096xbf16> to vector<32x128xbf16>
    %24 = arith.maximumf %22, %23 : vector<32x128xbf16>
    %25 = vector.extract_strided_slice %3 {offsets = [0, 1792], sizes = [32, 128], strides = [1, 1]} : vector<32x4096xbf16> to vector<32x128xbf16>
    %26 = vector.extract_strided_slice %3 {offsets = [0, 1920], sizes = [32, 128], strides = [1, 1]} : vector<32x4096xbf16> to vector<32x128xbf16>
    %27 = arith.maximumf %25, %26 : vector<32x128xbf16>
    %28 = vector.extract_strided_slice %3 {offsets = [0, 2048], sizes = [32, 128], strides = [1, 1]} : vector<32x4096xbf16> to vector<32x128xbf16>
    %29 = vector.extract_strided_slice %3 {offsets = [0, 2176], sizes = [32, 128], strides = [1, 1]} : vector<32x4096xbf16> to vector<32x128xbf16>
    %30 = arith.maximumf %28, %29 : vector<32x128xbf16>
    %31 = vector.extract_strided_slice %3 {offsets = [0, 2304], sizes = [32, 128], strides = [1, 1]} : vector<32x4096xbf16> to vector<32x128xbf16>
    %32 = vector.extract_strided_slice %3 {offsets = [0, 2432], sizes = [32, 128], strides = [1, 1]} : vector<32x4096xbf16> to vector<32x128xbf16>
    %33 = arith.maximumf %31, %32 : vector<32x128xbf16>
    %34 = vector.extract_strided_slice %3 {offsets = [0, 2560], sizes = [32, 128], strides = [1, 1]} : vector<32x4096xbf16> to vector<32x128xbf16>
    %35 = vector.extract_strided_slice %3 {offsets = [0, 2688], sizes = [32, 128], strides = [1, 1]} : vector<32x4096xbf16> to vector<32x128xbf16>
    %36 = arith.maximumf %34, %35 : vector<32x128xbf16>
    %37 = vector.extract_strided_slice %3 {offsets = [0, 2816], sizes = [32, 128], strides = [1, 1]} : vector<32x4096xbf16> to vector<32x128xbf16>
    %38 = vector.extract_strided_slice %3 {offsets = [0, 2944], sizes = [32, 128], strides = [1, 1]} : vector<32x4096xbf16> to vector<32x128xbf16>
    %39 = arith.maximumf %37, %38 : vector<32x128xbf16>
    %40 = vector.extract_strided_slice %3 {offsets = [0, 3072], sizes = [32, 128], strides = [1, 1]} : vector<32x4096xbf16> to vector<32x128xbf16>
    %41 = vector.extract_strided_slice %3 {offsets = [0, 3200], sizes = [32, 128], strides = [1, 1]} : vector<32x4096xbf16> to vector<32x128xbf16>
    %42 = arith.maximumf %40, %41 : vector<32x128xbf16>
    %43 = vector.extract_strided_slice %3 {offsets = [0, 3328], sizes = [32, 128], strides = [1, 1]} : vector<32x4096xbf16> to vector<32x128xbf16>
    %44 = vector.extract_strided_slice %3 {offsets = [0, 3456], sizes = [32, 128], strides = [1, 1]} : vector<32x4096xbf16> to vector<32x128xbf16>
    %45 = arith.maximumf %43, %44 : vector<32x128xbf16>
    %46 = vector.extract_strided_slice %3 {offsets = [0, 3584], sizes = [32, 128], strides = [1, 1]} : vector<32x4096xbf16> to vector<32x128xbf16>
    %47 = vector.extract_strided_slice %3 {offsets = [0, 3712], sizes = [32, 128], strides = [1, 1]} : vector<32x4096xbf16> to vector<32x128xbf16>
    %48 = arith.maximumf %46, %47 : vector<32x128xbf16>
    %49 = vector.extract_strided_slice %3 {offsets = [0, 3840], sizes = [32, 128], strides = [1, 1]} : vector<32x4096xbf16> to vector<32x128xbf16>
    %50 = vector.extract_strided_slice %3 {offsets = [0, 3968], sizes = [32, 128], strides = [1, 1]} : vector<32x4096xbf16> to vector<32x128xbf16>
    %51 = arith.maximumf %49, %50 : vector<32x128xbf16>
    %52 = tpu.concatenate %6, %9, %12, %15, %18, %21, %24, %27, %30, %33, %36, %39, %42, %45, %48, %51 in 1 : vector<32x128xbf16>, vector<32x128xbf16>, vector<32x128xbf16>, vector<32x128xbf16>, vector<32x128xbf16>, vector<32x128xbf16>, vector<32x128xbf16>, vector<32x128xbf16>, vector<32x128xbf16>, vector<32x128xbf16>, vector<32x128xbf16>, vector<32x128xbf16>, vector<32x128xbf16>, vector<32x128xbf16>, vector<32x128xbf16>, vector<32x128xbf16> -> vector<32x2048xbf16>
    %c0_1 = arith.constant 0 : index
    %c0_2 = arith.constant 0 : index
    %53 = vector.load %arg2[%c0_1, %c0_2] : memref<32x2048xbf16, #tpu.memory_space<vmem>>, vector<32x2048xbf16>
    tpu.vector_store %arg2[%c0_1, %c0_2], %52 {strides = array<i32>} : memref<32x2048xbf16, #tpu.memory_space<vmem>>, vector<32x2048xbf16>,
    return
  }
  func.func @transform_0(%arg0: i32) -> (i32, i32) {
    %c0_i32 = arith.constant 0 : i32
    %c0_i32_0 = arith.constant 0 : i32
    return %arg0, %c0_i32 : i32, i32
  }
  func.func @transform_1(%arg0: i32) -> (i32, i32) {
    %c0_i32 = arith.constant 0 : i32
    %c0_i32_0 = arith.constant 0 : i32
    return %arg0, %c0_i32 : i32, i32
  }
}

module attributes {stable_mosaic.version = 11 : i64} {
  func.func @_conv_tap_kernel(%arg0: i32, %arg1: memref<128x128xbf16, #tpu.memory_space<vmem>>, %arg2: memref<128x128xbf16, #tpu.memory_space<vmem>>, %arg3: memref<9x128x128xbf16, #tpu.memory_space<vmem>>, %arg4: memref<1x128xf32, #tpu.memory_space<vmem>>, %arg5: memref<128x128xbf16, #tpu.memory_space<vmem>>) attributes {dimension_semantics = [#tpu.dimension_semantics<parallel>], iteration_bounds = array<i64: 6>, scalar_prefetch = 0 : i64, scratch_operands = 0 : i64, tpu.core_type = #tpu.core_type<tc>, window_params = [{transform_indices = @transform_0, window_bounds = array<i64: 128, 128>}, {transform_indices = @transform_1, window_bounds = array<i64: 128, 128>}, {pipeline_mode = #tpu.pipeline_mode<synchronous>, transform_indices = @transform_2, window_bounds = array<i64: 9, 128, 128>}, {pipeline_mode = #tpu.pipeline_mode<synchronous>, transform_indices = @transform_3, window_bounds = array<i64: 1, 128>}, {transform_indices = @transform_4, window_bounds = array<i64: 128, 128>}]} {
    %c0 = arith.constant 0 : index
    %c0_0 = arith.constant 0 : index
    %0 = vector.load %arg1[%c0, %c0_0] : memref<128x128xbf16, #tpu.memory_space<vmem>>, vector<128x128xbf16>
    %c0_1 = arith.constant 0 : index
    %c0_2 = arith.constant 0 : index
    %1 = vector.load %arg2[%c0_1, %c0_2] : memref<128x128xbf16, #tpu.memory_space<vmem>>, vector<128x128xbf16>
    %2 = tpu.concatenate %0, %1 in 0 : vector<128x128xbf16>, vector<128x128xbf16> -> vector<256x128xbf16>
    %3 = arith.extf %2 : vector<256x128xbf16> to vector<256x128xf32>
    %cst = arith.constant 0.000000e+00 : f32
    %4 = vector.broadcast %cst : f32 to vector<128x128xf32>
    %5 = vector.extract_strided_slice %3 {offsets = [0, 0], sizes = [128, 128], strides = [1, 1]} : vector<256x128xf32> to vector<128x128xf32>
    %6 = arith.truncf %5 : vector<128x128xf32> to vector<128x128xbf16>
    %c0_3 = arith.constant 0 : index
    %c0_4 = arith.constant 0 : index
    %c0_5 = arith.constant 0 : index
    %7 = vector.load %arg3[%c0_3, %c0_4, %c0_5] : memref<9x128x128xbf16, #tpu.memory_space<vmem>>, vector<1x128x128xbf16>
    %8 = vector.shape_cast %7 : vector<1x128x128xbf16> to vector<128x128xbf16>
    %cst_6 = arith.constant dense<0.000000e+00> : vector<128x128xf32>
    %9 = tpu.matmul %6, %8, %cst_6 {dimension_numbers = #tpu.dot_dimension_numbers<[1], [0], [0], [1], [0, 0, 1, 1], [], []>} : vector<128x128xbf16>, vector<128x128xbf16>, vector<128x128xf32> -> vector<128x128xf32>
    %10 = arith.addf %4, %9 : vector<128x128xf32>
    %11 = vector.extract_strided_slice %3 {offsets = [1, 0], sizes = [128, 128], strides = [1, 1]} : vector<256x128xf32> to vector<128x128xf32>
    %12 = arith.truncf %11 : vector<128x128xf32> to vector<128x128xbf16>
    %c1 = arith.constant 1 : index
    %c0_7 = arith.constant 0 : index
    %c0_8 = arith.constant 0 : index
    %13 = vector.load %arg3[%c1, %c0_7, %c0_8] : memref<9x128x128xbf16, #tpu.memory_space<vmem>>, vector<1x128x128xbf16>
    %14 = vector.shape_cast %13 : vector<1x128x128xbf16> to vector<128x128xbf16>
    %cst_9 = arith.constant dense<0.000000e+00> : vector<128x128xf32>
    %15 = tpu.matmul %12, %14, %cst_9 {dimension_numbers = #tpu.dot_dimension_numbers<[1], [0], [0], [1], [0, 0, 1, 1], [], []>} : vector<128x128xbf16>, vector<128x128xbf16>, vector<128x128xf32> -> vector<128x128xf32>
    %16 = arith.addf %10, %15 : vector<128x128xf32>
    %17 = vector.extract_strided_slice %3 {offsets = [2, 0], sizes = [128, 128], strides = [1, 1]} : vector<256x128xf32> to vector<128x128xf32>
    %18 = arith.truncf %17 : vector<128x128xf32> to vector<128x128xbf16>
    %c2 = arith.constant 2 : index
    %c0_10 = arith.constant 0 : index
    %c0_11 = arith.constant 0 : index
    %19 = vector.load %arg3[%c2, %c0_10, %c0_11] : memref<9x128x128xbf16, #tpu.memory_space<vmem>>, vector<1x128x128xbf16>
    %20 = vector.shape_cast %19 : vector<1x128x128xbf16> to vector<128x128xbf16>
    %cst_12 = arith.constant dense<0.000000e+00> : vector<128x128xf32>
    %21 = tpu.matmul %18, %20, %cst_12 {dimension_numbers = #tpu.dot_dimension_numbers<[1], [0], [0], [1], [0, 0, 1, 1], [], []>} : vector<128x128xbf16>, vector<128x128xbf16>, vector<128x128xf32> -> vector<128x128xf32>
    %22 = arith.addf %16, %21 : vector<128x128xf32>
    %23 = vector.extract_strided_slice %3 {offsets = [18, 0], sizes = [128, 128], strides = [1, 1]} : vector<256x128xf32> to vector<128x128xf32>
    %24 = arith.truncf %23 : vector<128x128xf32> to vector<128x128xbf16>
    %c3 = arith.constant 3 : index
    %c0_13 = arith.constant 0 : index
    %c0_14 = arith.constant 0 : index
    %25 = vector.load %arg3[%c3, %c0_13, %c0_14] : memref<9x128x128xbf16, #tpu.memory_space<vmem>>, vector<1x128x128xbf16>
    %26 = vector.shape_cast %25 : vector<1x128x128xbf16> to vector<128x128xbf16>
    %cst_15 = arith.constant dense<0.000000e+00> : vector<128x128xf32>
    %27 = tpu.matmul %24, %26, %cst_15 {dimension_numbers = #tpu.dot_dimension_numbers<[1], [0], [0], [1], [0, 0, 1, 1], [], []>} : vector<128x128xbf16>, vector<128x128xbf16>, vector<128x128xf32> -> vector<128x128xf32>
    %28 = arith.addf %22, %27 : vector<128x128xf32>
    %29 = vector.extract_strided_slice %3 {offsets = [19, 0], sizes = [128, 128], strides = [1, 1]} : vector<256x128xf32> to vector<128x128xf32>
    %30 = arith.truncf %29 : vector<128x128xf32> to vector<128x128xbf16>
    %c4 = arith.constant 4 : index
    %c0_16 = arith.constant 0 : index
    %c0_17 = arith.constant 0 : index
    %31 = vector.load %arg3[%c4, %c0_16, %c0_17] : memref<9x128x128xbf16, #tpu.memory_space<vmem>>, vector<1x128x128xbf16>
    %32 = vector.shape_cast %31 : vector<1x128x128xbf16> to vector<128x128xbf16>
    %cst_18 = arith.constant dense<0.000000e+00> : vector<128x128xf32>
    %33 = tpu.matmul %30, %32, %cst_18 {dimension_numbers = #tpu.dot_dimension_numbers<[1], [0], [0], [1], [0, 0, 1, 1], [], []>} : vector<128x128xbf16>, vector<128x128xbf16>, vector<128x128xf32> -> vector<128x128xf32>
    %34 = arith.addf %28, %33 : vector<128x128xf32>
    %35 = vector.extract_strided_slice %3 {offsets = [20, 0], sizes = [128, 128], strides = [1, 1]} : vector<256x128xf32> to vector<128x128xf32>
    %36 = arith.truncf %35 : vector<128x128xf32> to vector<128x128xbf16>
    %c5 = arith.constant 5 : index
    %c0_19 = arith.constant 0 : index
    %c0_20 = arith.constant 0 : index
    %37 = vector.load %arg3[%c5, %c0_19, %c0_20] : memref<9x128x128xbf16, #tpu.memory_space<vmem>>, vector<1x128x128xbf16>
    %38 = vector.shape_cast %37 : vector<1x128x128xbf16> to vector<128x128xbf16>
    %cst_21 = arith.constant dense<0.000000e+00> : vector<128x128xf32>
    %39 = tpu.matmul %36, %38, %cst_21 {dimension_numbers = #tpu.dot_dimension_numbers<[1], [0], [0], [1], [0, 0, 1, 1], [], []>} : vector<128x128xbf16>, vector<128x128xbf16>, vector<128x128xf32> -> vector<128x128xf32>
    %40 = arith.addf %34, %39 : vector<128x128xf32>
    %41 = vector.extract_strided_slice %3 {offsets = [36, 0], sizes = [128, 128], strides = [1, 1]} : vector<256x128xf32> to vector<128x128xf32>
    %42 = arith.truncf %41 : vector<128x128xf32> to vector<128x128xbf16>
    %c6 = arith.constant 6 : index
    %c0_22 = arith.constant 0 : index
    %c0_23 = arith.constant 0 : index
    %43 = vector.load %arg3[%c6, %c0_22, %c0_23] : memref<9x128x128xbf16, #tpu.memory_space<vmem>>, vector<1x128x128xbf16>
    %44 = vector.shape_cast %43 : vector<1x128x128xbf16> to vector<128x128xbf16>
    %cst_24 = arith.constant dense<0.000000e+00> : vector<128x128xf32>
    %45 = tpu.matmul %42, %44, %cst_24 {dimension_numbers = #tpu.dot_dimension_numbers<[1], [0], [0], [1], [0, 0, 1, 1], [], []>} : vector<128x128xbf16>, vector<128x128xbf16>, vector<128x128xf32> -> vector<128x128xf32>
    %46 = arith.addf %40, %45 : vector<128x128xf32>
    %47 = vector.extract_strided_slice %3 {offsets = [37, 0], sizes = [128, 128], strides = [1, 1]} : vector<256x128xf32> to vector<128x128xf32>
    %48 = arith.truncf %47 : vector<128x128xf32> to vector<128x128xbf16>
    %c7 = arith.constant 7 : index
    %c0_25 = arith.constant 0 : index
    %c0_26 = arith.constant 0 : index
    %49 = vector.load %arg3[%c7, %c0_25, %c0_26] : memref<9x128x128xbf16, #tpu.memory_space<vmem>>, vector<1x128x128xbf16>
    %50 = vector.shape_cast %49 : vector<1x128x128xbf16> to vector<128x128xbf16>
    %cst_27 = arith.constant dense<0.000000e+00> : vector<128x128xf32>
    %51 = tpu.matmul %48, %50, %cst_27 {dimension_numbers = #tpu.dot_dimension_numbers<[1], [0], [0], [1], [0, 0, 1, 1], [], []>} : vector<128x128xbf16>, vector<128x128xbf16>, vector<128x128xf32> -> vector<128x128xf32>
    %52 = arith.addf %46, %51 : vector<128x128xf32>
    %53 = vector.extract_strided_slice %3 {offsets = [38, 0], sizes = [128, 128], strides = [1, 1]} : vector<256x128xf32> to vector<128x128xf32>
    %54 = arith.truncf %53 : vector<128x128xf32> to vector<128x128xbf16>
    %c8 = arith.constant 8 : index
    %c0_28 = arith.constant 0 : index
    %c0_29 = arith.constant 0 : index
    %55 = vector.load %arg3[%c8, %c0_28, %c0_29] : memref<9x128x128xbf16, #tpu.memory_space<vmem>>, vector<1x128x128xbf16>
    %56 = vector.shape_cast %55 : vector<1x128x128xbf16> to vector<128x128xbf16>
    %cst_30 = arith.constant dense<0.000000e+00> : vector<128x128xf32>
    %57 = tpu.matmul %54, %56, %cst_30 {dimension_numbers = #tpu.dot_dimension_numbers<[1], [0], [0], [1], [0, 0, 1, 1], [], []>} : vector<128x128xbf16>, vector<128x128xbf16>, vector<128x128xf32> -> vector<128x128xf32>
    %58 = arith.addf %52, %57 : vector<128x128xf32>
    %c0_31 = arith.constant 0 : index
    %c0_32 = arith.constant 0 : index
    %59 = vector.load %arg4[%c0_31, %c0_32] : memref<1x128xf32, #tpu.memory_space<vmem>>, vector<1x128xf32>
    %60 = vector.broadcast %59 : vector<1x128xf32> to vector<128x128xf32>
    %61 = arith.addf %58, %60 : vector<128x128xf32>
    %cst_33 = arith.constant 0.000000e+00 : f32
    %62 = vector.broadcast %cst_33 : f32 to vector<128x128xf32>
    %63 = arith.maximumf %61, %62 : vector<128x128xf32>
    %64 = arith.truncf %63 : vector<128x128xf32> to vector<128x128xbf16>
    %c0_34 = arith.constant 0 : index
    %c0_35 = arith.constant 0 : index
    %65 = vector.load %arg5[%c0_34, %c0_35] : memref<128x128xbf16, #tpu.memory_space<vmem>>, vector<128x128xbf16>
    tpu.vector_store %arg5[%c0_34, %c0_35], %64 {strides = array<i32>} : memref<128x128xbf16, #tpu.memory_space<vmem>>, vector<128x128xbf16>,
    return
  }
  func.func @transform_0(%arg0: i32) -> (i32, i32) {
    %c0_i32 = arith.constant 0 : i32
    %c0_i32_0 = arith.constant 0 : i32
    return %arg0, %c0_i32 : i32, i32
  }
  func.func @transform_1(%arg0: i32) -> (i32, i32) {
    %c1_i32 = arith.constant 1 : i32
    %0 = arith.addi %arg0, %c1_i32 : i32
    %c0_i32 = arith.constant 0 : i32
    %c0_i32_0 = arith.constant 0 : i32
    return %0, %c0_i32 : i32, i32
  }
  func.func @transform_2(%arg0: i32) -> (i32, i32, i32) {
    %c0_i32 = arith.constant 0 : i32
    %c0_i32_0 = arith.constant 0 : i32
    %c0_i32_1 = arith.constant 0 : i32
    %c0_i32_2 = arith.constant 0 : i32
    return %c0_i32, %c0_i32_0, %c0_i32_1 : i32, i32, i32
  }
  func.func @transform_3(%arg0: i32) -> (i32, i32) {
    %c0_i32 = arith.constant 0 : i32
    %c0_i32_0 = arith.constant 0 : i32
    %c0_i32_1 = arith.constant 0 : i32
    return %c0_i32, %c0_i32_0 : i32, i32
  }
  func.func @transform_4(%arg0: i32) -> (i32, i32) {
    %c0_i32 = arith.constant 0 : i32
    %c0_i32_0 = arith.constant 0 : i32
    return %arg0, %c0_i32 : i32, i32
  }
}

module attributes {stable_mosaic.version = 11 : i64} {
  func.func @_maxpool_kernel(%arg0: i32, %arg1: memref<16x4096xbf16, #tpu.memory_space<vmem>>, %arg2: memref<16x1024xbf16, #tpu.memory_space<vmem>>) attributes {dimension_semantics = [#tpu.dimension_semantics<parallel>], iteration_bounds = array<i64: 1>, scalar_prefetch = 0 : i64, scratch_operands = 0 : i64, tpu.core_type = #tpu.core_type<tc>, window_params = [{transform_indices = @transform_0, window_bounds = array<i64: 16, 4096>}, {transform_indices = @transform_1, window_bounds = array<i64: 16, 1024>}]} {
    %c0 = arith.constant 0 : index
    %c0_0 = arith.constant 0 : index
    %0 = vector.load %arg1[%c0, %c0_0] : memref<16x4096xbf16, #tpu.memory_space<vmem>>, vector<16x4096xbf16>
    %1 = vector.extract_strided_slice %0 {offsets = [0, 0], sizes = [16, 2048], strides = [1, 1]} : vector<16x4096xbf16> to vector<16x2048xbf16>
    %2 = vector.extract_strided_slice %0 {offsets = [0, 2048], sizes = [16, 2048], strides = [1, 1]} : vector<16x4096xbf16> to vector<16x2048xbf16>
    %3 = arith.maximumf %1, %2 : vector<16x2048xbf16>
    %4 = vector.extract_strided_slice %3 {offsets = [0, 0], sizes = [16, 128], strides = [1, 1]} : vector<16x2048xbf16> to vector<16x128xbf16>
    %5 = vector.extract_strided_slice %3 {offsets = [0, 128], sizes = [16, 128], strides = [1, 1]} : vector<16x2048xbf16> to vector<16x128xbf16>
    %6 = arith.maximumf %4, %5 : vector<16x128xbf16>
    %7 = vector.extract_strided_slice %3 {offsets = [0, 256], sizes = [16, 128], strides = [1, 1]} : vector<16x2048xbf16> to vector<16x128xbf16>
    %8 = vector.extract_strided_slice %3 {offsets = [0, 384], sizes = [16, 128], strides = [1, 1]} : vector<16x2048xbf16> to vector<16x128xbf16>
    %9 = arith.maximumf %7, %8 : vector<16x128xbf16>
    %10 = vector.extract_strided_slice %3 {offsets = [0, 512], sizes = [16, 128], strides = [1, 1]} : vector<16x2048xbf16> to vector<16x128xbf16>
    %11 = vector.extract_strided_slice %3 {offsets = [0, 640], sizes = [16, 128], strides = [1, 1]} : vector<16x2048xbf16> to vector<16x128xbf16>
    %12 = arith.maximumf %10, %11 : vector<16x128xbf16>
    %13 = vector.extract_strided_slice %3 {offsets = [0, 768], sizes = [16, 128], strides = [1, 1]} : vector<16x2048xbf16> to vector<16x128xbf16>
    %14 = vector.extract_strided_slice %3 {offsets = [0, 896], sizes = [16, 128], strides = [1, 1]} : vector<16x2048xbf16> to vector<16x128xbf16>
    %15 = arith.maximumf %13, %14 : vector<16x128xbf16>
    %16 = vector.extract_strided_slice %3 {offsets = [0, 1024], sizes = [16, 128], strides = [1, 1]} : vector<16x2048xbf16> to vector<16x128xbf16>
    %17 = vector.extract_strided_slice %3 {offsets = [0, 1152], sizes = [16, 128], strides = [1, 1]} : vector<16x2048xbf16> to vector<16x128xbf16>
    %18 = arith.maximumf %16, %17 : vector<16x128xbf16>
    %19 = vector.extract_strided_slice %3 {offsets = [0, 1280], sizes = [16, 128], strides = [1, 1]} : vector<16x2048xbf16> to vector<16x128xbf16>
    %20 = vector.extract_strided_slice %3 {offsets = [0, 1408], sizes = [16, 128], strides = [1, 1]} : vector<16x2048xbf16> to vector<16x128xbf16>
    %21 = arith.maximumf %19, %20 : vector<16x128xbf16>
    %22 = vector.extract_strided_slice %3 {offsets = [0, 1536], sizes = [16, 128], strides = [1, 1]} : vector<16x2048xbf16> to vector<16x128xbf16>
    %23 = vector.extract_strided_slice %3 {offsets = [0, 1664], sizes = [16, 128], strides = [1, 1]} : vector<16x2048xbf16> to vector<16x128xbf16>
    %24 = arith.maximumf %22, %23 : vector<16x128xbf16>
    %25 = vector.extract_strided_slice %3 {offsets = [0, 1792], sizes = [16, 128], strides = [1, 1]} : vector<16x2048xbf16> to vector<16x128xbf16>
    %26 = vector.extract_strided_slice %3 {offsets = [0, 1920], sizes = [16, 128], strides = [1, 1]} : vector<16x2048xbf16> to vector<16x128xbf16>
    %27 = arith.maximumf %25, %26 : vector<16x128xbf16>
    %28 = tpu.concatenate %6, %9, %12, %15, %18, %21, %24, %27 in 1 : vector<16x128xbf16>, vector<16x128xbf16>, vector<16x128xbf16>, vector<16x128xbf16>, vector<16x128xbf16>, vector<16x128xbf16>, vector<16x128xbf16>, vector<16x128xbf16> -> vector<16x1024xbf16>
    %c0_1 = arith.constant 0 : index
    %c0_2 = arith.constant 0 : index
    %29 = vector.load %arg2[%c0_1, %c0_2] : memref<16x1024xbf16, #tpu.memory_space<vmem>>, vector<16x1024xbf16>
    tpu.vector_store %arg2[%c0_1, %c0_2], %28 {strides = array<i32>} : memref<16x1024xbf16, #tpu.memory_space<vmem>>, vector<16x1024xbf16>,
    return
  }
  func.func @transform_0(%arg0: i32) -> (i32, i32) {
    %c0_i32 = arith.constant 0 : i32
    %c0_i32_0 = arith.constant 0 : i32
    return %arg0, %c0_i32 : i32, i32
  }
  func.func @transform_1(%arg0: i32) -> (i32, i32) {
    %c0_i32 = arith.constant 0 : i32
    %c0_i32_0 = arith.constant 0 : i32
    return %arg0, %c0_i32 : i32, i32
  }
}

module attributes {stable_mosaic.version = 11 : i64} {
  func.func @_conv_tap_kernel(%arg0: i32, %arg1: memref<128x128xbf16, #tpu.memory_space<vmem>>, %arg2: memref<128x128xbf16, #tpu.memory_space<vmem>>, %arg3: memref<9x128x128xbf16, #tpu.memory_space<vmem>>, %arg4: memref<1x128xf32, #tpu.memory_space<vmem>>, %arg5: memref<128x128xbf16, #tpu.memory_space<vmem>>) attributes {dimension_semantics = [#tpu.dimension_semantics<parallel>], iteration_bounds = array<i64: 2>, scalar_prefetch = 0 : i64, scratch_operands = 0 : i64, tpu.core_type = #tpu.core_type<tc>, window_params = [{transform_indices = @transform_0, window_bounds = array<i64: 128, 128>}, {transform_indices = @transform_1, window_bounds = array<i64: 128, 128>}, {pipeline_mode = #tpu.pipeline_mode<synchronous>, transform_indices = @transform_2, window_bounds = array<i64: 9, 128, 128>}, {pipeline_mode = #tpu.pipeline_mode<synchronous>, transform_indices = @transform_3, window_bounds = array<i64: 1, 128>}, {transform_indices = @transform_4, window_bounds = array<i64: 128, 128>}]} {
    %c0 = arith.constant 0 : index
    %c0_0 = arith.constant 0 : index
    %0 = vector.load %arg1[%c0, %c0_0] : memref<128x128xbf16, #tpu.memory_space<vmem>>, vector<128x128xbf16>
    %c0_1 = arith.constant 0 : index
    %c0_2 = arith.constant 0 : index
    %1 = vector.load %arg2[%c0_1, %c0_2] : memref<128x128xbf16, #tpu.memory_space<vmem>>, vector<128x128xbf16>
    %2 = tpu.concatenate %0, %1 in 0 : vector<128x128xbf16>, vector<128x128xbf16> -> vector<256x128xbf16>
    %3 = arith.extf %2 : vector<256x128xbf16> to vector<256x128xf32>
    %cst = arith.constant 0.000000e+00 : f32
    %4 = vector.broadcast %cst : f32 to vector<128x128xf32>
    %5 = vector.extract_strided_slice %3 {offsets = [0, 0], sizes = [128, 128], strides = [1, 1]} : vector<256x128xf32> to vector<128x128xf32>
    %6 = arith.truncf %5 : vector<128x128xf32> to vector<128x128xbf16>
    %c0_3 = arith.constant 0 : index
    %c0_4 = arith.constant 0 : index
    %c0_5 = arith.constant 0 : index
    %7 = vector.load %arg3[%c0_3, %c0_4, %c0_5] : memref<9x128x128xbf16, #tpu.memory_space<vmem>>, vector<1x128x128xbf16>
    %8 = vector.shape_cast %7 : vector<1x128x128xbf16> to vector<128x128xbf16>
    %cst_6 = arith.constant dense<0.000000e+00> : vector<128x128xf32>
    %9 = tpu.matmul %6, %8, %cst_6 {dimension_numbers = #tpu.dot_dimension_numbers<[1], [0], [0], [1], [0, 0, 1, 1], [], []>} : vector<128x128xbf16>, vector<128x128xbf16>, vector<128x128xf32> -> vector<128x128xf32>
    %10 = arith.addf %4, %9 : vector<128x128xf32>
    %11 = vector.extract_strided_slice %3 {offsets = [1, 0], sizes = [128, 128], strides = [1, 1]} : vector<256x128xf32> to vector<128x128xf32>
    %12 = arith.truncf %11 : vector<128x128xf32> to vector<128x128xbf16>
    %c1 = arith.constant 1 : index
    %c0_7 = arith.constant 0 : index
    %c0_8 = arith.constant 0 : index
    %13 = vector.load %arg3[%c1, %c0_7, %c0_8] : memref<9x128x128xbf16, #tpu.memory_space<vmem>>, vector<1x128x128xbf16>
    %14 = vector.shape_cast %13 : vector<1x128x128xbf16> to vector<128x128xbf16>
    %cst_9 = arith.constant dense<0.000000e+00> : vector<128x128xf32>
    %15 = tpu.matmul %12, %14, %cst_9 {dimension_numbers = #tpu.dot_dimension_numbers<[1], [0], [0], [1], [0, 0, 1, 1], [], []>} : vector<128x128xbf16>, vector<128x128xbf16>, vector<128x128xf32> -> vector<128x128xf32>
    %16 = arith.addf %10, %15 : vector<128x128xf32>
    %17 = vector.extract_strided_slice %3 {offsets = [2, 0], sizes = [128, 128], strides = [1, 1]} : vector<256x128xf32> to vector<128x128xf32>
    %18 = arith.truncf %17 : vector<128x128xf32> to vector<128x128xbf16>
    %c2 = arith.constant 2 : index
    %c0_10 = arith.constant 0 : index
    %c0_11 = arith.constant 0 : index
    %19 = vector.load %arg3[%c2, %c0_10, %c0_11] : memref<9x128x128xbf16, #tpu.memory_space<vmem>>, vector<1x128x128xbf16>
    %20 = vector.shape_cast %19 : vector<1x128x128xbf16> to vector<128x128xbf16>
    %cst_12 = arith.constant dense<0.000000e+00> : vector<128x128xf32>
    %21 = tpu.matmul %18, %20, %cst_12 {dimension_numbers = #tpu.dot_dimension_numbers<[1], [0], [0], [1], [0, 0, 1, 1], [], []>} : vector<128x128xbf16>, vector<128x128xbf16>, vector<128x128xf32> -> vector<128x128xf32>
    %22 = arith.addf %16, %21 : vector<128x128xf32>
    %23 = vector.extract_strided_slice %3 {offsets = [10, 0], sizes = [128, 128], strides = [1, 1]} : vector<256x128xf32> to vector<128x128xf32>
    %24 = arith.truncf %23 : vector<128x128xf32> to vector<128x128xbf16>
    %c3 = arith.constant 3 : index
    %c0_13 = arith.constant 0 : index
    %c0_14 = arith.constant 0 : index
    %25 = vector.load %arg3[%c3, %c0_13, %c0_14] : memref<9x128x128xbf16, #tpu.memory_space<vmem>>, vector<1x128x128xbf16>
    %26 = vector.shape_cast %25 : vector<1x128x128xbf16> to vector<128x128xbf16>
    %cst_15 = arith.constant dense<0.000000e+00> : vector<128x128xf32>
    %27 = tpu.matmul %24, %26, %cst_15 {dimension_numbers = #tpu.dot_dimension_numbers<[1], [0], [0], [1], [0, 0, 1, 1], [], []>} : vector<128x128xbf16>, vector<128x128xbf16>, vector<128x128xf32> -> vector<128x128xf32>
    %28 = arith.addf %22, %27 : vector<128x128xf32>
    %29 = vector.extract_strided_slice %3 {offsets = [11, 0], sizes = [128, 128], strides = [1, 1]} : vector<256x128xf32> to vector<128x128xf32>
    %30 = arith.truncf %29 : vector<128x128xf32> to vector<128x128xbf16>
    %c4 = arith.constant 4 : index
    %c0_16 = arith.constant 0 : index
    %c0_17 = arith.constant 0 : index
    %31 = vector.load %arg3[%c4, %c0_16, %c0_17] : memref<9x128x128xbf16, #tpu.memory_space<vmem>>, vector<1x128x128xbf16>
    %32 = vector.shape_cast %31 : vector<1x128x128xbf16> to vector<128x128xbf16>
    %cst_18 = arith.constant dense<0.000000e+00> : vector<128x128xf32>
    %33 = tpu.matmul %30, %32, %cst_18 {dimension_numbers = #tpu.dot_dimension_numbers<[1], [0], [0], [1], [0, 0, 1, 1], [], []>} : vector<128x128xbf16>, vector<128x128xbf16>, vector<128x128xf32> -> vector<128x128xf32>
    %34 = arith.addf %28, %33 : vector<128x128xf32>
    %35 = vector.extract_strided_slice %3 {offsets = [12, 0], sizes = [128, 128], strides = [1, 1]} : vector<256x128xf32> to vector<128x128xf32>
    %36 = arith.truncf %35 : vector<128x128xf32> to vector<128x128xbf16>
    %c5 = arith.constant 5 : index
    %c0_19 = arith.constant 0 : index
    %c0_20 = arith.constant 0 : index
    %37 = vector.load %arg3[%c5, %c0_19, %c0_20] : memref<9x128x128xbf16, #tpu.memory_space<vmem>>, vector<1x128x128xbf16>
    %38 = vector.shape_cast %37 : vector<1x128x128xbf16> to vector<128x128xbf16>
    %cst_21 = arith.constant dense<0.000000e+00> : vector<128x128xf32>
    %39 = tpu.matmul %36, %38, %cst_21 {dimension_numbers = #tpu.dot_dimension_numbers<[1], [0], [0], [1], [0, 0, 1, 1], [], []>} : vector<128x128xbf16>, vector<128x128xbf16>, vector<128x128xf32> -> vector<128x128xf32>
    %40 = arith.addf %34, %39 : vector<128x128xf32>
    %41 = vector.extract_strided_slice %3 {offsets = [20, 0], sizes = [128, 128], strides = [1, 1]} : vector<256x128xf32> to vector<128x128xf32>
    %42 = arith.truncf %41 : vector<128x128xf32> to vector<128x128xbf16>
    %c6 = arith.constant 6 : index
    %c0_22 = arith.constant 0 : index
    %c0_23 = arith.constant 0 : index
    %43 = vector.load %arg3[%c6, %c0_22, %c0_23] : memref<9x128x128xbf16, #tpu.memory_space<vmem>>, vector<1x128x128xbf16>
    %44 = vector.shape_cast %43 : vector<1x128x128xbf16> to vector<128x128xbf16>
    %cst_24 = arith.constant dense<0.000000e+00> : vector<128x128xf32>
    %45 = tpu.matmul %42, %44, %cst_24 {dimension_numbers = #tpu.dot_dimension_numbers<[1], [0], [0], [1], [0, 0, 1, 1], [], []>} : vector<128x128xbf16>, vector<128x128xbf16>, vector<128x128xf32> -> vector<128x128xf32>
    %46 = arith.addf %40, %45 : vector<128x128xf32>
    %47 = vector.extract_strided_slice %3 {offsets = [21, 0], sizes = [128, 128], strides = [1, 1]} : vector<256x128xf32> to vector<128x128xf32>
    %48 = arith.truncf %47 : vector<128x128xf32> to vector<128x128xbf16>
    %c7 = arith.constant 7 : index
    %c0_25 = arith.constant 0 : index
    %c0_26 = arith.constant 0 : index
    %49 = vector.load %arg3[%c7, %c0_25, %c0_26] : memref<9x128x128xbf16, #tpu.memory_space<vmem>>, vector<1x128x128xbf16>
    %50 = vector.shape_cast %49 : vector<1x128x128xbf16> to vector<128x128xbf16>
    %cst_27 = arith.constant dense<0.000000e+00> : vector<128x128xf32>
    %51 = tpu.matmul %48, %50, %cst_27 {dimension_numbers = #tpu.dot_dimension_numbers<[1], [0], [0], [1], [0, 0, 1, 1], [], []>} : vector<128x128xbf16>, vector<128x128xbf16>, vector<128x128xf32> -> vector<128x128xf32>
    %52 = arith.addf %46, %51 : vector<128x128xf32>
    %53 = vector.extract_strided_slice %3 {offsets = [22, 0], sizes = [128, 128], strides = [1, 1]} : vector<256x128xf32> to vector<128x128xf32>
    %54 = arith.truncf %53 : vector<128x128xf32> to vector<128x128xbf16>
    %c8 = arith.constant 8 : index
    %c0_28 = arith.constant 0 : index
    %c0_29 = arith.constant 0 : index
    %55 = vector.load %arg3[%c8, %c0_28, %c0_29] : memref<9x128x128xbf16, #tpu.memory_space<vmem>>, vector<1x128x128xbf16>
    %56 = vector.shape_cast %55 : vector<1x128x128xbf16> to vector<128x128xbf16>
    %cst_30 = arith.constant dense<0.000000e+00> : vector<128x128xf32>
    %57 = tpu.matmul %54, %56, %cst_30 {dimension_numbers = #tpu.dot_dimension_numbers<[1], [0], [0], [1], [0, 0, 1, 1], [], []>} : vector<128x128xbf16>, vector<128x128xbf16>, vector<128x128xf32> -> vector<128x128xf32>
    %58 = arith.addf %52, %57 : vector<128x128xf32>
    %c0_31 = arith.constant 0 : index
    %c0_32 = arith.constant 0 : index
    %59 = vector.load %arg4[%c0_31, %c0_32] : memref<1x128xf32, #tpu.memory_space<vmem>>, vector<1x128xf32>
    %60 = vector.broadcast %59 : vector<1x128xf32> to vector<128x128xf32>
    %61 = arith.addf %58, %60 : vector<128x128xf32>
    %cst_33 = arith.constant 0.000000e+00 : f32
    %62 = vector.broadcast %cst_33 : f32 to vector<128x128xf32>
    %63 = arith.maximumf %61, %62 : vector<128x128xf32>
    %64 = arith.truncf %63 : vector<128x128xf32> to vector<128x128xbf16>
    %c0_34 = arith.constant 0 : index
    %c0_35 = arith.constant 0 : index
    %65 = vector.load %arg5[%c0_34, %c0_35] : memref<128x128xbf16, #tpu.memory_space<vmem>>, vector<128x128xbf16>
    tpu.vector_store %arg5[%c0_34, %c0_35], %64 {strides = array<i32>} : memref<128x128xbf16, #tpu.memory_space<vmem>>, vector<128x128xbf16>,
    return
  }
  func.func @transform_0(%arg0: i32) -> (i32, i32) {
    %c0_i32 = arith.constant 0 : i32
    %c0_i32_0 = arith.constant 0 : i32
    return %arg0, %c0_i32 : i32, i32
  }
  func.func @transform_1(%arg0: i32) -> (i32, i32) {
    %c1_i32 = arith.constant 1 : i32
    %0 = arith.addi %arg0, %c1_i32 : i32
    %c0_i32 = arith.constant 0 : i32
    %c0_i32_0 = arith.constant 0 : i32
    return %0, %c0_i32 : i32, i32
  }
  func.func @transform_2(%arg0: i32) -> (i32, i32, i32) {
    %c0_i32 = arith.constant 0 : i32
    %c0_i32_0 = arith.constant 0 : i32
    %c0_i32_1 = arith.constant 0 : i32
    %c0_i32_2 = arith.constant 0 : i32
    return %c0_i32, %c0_i32_0, %c0_i32_1 : i32, i32, i32
  }
  func.func @transform_3(%arg0: i32) -> (i32, i32) {
    %c0_i32 = arith.constant 0 : i32
    %c0_i32_0 = arith.constant 0 : i32
    %c0_i32_1 = arith.constant 0 : i32
    return %c0_i32, %c0_i32_0 : i32, i32
  }
  func.func @transform_4(%arg0: i32) -> (i32, i32) {
    %c0_i32 = arith.constant 0 : i32
    %c0_i32_0 = arith.constant 0 : i32
    return %arg0, %c0_i32 : i32, i32
  }
}

module attributes {stable_mosaic.version = 11 : i64} {
  func.func @_maxpool_kernel(%arg0: i32, %arg1: memref<8x2048xbf16, #tpu.memory_space<vmem>>, %arg2: memref<8x512xbf16, #tpu.memory_space<vmem>>) attributes {dimension_semantics = [#tpu.dimension_semantics<parallel>], iteration_bounds = array<i64: 1>, scalar_prefetch = 0 : i64, scratch_operands = 0 : i64, tpu.core_type = #tpu.core_type<tc>, window_params = [{transform_indices = @transform_0, window_bounds = array<i64: 8, 2048>}, {transform_indices = @transform_1, window_bounds = array<i64: 8, 512>}]} {
    %c0 = arith.constant 0 : index
    %c0_0 = arith.constant 0 : index
    %0 = vector.load %arg1[%c0, %c0_0] : memref<8x2048xbf16, #tpu.memory_space<vmem>>, vector<8x2048xbf16>
    %1 = vector.extract_strided_slice %0 {offsets = [0, 0], sizes = [8, 1024], strides = [1, 1]} : vector<8x2048xbf16> to vector<8x1024xbf16>
    %2 = vector.extract_strided_slice %0 {offsets = [0, 1024], sizes = [8, 1024], strides = [1, 1]} : vector<8x2048xbf16> to vector<8x1024xbf16>
    %3 = arith.maximumf %1, %2 : vector<8x1024xbf16>
    %4 = vector.extract_strided_slice %3 {offsets = [0, 0], sizes = [8, 128], strides = [1, 1]} : vector<8x1024xbf16> to vector<8x128xbf16>
    %5 = vector.extract_strided_slice %3 {offsets = [0, 128], sizes = [8, 128], strides = [1, 1]} : vector<8x1024xbf16> to vector<8x128xbf16>
    %6 = arith.maximumf %4, %5 : vector<8x128xbf16>
    %7 = vector.extract_strided_slice %3 {offsets = [0, 256], sizes = [8, 128], strides = [1, 1]} : vector<8x1024xbf16> to vector<8x128xbf16>
    %8 = vector.extract_strided_slice %3 {offsets = [0, 384], sizes = [8, 128], strides = [1, 1]} : vector<8x1024xbf16> to vector<8x128xbf16>
    %9 = arith.maximumf %7, %8 : vector<8x128xbf16>
    %10 = vector.extract_strided_slice %3 {offsets = [0, 512], sizes = [8, 128], strides = [1, 1]} : vector<8x1024xbf16> to vector<8x128xbf16>
    %11 = vector.extract_strided_slice %3 {offsets = [0, 640], sizes = [8, 128], strides = [1, 1]} : vector<8x1024xbf16> to vector<8x128xbf16>
    %12 = arith.maximumf %10, %11 : vector<8x128xbf16>
    %13 = vector.extract_strided_slice %3 {offsets = [0, 768], sizes = [8, 128], strides = [1, 1]} : vector<8x1024xbf16> to vector<8x128xbf16>
    %14 = vector.extract_strided_slice %3 {offsets = [0, 896], sizes = [8, 128], strides = [1, 1]} : vector<8x1024xbf16> to vector<8x128xbf16>
    %15 = arith.maximumf %13, %14 : vector<8x128xbf16>
    %16 = tpu.concatenate %6, %9, %12, %15 in 1 : vector<8x128xbf16>, vector<8x128xbf16>, vector<8x128xbf16>, vector<8x128xbf16> -> vector<8x512xbf16>
    %c0_1 = arith.constant 0 : index
    %c0_2 = arith.constant 0 : index
    %17 = vector.load %arg2[%c0_1, %c0_2] : memref<8x512xbf16, #tpu.memory_space<vmem>>, vector<8x512xbf16>
    tpu.vector_store %arg2[%c0_1, %c0_2], %16 {strides = array<i32>} : memref<8x512xbf16, #tpu.memory_space<vmem>>, vector<8x512xbf16>,
    return
  }
  func.func @transform_0(%arg0: i32) -> (i32, i32) {
    %c0_i32 = arith.constant 0 : i32
    %c0_i32_0 = arith.constant 0 : i32
    return %arg0, %c0_i32 : i32, i32
  }
  func.func @transform_1(%arg0: i32) -> (i32, i32) {
    %c0_i32 = arith.constant 0 : i32
    %c0_i32_0 = arith.constant 0 : i32
    return %arg0, %c0_i32 : i32, i32
  }
}

module attributes {stable_mosaic.version = 11 : i64} {
  func.func @_conv_tap_kernel(%arg0: i32, %arg1: memref<72x128xbf16, #tpu.memory_space<vmem>>, %arg2: memref<72x128xbf16, #tpu.memory_space<vmem>>, %arg3: memref<9x128x128xbf16, #tpu.memory_space<vmem>>, %arg4: memref<1x128xf32, #tpu.memory_space<vmem>>, %arg5: memref<72x128xbf16, #tpu.memory_space<vmem>>) attributes {dimension_semantics = [#tpu.dimension_semantics<parallel>], iteration_bounds = array<i64: 1>, scalar_prefetch = 0 : i64, scratch_operands = 0 : i64, tpu.core_type = #tpu.core_type<tc>, window_params = [{transform_indices = @transform_0, window_bounds = array<i64: 72, 128>}, {transform_indices = @transform_1, window_bounds = array<i64: 72, 128>}, {pipeline_mode = #tpu.pipeline_mode<synchronous>, transform_indices = @transform_2, window_bounds = array<i64: 9, 128, 128>}, {pipeline_mode = #tpu.pipeline_mode<synchronous>, transform_indices = @transform_3, window_bounds = array<i64: 1, 128>}, {transform_indices = @transform_4, window_bounds = array<i64: 72, 128>}]} {
    %c0 = arith.constant 0 : index
    %c0_0 = arith.constant 0 : index
    %0 = vector.load %arg1[%c0, %c0_0] : memref<72x128xbf16, #tpu.memory_space<vmem>>, vector<72x128xbf16>
    %c0_1 = arith.constant 0 : index
    %c0_2 = arith.constant 0 : index
    %1 = vector.load %arg2[%c0_1, %c0_2] : memref<72x128xbf16, #tpu.memory_space<vmem>>, vector<72x128xbf16>
    %2 = tpu.concatenate %0, %1 in 0 : vector<72x128xbf16>, vector<72x128xbf16> -> vector<144x128xbf16>
    %3 = arith.extf %2 : vector<144x128xbf16> to vector<144x128xf32>
    %cst = arith.constant 0.000000e+00 : f32
    %4 = vector.broadcast %cst : f32 to vector<72x128xf32>
    %5 = vector.extract_strided_slice %3 {offsets = [0, 0], sizes = [72, 128], strides = [1, 1]} : vector<144x128xf32> to vector<72x128xf32>
    %6 = arith.truncf %5 : vector<72x128xf32> to vector<72x128xbf16>
    %c0_3 = arith.constant 0 : index
    %c0_4 = arith.constant 0 : index
    %c0_5 = arith.constant 0 : index
    %7 = vector.load %arg3[%c0_3, %c0_4, %c0_5] : memref<9x128x128xbf16, #tpu.memory_space<vmem>>, vector<1x128x128xbf16>
    %8 = vector.shape_cast %7 : vector<1x128x128xbf16> to vector<128x128xbf16>
    %cst_6 = arith.constant dense<0.000000e+00> : vector<72x128xf32>
    %9 = tpu.matmul %6, %8, %cst_6 {dimension_numbers = #tpu.dot_dimension_numbers<[1], [0], [0], [1], [0, 0, 1, 1], [], []>} : vector<72x128xbf16>, vector<128x128xbf16>, vector<72x128xf32> -> vector<72x128xf32>
    %10 = arith.addf %4, %9 : vector<72x128xf32>
    %11 = vector.extract_strided_slice %3 {offsets = [1, 0], sizes = [72, 128], strides = [1, 1]} : vector<144x128xf32> to vector<72x128xf32>
    %12 = arith.truncf %11 : vector<72x128xf32> to vector<72x128xbf16>
    %c1 = arith.constant 1 : index
    %c0_7 = arith.constant 0 : index
    %c0_8 = arith.constant 0 : index
    %13 = vector.load %arg3[%c1, %c0_7, %c0_8] : memref<9x128x128xbf16, #tpu.memory_space<vmem>>, vector<1x128x128xbf16>
    %14 = vector.shape_cast %13 : vector<1x128x128xbf16> to vector<128x128xbf16>
    %cst_9 = arith.constant dense<0.000000e+00> : vector<72x128xf32>
    %15 = tpu.matmul %12, %14, %cst_9 {dimension_numbers = #tpu.dot_dimension_numbers<[1], [0], [0], [1], [0, 0, 1, 1], [], []>} : vector<72x128xbf16>, vector<128x128xbf16>, vector<72x128xf32> -> vector<72x128xf32>
    %16 = arith.addf %10, %15 : vector<72x128xf32>
    %17 = vector.extract_strided_slice %3 {offsets = [2, 0], sizes = [72, 128], strides = [1, 1]} : vector<144x128xf32> to vector<72x128xf32>
    %18 = arith.truncf %17 : vector<72x128xf32> to vector<72x128xbf16>
    %c2 = arith.constant 2 : index
    %c0_10 = arith.constant 0 : index
    %c0_11 = arith.constant 0 : index
    %19 = vector.load %arg3[%c2, %c0_10, %c0_11] : memref<9x128x128xbf16, #tpu.memory_space<vmem>>, vector<1x128x128xbf16>
    %20 = vector.shape_cast %19 : vector<1x128x128xbf16> to vector<128x128xbf16>
    %cst_12 = arith.constant dense<0.000000e+00> : vector<72x128xf32>
    %21 = tpu.matmul %18, %20, %cst_12 {dimension_numbers = #tpu.dot_dimension_numbers<[1], [0], [0], [1], [0, 0, 1, 1], [], []>} : vector<72x128xbf16>, vector<128x128xbf16>, vector<72x128xf32> -> vector<72x128xf32>
    %22 = arith.addf %16, %21 : vector<72x128xf32>
    %23 = vector.extract_strided_slice %3 {offsets = [6, 0], sizes = [72, 128], strides = [1, 1]} : vector<144x128xf32> to vector<72x128xf32>
    %24 = arith.truncf %23 : vector<72x128xf32> to vector<72x128xbf16>
    %c3 = arith.constant 3 : index
    %c0_13 = arith.constant 0 : index
    %c0_14 = arith.constant 0 : index
    %25 = vector.load %arg3[%c3, %c0_13, %c0_14] : memref<9x128x128xbf16, #tpu.memory_space<vmem>>, vector<1x128x128xbf16>
    %26 = vector.shape_cast %25 : vector<1x128x128xbf16> to vector<128x128xbf16>
    %cst_15 = arith.constant dense<0.000000e+00> : vector<72x128xf32>
    %27 = tpu.matmul %24, %26, %cst_15 {dimension_numbers = #tpu.dot_dimension_numbers<[1], [0], [0], [1], [0, 0, 1, 1], [], []>} : vector<72x128xbf16>, vector<128x128xbf16>, vector<72x128xf32> -> vector<72x128xf32>
    %28 = arith.addf %22, %27 : vector<72x128xf32>
    %29 = vector.extract_strided_slice %3 {offsets = [7, 0], sizes = [72, 128], strides = [1, 1]} : vector<144x128xf32> to vector<72x128xf32>
    %30 = arith.truncf %29 : vector<72x128xf32> to vector<72x128xbf16>
    %c4 = arith.constant 4 : index
    %c0_16 = arith.constant 0 : index
    %c0_17 = arith.constant 0 : index
    %31 = vector.load %arg3[%c4, %c0_16, %c0_17] : memref<9x128x128xbf16, #tpu.memory_space<vmem>>, vector<1x128x128xbf16>
    %32 = vector.shape_cast %31 : vector<1x128x128xbf16> to vector<128x128xbf16>
    %cst_18 = arith.constant dense<0.000000e+00> : vector<72x128xf32>
    %33 = tpu.matmul %30, %32, %cst_18 {dimension_numbers = #tpu.dot_dimension_numbers<[1], [0], [0], [1], [0, 0, 1, 1], [], []>} : vector<72x128xbf16>, vector<128x128xbf16>, vector<72x128xf32> -> vector<72x128xf32>
    %34 = arith.addf %28, %33 : vector<72x128xf32>
    %35 = vector.extract_strided_slice %3 {offsets = [8, 0], sizes = [72, 128], strides = [1, 1]} : vector<144x128xf32> to vector<72x128xf32>
    %36 = arith.truncf %35 : vector<72x128xf32> to vector<72x128xbf16>
    %c5 = arith.constant 5 : index
    %c0_19 = arith.constant 0 : index
    %c0_20 = arith.constant 0 : index
    %37 = vector.load %arg3[%c5, %c0_19, %c0_20] : memref<9x128x128xbf16, #tpu.memory_space<vmem>>, vector<1x128x128xbf16>
    %38 = vector.shape_cast %37 : vector<1x128x128xbf16> to vector<128x128xbf16>
    %cst_21 = arith.constant dense<0.000000e+00> : vector<72x128xf32>
    %39 = tpu.matmul %36, %38, %cst_21 {dimension_numbers = #tpu.dot_dimension_numbers<[1], [0], [0], [1], [0, 0, 1, 1], [], []>} : vector<72x128xbf16>, vector<128x128xbf16>, vector<72x128xf32> -> vector<72x128xf32>
    %40 = arith.addf %34, %39 : vector<72x128xf32>
    %41 = vector.extract_strided_slice %3 {offsets = [12, 0], sizes = [72, 128], strides = [1, 1]} : vector<144x128xf32> to vector<72x128xf32>
    %42 = arith.truncf %41 : vector<72x128xf32> to vector<72x128xbf16>
    %c6 = arith.constant 6 : index
    %c0_22 = arith.constant 0 : index
    %c0_23 = arith.constant 0 : index
    %43 = vector.load %arg3[%c6, %c0_22, %c0_23] : memref<9x128x128xbf16, #tpu.memory_space<vmem>>, vector<1x128x128xbf16>
    %44 = vector.shape_cast %43 : vector<1x128x128xbf16> to vector<128x128xbf16>
    %cst_24 = arith.constant dense<0.000000e+00> : vector<72x128xf32>
    %45 = tpu.matmul %42, %44, %cst_24 {dimension_numbers = #tpu.dot_dimension_numbers<[1], [0], [0], [1], [0, 0, 1, 1], [], []>} : vector<72x128xbf16>, vector<128x128xbf16>, vector<72x128xf32> -> vector<72x128xf32>
    %46 = arith.addf %40, %45 : vector<72x128xf32>
    %47 = vector.extract_strided_slice %3 {offsets = [13, 0], sizes = [72, 128], strides = [1, 1]} : vector<144x128xf32> to vector<72x128xf32>
    %48 = arith.truncf %47 : vector<72x128xf32> to vector<72x128xbf16>
    %c7 = arith.constant 7 : index
    %c0_25 = arith.constant 0 : index
    %c0_26 = arith.constant 0 : index
    %49 = vector.load %arg3[%c7, %c0_25, %c0_26] : memref<9x128x128xbf16, #tpu.memory_space<vmem>>, vector<1x128x128xbf16>
    %50 = vector.shape_cast %49 : vector<1x128x128xbf16> to vector<128x128xbf16>
    %cst_27 = arith.constant dense<0.000000e+00> : vector<72x128xf32>
    %51 = tpu.matmul %48, %50, %cst_27 {dimension_numbers = #tpu.dot_dimension_numbers<[1], [0], [0], [1], [0, 0, 1, 1], [], []>} : vector<72x128xbf16>, vector<128x128xbf16>, vector<72x128xf32> -> vector<72x128xf32>
    %52 = arith.addf %46, %51 : vector<72x128xf32>
    %53 = vector.extract_strided_slice %3 {offsets = [14, 0], sizes = [72, 128], strides = [1, 1]} : vector<144x128xf32> to vector<72x128xf32>
    %54 = arith.truncf %53 : vector<72x128xf32> to vector<72x128xbf16>
    %c8 = arith.constant 8 : index
    %c0_28 = arith.constant 0 : index
    %c0_29 = arith.constant 0 : index
    %55 = vector.load %arg3[%c8, %c0_28, %c0_29] : memref<9x128x128xbf16, #tpu.memory_space<vmem>>, vector<1x128x128xbf16>
    %56 = vector.shape_cast %55 : vector<1x128x128xbf16> to vector<128x128xbf16>
    %cst_30 = arith.constant dense<0.000000e+00> : vector<72x128xf32>
    %57 = tpu.matmul %54, %56, %cst_30 {dimension_numbers = #tpu.dot_dimension_numbers<[1], [0], [0], [1], [0, 0, 1, 1], [], []>} : vector<72x128xbf16>, vector<128x128xbf16>, vector<72x128xf32> -> vector<72x128xf32>
    %58 = arith.addf %52, %57 : vector<72x128xf32>
    %c0_31 = arith.constant 0 : index
    %c0_32 = arith.constant 0 : index
    %59 = vector.load %arg4[%c0_31, %c0_32] : memref<1x128xf32, #tpu.memory_space<vmem>>, vector<1x128xf32>
    %60 = vector.broadcast %59 : vector<1x128xf32> to vector<72x128xf32>
    %61 = arith.addf %58, %60 : vector<72x128xf32>
    %cst_33 = arith.constant 0.000000e+00 : f32
    %62 = vector.broadcast %cst_33 : f32 to vector<72x128xf32>
    %63 = arith.maximumf %61, %62 : vector<72x128xf32>
    %64 = arith.truncf %63 : vector<72x128xf32> to vector<72x128xbf16>
    %c0_34 = arith.constant 0 : index
    %c0_35 = arith.constant 0 : index
    %65 = vector.load %arg5[%c0_34, %c0_35] : memref<72x128xbf16, #tpu.memory_space<vmem>>, vector<72x128xbf16>
    tpu.vector_store %arg5[%c0_34, %c0_35], %64 {strides = array<i32>} : memref<72x128xbf16, #tpu.memory_space<vmem>>, vector<72x128xbf16>,
    return
  }
  func.func @transform_0(%arg0: i32) -> (i32, i32) {
    %c0_i32 = arith.constant 0 : i32
    %c0_i32_0 = arith.constant 0 : i32
    return %arg0, %c0_i32 : i32, i32
  }
  func.func @transform_1(%arg0: i32) -> (i32, i32) {
    %c1_i32 = arith.constant 1 : i32
    %0 = arith.addi %arg0, %c1_i32 : i32
    %c0_i32 = arith.constant 0 : i32
    %c0_i32_0 = arith.constant 0 : i32
    return %0, %c0_i32 : i32, i32
  }
  func.func @transform_2(%arg0: i32) -> (i32, i32, i32) {
    %c0_i32 = arith.constant 0 : i32
    %c0_i32_0 = arith.constant 0 : i32
    %c0_i32_1 = arith.constant 0 : i32
    %c0_i32_2 = arith.constant 0 : i32
    return %c0_i32, %c0_i32_0, %c0_i32_1 : i32, i32, i32
  }
  func.func @transform_3(%arg0: i32) -> (i32, i32) {
    %c0_i32 = arith.constant 0 : i32
    %c0_i32_0 = arith.constant 0 : i32
    %c0_i32_1 = arith.constant 0 : i32
    return %c0_i32, %c0_i32_0 : i32, i32
  }
  func.func @transform_4(%arg0: i32) -> (i32, i32) {
    %c0_i32 = arith.constant 0 : i32
    %c0_i32_0 = arith.constant 0 : i32
    return %arg0, %c0_i32 : i32, i32
  }
}

module attributes {stable_mosaic.version = 11 : i64} {
  func.func @_maxpool_kernel(%arg0: i32, %arg1: memref<4x1024xbf16, #tpu.memory_space<vmem>>, %arg2: memref<4x256xbf16, #tpu.memory_space<vmem>>) attributes {dimension_semantics = [#tpu.dimension_semantics<parallel>], iteration_bounds = array<i64: 1>, scalar_prefetch = 0 : i64, scratch_operands = 0 : i64, tpu.core_type = #tpu.core_type<tc>, window_params = [{transform_indices = @transform_0, window_bounds = array<i64: 4, 1024>}, {transform_indices = @transform_1, window_bounds = array<i64: 4, 256>}]} {
    %c0 = arith.constant 0 : index
    %c0_0 = arith.constant 0 : index
    %0 = vector.load %arg1[%c0, %c0_0] : memref<4x1024xbf16, #tpu.memory_space<vmem>>, vector<4x1024xbf16>
    %1 = vector.extract_strided_slice %0 {offsets = [0, 0], sizes = [4, 512], strides = [1, 1]} : vector<4x1024xbf16> to vector<4x512xbf16>
    %2 = vector.extract_strided_slice %0 {offsets = [0, 512], sizes = [4, 512], strides = [1, 1]} : vector<4x1024xbf16> to vector<4x512xbf16>
    %3 = arith.maximumf %1, %2 : vector<4x512xbf16>
    %4 = vector.extract_strided_slice %3 {offsets = [0, 0], sizes = [4, 128], strides = [1, 1]} : vector<4x512xbf16> to vector<4x128xbf16>
    %5 = vector.extract_strided_slice %3 {offsets = [0, 128], sizes = [4, 128], strides = [1, 1]} : vector<4x512xbf16> to vector<4x128xbf16>
    %6 = arith.maximumf %4, %5 : vector<4x128xbf16>
    %7 = vector.extract_strided_slice %3 {offsets = [0, 256], sizes = [4, 128], strides = [1, 1]} : vector<4x512xbf16> to vector<4x128xbf16>
    %8 = vector.extract_strided_slice %3 {offsets = [0, 384], sizes = [4, 128], strides = [1, 1]} : vector<4x512xbf16> to vector<4x128xbf16>
    %9 = arith.maximumf %7, %8 : vector<4x128xbf16>
    %10 = tpu.concatenate %6, %9 in 1 : vector<4x128xbf16>, vector<4x128xbf16> -> vector<4x256xbf16>
    %c0_1 = arith.constant 0 : index
    %c0_2 = arith.constant 0 : index
    %11 = vector.load %arg2[%c0_1, %c0_2] : memref<4x256xbf16, #tpu.memory_space<vmem>>, vector<4x256xbf16>
    tpu.vector_store %arg2[%c0_1, %c0_2], %10 {strides = array<i32>} : memref<4x256xbf16, #tpu.memory_space<vmem>>, vector<4x256xbf16>,
    return
  }
  func.func @transform_0(%arg0: i32) -> (i32, i32) {
    %c0_i32 = arith.constant 0 : i32
    %c0_i32_0 = arith.constant 0 : i32
    return %arg0, %c0_i32 : i32, i32
  }
  func.func @transform_1(%arg0: i32) -> (i32, i32) {
    %c0_i32 = arith.constant 0 : i32
    %c0_i32_0 = arith.constant 0 : i32
    return %arg0, %c0_i32 : i32, i32
  }
}

module attributes {stable_mosaic.version = 11 : i64} {
  func.func @_maxpool_kernel(%arg0: i32, %arg1: memref<2x512xbf16, #tpu.memory_space<vmem>>, %arg2: memref<2x128xbf16, #tpu.memory_space<vmem>>) attributes {dimension_semantics = [#tpu.dimension_semantics<parallel>], iteration_bounds = array<i64: 1>, scalar_prefetch = 0 : i64, scratch_operands = 0 : i64, tpu.core_type = #tpu.core_type<tc>, window_params = [{transform_indices = @transform_0, window_bounds = array<i64: 2, 512>}, {transform_indices = @transform_1, window_bounds = array<i64: 2, 128>}]} {
    %c0 = arith.constant 0 : index
    %c0_0 = arith.constant 0 : index
    %0 = vector.load %arg1[%c0, %c0_0] : memref<2x512xbf16, #tpu.memory_space<vmem>>, vector<2x512xbf16>
    %1 = vector.extract_strided_slice %0 {offsets = [0, 0], sizes = [2, 256], strides = [1, 1]} : vector<2x512xbf16> to vector<2x256xbf16>
    %2 = vector.extract_strided_slice %0 {offsets = [0, 256], sizes = [2, 256], strides = [1, 1]} : vector<2x512xbf16> to vector<2x256xbf16>
    %3 = arith.maximumf %1, %2 : vector<2x256xbf16>
    %4 = vector.extract_strided_slice %3 {offsets = [0, 0], sizes = [2, 128], strides = [1, 1]} : vector<2x256xbf16> to vector<2x128xbf16>
    %5 = vector.extract_strided_slice %3 {offsets = [0, 128], sizes = [2, 128], strides = [1, 1]} : vector<2x256xbf16> to vector<2x128xbf16>
    %6 = arith.maximumf %4, %5 : vector<2x128xbf16>
    %c0_1 = arith.constant 0 : index
    %c0_2 = arith.constant 0 : index
    %7 = vector.load %arg2[%c0_1, %c0_2] : memref<2x128xbf16, #tpu.memory_space<vmem>>, vector<2x128xbf16>
    tpu.vector_store %arg2[%c0_1, %c0_2], %6 {strides = array<i32>} : memref<2x128xbf16, #tpu.memory_space<vmem>>, vector<2x128xbf16>,
    return
  }
  func.func @transform_0(%arg0: i32) -> (i32, i32) {
    %c0_i32 = arith.constant 0 : i32
    %c0_i32_0 = arith.constant 0 : i32
    return %arg0, %c0_i32 : i32, i32
  }
  func.func @transform_1(%arg0: i32) -> (i32, i32) {
    %c0_i32 = arith.constant 0 : i32
    %c0_i32_0 = arith.constant 0 : i32
    return %arg0, %c0_i32 : i32, i32
  }
}

module attributes {stable_mosaic.version = 11 : i64} {
  func.func @_conv_tap_kernel(%arg0: i32, %arg1: memref<32x128xbf16, #tpu.memory_space<vmem>>, %arg2: memref<32x128xbf16, #tpu.memory_space<vmem>>, %arg3: memref<9x128x128xbf16, #tpu.memory_space<vmem>>, %arg4: memref<1x128xf32, #tpu.memory_space<vmem>>, %arg5: memref<32x128xbf16, #tpu.memory_space<vmem>>) attributes {dimension_semantics = [#tpu.dimension_semantics<parallel>], iteration_bounds = array<i64: 1>, scalar_prefetch = 0 : i64, scratch_operands = 0 : i64, tpu.core_type = #tpu.core_type<tc>, window_params = [{transform_indices = @transform_0, window_bounds = array<i64: 32, 128>}, {transform_indices = @transform_1, window_bounds = array<i64: 32, 128>}, {pipeline_mode = #tpu.pipeline_mode<synchronous>, transform_indices = @transform_2, window_bounds = array<i64: 9, 128, 128>}, {pipeline_mode = #tpu.pipeline_mode<synchronous>, transform_indices = @transform_3, window_bounds = array<i64: 1, 128>}, {transform_indices = @transform_4, window_bounds = array<i64: 32, 128>}]} {
    %c0 = arith.constant 0 : index
    %c0_0 = arith.constant 0 : index
    %0 = vector.load %arg1[%c0, %c0_0] : memref<32x128xbf16, #tpu.memory_space<vmem>>, vector<32x128xbf16>
    %c0_1 = arith.constant 0 : index
    %c0_2 = arith.constant 0 : index
    %1 = vector.load %arg2[%c0_1, %c0_2] : memref<32x128xbf16, #tpu.memory_space<vmem>>, vector<32x128xbf16>
    %2 = tpu.concatenate %0, %1 in 0 : vector<32x128xbf16>, vector<32x128xbf16> -> vector<64x128xbf16>
    %3 = arith.extf %2 : vector<64x128xbf16> to vector<64x128xf32>
    %cst = arith.constant 0.000000e+00 : f32
    %4 = vector.broadcast %cst : f32 to vector<32x128xf32>
    %5 = vector.extract_strided_slice %3 {offsets = [0, 0], sizes = [32, 128], strides = [1, 1]} : vector<64x128xf32> to vector<32x128xf32>
    %6 = arith.truncf %5 : vector<32x128xf32> to vector<32x128xbf16>
    %c0_3 = arith.constant 0 : index
    %c0_4 = arith.constant 0 : index
    %c0_5 = arith.constant 0 : index
    %7 = vector.load %arg3[%c0_3, %c0_4, %c0_5] : memref<9x128x128xbf16, #tpu.memory_space<vmem>>, vector<1x128x128xbf16>
    %8 = vector.shape_cast %7 : vector<1x128x128xbf16> to vector<128x128xbf16>
    %cst_6 = arith.constant dense<0.000000e+00> : vector<32x128xf32>
    %9 = tpu.matmul %6, %8, %cst_6 {dimension_numbers = #tpu.dot_dimension_numbers<[1], [0], [0], [1], [0, 0, 1, 1], [], []>} : vector<32x128xbf16>, vector<128x128xbf16>, vector<32x128xf32> -> vector<32x128xf32>
    %10 = arith.addf %4, %9 : vector<32x128xf32>
    %11 = vector.extract_strided_slice %3 {offsets = [1, 0], sizes = [32, 128], strides = [1, 1]} : vector<64x128xf32> to vector<32x128xf32>
    %12 = arith.truncf %11 : vector<32x128xf32> to vector<32x128xbf16>
    %c1 = arith.constant 1 : index
    %c0_7 = arith.constant 0 : index
    %c0_8 = arith.constant 0 : index
    %13 = vector.load %arg3[%c1, %c0_7, %c0_8] : memref<9x128x128xbf16, #tpu.memory_space<vmem>>, vector<1x128x128xbf16>
    %14 = vector.shape_cast %13 : vector<1x128x128xbf16> to vector<128x128xbf16>
    %cst_9 = arith.constant dense<0.000000e+00> : vector<32x128xf32>
    %15 = tpu.matmul %12, %14, %cst_9 {dimension_numbers = #tpu.dot_dimension_numbers<[1], [0], [0], [1], [0, 0, 1, 1], [], []>} : vector<32x128xbf16>, vector<128x128xbf16>, vector<32x128xf32> -> vector<32x128xf32>
    %16 = arith.addf %10, %15 : vector<32x128xf32>
    %17 = vector.extract_strided_slice %3 {offsets = [2, 0], sizes = [32, 128], strides = [1, 1]} : vector<64x128xf32> to vector<32x128xf32>
    %18 = arith.truncf %17 : vector<32x128xf32> to vector<32x128xbf16>
    %c2 = arith.constant 2 : index
    %c0_10 = arith.constant 0 : index
    %c0_11 = arith.constant 0 : index
    %19 = vector.load %arg3[%c2, %c0_10, %c0_11] : memref<9x128x128xbf16, #tpu.memory_space<vmem>>, vector<1x128x128xbf16>
    %20 = vector.shape_cast %19 : vector<1x128x128xbf16> to vector<128x128xbf16>
    %cst_12 = arith.constant dense<0.000000e+00> : vector<32x128xf32>
    %21 = tpu.matmul %18, %20, %cst_12 {dimension_numbers = #tpu.dot_dimension_numbers<[1], [0], [0], [1], [0, 0, 1, 1], [], []>} : vector<32x128xbf16>, vector<128x128xbf16>, vector<32x128xf32> -> vector<32x128xf32>
    %22 = arith.addf %16, %21 : vector<32x128xf32>
    %23 = vector.extract_strided_slice %3 {offsets = [4, 0], sizes = [32, 128], strides = [1, 1]} : vector<64x128xf32> to vector<32x128xf32>
    %24 = arith.truncf %23 : vector<32x128xf32> to vector<32x128xbf16>
    %c3 = arith.constant 3 : index
    %c0_13 = arith.constant 0 : index
    %c0_14 = arith.constant 0 : index
    %25 = vector.load %arg3[%c3, %c0_13, %c0_14] : memref<9x128x128xbf16, #tpu.memory_space<vmem>>, vector<1x128x128xbf16>
    %26 = vector.shape_cast %25 : vector<1x128x128xbf16> to vector<128x128xbf16>
    %cst_15 = arith.constant dense<0.000000e+00> : vector<32x128xf32>
    %27 = tpu.matmul %24, %26, %cst_15 {dimension_numbers = #tpu.dot_dimension_numbers<[1], [0], [0], [1], [0, 0, 1, 1], [], []>} : vector<32x128xbf16>, vector<128x128xbf16>, vector<32x128xf32> -> vector<32x128xf32>
    %28 = arith.addf %22, %27 : vector<32x128xf32>
    %29 = vector.extract_strided_slice %3 {offsets = [5, 0], sizes = [32, 128], strides = [1, 1]} : vector<64x128xf32> to vector<32x128xf32>
    %30 = arith.truncf %29 : vector<32x128xf32> to vector<32x128xbf16>
    %c4 = arith.constant 4 : index
    %c0_16 = arith.constant 0 : index
    %c0_17 = arith.constant 0 : index
    %31 = vector.load %arg3[%c4, %c0_16, %c0_17] : memref<9x128x128xbf16, #tpu.memory_space<vmem>>, vector<1x128x128xbf16>
    %32 = vector.shape_cast %31 : vector<1x128x128xbf16> to vector<128x128xbf16>
    %cst_18 = arith.constant dense<0.000000e+00> : vector<32x128xf32>
    %33 = tpu.matmul %30, %32, %cst_18 {dimension_numbers = #tpu.dot_dimension_numbers<[1], [0], [0], [1], [0, 0, 1, 1], [], []>} : vector<32x128xbf16>, vector<128x128xbf16>, vector<32x128xf32> -> vector<32x128xf32>
    %34 = arith.addf %28, %33 : vector<32x128xf32>
    %35 = vector.extract_strided_slice %3 {offsets = [6, 0], sizes = [32, 128], strides = [1, 1]} : vector<64x128xf32> to vector<32x128xf32>
    %36 = arith.truncf %35 : vector<32x128xf32> to vector<32x128xbf16>
    %c5 = arith.constant 5 : index
    %c0_19 = arith.constant 0 : index
    %c0_20 = arith.constant 0 : index
    %37 = vector.load %arg3[%c5, %c0_19, %c0_20] : memref<9x128x128xbf16, #tpu.memory_space<vmem>>, vector<1x128x128xbf16>
    %38 = vector.shape_cast %37 : vector<1x128x128xbf16> to vector<128x128xbf16>
    %cst_21 = arith.constant dense<0.000000e+00> : vector<32x128xf32>
    %39 = tpu.matmul %36, %38, %cst_21 {dimension_numbers = #tpu.dot_dimension_numbers<[1], [0], [0], [1], [0, 0, 1, 1], [], []>} : vector<32x128xbf16>, vector<128x128xbf16>, vector<32x128xf32> -> vector<32x128xf32>
    %40 = arith.addf %34, %39 : vector<32x128xf32>
    %41 = vector.extract_strided_slice %3 {offsets = [8, 0], sizes = [32, 128], strides = [1, 1]} : vector<64x128xf32> to vector<32x128xf32>
    %42 = arith.truncf %41 : vector<32x128xf32> to vector<32x128xbf16>
    %c6 = arith.constant 6 : index
    %c0_22 = arith.constant 0 : index
    %c0_23 = arith.constant 0 : index
    %43 = vector.load %arg3[%c6, %c0_22, %c0_23] : memref<9x128x128xbf16, #tpu.memory_space<vmem>>, vector<1x128x128xbf16>
    %44 = vector.shape_cast %43 : vector<1x128x128xbf16> to vector<128x128xbf16>
    %cst_24 = arith.constant dense<0.000000e+00> : vector<32x128xf32>
    %45 = tpu.matmul %42, %44, %cst_24 {dimension_numbers = #tpu.dot_dimension_numbers<[1], [0], [0], [1], [0, 0, 1, 1], [], []>} : vector<32x128xbf16>, vector<128x128xbf16>, vector<32x128xf32> -> vector<32x128xf32>
    %46 = arith.addf %40, %45 : vector<32x128xf32>
    %47 = vector.extract_strided_slice %3 {offsets = [9, 0], sizes = [32, 128], strides = [1, 1]} : vector<64x128xf32> to vector<32x128xf32>
    %48 = arith.truncf %47 : vector<32x128xf32> to vector<32x128xbf16>
    %c7 = arith.constant 7 : index
    %c0_25 = arith.constant 0 : index
    %c0_26 = arith.constant 0 : index
    %49 = vector.load %arg3[%c7, %c0_25, %c0_26] : memref<9x128x128xbf16, #tpu.memory_space<vmem>>, vector<1x128x128xbf16>
    %50 = vector.shape_cast %49 : vector<1x128x128xbf16> to vector<128x128xbf16>
    %cst_27 = arith.constant dense<0.000000e+00> : vector<32x128xf32>
    %51 = tpu.matmul %48, %50, %cst_27 {dimension_numbers = #tpu.dot_dimension_numbers<[1], [0], [0], [1], [0, 0, 1, 1], [], []>} : vector<32x128xbf16>, vector<128x128xbf16>, vector<32x128xf32> -> vector<32x128xf32>
    %52 = arith.addf %46, %51 : vector<32x128xf32>
    %53 = vector.extract_strided_slice %3 {offsets = [10, 0], sizes = [32, 128], strides = [1, 1]} : vector<64x128xf32> to vector<32x128xf32>
    %54 = arith.truncf %53 : vector<32x128xf32> to vector<32x128xbf16>
    %c8 = arith.constant 8 : index
    %c0_28 = arith.constant 0 : index
    %c0_29 = arith.constant 0 : index
    %55 = vector.load %arg3[%c8, %c0_28, %c0_29] : memref<9x128x128xbf16, #tpu.memory_space<vmem>>, vector<1x128x128xbf16>
    %56 = vector.shape_cast %55 : vector<1x128x128xbf16> to vector<128x128xbf16>
    %cst_30 = arith.constant dense<0.000000e+00> : vector<32x128xf32>
    %57 = tpu.matmul %54, %56, %cst_30 {dimension_numbers = #tpu.dot_dimension_numbers<[1], [0], [0], [1], [0, 0, 1, 1], [], []>} : vector<32x128xbf16>, vector<128x128xbf16>, vector<32x128xf32> -> vector<32x128xf32>
    %58 = arith.addf %52, %57 : vector<32x128xf32>
    %c0_31 = arith.constant 0 : index
    %c0_32 = arith.constant 0 : index
    %59 = vector.load %arg4[%c0_31, %c0_32] : memref<1x128xf32, #tpu.memory_space<vmem>>, vector<1x128xf32>
    %60 = vector.broadcast %59 : vector<1x128xf32> to vector<32x128xf32>
    %61 = arith.addf %58, %60 : vector<32x128xf32>
    %cst_33 = arith.constant 0.000000e+00 : f32
    %62 = vector.broadcast %cst_33 : f32 to vector<32x128xf32>
    %63 = arith.maximumf %61, %62 : vector<32x128xf32>
    %64 = arith.truncf %63 : vector<32x128xf32> to vector<32x128xbf16>
    %c0_34 = arith.constant 0 : index
    %c0_35 = arith.constant 0 : index
    %65 = vector.load %arg5[%c0_34, %c0_35] : memref<32x128xbf16, #tpu.memory_space<vmem>>, vector<32x128xbf16>
    tpu.vector_store %arg5[%c0_34, %c0_35], %64 {strides = array<i32>} : memref<32x128xbf16, #tpu.memory_space<vmem>>, vector<32x128xbf16>,
    return
  }
  func.func @transform_0(%arg0: i32) -> (i32, i32) {
    %c0_i32 = arith.constant 0 : i32
    %c0_i32_0 = arith.constant 0 : i32
    return %arg0, %c0_i32 : i32, i32
  }
  func.func @transform_1(%arg0: i32) -> (i32, i32) {
    %c1_i32 = arith.constant 1 : i32
    %0 = arith.addi %arg0, %c1_i32 : i32
    %c0_i32 = arith.constant 0 : i32
    %c0_i32_0 = arith.constant 0 : i32
    return %0, %c0_i32 : i32, i32
  }
  func.func @transform_2(%arg0: i32) -> (i32, i32, i32) {
    %c0_i32 = arith.constant 0 : i32
    %c0_i32_0 = arith.constant 0 : i32
    %c0_i32_1 = arith.constant 0 : i32
    %c0_i32_2 = arith.constant 0 : i32
    return %c0_i32, %c0_i32_0, %c0_i32_1 : i32, i32, i32
  }
  func.func @transform_3(%arg0: i32) -> (i32, i32) {
    %c0_i32 = arith.constant 0 : i32
    %c0_i32_0 = arith.constant 0 : i32
    %c0_i32_1 = arith.constant 0 : i32
    return %c0_i32, %c0_i32_0 : i32, i32
  }
  func.func @transform_4(%arg0: i32) -> (i32, i32) {
    %c0_i32 = arith.constant 0 : i32
    %c0_i32_0 = arith.constant 0 : i32
    return %arg0, %c0_i32 : i32, i32
  }
}

module attributes {stable_mosaic.version = 11 : i64} {
  func.func @_matmul_bias_kernel(%arg0: i32, %arg1: memref<8x128xbf16, #tpu.memory_space<vmem>>, %arg2: memref<128x512xbf16, #tpu.memory_space<vmem>>, %arg3: memref<1x512xf32, #tpu.memory_space<vmem>>, %arg4: memref<8x512xbf16, #tpu.memory_space<vmem>>) attributes {dimension_semantics = [#tpu.dimension_semantics<parallel>], iteration_bounds = array<i64: 1>, scalar_prefetch = 0 : i64, scratch_operands = 0 : i64, tpu.core_type = #tpu.core_type<tc>, window_params = [{transform_indices = @transform_0, window_bounds = array<i64: 8, 128>}, {pipeline_mode = #tpu.pipeline_mode<synchronous>, transform_indices = @transform_1, window_bounds = array<i64: 128, 512>}, {pipeline_mode = #tpu.pipeline_mode<synchronous>, transform_indices = @transform_2, window_bounds = array<i64: 1, 512>}, {transform_indices = @transform_3, window_bounds = array<i64: 8, 512>}]} {
    %c0 = arith.constant 0 : index
    %c0_0 = arith.constant 0 : index
    %0 = vector.load %arg1[%c0, %c0_0] : memref<8x128xbf16, #tpu.memory_space<vmem>>, vector<8x128xbf16>
    %c0_1 = arith.constant 0 : index
    %c0_2 = arith.constant 0 : index
    %1 = vector.load %arg2[%c0_1, %c0_2] : memref<128x512xbf16, #tpu.memory_space<vmem>>, vector<128x512xbf16>
    %cst = arith.constant dense<0.000000e+00> : vector<8x512xf32>
    %2 = tpu.matmul %0, %1, %cst {dimension_numbers = #tpu.dot_dimension_numbers<[1], [0], [0], [1], [0, 0, 1, 1], [], []>} : vector<8x128xbf16>, vector<128x512xbf16>, vector<8x512xf32> -> vector<8x512xf32>
    %c0_3 = arith.constant 0 : index
    %c0_4 = arith.constant 0 : index
    %3 = vector.load %arg3[%c0_3, %c0_4] : memref<1x512xf32, #tpu.memory_space<vmem>>, vector<1x512xf32>
    %4 = vector.broadcast %3 : vector<1x512xf32> to vector<8x512xf32>
    %5 = arith.addf %2, %4 : vector<8x512xf32>
    %6 = arith.truncf %5 : vector<8x512xf32> to vector<8x512xbf16>
    %c0_5 = arith.constant 0 : index
    %c0_6 = arith.constant 0 : index
    %7 = vector.load %arg4[%c0_5, %c0_6] : memref<8x512xbf16, #tpu.memory_space<vmem>>, vector<8x512xbf16>
    tpu.vector_store %arg4[%c0_5, %c0_6], %6 {strides = array<i32>} : memref<8x512xbf16, #tpu.memory_space<vmem>>, vector<8x512xbf16>,
    return
  }
  func.func @transform_0(%arg0: i32) -> (i32, i32) {
    %c0_i32 = arith.constant 0 : i32
    %c0_i32_0 = arith.constant 0 : i32
    return %arg0, %c0_i32 : i32, i32
  }
  func.func @transform_1(%arg0: i32) -> (i32, i32) {
    %c0_i32 = arith.constant 0 : i32
    %c0_i32_0 = arith.constant 0 : i32
    %c0_i32_1 = arith.constant 0 : i32
    return %c0_i32, %c0_i32_0 : i32, i32
  }
  func.func @transform_2(%arg0: i32) -> (i32, i32) {
    %c0_i32 = arith.constant 0 : i32
    %c0_i32_0 = arith.constant 0 : i32
    %c0_i32_1 = arith.constant 0 : i32
    return %c0_i32, %c0_i32_0 : i32, i32
  }
  func.func @transform_3(%arg0: i32) -> (i32, i32) {
    %c0_i32 = arith.constant 0 : i32
    %c0_i32_0 = arith.constant 0 : i32
    return %arg0, %c0_i32 : i32, i32
  }
}

module attributes {stable_mosaic.version = 11 : i64} {
  func.func @_matmul_bias_kernel(%arg0: i32, %arg1: memref<32x128xbf16, #tpu.memory_space<vmem>>, %arg2: memref<128x512xbf16, #tpu.memory_space<vmem>>, %arg3: memref<1x512xf32, #tpu.memory_space<vmem>>, %arg4: memref<32x512xbf16, #tpu.memory_space<vmem>>) attributes {dimension_semantics = [#tpu.dimension_semantics<parallel>], iteration_bounds = array<i64: 1>, scalar_prefetch = 0 : i64, scratch_operands = 0 : i64, tpu.core_type = #tpu.core_type<tc>, window_params = [{transform_indices = @transform_0, window_bounds = array<i64: 32, 128>}, {pipeline_mode = #tpu.pipeline_mode<synchronous>, transform_indices = @transform_1, window_bounds = array<i64: 128, 512>}, {pipeline_mode = #tpu.pipeline_mode<synchronous>, transform_indices = @transform_2, window_bounds = array<i64: 1, 512>}, {transform_indices = @transform_3, window_bounds = array<i64: 32, 512>}]} {
    %c0 = arith.constant 0 : index
    %c0_0 = arith.constant 0 : index
    %0 = vector.load %arg1[%c0, %c0_0] : memref<32x128xbf16, #tpu.memory_space<vmem>>, vector<32x128xbf16>
    %c0_1 = arith.constant 0 : index
    %c0_2 = arith.constant 0 : index
    %1 = vector.load %arg2[%c0_1, %c0_2] : memref<128x512xbf16, #tpu.memory_space<vmem>>, vector<128x512xbf16>
    %cst = arith.constant dense<0.000000e+00> : vector<32x512xf32>
    %2 = tpu.matmul %0, %1, %cst {dimension_numbers = #tpu.dot_dimension_numbers<[1], [0], [0], [1], [0, 0, 1, 1], [], []>} : vector<32x128xbf16>, vector<128x512xbf16>, vector<32x512xf32> -> vector<32x512xf32>
    %c0_3 = arith.constant 0 : index
    %c0_4 = arith.constant 0 : index
    %3 = vector.load %arg3[%c0_3, %c0_4] : memref<1x512xf32, #tpu.memory_space<vmem>>, vector<1x512xf32>
    %4 = vector.broadcast %3 : vector<1x512xf32> to vector<32x512xf32>
    %5 = arith.addf %2, %4 : vector<32x512xf32>
    %6 = arith.truncf %5 : vector<32x512xf32> to vector<32x512xbf16>
    %c0_5 = arith.constant 0 : index
    %c0_6 = arith.constant 0 : index
    %7 = vector.load %arg4[%c0_5, %c0_6] : memref<32x512xbf16, #tpu.memory_space<vmem>>, vector<32x512xbf16>
    tpu.vector_store %arg4[%c0_5, %c0_6], %6 {strides = array<i32>} : memref<32x512xbf16, #tpu.memory_space<vmem>>, vector<32x512xbf16>,
    return
  }
  func.func @transform_0(%arg0: i32) -> (i32, i32) {
    %c0_i32 = arith.constant 0 : i32
    %c0_i32_0 = arith.constant 0 : i32
    return %arg0, %c0_i32 : i32, i32
  }
  func.func @transform_1(%arg0: i32) -> (i32, i32) {
    %c0_i32 = arith.constant 0 : i32
    %c0_i32_0 = arith.constant 0 : i32
    %c0_i32_1 = arith.constant 0 : i32
    return %c0_i32, %c0_i32_0 : i32, i32
  }
  func.func @transform_2(%arg0: i32) -> (i32, i32) {
    %c0_i32 = arith.constant 0 : i32
    %c0_i32_0 = arith.constant 0 : i32
    %c0_i32_1 = arith.constant 0 : i32
    return %c0_i32, %c0_i32_0 : i32, i32
  }
  func.func @transform_3(%arg0: i32) -> (i32, i32) {
    %c0_i32 = arith.constant 0 : i32
    %c0_i32_0 = arith.constant 0 : i32
    return %arg0, %c0_i32 : i32, i32
  }
}

module attributes {stable_mosaic.version = 11 : i64} {
  func.func @_matmul_bias_kernel(%arg0: i32, %arg1: memref<128x128xbf16, #tpu.memory_space<vmem>>, %arg2: memref<128x512xbf16, #tpu.memory_space<vmem>>, %arg3: memref<1x512xf32, #tpu.memory_space<vmem>>, %arg4: memref<128x512xbf16, #tpu.memory_space<vmem>>) attributes {dimension_semantics = [#tpu.dimension_semantics<parallel>], iteration_bounds = array<i64: 1>, scalar_prefetch = 0 : i64, scratch_operands = 0 : i64, tpu.core_type = #tpu.core_type<tc>, window_params = [{transform_indices = @transform_0, window_bounds = array<i64: 128, 128>}, {pipeline_mode = #tpu.pipeline_mode<synchronous>, transform_indices = @transform_1, window_bounds = array<i64: 128, 512>}, {pipeline_mode = #tpu.pipeline_mode<synchronous>, transform_indices = @transform_2, window_bounds = array<i64: 1, 512>}, {transform_indices = @transform_3, window_bounds = array<i64: 128, 512>}]} {
    %c0 = arith.constant 0 : index
    %c0_0 = arith.constant 0 : index
    %0 = vector.load %arg1[%c0, %c0_0] : memref<128x128xbf16, #tpu.memory_space<vmem>>, vector<128x128xbf16>
    %c0_1 = arith.constant 0 : index
    %c0_2 = arith.constant 0 : index
    %1 = vector.load %arg2[%c0_1, %c0_2] : memref<128x512xbf16, #tpu.memory_space<vmem>>, vector<128x512xbf16>
    %cst = arith.constant dense<0.000000e+00> : vector<128x512xf32>
    %2 = tpu.matmul %0, %1, %cst {dimension_numbers = #tpu.dot_dimension_numbers<[1], [0], [0], [1], [0, 0, 1, 1], [], []>} : vector<128x128xbf16>, vector<128x512xbf16>, vector<128x512xf32> -> vector<128x512xf32>
    %c0_3 = arith.constant 0 : index
    %c0_4 = arith.constant 0 : index
    %3 = vector.load %arg3[%c0_3, %c0_4] : memref<1x512xf32, #tpu.memory_space<vmem>>, vector<1x512xf32>
    %4 = vector.broadcast %3 : vector<1x512xf32> to vector<128x512xf32>
    %5 = arith.addf %2, %4 : vector<128x512xf32>
    %6 = arith.truncf %5 : vector<128x512xf32> to vector<128x512xbf16>
    %c0_5 = arith.constant 0 : index
    %c0_6 = arith.constant 0 : index
    %7 = vector.load %arg4[%c0_5, %c0_6] : memref<128x512xbf16, #tpu.memory_space<vmem>>, vector<128x512xbf16>
    tpu.vector_store %arg4[%c0_5, %c0_6], %6 {strides = array<i32>} : memref<128x512xbf16, #tpu.memory_space<vmem>>, vector<128x512xbf16>,
    return
  }
  func.func @transform_0(%arg0: i32) -> (i32, i32) {
    %c0_i32 = arith.constant 0 : i32
    %c0_i32_0 = arith.constant 0 : i32
    return %arg0, %c0_i32 : i32, i32
  }
  func.func @transform_1(%arg0: i32) -> (i32, i32) {
    %c0_i32 = arith.constant 0 : i32
    %c0_i32_0 = arith.constant 0 : i32
    %c0_i32_1 = arith.constant 0 : i32
    return %c0_i32, %c0_i32_0 : i32, i32
  }
  func.func @transform_2(%arg0: i32) -> (i32, i32) {
    %c0_i32 = arith.constant 0 : i32
    %c0_i32_0 = arith.constant 0 : i32
    %c0_i32_1 = arith.constant 0 : i32
    return %c0_i32, %c0_i32_0 : i32, i32
  }
  func.func @transform_3(%arg0: i32) -> (i32, i32) {
    %c0_i32 = arith.constant 0 : i32
    %c0_i32_0 = arith.constant 0 : i32
    return %arg0, %c0_i32 : i32, i32
  }
}

module attributes {stable_mosaic.version = 11 : i64} {
  func.func @_matmul_bias_kernel(%arg0: i32, %arg1: memref<128x128xbf16, #tpu.memory_space<vmem>>, %arg2: memref<128x512xbf16, #tpu.memory_space<vmem>>, %arg3: memref<1x512xf32, #tpu.memory_space<vmem>>, %arg4: memref<128x512xbf16, #tpu.memory_space<vmem>>) attributes {dimension_semantics = [#tpu.dimension_semantics<parallel>], iteration_bounds = array<i64: 4>, scalar_prefetch = 0 : i64, scratch_operands = 0 : i64, tpu.core_type = #tpu.core_type<tc>, window_params = [{transform_indices = @transform_0, window_bounds = array<i64: 128, 128>}, {pipeline_mode = #tpu.pipeline_mode<synchronous>, transform_indices = @transform_1, window_bounds = array<i64: 128, 512>}, {pipeline_mode = #tpu.pipeline_mode<synchronous>, transform_indices = @transform_2, window_bounds = array<i64: 1, 512>}, {transform_indices = @transform_3, window_bounds = array<i64: 128, 512>}]} {
    %c0 = arith.constant 0 : index
    %c0_0 = arith.constant 0 : index
    %0 = vector.load %arg1[%c0, %c0_0] : memref<128x128xbf16, #tpu.memory_space<vmem>>, vector<128x128xbf16>
    %c0_1 = arith.constant 0 : index
    %c0_2 = arith.constant 0 : index
    %1 = vector.load %arg2[%c0_1, %c0_2] : memref<128x512xbf16, #tpu.memory_space<vmem>>, vector<128x512xbf16>
    %cst = arith.constant dense<0.000000e+00> : vector<128x512xf32>
    %2 = tpu.matmul %0, %1, %cst {dimension_numbers = #tpu.dot_dimension_numbers<[1], [0], [0], [1], [0, 0, 1, 1], [], []>} : vector<128x128xbf16>, vector<128x512xbf16>, vector<128x512xf32> -> vector<128x512xf32>
    %c0_3 = arith.constant 0 : index
    %c0_4 = arith.constant 0 : index
    %3 = vector.load %arg3[%c0_3, %c0_4] : memref<1x512xf32, #tpu.memory_space<vmem>>, vector<1x512xf32>
    %4 = vector.broadcast %3 : vector<1x512xf32> to vector<128x512xf32>
    %5 = arith.addf %2, %4 : vector<128x512xf32>
    %6 = arith.truncf %5 : vector<128x512xf32> to vector<128x512xbf16>
    %c0_5 = arith.constant 0 : index
    %c0_6 = arith.constant 0 : index
    %7 = vector.load %arg4[%c0_5, %c0_6] : memref<128x512xbf16, #tpu.memory_space<vmem>>, vector<128x512xbf16>
    tpu.vector_store %arg4[%c0_5, %c0_6], %6 {strides = array<i32>} : memref<128x512xbf16, #tpu.memory_space<vmem>>, vector<128x512xbf16>,
    return
  }
  func.func @transform_0(%arg0: i32) -> (i32, i32) {
    %c0_i32 = arith.constant 0 : i32
    %c0_i32_0 = arith.constant 0 : i32
    return %arg0, %c0_i32 : i32, i32
  }
  func.func @transform_1(%arg0: i32) -> (i32, i32) {
    %c0_i32 = arith.constant 0 : i32
    %c0_i32_0 = arith.constant 0 : i32
    %c0_i32_1 = arith.constant 0 : i32
    return %c0_i32, %c0_i32_0 : i32, i32
  }
  func.func @transform_2(%arg0: i32) -> (i32, i32) {
    %c0_i32 = arith.constant 0 : i32
    %c0_i32_0 = arith.constant 0 : i32
    %c0_i32_1 = arith.constant 0 : i32
    return %c0_i32, %c0_i32_0 : i32, i32
  }
  func.func @transform_3(%arg0: i32) -> (i32, i32) {
    %c0_i32 = arith.constant 0 : i32
    %c0_i32_0 = arith.constant 0 : i32
    return %arg0, %c0_i32 : i32, i32
  }
}

module attributes {stable_mosaic.version = 11 : i64} {
  func.func @_conv_tap_kernel(%arg0: i32, %arg1: memref<128x128xbf16, #tpu.memory_space<vmem>>, %arg2: memref<128x128xbf16, #tpu.memory_space<vmem>>, %arg3: memref<9x128x128xbf16, #tpu.memory_space<vmem>>, %arg4: memref<1x128xf32, #tpu.memory_space<vmem>>, %arg5: memref<128x128xbf16, #tpu.memory_space<vmem>>) attributes {dimension_semantics = [#tpu.dimension_semantics<parallel>], iteration_bounds = array<i64: 19>, scalar_prefetch = 0 : i64, scratch_operands = 0 : i64, tpu.core_type = #tpu.core_type<tc>, window_params = [{transform_indices = @transform_0, window_bounds = array<i64: 128, 128>}, {transform_indices = @transform_1, window_bounds = array<i64: 128, 128>}, {pipeline_mode = #tpu.pipeline_mode<synchronous>, transform_indices = @transform_2, window_bounds = array<i64: 9, 128, 128>}, {pipeline_mode = #tpu.pipeline_mode<synchronous>, transform_indices = @transform_3, window_bounds = array<i64: 1, 128>}, {transform_indices = @transform_4, window_bounds = array<i64: 128, 128>}]} {
    %c0 = arith.constant 0 : index
    %c0_0 = arith.constant 0 : index
    %0 = vector.load %arg1[%c0, %c0_0] : memref<128x128xbf16, #tpu.memory_space<vmem>>, vector<128x128xbf16>
    %c0_1 = arith.constant 0 : index
    %c0_2 = arith.constant 0 : index
    %1 = vector.load %arg2[%c0_1, %c0_2] : memref<128x128xbf16, #tpu.memory_space<vmem>>, vector<128x128xbf16>
    %2 = tpu.concatenate %0, %1 in 0 : vector<128x128xbf16>, vector<128x128xbf16> -> vector<256x128xbf16>
    %3 = arith.extf %2 : vector<256x128xbf16> to vector<256x128xf32>
    %cst = arith.constant 0.000000e+00 : f32
    %4 = vector.broadcast %cst : f32 to vector<128x128xf32>
    %5 = vector.extract_strided_slice %3 {offsets = [0, 0], sizes = [128, 128], strides = [1, 1]} : vector<256x128xf32> to vector<128x128xf32>
    %6 = arith.truncf %5 : vector<128x128xf32> to vector<128x128xbf16>
    %c0_3 = arith.constant 0 : index
    %c0_4 = arith.constant 0 : index
    %c0_5 = arith.constant 0 : index
    %7 = vector.load %arg3[%c0_3, %c0_4, %c0_5] : memref<9x128x128xbf16, #tpu.memory_space<vmem>>, vector<1x128x128xbf16>
    %8 = vector.shape_cast %7 : vector<1x128x128xbf16> to vector<128x128xbf16>
    %cst_6 = arith.constant dense<0.000000e+00> : vector<128x128xf32>
    %9 = tpu.matmul %6, %8, %cst_6 {dimension_numbers = #tpu.dot_dimension_numbers<[1], [0], [0], [1], [0, 0, 1, 1], [], []>} : vector<128x128xbf16>, vector<128x128xbf16>, vector<128x128xf32> -> vector<128x128xf32>
    %10 = arith.addf %4, %9 : vector<128x128xf32>
    %11 = vector.extract_strided_slice %3 {offsets = [1, 0], sizes = [128, 128], strides = [1, 1]} : vector<256x128xf32> to vector<128x128xf32>
    %12 = arith.truncf %11 : vector<128x128xf32> to vector<128x128xbf16>
    %c1 = arith.constant 1 : index
    %c0_7 = arith.constant 0 : index
    %c0_8 = arith.constant 0 : index
    %13 = vector.load %arg3[%c1, %c0_7, %c0_8] : memref<9x128x128xbf16, #tpu.memory_space<vmem>>, vector<1x128x128xbf16>
    %14 = vector.shape_cast %13 : vector<1x128x128xbf16> to vector<128x128xbf16>
    %cst_9 = arith.constant dense<0.000000e+00> : vector<128x128xf32>
    %15 = tpu.matmul %12, %14, %cst_9 {dimension_numbers = #tpu.dot_dimension_numbers<[1], [0], [0], [1], [0, 0, 1, 1], [], []>} : vector<128x128xbf16>, vector<128x128xbf16>, vector<128x128xf32> -> vector<128x128xf32>
    %16 = arith.addf %10, %15 : vector<128x128xf32>
    %17 = vector.extract_strided_slice %3 {offsets = [2, 0], sizes = [128, 128], strides = [1, 1]} : vector<256x128xf32> to vector<128x128xf32>
    %18 = arith.truncf %17 : vector<128x128xf32> to vector<128x128xbf16>
    %c2 = arith.constant 2 : index
    %c0_10 = arith.constant 0 : index
    %c0_11 = arith.constant 0 : index
    %19 = vector.load %arg3[%c2, %c0_10, %c0_11] : memref<9x128x128xbf16, #tpu.memory_space<vmem>>, vector<1x128x128xbf16>
    %20 = vector.shape_cast %19 : vector<1x128x128xbf16> to vector<128x128xbf16>
    %cst_12 = arith.constant dense<0.000000e+00> : vector<128x128xf32>
    %21 = tpu.matmul %18, %20, %cst_12 {dimension_numbers = #tpu.dot_dimension_numbers<[1], [0], [0], [1], [0, 0, 1, 1], [], []>} : vector<128x128xbf16>, vector<128x128xbf16>, vector<128x128xf32> -> vector<128x128xf32>
    %22 = arith.addf %16, %21 : vector<128x128xf32>
    %23 = vector.extract_strided_slice %3 {offsets = [34, 0], sizes = [128, 128], strides = [1, 1]} : vector<256x128xf32> to vector<128x128xf32>
    %24 = arith.truncf %23 : vector<128x128xf32> to vector<128x128xbf16>
    %c3 = arith.constant 3 : index
    %c0_13 = arith.constant 0 : index
    %c0_14 = arith.constant 0 : index
    %25 = vector.load %arg3[%c3, %c0_13, %c0_14] : memref<9x128x128xbf16, #tpu.memory_space<vmem>>, vector<1x128x128xbf16>
    %26 = vector.shape_cast %25 : vector<1x128x128xbf16> to vector<128x128xbf16>
    %cst_15 = arith.constant dense<0.000000e+00> : vector<128x128xf32>
    %27 = tpu.matmul %24, %26, %cst_15 {dimension_numbers = #tpu.dot_dimension_numbers<[1], [0], [0], [1], [0, 0, 1, 1], [], []>} : vector<128x128xbf16>, vector<128x128xbf16>, vector<128x128xf32> -> vector<128x128xf32>
    %28 = arith.addf %22, %27 : vector<128x128xf32>
    %29 = vector.extract_strided_slice %3 {offsets = [35, 0], sizes = [128, 128], strides = [1, 1]} : vector<256x128xf32> to vector<128x128xf32>
    %30 = arith.truncf %29 : vector<128x128xf32> to vector<128x128xbf16>
    %c4 = arith.constant 4 : index
    %c0_16 = arith.constant 0 : index
    %c0_17 = arith.constant 0 : index
    %31 = vector.load %arg3[%c4, %c0_16, %c0_17] : memref<9x128x128xbf16, #tpu.memory_space<vmem>>, vector<1x128x128xbf16>
    %32 = vector.shape_cast %31 : vector<1x128x128xbf16> to vector<128x128xbf16>
    %cst_18 = arith.constant dense<0.000000e+00> : vector<128x128xf32>
    %33 = tpu.matmul %30, %32, %cst_18 {dimension_numbers = #tpu.dot_dimension_numbers<[1], [0], [0], [1], [0, 0, 1, 1], [], []>} : vector<128x128xbf16>, vector<128x128xbf16>, vector<128x128xf32> -> vector<128x128xf32>
    %34 = arith.addf %28, %33 : vector<128x128xf32>
    %35 = vector.extract_strided_slice %3 {offsets = [36, 0], sizes = [128, 128], strides = [1, 1]} : vector<256x128xf32> to vector<128x128xf32>
    %36 = arith.truncf %35 : vector<128x128xf32> to vector<128x128xbf16>
    %c5 = arith.constant 5 : index
    %c0_19 = arith.constant 0 : index
    %c0_20 = arith.constant 0 : index
    %37 = vector.load %arg3[%c5, %c0_19, %c0_20] : memref<9x128x128xbf16, #tpu.memory_space<vmem>>, vector<1x128x128xbf16>
    %38 = vector.shape_cast %37 : vector<1x128x128xbf16> to vector<128x128xbf16>
    %cst_21 = arith.constant dense<0.000000e+00> : vector<128x128xf32>
    %39 = tpu.matmul %36, %38, %cst_21 {dimension_numbers = #tpu.dot_dimension_numbers<[1], [0], [0], [1], [0, 0, 1, 1], [], []>} : vector<128x128xbf16>, vector<128x128xbf16>, vector<128x128xf32> -> vector<128x128xf32>
    %40 = arith.addf %34, %39 : vector<128x128xf32>
    %41 = vector.extract_strided_slice %3 {offsets = [68, 0], sizes = [128, 128], strides = [1, 1]} : vector<256x128xf32> to vector<128x128xf32>
    %42 = arith.truncf %41 : vector<128x128xf32> to vector<128x128xbf16>
    %c6 = arith.constant 6 : index
    %c0_22 = arith.constant 0 : index
    %c0_23 = arith.constant 0 : index
    %43 = vector.load %arg3[%c6, %c0_22, %c0_23] : memref<9x128x128xbf16, #tpu.memory_space<vmem>>, vector<1x128x128xbf16>
    %44 = vector.shape_cast %43 : vector<1x128x128xbf16> to vector<128x128xbf16>
    %cst_24 = arith.constant dense<0.000000e+00> : vector<128x128xf32>
    %45 = tpu.matmul %42, %44, %cst_24 {dimension_numbers = #tpu.dot_dimension_numbers<[1], [0], [0], [1], [0, 0, 1, 1], [], []>} : vector<128x128xbf16>, vector<128x128xbf16>, vector<128x128xf32> -> vector<128x128xf32>
    %46 = arith.addf %40, %45 : vector<128x128xf32>
    %47 = vector.extract_strided_slice %3 {offsets = [69, 0], sizes = [128, 128], strides = [1, 1]} : vector<256x128xf32> to vector<128x128xf32>
    %48 = arith.truncf %47 : vector<128x128xf32> to vector<128x128xbf16>
    %c7 = arith.constant 7 : index
    %c0_25 = arith.constant 0 : index
    %c0_26 = arith.constant 0 : index
    %49 = vector.load %arg3[%c7, %c0_25, %c0_26] : memref<9x128x128xbf16, #tpu.memory_space<vmem>>, vector<1x128x128xbf16>
    %50 = vector.shape_cast %49 : vector<1x128x128xbf16> to vector<128x128xbf16>
    %cst_27 = arith.constant dense<0.000000e+00> : vector<128x128xf32>
    %51 = tpu.matmul %48, %50, %cst_27 {dimension_numbers = #tpu.dot_dimension_numbers<[1], [0], [0], [1], [0, 0, 1, 1], [], []>} : vector<128x128xbf16>, vector<128x128xbf16>, vector<128x128xf32> -> vector<128x128xf32>
    %52 = arith.addf %46, %51 : vector<128x128xf32>
    %53 = vector.extract_strided_slice %3 {offsets = [70, 0], sizes = [128, 128], strides = [1, 1]} : vector<256x128xf32> to vector<128x128xf32>
    %54 = arith.truncf %53 : vector<128x128xf32> to vector<128x128xbf16>
    %c8 = arith.constant 8 : index
    %c0_28 = arith.constant 0 : index
    %c0_29 = arith.constant 0 : index
    %55 = vector.load %arg3[%c8, %c0_28, %c0_29] : memref<9x128x128xbf16, #tpu.memory_space<vmem>>, vector<1x128x128xbf16>
    %56 = vector.shape_cast %55 : vector<1x128x128xbf16> to vector<128x128xbf16>
    %cst_30 = arith.constant dense<0.000000e+00> : vector<128x128xf32>
    %57 = tpu.matmul %54, %56, %cst_30 {dimension_numbers = #tpu.dot_dimension_numbers<[1], [0], [0], [1], [0, 0, 1, 1], [], []>} : vector<128x128xbf16>, vector<128x128xbf16>, vector<128x128xf32> -> vector<128x128xf32>
    %58 = arith.addf %52, %57 : vector<128x128xf32>
    %c0_31 = arith.constant 0 : index
    %c0_32 = arith.constant 0 : index
    %59 = vector.load %arg4[%c0_31, %c0_32] : memref<1x128xf32, #tpu.memory_space<vmem>>, vector<1x128xf32>
    %60 = vector.broadcast %59 : vector<1x128xf32> to vector<128x128xf32>
    %61 = arith.addf %58, %60 : vector<128x128xf32>
    %cst_33 = arith.constant 0.000000e+00 : f32
    %62 = vector.broadcast %cst_33 : f32 to vector<128x128xf32>
    %63 = arith.subf %62, %61 : vector<128x128xf32>
    %64 = math.exp %63 : vector<128x128xf32>
    %cst_34 = arith.constant 1.000000e+00 : f32
    %65 = vector.broadcast %cst_34 : f32 to vector<128x128xf32>
    %66 = arith.addf %65, %64 : vector<128x128xf32>
    %cst_35 = arith.constant 1.000000e+00 : f32
    %67 = vector.broadcast %cst_35 : f32 to vector<128x128xf32>
    %68 = arith.divf %67, %66 : vector<128x128xf32>
    %69 = arith.truncf %68 : vector<128x128xf32> to vector<128x128xbf16>
    %c0_36 = arith.constant 0 : index
    %c0_37 = arith.constant 0 : index
    %70 = vector.load %arg5[%c0_36, %c0_37] : memref<128x128xbf16, #tpu.memory_space<vmem>>, vector<128x128xbf16>
    tpu.vector_store %arg5[%c0_36, %c0_37], %69 {strides = array<i32>} : memref<128x128xbf16, #tpu.memory_space<vmem>>, vector<128x128xbf16>,
    return
  }
  func.func @transform_0(%arg0: i32) -> (i32, i32) {
    %c0_i32 = arith.constant 0 : i32
    %c0_i32_0 = arith.constant 0 : i32
    return %arg0, %c0_i32 : i32, i32
  }
  func.func @transform_1(%arg0: i32) -> (i32, i32) {
    %c1_i32 = arith.constant 1 : i32
    %0 = arith.addi %arg0, %c1_i32 : i32
    %c0_i32 = arith.constant 0 : i32
    %c0_i32_0 = arith.constant 0 : i32
    return %0, %c0_i32 : i32, i32
  }
  func.func @transform_2(%arg0: i32) -> (i32, i32, i32) {
    %c0_i32 = arith.constant 0 : i32
    %c0_i32_0 = arith.constant 0 : i32
    %c0_i32_1 = arith.constant 0 : i32
    %c0_i32_2 = arith.constant 0 : i32
    return %c0_i32, %c0_i32_0, %c0_i32_1 : i32, i32, i32
  }
  func.func @transform_3(%arg0: i32) -> (i32, i32) {
    %c0_i32 = arith.constant 0 : i32
    %c0_i32_0 = arith.constant 0 : i32
    %c0_i32_1 = arith.constant 0 : i32
    return %c0_i32, %c0_i32_0 : i32, i32
  }
  func.func @transform_4(%arg0: i32) -> (i32, i32) {
    %c0_i32 = arith.constant 0 : i32
    %c0_i32_0 = arith.constant 0 : i32
    return %arg0, %c0_i32 : i32, i32
  }
}

</mosaic_0001>

<bundles_post_ra>
// kernel: unet_forward.31
= control target key start
LH: loop header
LB: loop body
LE: loop exit
PB: predicated region body
PF: predicated region fallthrough
CT: control target
= control target key end

     0   :  { %s3456_s15 = smov 0   ;;  %s4092_s0 = inlined_call_operand.vmem [shape: bf16[2560,128], index: 0, kind: input, shape index: {}, may-alias: {0,1}]   ;;  %s4093_s1 = inlined_call_operand.vmem [shape: bf16[2560,128], index: 1, kind: input, shape index: {}, may-alias: {0,1}]   ;;  %s4094_s2 = inlined_call_operand.vmem [shape: bf16[9,128,128], index: 2, kind: input, shape index: {}]   ;;  %s4095_s3 = inlined_call_operand.vmem [shape: f32[1,128], index: 3, kind: input, shape index: {}]   ;;  %s4096_s4 = inlined_call_operand.vmem [shape: bf16[2432,128], index: 4, kind: output, shape index: {}]  }
   0x1 LB: > { %s2437_s16 = sadd.s32 4294967295, %s3429_s15   ;;  %p2441_p0 = scmp.ge.s32.totalorder %s3429_s15, 1  ;;  %s3429_s15 = sphi %s3456_s15, %s14_s15  }
   0x2   : > { %p178_p1 = scmp.lt.s32.totalorder %s3429_s15, 20 }
   0x4   : > { %p179_p2 = pnand %p2441_p0, %p178_p1 }
   0x5   : > { %v3335_v0 = vld [vmem:[%s4094_s2 + $0x40] sm:$0xff] (!%p179_p2)   ;;  %s3467_s19 = sshll.u32 (!%p179_p2), %s2437_s16, 4  ;;  %v3337_v2 = vld [vmem:[%s4094_s2 + $0x48] sm:$0xff] (!%p179_p2)   ;;  %v3339_v4 = vld [vmem:[%s4094_s2 + $0x50] sm:$0xff] (!%p179_p2)   ;;  %vm402_vm0 = vsmask.f32 (!%p179_p2), 7424 }
   0x6   : > { %182 = sbr.rel (%p179_p2) target bundleno = 399 (0x18f), region = 36  ;;  %v3336_v1 = vld [vmem:[%s4094_s2 + $0x100] sm:$0xff] (!%p179_p2)   ;;  %2895 = vmatprep.subr.bf16.mxu1 (!%p179_p2), %v3335_v0  ;;  %v3338_v3 = vld [vmem:[%s4094_s2 + $0x108] sm:$0xff] (!%p179_p2)   ;;  %p211_p3 = scmp.lt.s32.totalorder (!%p179_p2), %s3467_s19, 319  ;;  %v3340_v5 = vld [vmem:[%s4094_s2 + $0x110] sm:$0xff] (!%p179_p2)   ;;  %vm1429_vm2 = vcmask (!%p179_p2), 1045504  }
   0x7   : > { %3023 = vmatprep.subr.bf16.mxu0 (!%p179_p2), %v3336_v1  ;;  %2896 = vmatpush3.bf16.msra.mxu1 (!%p179_p2), %v3335_v0  ;;  %v3341_v6 = vld [vmem:[%s4094_s2 + $0x58] sm:$0xff] (!%p179_p2)   ;;  %s2684_s7 = sadd.s32 (!%p179_p2), 16, %s3467_s19  ;;  %v3343_v8 = vld [vmem:[%s4094_s2 + $0x60] sm:$0xff] (!%p179_p2)   ;;  %v3345_v10 = vld [vmem:[%s4094_s2 + $0x68] sm:$0xff] (!%p179_p2)   ;;  %vm1192_vm1 = vsmask.f32 (!%p179_p2), 6400 }
   0x8   : > { %3024 = vmatpush3.bf16.msra.mxu0 (!%p179_p2), %v3336_v1  ;;  %2897 = vmatprep.subr.bf16.mxu1 (!%p179_p2), %v3337_v2  ;;  %v3342_v7 = vld [vmem:[%s4094_s2 + $0x118] sm:$0xff] (!%p179_p2)   ;;  %p218_p4 = scmp.lt.s32.totalorder (!%p179_p2), %s2684_s7, 319  ;;  %v3344_v9 = vld [vmem:[%s4094_s2 + $0x120] sm:$0xff] (!%p179_p2)   ;;  %v3346_v11 = vld [vmem:[%s4094_s2 + $0x128] sm:$0xff] (!%p179_p2)   ;;  %vm795_vm3 = vcmask (!%p179_p2), 1046528   ;;  %vm2063_vm5 = vcmask (!%p179_p2), 1044480  }
   0x9   : > { %3025 = vmatprep.subr.bf16.mxu0 (!%p179_p2), %v3338_v3  ;;  %v3347_v14 = vld [vmem:[%s4094_s2 + $0x70] sm:$0xff] (!%p179_p2)   ;;  %v3349_v32 = vld [vmem:[%s4094_s2 + $0x78] sm:$0xff] (!%p179_p2)   ;;  %v3355_v44 = vld [vmem:[%s4094_s2] sm:$0xff] (!%p179_p2)   ;;  %vm1826_vm4 = vsmask.f32 (!%p179_p2), 5376  ;;  %p225_p5 = scmp.lt.s32.totalorder (!%p179_p2), %s3467_s19, 303 }
   0xa   : > { %v3348_v19 = vld [vmem:[%s4094_s2 + $0x130] sm:$0xff] (!%p179_p2)   ;;  %v3350_v36 = vld [vmem:[%s4094_s2 + $0x138] sm:$0xff] (!%p179_p2)   ;;  %v3357_v48 = vld [vmem:[%s4094_s2 + $0x140] sm:$0xff] (!%p179_p2)  }
   0xb   : > { %2898 = vmatpush3.bf16.msra.mxu1 (!%p179_p2), %v3337_v2  ;;  %v3358_v56 = vld [vmem:[%s4094_s2 + $0x8] sm:$0xff] (!%p179_p2)  }
   0xc   : > { %3026 = vmatpush3.bf16.msra.mxu0 (!%p179_p2), %v3338_v3  ;;  %2899 = vmatprep.subr.bf16.mxu1 (!%p179_p2), %v3339_v4  ;;  %v3359_v62 = vld [vmem:[%s4094_s2 + $0x148] sm:$0xff] (!%p179_p2)   ;;  %v3361_v3 = vld [vmem:[%s4094_s2 + $0x10] sm:$0xff] (!%p179_p2)  }
   0xd   : > { %s212_s30 = scalar_select %p211_p3, %s3467_s19, 319  ;;  %3027 = vmatprep.subr.bf16.mxu0 %v3340_v5 }
   0xe   : > { %s4098_s7 = smov (!%p218_p4, %s2684_s7), 319  ;;  %s4100_s19 = smov (!%p225_p5, %s3467_s19), 303 }
   0xf   : > { %2900 = vmatpush3.bf16.msra.mxu1 %v3339_v4  ;;  %s2443_s10 = sshll.u32 %s212_s30, 2  ;;  %s2445_s11 = sshll.u32 %s4098_s7, 2 }
  0x10   : > { %3028 = vmatpush3.bf16.msra.mxu0 %v3340_v5  ;;  %2901 = vmatprep.subr.bf16.mxu1 %v3341_v6  ;;  %s3505_s21 = scalar_lea.vmem %s4092_s0, %s2443_s10  ;;  %s3596_s18 = scalar_lea.vmem %s4093_s1, %s2445_s11 }
  0x11   : > { %3029 = vmatprep.subr.bf16.mxu0 %v3342_v7  ;;  %v3513_v12 = vld [vmem:[%s3505_s21] sm:$0xff]   ;;  %v3516_v13 = vld [vmem:[%s3505_s21 + $0x8] sm:$0xff]   ;;  %v3525_v18 = vld [vmem:[%s3505_s21 + $0x10] sm:$0xff]  }
  0x12   : > { %v404_v15 = vshrl.u32 %v3513_v12, 16  ;;  %v406_v16 = vshll.u32 %v3513_v12, 16  ;;  %v411_v17 = vshll.u32 %v3516_v13, 16  ;;  %v3531_v20 = vld [vmem:[%s3505_s21 + $0x18] sm:$0xff]   ;;  %v419_v23 = vshll.u32 %v3525_v18, 16  ;;  %v3539_v28 = vld [vmem:[%s3505_s21 + $0x20] sm:$0xff]  }
  0x13   : > { %2902 = vmatpush3.bf16.msra.mxu1 %v3341_v6  ;;  %v423_v24 = vshrl.u32 %v3525_v18, 16  ;;  %v427_v25 = vshll.u32 %v3531_v20, 16  ;;  %v431_v26 = vshrl.u32 %v3531_v20, 16  ;;  %v415_v27 = vshrl.u32 %v3516_v13, 16  ;;  %v3560_v46 = vld [vmem:[%s3505_s21 + $0x28] sm:$0xff]   ;;  %v3574_v54 = vld [vmem:[%s3505_s21 + $0x30] sm:$0xff]  }
  0x14   : > { %3030 = vmatpush3.bf16.msra.mxu0 %v3342_v7  ;;  %2903 = vmatprep.subr.bf16.mxu1 %v3343_v8  ;;  %v408_v21 = vrot.slane %v406_v16, 1  ;;  %v413_v22 = vrot.slane %v411_v17, 1  ;;  %v1194_v31 = vrot.slane %v419_v23, 2  ;;  %v3545_v35 = vshll.u32 %v3539_v28, 16  ;;  %v3606_v7 = vld [vmem:[%s3505_s21 + $0x38] sm:$0xff]  }
  0x15   : > { %3031 = vmatprep.subr.bf16.mxu0 %v3344_v9  ;;  %v1193_v30 = vrot.slane %v423_v24, 1  ;;  %v1196_v33 = vrot.slane %v431_v26, 1  ;;  %v1197_v34 = vrot.slane %v427_v25, 2  ;;  %v3552_v39 = vshrl.u32 %v3539_v28, 16 }
  0x16   : > { %v409_v29 = vor.u32 %v408_v21, %v404_v15  ;;  %v1201_v41 = vrot.slane %v3545_v35, 2  ;;  %v417_v42 = vor.u32 %v415_v27, %v413_v22  ;;  %v421_v43 = vrot.slane %v419_v23, 1  ;;  %v3365_v23 = vld [vmem:[%s4094_s2 + $0x158] sm:$0xff]  }
  0x17   : > { %2904 = vmatpush3.bf16.msra.mxu1 %v3343_v8  ;;  %v1195_v38 = vor.u32 %v1194_v31, %v1193_v30  ;;  %v1198_v40 = vor.u32 %v1197_v34, %v1196_v33  ;;  %v1200_v45 = vrot.slane %v3552_v39, 1  ;;  %v3568_v50 = vshll.u32 %v3560_v46, 16  ;;  %v3636_v30 = vld [vmem:[%s3596_s18 + $0x8] sm:$0xff]  }
  0x18   : > { %3032 = vmatpush3.bf16.msra.mxu0 %v3344_v9  ;;  %2905 = vmatprep.subr.bf16.mxu1 %v3345_v10  ;;  %v414_v37 = vsel %vm402_vm0, %v409_v29, %v413_v22  ;;  %v3571_v51 = vshrl.u32 %v3560_v46, 16  ;;  %v425_v52 = vor.u32 %v423_v24, %v421_v43  ;;  %v429_v53 = vrot.slane %v427_v25, 1  ;;  %v3363_v9 = vld [vmem:[%s4094_s2 + $0x150] sm:$0xff]   ;;  %v3364_v22 = vld [vmem:[%s4094_s2 + $0x18] sm:$0xff]  }
  0x19   : > { %3033 = vmatprep.subr.bf16.mxu0 %v3346_v11  ;;  %2911 = vmatprep.mubr.bf16.mxu1 %v414_v37  ;;  %v1199_v47 = vsel %vm1192_vm1, %v1195_v38, %v1198_v40  ;;  %v1202_v49 = vor.u32 %v1201_v41, %v1200_v45  ;;  %v422_v55 = vsel %vm402_vm0, %v417_v42, %v421_v43  ;;  %v1205_v58 = vrot.slane %v3568_v50, 2  ;;  %v3651_v43 = vld [vmem:[%s3596_s18 + $0x10] sm:$0xf] }
  0x1a   : > { %3039 = vmatprep.mubr.bf16.mxu0 %v1199_v47  ;;  %v1204_v57 = vrot.slane %v3571_v51, 1  ;;  %v3584_v60 = vshll.u32 %v3574_v54, 16  ;;  %v3587_v61 = vshrl.u32 %v3574_v54, 16  ;;  %v437_v0 = vrot.slane %v3545_v35, 1 }
  0x1b   : > { %2906 = vmatpush3.bf16.msra.mxu1 %v3345_v10  ;;  %v1203_v59 = vsel %vm1192_vm1, %v1198_v40, %v1202_v49  ;;  %v430_v1 = vsel %vm402_vm0, %v425_v52, %v429_v53  ;;  %v433_v2 = vor.u32 %v431_v26, %v429_v53  ;;  %v247_v10 = vld [vmem:[%s3596_s18] sm:$0xf]  ;;  %v3617_v15 = vshrl.u32 %v3606_v7, 16 }
  0x1c   : > { %3034 = vmatpush3.bf16.msra.mxu0 %v3346_v11  ;;  %2907 = vmatprep.subr.bf16.mxu1 %v3347_v14  ;;  %v1206_v63 = vor.u32 %v1205_v58, %v1204_v57  ;;  %v1208_v4 = vrot.slane %v3587_v61, 1  ;;  %v1209_v5 = vrot.slane %v3584_v60, 2  ;;  %v248_v11 = vld [vmem:[%s3596_s18 + $0x4] sm:$0xf]  ;;  %v445_v21 = vrot.slane %v3568_v50, 1 }
  0x1d   : > { %3035 = vmatprep.subr.bf16.mxu0 %v3348_v19  ;;  %v3619_v16 = vcombine.low %v247_v10, %v248_v11  ;;  %v438_v17 = vsel %vm402_vm0, %v433_v2, %v437_v0  ;;  %v1212_v24 = vrot.slane %v3617_v15, 1  ;;  %v1229_v37 = vshll.u32 %v3636_v30, 16  ;;  %v3369_v52 = vld [vmem:[%s4094_s2 + $0x160] sm:$0xff]   ;;  %v3376_v11 = vld [vmem:[%s4094_s2 + $0x170] sm:$0xff]  }
  0x1e   : > { %v1207_v6 = vsel %vm1192_vm1, %v1202_v49, %v1206_v63  ;;  %v1210_v8 = vor.u32 %v1209_v5, %v1208_v4  ;;  %v449_v40 = vor.u32 %v3571_v51, %v445_v21  ;;  %v453_v41 = vrot.slane %v3584_v60, 1 }
  0x1f   : > { %2908 = vmatpush3.bf16.msra.mxu1 %v3347_v14  ;;  %v3614_v14 = vshll.u32 %v3606_v7, 16  ;;  %v1217_v26 = vshrl.u32 %v3619_v16, 16  ;;  %v1220_v27 = vshll.u32 %v3619_v16, 16  ;;  %v3648_v42 = vcombine.low %v247_v10, %v247_v10 }
  0x20   : > { %3036 = vmatpush3.bf16.msra.mxu0 %v3348_v19  ;;  %2909 = vmatprep.subr.bf16.mxu1 %v3349_v32  ;;  %v441_v19 = vor.u32 %v3552_v39, %v437_v0  ;;  %v1211_v29 = vsel %vm1192_vm1, %v1206_v63, %v1210_v8  ;;  %v3662_v49 = vcombine.low %v3651_v43, %v3651_v43 }
  0x21   : > { %3037 = vmatprep.subr.bf16.mxu0 %v3350_v36  ;;  %v1213_v25 = vrot.slane %v3614_v14, 2  ;;  %v1222_v33 = vrot.slane %v1220_v27, 2  ;;  %v461_v53 = vrot.slane %v3614_v14, 1  ;;  %v454_v58 = vsel %vm402_vm0, %v449_v40, %v453_v41 }
  0x22   : > { %v446_v34 = vsel %vm402_vm0, %v441_v19, %v445_v21  ;;  %v1238_v57 = vshll.u32 %v3662_v49, 16  ;;  %v467_v63 = vshll.u32 %v3648_v42, 16  ;;  %v1431_v21 = vrot.slane %v3531_v20, 2 }
  0x23   : > { %2910 = vmatpush3.bf16.msra.mxu1 %v3349_v32  ;;  %v1214_v31 = vor.u32 %v1213_v25, %v1212_v24  ;;  %v1219_v32 = vrot.slane %v1217_v26, 1  ;;  %v3377_v24 = vld [vmem:[%s4094_s2 + $0x38] sm:$0xff]   ;;  %v797_v25 = vrot.slane %v3516_v13, 1 }
  0x24   : > { %3038 = vmatpush3.bf16.msra.mxu0 %v3350_v36  ;;  %2927 = vmatprep.subr.bf16.mxu1 %v3355_v44  ;;  %v1226_v36 = vshrl.u32 %v3636_v30, 16  ;;  %v1240_v2 = vrot.slane %v1238_v57, 2  ;;  %v3381_v57 = vld [vmem:[%s4094_s2 + $0x88] sm:$0xff]  }
  0x25   : > { %3055 = vmatprep.subr.bf16.mxu0 %v3357_v48  ;;  %v1215_v38 = vsel %vm1192_vm1, %v1210_v8, %v1214_v31  ;;  %v1223_v45 = vor.u32 %v1222_v33, %v1219_v32  ;;  %v469_v8 = vrot.slane %v467_v63, 1  ;;  %v801_v33 = vrot.slane %v3531_v20, 1 }
  0x26   : > { %2912 = vmatmul.mubr.bf16.vlgmr.msra.gmra.mrb[0].mxu1 %v422_v55  ;;  %v1228_v47 = vrot.slane %v1226_v36, 1  ;;  %v457_v55 = vor.u32 %v3587_v61, %v453_v41  ;;  %v1433_v41 = vrot.slane %v3539_v28, 2  ;;  %v1828_v63 = vrot.slane %v3545_v35, 3  ;;  %v3383_v35 = vld [vmem:[%s4094_s2 + $0x90] sm:$0xff]  }
  0x27   : > { %3040 = vmatmul.mubr.bf16.vlgmr.msra.gmra.mrb[0].mxu0 %v1203_v59  ;;  %2928 = vmatpush3.bf16.msra.mxu1 %v3355_v44  ;;  %v3367_v44 = vld [vmem:[%s4094_s2 + $0x20] sm:$0xff]   ;;  %v3370_v59 = vld [vmem:[%s4094_s2 + $0x28] sm:$0xff]   ;;  %v1224_v0 = vsel %vm1192_vm1, %v1214_v31, %v1223_v45  ;;  %v799_v31 = vrot.slane %v3525_v18, 1 }
  0x28   : > { %3056 = vmatpush3.bf16.msra.mxu0 %v3357_v48  ;;  %2929 = vmatprep.subr.bf16.mxu1 %v3358_v56  ;;  %v1231_v48 = vrot.slane %v1229_v37, 2  ;;  %v462_v4 = vsel %vm402_vm0, %v457_v55, %v461_v53 }
  0x29   : > { %3057 = vmatprep.subr.bf16.mxu0 %v3359_v62  ;;  %2915 = vmatprep.mubr.bf16.mxu1 %v430_v1  ;;  %v3711_v40 = vsel %vm795_vm3, %v797_v25, %v799_v31 }
  0x2a   : > { %3043 = vmatprep.mubr.bf16.mxu0 %v1207_v6  ;;  %v465_v6 = vor.u32 %v3617_v15, %v461_v53  ;;  %v1435_v53 = vrot.slane %v3560_v46, 2 }
  0x2b   : > { %2930 = vmatpush3.bf16.msra.mxu1 %v3358_v56  ;;  %v1235_v56 = vshrl.u32 %v3662_v49, 16 }
  0x2c   : > { %3058 = vmatpush3.bf16.msra.mxu0 %v3359_v62  ;;  %2931 = vmatprep.subr.bf16.mxu1 %v3361_v3  ;;  %v1232_v62 = vor.u32 %v1231_v48, %v1228_v47  ;;  %v470_v19 = vsel %vm402_vm0, %v465_v6, %v469_v8  ;;  %v3380_v47 = vld [vmem:[%s4094_s2 + $0x180] sm:$0xff]   ;;  %v807_v48 = vrot.slane %v3574_v54, 1  ;;  %v1439_v6 = vrot.slane %v3606_v7, 2 }
  0x2d   : > { %3059 = vmatprep.subr.bf16.mxu0 %v3363_v9  ;;  %v1237_v1 = vrot.slane %v1235_v56, 1  ;;  %v1434_v56 = vsel %vm1429_vm2, %v1431_v21, %v1433_v41 }
  0x2e   : > { %2916 = vmatmul.mubr.bf16.gmra.mrb[4].mxu1 %v438_v17  ;;  %v1233_v5 = vsel %vm1192_vm1, %v1223_v45, %v1232_v62  ;;  %v1430_v17 = vrot.slane %v3525_v18, 2  ;;  %v805_v45 = vrot.slane %v3560_v46, 1 }
  0x2f   : > { %3044 = vmatmul.mubr.bf16.gmra.mrb[4].mxu0 %v1211_v29  ;;  %2932 = vmatpush3.bf16.msra.mxu1 %v3361_v3  ;;  %v3371_v3 = vld [vmem:[%s4094_s2 + $0x168] sm:$0xff]   ;;  %v1241_v10 = vor.u32 %v1240_v2, %v1237_v1  ;;  %v3378_v29 = vld [vmem:[%s4094_s2 + $0x178] sm:$0xff]   ;;  %v3755_v1 = vsel %vm1429_vm2, %v1433_v41, %v1435_v53 }
  0x30   : > { %3060 = vmatpush3.bf16.msra.mxu0 %v3363_v9  ;;  %2933 = vmatprep.subr.bf16.mxu1 %v3364_v22  ;;  %v3374_v9 = vld [vmem:[%s4094_s2 + $0x30] sm:$0xff]   ;;  %v3732_v55 = vsel %vm795_vm3, %v805_v45, %v807_v48 }
  0x31   : > { %3061 = vmatprep.subr.bf16.mxu0 %v3365_v23  ;;  %2919 = vmatprep.mubr.bf16.mxu1 %v446_v34  ;;  %v1432_v34 = vsel %vm1429_vm2, %v1430_v17, %v1431_v21  ;;  %v1441_v17 = vrot.slane %v3619_v16, 2  ;;  %v1847_v21 = vrot.slane %v1229_v37, 3 }
  0x32   : > { %3047 = vmatprep.mubr.bf16.mxu0 %v1215_v38  ;;  %v3379_v38 = vld [vmem:[%s4094_s2 + $0x80] sm:$0xff]  }
  0x33   : > { %2934 = vmatpush3.bf16.msra.mxu1 %v3364_v22  ;;  %v796_v22 = vrot.slane %v3513_v12, 1 }
  0x34   : > { %3062 = vmatpush3.bf16.msra.mxu0 %v3365_v23  ;;  %2935 = vmatprep.subr.bf16.mxu1 %v3367_v44  ;;  %v1242_v23 = vsel %vm1192_vm1, %v1232_v62, %v1241_v10  ;;  %v3382_v62 = vld [vmem:[%s4094_s2 + $0x188] sm:$0xff]  }
  0x35   : > { %3063 = vmatprep.subr.bf16.mxu0 %v3369_v52  ;;  %v3703_v32 = vsel %vm795_vm3, %v796_v22, %v797_v25  ;;  %v1005_v22 = vrot.slane %v3619_v16, 1 }
  0x36   : > { %2920 = vmatmul.mubr.bf16.gmra.mrb[8].mxu1 %v454_v58 }
  0x37   : > { %3048 = vmatmul.mubr.bf16.gmra.mrb[8].mxu0 %v1224_v0  ;;  %2936 = vmatpush3.bf16.msra.mxu1 %v3367_v44  ;;  %v3717_v44 = vsel %vm795_vm3, %v799_v31, %v801_v33  ;;  %v1830_v0 = vrot.slane %v3571_v51, 2  ;;  %v3384_v51 = vld [vmem:[%s4094_s2 + $0x190] sm:$0xff]   ;;  %v3389_v31 = vld [vmem:[%s4094_s2 + $0xa8] sm:$0xff]  }
  0x38   : > { %3064 = vmatpush3.bf16.msra.mxu0 %v3369_v52  ;;  %2937 = vmatprep.subr.bf16.mxu1 %v3370_v59  ;;  %v3726_v52 = vrot.slane %v3606_v7, 1 }
  0x39   : > { %3065 = vmatprep.subr.bf16.mxu0 %v3371_v3  ;;  %2923 = vmatprep.mubr.bf16.mxu1 %v462_v4 }
  0x3a   : > { %3051 = vmatprep.mubr.bf16.mxu0 %v1233_v5  ;;  %v3741_v58 = vsel %vm795_vm3, %v807_v48, %v3726_v52  ;;  %v1835_v5 = vrot.slane %v3584_v60, 3  ;;  %v1842_v60 = vrot.slane %v1217_v26, 2  ;;  %v3810_v37 = vsel %vm795_vm3, %v3726_v52, %v1005_v22 }
  0x3b   : > { %2938 = vmatpush3.bf16.msra.mxu1 %v3370_v59  ;;  %v1827_v59 = vrot.slane %v3552_v39, 2  ;;  %v1437_v39 = vrot.slane %v3574_v54, 2 }
  0x3c   : > { %3066 = vmatpush3.bf16.msra.mxu0 %v3371_v3  ;;  %2939 = vmatprep.subr.bf16.mxu1 %v3374_v9  ;;  %v1831_v3 = vrot.slane %v3568_v50, 3  ;;  %v1838_v50 = vrot.slane %v3617_v15, 2  ;;  %v3386_v15 = vld [vmem:[%s4094_s2 + $0x198] sm:$0xff]  }
  0x3d   : > { %3067 = vmatprep.subr.bf16.mxu0 %v3376_v11  ;;  %v1829_v2 = vor.u32 %v1828_v63, %v1827_v59  ;;  %v3790_v26 = vsel %vm1429_vm2, %v1437_v39, %v1439_v6 }
  0x3e   : > { %2924 = vmatmul.mubr.bf16.gmra.mrb[12].mxu1 %v470_v19  ;;  %v1832_v4 = vor.u32 %v1831_v3, %v1830_v0 }
  0x3f   : > { %3052 = vmatmul.mubr.bf16.gmra.mrb[12].mxu0 %v1242_v23  ;;  %2940 = vmatpush3.bf16.msra.mxu1 %v3374_v9  ;;  %v3385_v9 = vld [vmem:[%s4094_s2 + $0x98] sm:$0xff]   ;;  %v3805_v23 = vrot.slane %v3636_v30, 2 }
  0x40   : > { %3068 = vmatpush3.bf16.msra.mxu0 %v3376_v11  ;;  %2941 = vmatprep.subr.bf16.mxu1 %v3377_v24  ;;  %v1846_v11 = vrot.slane %v1226_v36, 2  ;;  %v3388_v36 = vld [vmem:[%s4094_s2 + $0x1a0] sm:$0xff]  }
  0x41   : > { %3069 = vmatprep.subr.bf16.mxu0 %v3378_v29  ;;  %2943 = vmatprep.mubr.bf16.mxu1 %v3513_v12  ;;  %v811_v12 = vrot.slane %v3648_v42, 1 }
  0x42   : > { %3071 = vmatprep.mubr.bf16.mxu0 %v1432_v34  ;;  %v1848_v25 = vor.u32 %v1847_v21, %v1846_v11  ;;  %v3390_v34 = vld [vmem:[%s4094_s2 + $0x1a8] sm:$0xff]   ;;  %v803_v11 = vrot.slane %v3539_v28, 1 }
  0x43   : > { %2942 = vmatpush3.bf16.msra.mxu1 %v3377_v24  ;;  %v3749_v42 = vsel %vm795_vm3, %v3726_v52, %v811_v12  ;;  %v252_v24 = vld [vmem:[%s3596_s18 + $0x14] sm:$0xf] }
  0x44   : > { %3070 = vmatpush3.bf16.msra.mxu0 %v3378_v29  ;;  %2959 = vmatprep.subr.bf16.mxu1 %v3379_v38  ;;  %v3813_v29 = vsel %vm1429_vm2, %v1439_v6, %v1441_v17  ;;  %v3823_v41 = vcombine.low %v3651_v43, %v252_v24  ;;  %v2071_v6 = vrot.slane %v3619_v16, 3  ;;  %v2069_v16 = vrot.slane %v3606_v7, 3  ;;  %v3960_v24 = vld [vmem:[%s3596_s18 + $0x20] ss:$0 sps:$4 sm:$0xff]  }
  0x45   : > { %3087 = vmatprep.subr.bf16.mxu0 %v3380_v47 }
  0x46   : > { %2944 = vmatmul.mubr.bf16.vlgmr.msra.gmra.mrb[0].mxu1 %v3516_v13  ;;  %v1834_v13 = vrot.slane %v3587_v61, 2  ;;  %v1839_v61 = vrot.slane %v3614_v14, 3  ;;  %v1843_v14 = vrot.slane %v1220_v27, 3  ;;  %v3387_v27 = vld [vmem:[%s4094_s2 + $0xa0] sm:$0xff]   ;;  %v1854_v59 = vshll.u32 %v3823_v41, 16 }
  0x47   : > { %3072 = vmatmul.mubr.bf16.vlgmr.msra.gmra.mrb[0].mxu0 %v1434_v56  ;;  %2960 = vmatpush3.bf16.msra.mxu1 %v3379_v38  ;;  %v1445_v38 = vrot.slane %v3662_v49, 2  ;;  %v1851_v56 = vshrl.u32 %v3823_v41, 16 }
  0x48   : > { %3088 = vmatpush3.bf16.msra.mxu0 %v3380_v47  ;;  %2961 = vmatprep.subr.bf16.mxu1 %v3381_v57  ;;  %v1836_v8 = vor.u32 %v1835_v5, %v1834_v13  ;;  %v1840_v10 = vor.u32 %v1839_v61, %v1838_v50  ;;  %v1844_v19 = vor.u32 %v1843_v14, %v1842_v60  ;;  %v1856_v0 = vrot.slane %v1854_v59, 3  ;;  %v3398_v14 = vld [vmem:[%s4094_s2 + $0x1c8] sm:$0xff]  }
  0x49   : > { %3089 = vmatprep.subr.bf16.mxu0 %v3382_v62  ;;  %2947 = vmatprep.mubr.bf16.mxu1 %v3525_v18  ;;  %v3773_v18 = vsel %vm1429_vm2, %v1435_v53, %v1437_v39  ;;  %v3827_v47 = vsel %vm1826_vm4, %v1829_v2, %v1832_v4  ;;  %v3838_v53 = vsel %vm1429_vm2, %v1441_v17, %v3805_v23  ;;  %v1853_v63 = vrot.slane %v1851_v56, 2  ;;  %v3399_v17 = vld [vmem:[%s4094_s2 + $0xd0] sm:$0xff]   ;;  %v3413_v56 = vld [vmem:[%s4094_s2 + $0x1f8] sm:$0xff]  }
  0x4a   : > { %3075 = vmatprep.mubr.bf16.mxu0 %v3755_v1  ;;  %v3830_v48 = vsel %vm1826_vm4, %v1832_v4, %v1836_v8  ;;  %v3833_v52 = vsel %vm1826_vm4, %v1836_v8, %v1840_v10  ;;  %v3841_v43 = vsel %vm1826_vm4, %v1840_v10, %v1844_v19  ;;  %v3844_v12 = vsel %vm1826_vm4, %v1844_v19, %v1848_v25  ;;  %v3395_v8 = vld [vmem:[%s4094_s2 + $0xc0] sm:$0xff]   ;;  %v3400_v19 = vld [vmem:[%s4094_s2 + $0x1d0] sm:$0xff]  }
  0x4b   : > { %2962 = vmatpush3.bf16.msra.mxu1 %v3381_v57  ;;  %v3391_v57 = vld [vmem:[%s4094_s2 + $0xb0] sm:$0xff]   ;;  %v1007_v39 = vrot.slane %v3636_v30, 1  ;;  %v1009_v2 = vrot.slane %v3662_v49, 1  ;;  %v1446_v3 = vsel %vm1429_vm2, %v3805_v23, %v1445_v38  ;;  %v3863_v13 = vor.u32 %v1856_v0, %v1853_v63 }
  0x4c   : > { %3090 = vmatpush3.bf16.msra.mxu0 %v3382_v62  ;;  %2963 = vmatprep.subr.bf16.mxu1 %v3383_v35  ;;  %v3392_v62 = vld [vmem:[%s4094_s2 + $0x1b0] sm:$0xff]   ;;  %v2065_v50 = vrot.slane %v3560_v46, 3  ;;  %v2073_v61 = vrot.slane %v3636_v30, 3  ;;  %v2075_v60 = vrot.slane %v3823_v41, 3  ;;  %v1869_v0 = vshrl.u32 %v3960_v24, 16 }
  0x4d   : > { %3091 = vmatprep.subr.bf16.mxu0 %v3384_v51  ;;  %v3869_v4 = vsel %vm795_vm3, %v1005_v22, %v1007_v39  ;;  %v3872_v49 = vsel %vm795_vm3, %v1007_v39, %v1009_v2  ;;  %v3877_v5 = vsel %vm1826_vm4, %v1848_v25, %v3863_v13  ;;  %v3406_v22 = vld [vmem:[%s4094_s2 + $0xe8] sm:$0xff]   ;;  %v1872_v39 = vshll.u32 %v3960_v24, 16 }
  0x4e   : > { %2948 = vmatmul.mubr.bf16.gmra.mrb[4].mxu1 %v3531_v20  ;;  %v3894_v10 = vsel %vm2063_vm5, %v2071_v6, %v2073_v61  ;;  %v3904_v30 = vsel %vm2063_vm5, %v2073_v61, %v2075_v60  ;;  %v3943_v20 = vld [vmem:[%s3596_s18 + $0x18] sm:$0xff]   ;;  %v3407_v25 = vld [vmem:[%s4094_s2 + $0x1e8] sm:$0xff]   ;;  %v1871_v2 = vrot.slane %v1869_v0, 2  ;;  %s2447_s18 = sshll.u32 %s4100_s19, 2 }
  0x4f   : > { %3076 = vmatmul.mubr.bf16.gmra.mrb[4].mxu0 %v3773_v18  ;;  %2964 = vmatpush3.bf16.msra.mxu1 %v3383_v35  ;;  %v3393_v35 = vld [vmem:[%s4094_s2 + $0xb8] sm:$0xff]   ;;  %v1641_v21 = vrot.slane %v3943_v20, 2  ;;  %v1863_v59 = vshll.u32 %v3943_v20, 16  ;;  %s4067_s7 = scalar_lea.vmem %s4096_s4, %s2447_s18 }
  0x50   : > { %3092 = vmatpush3.bf16.msra.mxu0 %v3384_v51  ;;  %2965 = vmatprep.subr.bf16.mxu1 %v3385_v9  ;;  %v3394_v51 = vld [vmem:[%s4094_s2 + $0x1b8] sm:$0xff]  }
  0x51   : > { %3093 = vmatprep.subr.bf16.mxu0 %v3386_v15  ;;  %2951 = vmatprep.mubr.bf16.mxu1 %v3539_v28  ;;  %v804_v28 = vsel %vm795_vm3, %v801_v33, %v803_v11  ;;  %v3403_v33 = vld [vmem:[%s4094_s2 + $0xe0] sm:$0xff]   ;;  %v1865_v63 = vrot.slane %v1863_v59, 3 }
  0x52   : > { %3079 = vmatprep.mubr.bf16.mxu0 %v3790_v26 }
  0x53   : > { %2966 = vmatpush3.bf16.msra.mxu1 %v3385_v9  ;;  %v2067_v9 = vrot.slane %v3574_v54, 3 }
  0x54   : > { %3094 = vmatpush3.bf16.msra.mxu0 %v3386_v15  ;;  %2967 = vmatprep.subr.bf16.mxu1 %v3387_v27  ;;  %v3396_v15 = vld [vmem:[%s4094_s2 + $0x1c0] sm:$0xff]  }
  0x55   : > { %3095 = vmatprep.subr.bf16.mxu0 %v3388_v36 }
  0x56   : > { %2952 = vmatmul.mubr.bf16.gmra.mrb[8].mxu1 %v3560_v46  ;;  %v2079_v46 = vrot.slane %v3960_v24, 3 }
  0x57   : > { %3080 = vmatmul.mubr.bf16.gmra.mrb[8].mxu0 %v3813_v29  ;;  %2968 = vmatpush3.bf16.msra.mxu1 %v3387_v27  ;;  %v1639_v27 = vrot.slane %v3823_v41, 2 }
  0x58   : > { %3096 = vmatpush3.bf16.msra.mxu0 %v3388_v36  ;;  %2969 = vmatprep.subr.bf16.mxu1 %v3389_v31 }
  0x59   : > { %3097 = vmatprep.subr.bf16.mxu0 %v3390_v34  ;;  %2955 = vmatprep.mubr.bf16.mxu1 %v3574_v54  ;;  %v3899_v54 = vsel %vm2063_vm5, %v2065_v50, %v2067_v9  ;;  %v1640_v36 = vsel %vm1429_vm2, %v3805_v23, %v1639_v27  ;;  %v3409_v23 = vld [vmem:[%s4094_s2 + $0xf0] sm:$0xff]  }
  0x5a   : > { %3083 = vmatprep.mubr.bf16.mxu0 %v3838_v53 }
  0x5b   : > { %2970 = vmatpush3.bf16.msra.mxu1 %v3389_v31  ;;  %v1643_v31 = vrot.slane %v3960_v24, 2 }
  0x5c   : > { %3098 = vmatpush3.bf16.msra.mxu0 %v3390_v34  ;;  %2971 = vmatprep.subr.bf16.mxu1 %v3391_v57  ;;  %v3411_v34 = vld [vmem:[%s4094_s2 + $0x1f0] sm:$0xff]  }
  0x5d   : > { %3099 = vmatprep.subr.bf16.mxu0 %v3392_v62  ;;  %v1644_v38 = vsel %vm1429_vm2, %v1641_v21, %v1643_v31  ;;  %v4053_v31 = vld [vmem:[%s4095_s3] ss:$0 sm:$0xff] }
  0x5e   : > { %2956 = vmatmul.mubr.bf16.gmra.mrb[12].mxu1 %v3606_v7  ;;  %v3910_v7 = vsel %vm2063_vm5, %v2069_v16, %v2071_v6 }
  0x5f   : > { %3084 = vmatmul.mubr.bf16.gmra.mrb[12].mxu0 %v1446_v3  ;;  %2972 = vmatpush3.bf16.msra.mxu1 %v3391_v57  ;;  %v3414_v57 = vld [vmem:[%s4094_s2 + $0x200] sm:$0xff]   ;;  %v1874_v3 = vrot.slane %v1872_v39, 3 }
  0x60   : > { %3100 = vmatpush3.bf16.msra.mxu0 %v3392_v62  ;;  %2973 = vmatprep.subr.bf16.mxu1 %v3393_v35 }
  0x61   : > { %3101 = vmatprep.subr.bf16.mxu0 %v3394_v51  ;;  %2975 = vmatprep.mubr.bf16.mxu1 %v3703_v32  ;;  %v3907_v32 = vsel %vm2063_vm5, %v2067_v9, %v2069_v16 }
  0x62   : > { %3103 = vmatprep.mubr.bf16.mxu0 %v3755_v1  ;;  %v3397_v1 = vld [vmem:[%s4094_s2 + $0xc8] sm:$0xff]  }
  0x63   : > { %2974 = vmatpush3.bf16.msra.mxu1 %v3393_v35  ;;  %v3420_v35 = vld [vmem:[%s4094_s2 + $0x230] sm:$0xff]  }
  0x64   : > { %3102 = vmatpush3.bf16.msra.mxu0 %v3394_v51  ;;  %2991 = vmatprep.subr.bf16.mxu1 %v3395_v8  ;;  %v3422_v51 = vld [vmem:[%s3505_s21 + $0x20] sm:$0xff]  }
  0x65   : > { %3119 = vmatprep.subr.bf16.mxu0 %v3396_v15  ;;  %v2064_v6 = vrot.slane %v3422_v51, 3 }
  0x66   : > { %2976 = vmatmul.mubr.bf16.vlgmr.msra.gmra.mrb[0].mxu1 %v3711_v40  ;;  %v3401_v40 = vld [vmem:[%s4094_s2 + $0xd8] sm:$0xff]  }
  0x67   : > { %3104 = vmatmul.mubr.bf16.vlgmr.msra.gmra.mrb[0].mxu0 %v3773_v18  ;;  %2992 = vmatpush3.bf16.msra.mxu1 %v3395_v8  ;;  %v3402_v18 = vld [vmem:[%s4094_s2 + $0x1d8] sm:$0xff]  }
  0x68   : > { %3120 = vmatpush3.bf16.msra.mxu0 %v3396_v15  ;;  %2993 = vmatprep.subr.bf16.mxu1 %v3397_v1 }
  0x69   : > { %3121 = vmatprep.subr.bf16.mxu0 %v3398_v14  ;;  %2979 = vmatprep.mubr.bf16.mxu1 %v3717_v44 }
  0x6a   : > { %3107 = vmatprep.mubr.bf16.mxu0 %v3790_v26  ;;  %v806_v26 = vsel %vm795_vm3, %v803_v11, %v805_v45  ;;  %v3405_v45 = vld [vmem:[%s4094_s2 + $0x1e0] sm:$0xff]  }
  0x6b   : > { %2994 = vmatpush3.bf16.msra.mxu1 %v3397_v1 }
  0x6c   : > { %3122 = vmatpush3.bf16.msra.mxu0 %v3398_v14  ;;  %2995 = vmatprep.subr.bf16.mxu1 %v3399_v17 }
  0x6d   : > { %3123 = vmatprep.subr.bf16.mxu0 %v3400_v19 }
  0x6e   : > { %2980 = vmatmul.mubr.bf16.gmra.mrb[4].mxu1 %v804_v28 }
  0x6f   : > { %3108 = vmatmul.mubr.bf16.gmra.mrb[4].mxu0 %v3813_v29  ;;  %2996 = vmatpush3.bf16.msra.mxu1 %v3399_v17  ;;  %v1642_v29 = vsel %vm1429_vm2, %v1639_v27, %v1641_v21 }
  0x70   : > { %3124 = vmatpush3.bf16.msra.mxu0 %v3400_v19  ;;  %2997 = vmatprep.subr.bf16.mxu1 %v3401_v40 }
  0x71   : > { %3125 = vmatprep.subr.bf16.mxu0 %v3402_v18  ;;  %2983 = vmatprep.mubr.bf16.mxu1 %v806_v26 }
  0x72   : > { %3111 = vmatprep.mubr.bf16.mxu0 %v3838_v53  ;;  %v3412_v53 = vld [vmem:[%s4094_s2 + $0xf8] sm:$0xff]  }
  0x73   : > { %2998 = vmatpush3.bf16.msra.mxu1 %v3401_v40 }
  0x74   : > { %3126 = vmatpush3.bf16.msra.mxu0 %v3402_v18  ;;  %2999 = vmatprep.subr.bf16.mxu1 %v3403_v33 }
  0x75   : > { %3127 = vmatprep.subr.bf16.mxu0 %v3405_v45 }
  0x76   : > { %2984 = vmatmul.mubr.bf16.gmra.mrb[8].mxu1 %v3732_v55 }
  0x77   : > { %3112 = vmatmul.mubr.bf16.gmra.mrb[8].mxu0 %v1640_v36  ;;  %3000 = vmatpush3.bf16.msra.mxu1 %v3403_v33 }
  0x78   : > { %3128 = vmatpush3.bf16.msra.mxu0 %v3405_v45  ;;  %3001 = vmatprep.subr.bf16.mxu1 %v3406_v22 }
  0x79   : > { %3129 = vmatprep.subr.bf16.mxu0 %v3407_v25  ;;  %2987 = vmatprep.mubr.bf16.mxu1 %v3741_v58 }
  0x7a   : > { %3115 = vmatprep.mubr.bf16.mxu0 %v1642_v29 }
  0x7b   : > { %3002 = vmatpush3.bf16.msra.mxu1 %v3406_v22 }
  0x7c   : > { %3130 = vmatpush3.bf16.msra.mxu0 %v3407_v25  ;;  %3003 = vmatprep.subr.bf16.mxu1 %v3409_v23 }
  0x7d   : > { %3131 = vmatprep.subr.bf16.mxu0 %v3411_v34 }
  0x7e   : > { %2988 = vmatmul.mubr.bf16.gmra.mrb[12].mxu1 %v3749_v42  ;;  %v3415_v42 = vld [vmem:[%s4094_s2 + $0x208] sm:$0xff]  }
  0x7f   : > { %3116 = vmatmul.mubr.bf16.gmra.mrb[12].mxu0 %v1644_v38  ;;  %3004 = vmatpush3.bf16.msra.mxu1 %v3409_v23 }
  0x80   : > { %3132 = vmatpush3.bf16.msra.mxu0 %v3411_v34  ;;  %3005 = vmatprep.subr.bf16.mxu1 %v3412_v53 }
  0x81   : > { %3133 = vmatprep.subr.bf16.mxu0 %v3413_v56  ;;  %3007 = vmatprep.mubr.bf16.mxu1 %v3717_v44  ;;  %v3416_v44 = vld [vmem:[%s4094_s2 + $0x210] sm:$0xff]  }
  0x82   : > { %3135 = vmatprep.mubr.bf16.mxu0 %v3827_v47  ;;  %v1860_v47 = vshrl.u32 %v3943_v20, 16 }
  0x83   : > { %3006 = vmatpush3.bf16.msra.mxu1 %v3412_v53 }
  0x84   : > { %3134 = vmatpush3.bf16.msra.mxu0 %v3413_v56  ;;  %3183 = vmatprep.subr.bf16.mxu1 %v3414_v57  ;;  %v1862_v62 = vrot.slane %v1860_v47, 2 }
  0x85   : > { %3151 = vmatprep.subr.bf16.mxu0 %v3414_v57 }
  0x86   : > { %3008 = vmatmul.mubr.bf16.vlgmr.msra.gmra.mrb[0].mxu1 %v804_v28 }
  0x87   : > { %3136 = vmatmul.mubr.bf16.vlgmr.msra.gmra.mrb[0].mxu0 %v3830_v48  ;;  %3191 = vmatpush3.bf16.msra.mxu1 %v3414_v57  ;;  %v3417_v48 = vld [vmem:[%s4094_s2 + $0x218] sm:$0xff]  }
  0x88   : > { %3152 = vmatpush3.bf16.msra.mxu0 %v3414_v57  ;;  %3184 = vmatprep.subr.bf16.mxu1 %v3415_v42 }
  0x89   : > { %3153 = vmatprep.subr.bf16.mxu0 %v3415_v42  ;;  %3011 = vmatprep.mubr.bf16.mxu1 %v806_v26 }
  0x8a   : > { %3139 = vmatprep.mubr.bf16.mxu0 %v3833_v52  ;;  %v3418_v52 = vld [vmem:[%s4094_s2 + $0x220] sm:$0xff]  }
  0x8b   : > { %3192 = vmatpush3.bf16.msra.mxu1 %v3415_v42 }
  0x8c   : > { %3154 = vmatpush3.bf16.msra.mxu0 %v3415_v42  ;;  %3185 = vmatprep.subr.bf16.mxu1 %v3416_v44 }
  0x8d   : > { %3155 = vmatprep.subr.bf16.mxu0 %v3416_v44 }
  0x8e   : > { %3012 = vmatmul.mubr.bf16.gmra.mrb[4].mxu1 %v3732_v55  ;;  %v1866_v55 = vor.u32 %v1865_v63, %v1862_v62 }
  0x8f   : > { %3140 = vmatmul.mubr.bf16.gmra.mrb[4].mxu0 %v3841_v43  ;;  %3193 = vmatpush3.bf16.msra.mxu1 %v3416_v44  ;;  %v3419_v43 = vld [vmem:[%s4094_s2 + $0x228] sm:$0xff]  }
  0x90   : > { %3156 = vmatpush3.bf16.msra.mxu0 %v3416_v44  ;;  %3186 = vmatprep.subr.bf16.mxu1 %v3417_v48 }
  0x91   : > { %3157 = vmatprep.subr.bf16.mxu0 %v3417_v48  ;;  %3015 = vmatprep.mubr.bf16.mxu1 %v3741_v58  ;;  %v1867_v58 = vsel %vm1826_vm4, %v3863_v13, %v1866_v55  ;;  %v3421_v13 = vld [vmem:[%s4094_s2 + $0x238] sm:$0xff]  }
  0x92   : > { %3143 = vmatprep.mubr.bf16.mxu0 %v3844_v12  ;;  %v1875_v12 = vor.u32 %v1874_v3, %v1871_v2 }
  0x93   : > { %3194 = vmatpush3.bf16.msra.mxu1 %v3417_v48 }
  0x94   : > { %3158 = vmatpush3.bf16.msra.mxu0 %v3417_v48  ;;  %3187 = vmatprep.subr.bf16.mxu1 %v3418_v52 }
  0x95   : > { %3159 = vmatprep.subr.bf16.mxu0 %v3418_v52 }
  0x96   : > { %3016 = vmatmul.mubr.bf16.gmra.mrb[8].mxu1 %v3810_v37  ;;  %v1876_v37 = vsel %vm1826_vm4, %v1866_v55, %v1875_v12 }
  0x97   : > { %3144 = vmatmul.mubr.bf16.gmra.mrb[8].mxu0 %v3877_v5  ;;  %3195 = vmatpush3.bf16.msra.mxu1 %v3418_v52  ;;  %v2066_v5 = vsel %vm2063_vm5, %v2064_v6, %v2065_v50 }
  0x98   : > { %3160 = vmatpush3.bf16.msra.mxu0 %v3418_v52  ;;  %3188 = vmatprep.subr.bf16.mxu1 %v3419_v43 }
  0x99   : > { %3161 = vmatprep.subr.bf16.mxu0 %v3419_v43  ;;  %3019 = vmatprep.mubr.bf16.mxu1 %v3869_v4  ;;  %v2077_v4 = vrot.slane %v3943_v20, 3 }
  0x9a   : > { %3147 = vmatprep.mubr.bf16.mxu0 %v1867_v58 }
  0x9b   : > { %3196 = vmatpush3.bf16.msra.mxu1 %v3419_v43  ;;  %v2080_v50 = vsel %vm2063_vm5, %v2077_v4, %v2079_v46 }
  0x9c   : > { %3162 = vmatpush3.bf16.msra.mxu0 %v3419_v43  ;;  %3189 = vmatprep.subr.bf16.mxu1 %v3420_v35 }
  0x9d   : > { %3163 = vmatprep.subr.bf16.mxu0 %v3420_v35 }
  0x9e   : > { %3020 = vmatmul.mubr.bf16.gmra.mrb[12].mxu1 %v3872_v49  ;;  %v2078_v49 = vsel %vm2063_vm5, %v2075_v60, %v2077_v4 }
  0x9f   : > { %3148 = vmatmul.mubr.bf16.gmra.mrb[12].mxu0 %v1876_v37  ;;  %3197 = vmatpush3.bf16.msra.mxu1 %v3420_v35 }
  0xa0   : > { %3164 = vmatpush3.bf16.msra.mxu0 %v3420_v35  ;;  %3190 = vmatprep.subr.bf16.mxu1 %v3421_v13 }
  0xa1   : > { %3165 = vmatprep.subr.bf16.mxu0 %v3421_v13  ;;  %3167 = vmatprep.mubr.bf16.mxu0 %v2066_v5 }
  0xa2   : > { %3175 = vmatprep.mubr.bf16.mxu1 %v3894_v10 }
  0xa3   : > { %3198 = vmatpush3.bf16.msra.mxu1 %v3421_v13 }
  0xa4   : > { %3166 = vmatpush3.bf16.msra.mxu0 %v3421_v13 }
  0xa6   : > { %3176 = vmatmul.mubr.bf16.vlgmr.msra.gmra.mrb[16].mxu1 %v3904_v30 }
  0xa7   : > { %3168 = vmatmul.mubr.bf16.vlgmr.msra.gmra.mrb[0].mxu0 %v3899_v54  ;;  %3179 = vmatprep.mubr.bf16.mxu1 %v2078_v49 }
  0xa8   : > { %3171 = vmatprep.mubr.bf16.mxu0 %v3907_v32 }
  0xae   : > { %3180 = vmatmul.mubr.bf16.gmra.mrb[20].mxu1 %v2080_v50 }
  0xaf   : > { %3172 = vmatmul.mubr.bf16.gmra.mrb[4].mxu0 %v3910_v7 }
 0x159   : > { %v3009_v8 = vpop.f32.mrb[0].mxu1 }
 0x15a   : > { %v1096_v61 = vpop.f32.mrb[1].mxu1 }
 0x15b   : > { %v3010_v9 = vpop.f32.mrb[2].mxu1 }
 0x15c   : > { %v1099_v41 = vpop.f32.mrb[3].mxu1 }
 0x161   : > { %v4041_v15 = vpop.f32.mrb[4].mxu1 }
 0x162   : > { %v4043_v60 = vpop.f32.mrb[5].mxu1 }
 0x163   : > { %v4045_v16 = vpop.f32.mrb[6].mxu1 }
 0x164   : > { %v4047_v10 = vpop.f32.mrb[7].mxu1 }
 0x169   : > { %v3017_v54 = vpop.f32.mrb[8].mxu1 }
 0x16a   : > { %v3145_v30 = vpop.f32.mrb[8].mxu0  ;;  %v1128_v32 = vpop.f32.mrb[9].mxu1 }
 0x16b   : > { %v3207_v1 = vadd.f32 %v3145_v30, %v3017_v54  ;;  %v1999_v14 = vpop.f32.mrb[9].mxu0  ;;  %v3018_v11 = vpop.f32.mrb[10].mxu1 }
 0x16c   : > { %v3209_v17 = vadd.f32 %v1999_v14, %v1128_v32  ;;  %v3146_v7 = vpop.f32.mrb[10].mxu0  ;;  %v1131_v19 = vpop.f32.mrb[11].mxu1 }
 0x16d   : > { %v3211_v28 = vadd.f32 %v3146_v7, %v3018_v11  ;;  %v2002_v40 = vpop.f32.mrb[11].mxu0 }
 0x16e   : > { %v3213_v18 = vadd.f32 %v2002_v40, %v1131_v19 }
 0x171   : > { %v3021_v26 = vpop.f32.mrb[12].mxu1 }
 0x172   : > { %v3149_v20 = vpop.f32.mrb[12].mxu0  ;;  %v1144_v33 = vpop.f32.mrb[13].mxu1 }
 0x173   : > { %v3215_v27 = vadd.f32 %v3149_v20, %v3021_v26  ;;  %v2015_v45 = vpop.f32.mrb[13].mxu0  ;;  %v3022_v21 = vpop.f32.mrb[14].mxu1 }
 0x174   : > { %v3217_v36 = vadd.f32 %v2015_v45, %v1144_v33  ;;  %v3150_v22 = vpop.f32.mrb[14].mxu0  ;;  %v1147_v24 = vpop.f32.mrb[15].mxu1 }
 0x175   : > { %v3219_v25 = vadd.f32 %v3150_v22, %v3022_v21  ;;  %v2018_v29 = vpop.f32.mrb[15].mxu0 }
 0x176   : > { %v3221_v23 = vadd.f32 %v2018_v29, %v1147_v24 }
 0x179   : > { %v3177_v34 = vpop.f32.mrb[16].mxu1 }
 0x17a   : > { %v3169_v38 = vpop.f32.mrb[0].mxu0  ;;  %v3208_v53 = vadd.f32 %v3207_v1, %v3177_v34  ;;  %v2203_v56 = vpop.f32.mrb[17].mxu1 }
 0x17b   : > { %v3199_v57 = vadd.f32 %v3169_v38, %v3009_v8  ;;  %v2171_v42 = vpop.f32.mrb[1].mxu0  ;;  %v3210_v44 = vadd.f32 %v3209_v17, %v2203_v56  ;;  %v3178_v47 = vpop.f32.mrb[18].mxu1 }
 0x17c   : > { %v2267_v59 = vadd.f32 %v3208_v53, %v4053_v31  ;;  %v3200_v48 = vadd.f32 %v2171_v42, %v1096_v61  ;;  %v3170_v62 = vpop.f32.mrb[2].mxu0  ;;  %v3212_v63 = vadd.f32 %v3211_v28, %v3178_v47  ;;  %v2206_v52 = vpop.f32.mrb[19].mxu1 }
 0x17d   : > { %v2259_v0 = vadd.f32 %v3199_v57, %v4053_v31  ;;  %v2265_v39 = vadd.f32 %v3210_v44, %v4053_v31  ;;  %v3201_v55 = vadd.f32 %v3170_v62, %v3010_v9  ;;  %v2174_v43 = vpop.f32.mrb[3].mxu0  ;;  %v3214_v2 = vadd.f32 %v3213_v18, %v2206_v52 }
 0x17e   : > { %v2257_v3 = vadd.f32 %v3200_v48, %v4053_v31  ;;  %v2268_v58 = vadd.f32 %v3212_v63, %v4053_v31  ;;  %v3202_v12 = vadd.f32 %v2174_v43, %v1099_v41  ;;  %v2283_v6 = vmax.f32 %v2267_v59, 0.0 }
 0x17f   : > { %v2260_v35 = vadd.f32 %v3201_v55, %v4053_v31  ;;  %v2266_v51 = vadd.f32 %v3214_v2, %v4053_v31  ;;  %v2275_v5 = vmax.f32 %v2259_v0, 0.0  ;;  %v2281_v4 = vmax.f32 %v2265_v39, 0.0 }
 0x180   : > { %v2284_v37 = vmax.f32 %v2268_v58, 0.0  ;;  %v2258_v13 = vadd.f32 %v3202_v12, %v4053_v31  ;;  %v2273_v8 = vmax.f32 %v2257_v3, 0.0 }
 0x181   : > { %v2276_v49 = vmax.f32 %v2260_v35, 0.0  ;;  %v2282_v46 = vmax.f32 %v2266_v51, 0.0  ;;  %v3181_v50 = vpop.f32.mrb[20].mxu1 }
 0x182   : > { %v2732_v61 = vpack.c.bf16 %v2284_v37, %v2283_v6  ;;  %v2274_v9 = vmax.f32 %v2258_v13, 0.0  ;;  %v3173_v41 = vpop.f32.mrb[4].mxu0  ;;  %v3216_v54 = vadd.f32 %v3215_v27, %v3181_v50  ;;  %v2219_v30 = vpop.f32.mrb[21].mxu1 }
 0x183   : > { %v2712_v32 = vpack.c.bf16 %v2276_v49, %v2275_v5  ;;  %v2727_v1 = vpack.c.bf16 %v2282_v46, %v2281_v4  ;;  %v3203_v14 = vadd.f32 %v3173_v41, %v4041_v15  ;;  %v2187_v11 = vpop.f32.mrb[5].mxu0  ;;  %v3218_v17 = vadd.f32 %v3217_v36, %v2219_v30  ;;  %v3182_v7 = vpop.f32.mrb[22].mxu1 }
 0x184   : > { %2748 = vst [vmem:[%s4067_s7 + $0x28] sm:$0xff] %v2732_v61   ;;  %v2707_v19 = vpack.c.bf16 %v2274_v9, %v2273_v8  ;;  %v2271_v28 = vadd.f32 %v3216_v54, %v4053_v31  ;;  %v3204_v40 = vadd.f32 %v2187_v11, %v4043_v60  ;;  %v3174_v18 = vpop.f32.mrb[6].mxu0  ;;  %v3220_v26 = vadd.f32 %v3219_v25, %v3182_v7  ;;  %v2222_v20 = vpop.f32.mrb[23].mxu1 }
 0x185   : > { %2744 = vst [vmem:[%s4067_s7 + $0x8] sm:$0xff] %v2712_v32   ;;  %2747 = vst [vmem:[%s4067_s7 + $0x20] sm:$0xff] %v2727_v1   ;;  %v2263_v33 = vadd.f32 %v3203_v14, %v4053_v31  ;;  %v2269_v27 = vadd.f32 %v3218_v17, %v4053_v31  ;;  %v3205_v15 = vadd.f32 %v3174_v18, %v4045_v16  ;;  %v2190_v45 = vpop.f32.mrb[7].mxu0 }
 0x186   : > { %v3222_v21 = vadd.f32 %v3221_v23, %v2222_v20  ;;  %2708 = vst [vmem:[%s4067_s7] sm:$0xff] %v2707_v19   ;;  %v2261_v36 = vadd.f32 %v3204_v40, %v4053_v31  ;;  %v2272_v22 = vadd.f32 %v3220_v26, %v4053_v31  ;;  %v3206_v60 = vadd.f32 %v2190_v45, %v4047_v10 }
 0x187   : > { %v2264_v24 = vadd.f32 %v3205_v15, %v4053_v31  ;;  %v2287_v29 = vmax.f32 %v2271_v28, 0.0  ;;  %v2279_v23 = vmax.f32 %v2263_v33, 0.0  ;;  %v2285_v38 = vmax.f32 %v2269_v27, 0.0 }
 0x188   : > { %v2270_v25 = vadd.f32 %v3222_v21, %v4053_v31  ;;  %v2288_v34 = vmax.f32 %v2272_v22, 0.0  ;;  %v2262_v16 = vadd.f32 %v3206_v60, %v4053_v31  ;;  %v2277_v57 = vmax.f32 %v2261_v36, 0.0 }
 0x189   : > { %v2280_v53 = vmax.f32 %v2264_v24, 0.0 }
 0x18a   : > { %v2286_v56 = vmax.f32 %v2270_v25, 0.0  ;;  %v2742_v42 = vpack.c.bf16 %v2288_v34, %v2287_v29  ;;  %v2278_v44 = vmax.f32 %v2262_v16, 0.0 }
 0x18b   : > { %v2722_v47 = vpack.c.bf16 %v2280_v53, %v2279_v23 }
 0x18c   : > { %v2737_v10 = vpack.c.bf16 %v2286_v56, %v2285_v38  ;;  %2750 = vst [vmem:[%s4067_s7 + $0x38] sm:$0xff] %v2742_v42   ;;  %v2717_v59 = vpack.c.bf16 %v2278_v44, %v2277_v57 }
 0x18d   : > { %2746 = vst [vmem:[%s4067_s7 + $0x18] sm:$0xff] %v2722_v47  }
 0x18e   : > { %2749 = vst [vmem:[%s4067_s7 + $0x30] sm:$0xff] %v2737_v10   ;;  %2745 = vst [vmem:[%s4067_s7 + $0x10] sm:$0xff] %v2717_v59  }
 0x18f PF: > { %s14_s15 = sadd.s32 1, %s3429_s15  }
 0x190   : > { %p11_p6 = scmp.ge.s32.totalorder %s14_s15, 21  }
 0x192   :  { %13 = sbr.rel (!%p11_p6) target bundleno = 1 (0x1), region = 77 }

// kernel: unet_forward.33
= control target key start
LH: loop header
LB: loop body
LE: loop exit
PB: predicated region body
PF: predicated region fallthrough
CT: control target
= control target key end

     0   :  { %s1206_s0 = inlined_call_operand.vmem [shape: bf16[32,8192], index: 0, kind: input, shape index: {}]   ;;  %s1207_s1 = inlined_call_operand.vmem [shape: bf16[32,2048], index: 1, kind: output, shape index: {}]  }
   0x1   :  { %v8_v0 = vld [vmem:[%s1206_s0] sm:$0xff]  ;;  %v9_v1 = vld [vmem:[%s1206_s0 + $0x8] sm:$0xff]  ;;  %v10_v5 = vld [vmem:[%s1206_s0 + $0x10] sm:$0xff] }
   0x2   :  { %v24_v2 = vld [vmem:[%s1206_s0 + $0x80] sm:$0xff]  ;;  %v25_v3 = vld [vmem:[%s1206_s0 + $0x88] sm:$0xff]  ;;  %v11_v6 = vld [vmem:[%s1206_s0 + $0x18] sm:$0xff] }
   0x3   :  { %v136_v4 = vmax.bf16 %v24_v2, %v8_v0  ;;  %v137_v7 = vmax.bf16 %v25_v3, %v9_v1  ;;  %v26_v8 = vld [vmem:[%s1206_s0 + $0x90] sm:$0xff]  ;;  %v27_v9 = vld [vmem:[%s1206_s0 + $0x98] sm:$0xff]  ;;  %v12_v10 = vld [vmem:[%s1206_s0 + $0x20] sm:$0xff] }
   0x4   :  { %v138_v12 = vmax.bf16 %v26_v8, %v10_v5  ;;  %v139_v13 = vmax.bf16 %v27_v9, %v11_v6  ;;  %v13_v14 = vld [vmem:[%s1206_s0 + $0x28] sm:$0xff]  ;;  %v28_v15 = vld [vmem:[%s1206_s0 + $0xa0] sm:$0xff]  ;;  %v14_v20 = vld [vmem:[%s1206_s0 + $0x30] sm:$0xff] }
   0x5   :  { %v204_v11 = vrot.slane %v136_v4, 4  ;;  %v29_v16 = vld [vmem:[%s1206_s0 + $0xa8] sm:$0xff]  ;;  %v220_v17 = vrot.slane %v137_v7, 4  ;;  %v140_v18 = vmax.bf16 %v28_v15, %v12_v10  ;;  %v15_v21 = vld [vmem:[%s1206_s0 + $0x38] sm:$0xff]  ;;  %v30_v22 = vld [vmem:[%s1206_s0 + $0xb0] sm:$0xff] }
   0x6   :  { %v141_v19 = vmax.bf16 %v29_v16, %v13_v14  ;;  %v236_v24 = vrot.slane %v138_v12, 4  ;;  %v252_v25 = vrot.slane %v139_v13, 4  ;;  %v31_v26 = vld [vmem:[%s1206_s0 + $0xb8] sm:$0xff]  ;;  %v142_v27 = vmax.bf16 %v30_v22, %v14_v20  ;;  %v16_v28 = vld [vmem:[%s1206_s0 + $0x40] sm:$0xff]  ;;  %v17_v29 = vld [vmem:[%s1206_s0 + $0x48] sm:$0xff] }
   0x7   :  { %v212_v23 = vmax.bf16 %v204_v11, %v136_v4  ;;  %v228_v30 = vmax.bf16 %v220_v17, %v137_v7  ;;  %v268_v31 = vrot.slane %v140_v18, 4  ;;  %v143_v33 = vmax.bf16 %v31_v26, %v15_v21  ;;  %v32_v34 = vld [vmem:[%s1206_s0 + $0xc0] sm:$0xff]  ;;  %v33_v35 = vld [vmem:[%s1206_s0 + $0xc8] sm:$0xff]  ;;  %v18_v36 = vld [vmem:[%s1206_s0 + $0x50] sm:$0xff] }
   0x8   :  { %v284_v32 = vrot.slane %v141_v19, 4  ;;  %v244_v37 = vmax.bf16 %v236_v24, %v138_v12  ;;  %v260_v38 = vmax.bf16 %v252_v25, %v139_v13  ;;  %v300_v39 = vrot.slane %v142_v27, 4  ;;  %v19_v41 = vld [vmem:[%s1206_s0 + $0x58] sm:$0xff]  ;;  %v34_v42 = vld [vmem:[%s1206_s0 + $0xd0] sm:$0xff]  ;;  %v20_v48 = vld [vmem:[%s1206_s0 + $0x60] sm:$0xff] }
   0x9   :  { %v144_v40 = vmax.bf16 %v32_v34, %v16_v28  ;;  %v35_v43 = vld [vmem:[%s1206_s0 + $0xd8] sm:$0xff]  ;;  %v684_v44 = vcombine.low %v212_v23, %v228_v30  ;;  %v276_v45 = vmax.bf16 %v268_v31, %v140_v18  ;;  %v316_v47 = vrot.slane %v143_v33, 4  ;;  %v21_v49 = vld [vmem:[%s1206_s0 + $0x68] sm:$0xff]  ;;  %v36_v50 = vld [vmem:[%s1206_s0 + $0xe0] sm:$0xff] }
   0xa   :  { %v292_v46 = vmax.bf16 %v284_v32, %v141_v19  ;;  %v685_v51 = vcombine.low %v244_v37, %v260_v38  ;;  %v308_v52 = vmax.bf16 %v300_v39, %v142_v27  ;;  %v145_v53 = vmax.bf16 %v33_v35, %v17_v29  ;;  %v37_v55 = vld [vmem:[%s1206_s0 + $0xe8] sm:$0xff]  ;;  %v22_v56 = vld [vmem:[%s1206_s0 + $0x70] sm:$0xff]  ;;  %v23_v61 = vld [vmem:[%s1206_s0 + $0x78] sm:$0xff] }
   0xb   :  { %v332_v54 = vrot.slane %v144_v40, 4  ;;  %648 = vst [vmem:[%s1207_s1] sm:$0xff] %v684_v44  ;;  %v324_v58 = vmax.bf16 %v316_v47, %v143_v33  ;;  %v146_v59 = vmax.bf16 %v34_v42, %v18_v36  ;;  %v147_v60 = vmax.bf16 %v35_v43, %v19_v41  ;;  %v38_v62 = vld [vmem:[%s1206_s0 + $0xf0] sm:$0xff]  ;;  %v39_v63 = vld [vmem:[%s1206_s0 + $0xf8] sm:$0xff]  ;;  %v40_v4 = vld [vmem:[%s1206_s0 + $0x100] sm:$0xff] }
   0xc   :  { %v686_v57 = vcombine.low %v276_v45, %v292_v46  ;;  %649 = vst [vmem:[%s1207_s1 + $0x8] sm:$0xff] %v685_v51  ;;  %v348_v1 = vrot.slane %v145_v53, 4  ;;  %v148_v2 = vmax.bf16 %v36_v50, %v20_v48  ;;  %v149_v3 = vmax.bf16 %v37_v55, %v21_v49  ;;  %v56_v5 = vld [vmem:[%s1206_s0 + $0x180] sm:$0xff]  ;;  %v41_v10 = vld [vmem:[%s1206_s0 + $0x108] sm:$0xff]  ;;  %v42_v16 = vld [vmem:[%s1206_s0 + $0x110] sm:$0xff] }
   0xd   :  { %v340_v0 = vmax.bf16 %v332_v54, %v144_v40  ;;  %v687_v6 = vcombine.low %v308_v52, %v324_v58  ;;  %v364_v7 = vrot.slane %v146_v59, 4  ;;  %v380_v8 = vrot.slane %v147_v60, 4  ;;  %v57_v15 = vld [vmem:[%s1206_s0 + $0x188] sm:$0xff]  ;;  %v43_v17 = vld [vmem:[%s1206_s0 + $0x118] sm:$0xff]  ;;  %v58_v22 = vld [vmem:[%s1206_s0 + $0x190] sm:$0xff] }
   0xe   :  { %650 = vst [vmem:[%s1207_s1 + $0x10] sm:$0xff] %v686_v57  ;;  %v150_v9 = vmax.bf16 %v38_v62, %v22_v56  ;;  %v356_v11 = vmax.bf16 %v348_v1, %v145_v53  ;;  %v396_v12 = vrot.slane %v148_v2, 4  ;;  %v412_v13 = vrot.slane %v149_v3, 4  ;;  %v59_v23 = vld [vmem:[%s1206_s0 + $0x198] sm:$0xff]  ;;  %v44_v24 = vld [vmem:[%s1206_s0 + $0x120] sm:$0xff]  ;;  %v45_v29 = vld [vmem:[%s1206_s0 + $0x128] sm:$0xff] }
   0xf   :  { %v151_v14 = vmax.bf16 %v39_v63, %v23_v61  ;;  %651 = vst [vmem:[%s1207_s1 + $0x18] sm:$0xff] %v687_v6  ;;  %v372_v18 = vmax.bf16 %v364_v7, %v146_v59  ;;  %v388_v19 = vmax.bf16 %v380_v8, %v147_v60  ;;  %v152_v21 = vmax.bf16 %v56_v5, %v40_v4  ;;  %v60_v30 = vld [vmem:[%s1206_s0 + $0x1a0] sm:$0xff]  ;;  %v61_v31 = vld [vmem:[%s1206_s0 + $0x1a8] sm:$0xff]  ;;  %v46_v36 = vld [vmem:[%s1206_s0 + $0x130] sm:$0xff] }
  0x10   :  { %v428_v20 = vrot.slane %v150_v9, 4  ;;  %v688_v25 = vcombine.low %v340_v0, %v356_v11  ;;  %v404_v26 = vmax.bf16 %v396_v12, %v148_v2  ;;  %v420_v27 = vmax.bf16 %v412_v13, %v149_v3  ;;  %v62_v37 = vld [vmem:[%s1206_s0 + $0x1b0] sm:$0xff]  ;;  %v47_v42 = vld [vmem:[%s1206_s0 + $0x138] sm:$0xff]  ;;  %v48_v48 = vld [vmem:[%s1206_s0 + $0x140] sm:$0xff] }
  0x11   :  { %v444_v28 = vrot.slane %v151_v14, 4  ;;  %v689_v32 = vcombine.low %v372_v18, %v388_v19  ;;  %v153_v34 = vmax.bf16 %v57_v15, %v41_v10  ;;  %v205_v35 = vrot.slane %v152_v21, 4  ;;  %v63_v43 = vld [vmem:[%s1206_s0 + $0x1b8] sm:$0xff]  ;;  %v64_v49 = vld [vmem:[%s1206_s0 + $0x1c0] sm:$0xff]  ;;  %v49_v54 = vld [vmem:[%s1206_s0 + $0x148] sm:$0xff] }
  0x12   :  { %v436_v33 = vmax.bf16 %v428_v20, %v150_v9  ;;  %652 = vst [vmem:[%s1207_s1 + $0x20] sm:$0xff] %v688_v25  ;;  %v690_v38 = vcombine.low %v404_v26, %v420_v27  ;;  %v154_v40 = vmax.bf16 %v58_v22, %v42_v16  ;;  %v155_v41 = vmax.bf16 %v59_v23, %v43_v17  ;;  %v65_v59 = vld [vmem:[%s1206_s0 + $0x1c8] sm:$0xff]  ;;  %v50_v60 = vld [vmem:[%s1206_s0 + $0x150] sm:$0xff]  ;;  %v51_v61 = vld [vmem:[%s1206_s0 + $0x158] sm:$0xff] }
  0x13   :  { %v452_v39 = vmax.bf16 %v444_v28, %v151_v14  ;;  %653 = vst [vmem:[%s1207_s1 + $0x28] sm:$0xff] %v689_v32  ;;  %v213_v44 = vmax.bf16 %v205_v35, %v152_v21  ;;  %v221_v45 = vrot.slane %v153_v34, 4  ;;  %v156_v46 = vmax.bf16 %v60_v30, %v44_v24  ;;  %v66_v2 = vld [vmem:[%s1206_s0 + $0x1d0] sm:$0xff]  ;;  %v67_v3 = vld [vmem:[%s1206_s0 + $0x1d8] sm:$0xff]  ;;  %v52_v4 = vld [vmem:[%s1206_s0 + $0x160] sm:$0xff] }
  0x14   :  { %v157_v47 = vmax.bf16 %v61_v31, %v45_v29  ;;  %654 = vst [vmem:[%s1207_s1 + $0x30] sm:$0xff] %v690_v38  ;;  %v237_v51 = vrot.slane %v154_v40, 4  ;;  %v253_v52 = vrot.slane %v155_v41, 4  ;;  %v158_v53 = vmax.bf16 %v62_v37, %v46_v36  ;;  %v53_v9 = vld [vmem:[%s1206_s0 + $0x168] sm:$0xff]  ;;  %v68_v10 = vld [vmem:[%s1206_s0 + $0x1e0] sm:$0xff]  ;;  %v54_v16 = vld [vmem:[%s1206_s0 + $0x170] sm:$0xff] }
  0x15   :  { %v691_v50 = vcombine.low %v436_v33, %v452_v39  ;;  %v229_v55 = vmax.bf16 %v221_v45, %v153_v34  ;;  %v269_v56 = vrot.slane %v156_v46, 4  ;;  %v159_v58 = vmax.bf16 %v63_v43, %v47_v42  ;;  %v69_v11 = vld [vmem:[%s1206_s0 + $0x1e8] sm:$0xff]  ;;  %v70_v17 = vld [vmem:[%s1206_s0 + $0x1f0] sm:$0xff]  ;;  %v55_v22 = vld [vmem:[%s1206_s0 + $0x178] sm:$0xff] }
  0x16   :  { %v285_v57 = vrot.slane %v157_v47, 4  ;;  %v245_v62 = vmax.bf16 %v237_v51, %v154_v40  ;;  %v261_v63 = vmax.bf16 %v253_v52, %v155_v41  ;;  %v301_v0 = vrot.slane %v158_v53, 4  ;;  %v71_v23 = vld [vmem:[%s1206_s0 + $0x1f8] sm:$0xff]  ;;  %v72_v28 = vld [vmem:[%s1206_s0 + $0x200] sm:$0xff]  ;;  %v73_v34 = vld [vmem:[%s1206_s0 + $0x208] sm:$0xff] }
  0x17   :  { %655 = vst [vmem:[%s1207_s1 + $0x38] sm:$0xff] %v691_v50  ;;  %v160_v1 = vmax.bf16 %v64_v49, %v48_v48  ;;  %v692_v5 = vcombine.low %v213_v44, %v229_v55  ;;  %v277_v6 = vmax.bf16 %v269_v56, %v156_v46  ;;  %v317_v8 = vrot.slane %v159_v58, 4  ;;  %v88_v29 = vld [vmem:[%s1206_s0 + $0x280] sm:$0xff]  ;;  %v89_v39 = vld [vmem:[%s1206_s0 + $0x288] sm:$0xff]  ;;  %v74_v40 = vld [vmem:[%s1206_s0 + $0x210] sm:$0xff] }
  0x18   :  { %v293_v7 = vmax.bf16 %v285_v57, %v157_v47  ;;  %v693_v12 = vcombine.low %v245_v62, %v261_v63  ;;  %v309_v13 = vmax.bf16 %v301_v0, %v158_v53  ;;  %v161_v14 = vmax.bf16 %v65_v59, %v49_v54  ;;  %v75_v41 = vld [vmem:[%s1206_s0 + $0x218] sm:$0xff]  ;;  %v90_v46 = vld [vmem:[%s1206_s0 + $0x290] sm:$0xff]  ;;  %v76_v48 = vld [vmem:[%s1206_s0 + $0x220] sm:$0xff] }
  0x19   :  { %v333_v15 = vrot.slane %v160_v1, 4  ;;  %656 = vst [vmem:[%s1207_s1 + $0x40] sm:$0xff] %v692_v5  ;;  %v325_v19 = vmax.bf16 %v317_v8, %v159_v58  ;;  %v162_v20 = vmax.bf16 %v66_v2, %v50_v60  ;;  %v163_v21 = vmax.bf16 %v67_v3, %v51_v61  ;;  %v91_v47 = vld [vmem:[%s1206_s0 + $0x298] sm:$0xff]  ;;  %v77_v53 = vld [vmem:[%s1206_s0 + $0x228] sm:$0xff]  ;;  %v92_v54 = vld [vmem:[%s1206_s0 + $0x2a0] sm:$0xff] }
  0x1a   :  { %v694_v18 = vcombine.low %v277_v6, %v293_v7  ;;  %657 = vst [vmem:[%s1207_s1 + $0x48] sm:$0xff] %v693_v12  ;;  %v349_v25 = vrot.slane %v161_v14, 4  ;;  %v164_v26 = vmax.bf16 %v68_v10, %v52_v4  ;;  %v165_v27 = vmax.bf16 %v69_v11, %v53_v9  ;;  %v93_v55 = vld [vmem:[%s1206_s0 + $0x2a8] sm:$0xff]  ;;  %v78_v60 = vld [vmem:[%s1206_s0 + $0x230] sm:$0xff]  ;;  %v79_v2 = vld [vmem:[%s1206_s0 + $0x238] sm:$0xff] }
  0x1b   :  { %v341_v24 = vmax.bf16 %v333_v15, %v160_v1  ;;  %v695_v30 = vcombine.low %v309_v13, %v325_v19  ;;  %v365_v31 = vrot.slane %v162_v20, 4  ;;  %v381_v32 = vrot.slane %v163_v21, 4  ;;  %v94_v61 = vld [vmem:[%s1206_s0 + $0x2b0] sm:$0xff]  ;;  %v95_v3 = vld [vmem:[%s1206_s0 + $0x2b8] sm:$0xff]  ;;  %v80_v8 = vld [vmem:[%s1206_s0 + $0x240] sm:$0xff] }
  0x1c   :  { %658 = vst [vmem:[%s1207_s1 + $0x50] sm:$0xff] %v694_v18  ;;  %v166_v33 = vmax.bf16 %v70_v17, %v54_v16  ;;  %v357_v35 = vmax.bf16 %v349_v25, %v161_v14  ;;  %v397_v36 = vrot.slane %v164_v26, 4  ;;  %v413_v37 = vrot.slane %v165_v27, 4  ;;  %v96_v9 = vld [vmem:[%s1206_s0 + $0x2c0] sm:$0xff]  ;;  %v81_v14 = vld [vmem:[%s1206_s0 + $0x248] sm:$0xff] }
  0x1d   :  { %v167_v38 = vmax.bf16 %v71_v23, %v55_v22  ;;  %659 = vst [vmem:[%s1207_s1 + $0x58] sm:$0xff] %v695_v30  ;;  %v373_v42 = vmax.bf16 %v365_v31, %v162_v20  ;;  %v389_v43 = vmax.bf16 %v381_v32, %v163_v21  ;;  %v168_v45 = vmax.bf16 %v88_v29, %v72_v28  ;;  %v97_v19 = vld [vmem:[%s1206_s0 + $0x2c8] sm:$0xff]  ;;  %v82_v20 = vld [vmem:[%s1206_s0 + $0x250] sm:$0xff]  ;;  %v83_v21 = vld [vmem:[%s1206_s0 + $0x258] sm:$0xff] }
  0x1e   :  { %v429_v44 = vrot.slane %v166_v33, 4  ;;  %v696_v49 = vcombine.low %v341_v24, %v357_v35  ;;  %v405_v50 = vmax.bf16 %v397_v36, %v164_v26  ;;  %v421_v51 = vmax.bf16 %v413_v37, %v165_v27  ;;  %v98_v26 = vld [vmem:[%s1206_s0 + $0x2d0] sm:$0xff]  ;;  %v99_v27 = vld [vmem:[%s1206_s0 + $0x2d8] sm:$0xff]  ;;  %v84_v28 = vld [vmem:[%s1206_s0 + $0x260] sm:$0xff] }
  0x1f   :  { %v445_v52 = vrot.slane %v167_v38, 4  ;;  %v697_v56 = vcombine.low %v373_v42, %v389_v43  ;;  %v169_v58 = vmax.bf16 %v89_v39, %v73_v34  ;;  %v206_v59 = vrot.slane %v168_v45, 4  ;;  %v100_v34 = vld [vmem:[%s1206_s0 + $0x2e0] sm:$0xff]  ;;  %v101_v35 = vld [vmem:[%s1206_s0 + $0x2e8] sm:$0xff] }
  0x20   :  { %v437_v57 = vmax.bf16 %v429_v44, %v166_v33  ;;  %660 = vst [vmem:[%s1207_s1 + $0x60] sm:$0xff] %v696_v49  ;;  %v698_v62 = vcombine.low %v405_v50, %v421_v51  ;;  %v170_v0 = vmax.bf16 %v90_v46, %v74_v40  ;;  %v171_v1 = vmax.bf16 %v91_v47, %v75_v41  ;;  %v85_v33 = vld [vmem:[%s1206_s0 + $0x268] sm:$0xff]  ;;  %v86_v40 = vld [vmem:[%s1206_s0 + $0x270] sm:$0xff]  ;;  %v87_v46 = vld [vmem:[%s1206_s0 + $0x278] sm:$0xff] }
  0x21   :  { %v453_v63 = vmax.bf16 %v445_v52, %v167_v38  ;;  %661 = vst [vmem:[%s1207_s1 + $0x68] sm:$0xff] %v697_v56  ;;  %v214_v4 = vmax.bf16 %v206_v59, %v168_v45  ;;  %v222_v5 = vrot.slane %v169_v58, 4  ;;  %v172_v6 = vmax.bf16 %v92_v54, %v76_v48  ;;  %v102_v41 = vld [vmem:[%s1206_s0 + $0x2f0] sm:$0xff]  ;;  %v103_v47 = vld [vmem:[%s1206_s0 + $0x2f8] sm:$0xff]  ;;  %v104_v52 = vld [vmem:[%s1206_s0 + $0x300] sm:$0xff] }
  0x22   :  { %v173_v7 = vmax.bf16 %v93_v55, %v77_v53  ;;  %662 = vst [vmem:[%s1207_s1 + $0x70] sm:$0xff] %v698_v62  ;;  %v238_v11 = vrot.slane %v170_v0, 4  ;;  %v254_v12 = vrot.slane %v171_v1, 4  ;;  %v174_v13 = vmax.bf16 %v94_v61, %v78_v60  ;;  %v120_v53 = vld [vmem:[%s1206_s0 + $0x380] sm:$0xff] }
  0x23   :  { %v699_v10 = vcombine.low %v437_v57, %v453_v63  ;;  %v230_v15 = vmax.bf16 %v222_v5, %v169_v58  ;;  %v270_v16 = vrot.slane %v172_v6, 4  ;;  %v175_v18 = vmax.bf16 %v95_v3, %v79_v2  ;;  %v105_v58 = vld [vmem:[%s1206_s0 + $0x308] sm:$0xff] }
  0x24   :  { %v286_v17 = vrot.slane %v173_v7, 4  ;;  %v246_v22 = vmax.bf16 %v238_v11, %v170_v0  ;;  %v262_v23 = vmax.bf16 %v254_v12, %v171_v1  ;;  %v302_v24 = vrot.slane %v174_v13, 4  ;;  %v121_v63 = vld [vmem:[%s1206_s0 + $0x388] sm:$0xff]  ;;  %v106_v0 = vld [vmem:[%s1206_s0 + $0x310] sm:$0xff]  ;;  %v107_v1 = vld [vmem:[%s1206_s0 + $0x318] sm:$0xff] }
  0x25   :  { %663 = vst [vmem:[%s1207_s1 + $0x78] sm:$0xff] %v699_v10  ;;  %v176_v25 = vmax.bf16 %v96_v9, %v80_v8  ;;  %v700_v29 = vcombine.low %v214_v4, %v230_v15  ;;  %v278_v30 = vmax.bf16 %v270_v16, %v172_v6  ;;  %v318_v32 = vrot.slane %v175_v18, 4  ;;  %v122_v6 = vld [vmem:[%s1206_s0 + $0x390] sm:$0xff]  ;;  %v108_v8 = vld [vmem:[%s1206_s0 + $0x320] sm:$0xff]  ;;  %v125_v15 = vld [vmem:[%s1206_s0 + $0x3a8] sm:$0xff] }
  0x26   :  { %v294_v31 = vmax.bf16 %v286_v17, %v173_v7  ;;  %v701_v36 = vcombine.low %v246_v22, %v262_v23  ;;  %v310_v37 = vmax.bf16 %v302_v24, %v174_v13  ;;  %v177_v38 = vmax.bf16 %v97_v19, %v81_v14  ;;  %v123_v7 = vld [vmem:[%s1206_s0 + $0x398] sm:$0xff]  ;;  %v109_v13 = vld [vmem:[%s1206_s0 + $0x328] sm:$0xff]  ;;  %v124_v14 = vld [vmem:[%s1206_s0 + $0x3a0] sm:$0xff] }
  0x27   :  { %v334_v39 = vrot.slane %v176_v25, 4  ;;  %664 = vst [vmem:[%s1207_s1 + $0x80] sm:$0xff] %v700_v29  ;;  %v326_v43 = vmax.bf16 %v318_v32, %v175_v18  ;;  %v178_v44 = vmax.bf16 %v98_v26, %v82_v20  ;;  %v179_v45 = vmax.bf16 %v99_v27, %v83_v21  ;;  %v110_v20 = vld [vmem:[%s1206_s0 + $0x330] sm:$0xff]  ;;  %v111_v26 = vld [vmem:[%s1206_s0 + $0x338] sm:$0xff]  ;;  %v112_v32 = vld [vmem:[%s1206_s0 + $0x340] sm:$0xff] }
  0x28   :  { %v702_v42 = vcombine.low %v278_v30, %v294_v31  ;;  %665 = vst [vmem:[%s1207_s1 + $0x88] sm:$0xff] %v701_v36  ;;  %v350_v49 = vrot.slane %v177_v38, 4  ;;  %v180_v50 = vmax.bf16 %v100_v34, %v84_v28  ;;  %v181_v51 = vmax.bf16 %v101_v35, %v85_v33  ;;  %v126_v21 = vld [vmem:[%s1206_s0 + $0x3b0] sm:$0xff]  ;;  %v127_v27 = vld [vmem:[%s1206_s0 + $0x3b8] sm:$0xff]  ;;  %v128_v33 = vld [vmem:[%s1206_s0 + $0x3c0] sm:$0xff] }
  0x29   :  { %v342_v48 = vmax.bf16 %v334_v39, %v176_v25  ;;  %v703_v54 = vcombine.low %v310_v37, %v326_v43  ;;  %v366_v55 = vrot.slane %v178_v44, 4  ;;  %v382_v56 = vrot.slane %v179_v45, 4  ;;  %v129_v43 = vld [vmem:[%s1206_s0 + $0x3c8] sm:$0xff] }
  0x2a   :  { %666 = vst [vmem:[%s1207_s1 + $0x90] sm:$0xff] %v702_v42  ;;  %v182_v57 = vmax.bf16 %v102_v41, %v86_v40  ;;  %v358_v59 = vmax.bf16 %v350_v49, %v177_v38  ;;  %v398_v60 = vrot.slane %v180_v50, 4  ;;  %v414_v61 = vrot.slane %v181_v51, 4  ;;  %v113_v38 = vld [vmem:[%s1206_s0 + $0x348] sm:$0xff] }
  0x2b   :  { %v183_v62 = vmax.bf16 %v103_v47, %v87_v46  ;;  %667 = vst [vmem:[%s1207_s1 + $0x98] sm:$0xff] %v703_v54  ;;  %v374_v2 = vmax.bf16 %v366_v55, %v178_v44  ;;  %v390_v3 = vmax.bf16 %v382_v56, %v179_v45  ;;  %v184_v5 = vmax.bf16 %v120_v53, %v104_v52  ;;  %v114_v44 = vld [vmem:[%s1206_s0 + $0x350] sm:$0xff]  ;;  %v115_v45 = vld [vmem:[%s1206_s0 + $0x358] sm:$0xff]  ;;  %v116_v52 = vld [vmem:[%s1206_s0 + $0x360] sm:$0xff] }
  0x2c   :  { %v430_v4 = vrot.slane %v182_v57, 4  ;;  %v704_v9 = vcombine.low %v342_v48, %v358_v59  ;;  %v406_v10 = vmax.bf16 %v398_v60, %v180_v50  ;;  %v422_v11 = vmax.bf16 %v414_v61, %v181_v51  ;;  %v130_v50 = vld [vmem:[%s1206_s0 + $0x3d0] sm:$0xff]  ;;  %v131_v51 = vld [vmem:[%s1206_s0 + $0x3d8] sm:$0xff]  ;;  %v133_v59 = vld [vmem:[%s1206_s0 + $0x3e8] sm:$0xff] }
  0x2d   :  { %v446_v12 = vrot.slane %v183_v62, 4  ;;  %v705_v16 = vcombine.low %v374_v2, %v390_v3  ;;  %v185_v18 = vmax.bf16 %v121_v63, %v105_v58  ;;  %v207_v19 = vrot.slane %v184_v5, 4  ;;  %v132_v58 = vld [vmem:[%s1206_s0 + $0x3e0] sm:$0xff] }
  0x2e   :  { %v438_v17 = vmax.bf16 %v430_v4, %v182_v57  ;;  %668 = vst [vmem:[%s1207_s1 + $0xa0] sm:$0xff] %v704_v9  ;;  %v706_v22 = vcombine.low %v406_v10, %v422_v11  ;;  %v186_v24 = vmax.bf16 %v122_v6, %v106_v0  ;;  %v187_v25 = vmax.bf16 %v123_v7, %v107_v1  ;;  %v117_v57 = vld [vmem:[%s1206_s0 + $0x368] sm:$0xff]  ;;  %v118_v0 = vld [vmem:[%s1206_s0 + $0x370] sm:$0xff]  ;;  %v119_v6 = vld [vmem:[%s1206_s0 + $0x378] sm:$0xff] }
  0x2f   :  { %v454_v23 = vmax.bf16 %v446_v12, %v183_v62  ;;  %669 = vst [vmem:[%s1207_s1 + $0xa8] sm:$0xff] %v705_v16  ;;  %v215_v28 = vmax.bf16 %v207_v19, %v184_v5  ;;  %v223_v29 = vrot.slane %v185_v18, 4  ;;  %v188_v30 = vmax.bf16 %v124_v14, %v108_v8  ;;  %v134_v1 = vld [vmem:[%s1206_s0 + $0x3f0] sm:$0xff]  ;;  %v135_v7 = vld [vmem:[%s1206_s0 + $0x3f8] sm:$0xff] }
  0x30   :  { %v189_v31 = vmax.bf16 %v125_v15, %v109_v13  ;;  %670 = vst [vmem:[%s1207_s1 + $0xb0] sm:$0xff] %v706_v22  ;;  %v239_v35 = vrot.slane %v186_v24, 4  ;;  %v255_v36 = vrot.slane %v187_v25, 4  ;;  %v190_v37 = vmax.bf16 %v126_v21, %v110_v20 }
  0x31   :  { %v707_v34 = vcombine.low %v438_v17, %v454_v23  ;;  %v231_v39 = vmax.bf16 %v223_v29, %v185_v18  ;;  %v271_v40 = vrot.slane %v188_v30, 4  ;;  %v191_v42 = vmax.bf16 %v127_v27, %v111_v26 }
  0x32   :  { %v287_v41 = vrot.slane %v189_v31, 4  ;;  %v247_v46 = vmax.bf16 %v239_v35, %v186_v24  ;;  %v263_v47 = vmax.bf16 %v255_v36, %v187_v25  ;;  %v303_v48 = vrot.slane %v190_v37, 4 }
  0x33   :  { %671 = vst [vmem:[%s1207_s1 + $0xb8] sm:$0xff] %v707_v34  ;;  %v192_v49 = vmax.bf16 %v128_v33, %v112_v32  ;;  %v708_v53 = vcombine.low %v215_v28, %v231_v39  ;;  %v279_v54 = vmax.bf16 %v271_v40, %v188_v30  ;;  %v319_v56 = vrot.slane %v191_v42, 4 }
  0x34   :  { %v295_v55 = vmax.bf16 %v287_v41, %v189_v31  ;;  %v709_v60 = vcombine.low %v247_v46, %v263_v47  ;;  %v311_v61 = vmax.bf16 %v303_v48, %v190_v37  ;;  %v193_v62 = vmax.bf16 %v129_v43, %v113_v38 }
  0x35   :  { %v335_v63 = vrot.slane %v192_v49, 4  ;;  %672 = vst [vmem:[%s1207_s1 + $0xc0] sm:$0xff] %v708_v53  ;;  %v327_v3 = vmax.bf16 %v319_v56, %v191_v42  ;;  %v194_v4 = vmax.bf16 %v130_v50, %v114_v44  ;;  %v195_v5 = vmax.bf16 %v131_v51, %v115_v45 }
  0x36   :  { %v710_v2 = vcombine.low %v279_v54, %v295_v55  ;;  %673 = vst [vmem:[%s1207_s1 + $0xc8] sm:$0xff] %v709_v60  ;;  %v351_v9 = vrot.slane %v193_v62, 4  ;;  %v196_v10 = vmax.bf16 %v132_v58, %v116_v52  ;;  %v197_v11 = vmax.bf16 %v133_v59, %v117_v57 }
  0x37   :  { %v343_v8 = vmax.bf16 %v335_v63, %v192_v49  ;;  %v711_v12 = vcombine.low %v311_v61, %v327_v3  ;;  %v367_v13 = vrot.slane %v194_v4, 4  ;;  %v383_v14 = vrot.slane %v195_v5, 4 }
  0x38   :  { %674 = vst [vmem:[%s1207_s1 + $0xd0] sm:$0xff] %v710_v2  ;;  %v198_v15 = vmax.bf16 %v134_v1, %v118_v0  ;;  %v359_v16 = vmax.bf16 %v351_v9, %v193_v62  ;;  %v399_v17 = vrot.slane %v196_v10, 4  ;;  %v415_v18 = vrot.slane %v197_v11, 4 }
  0x39   :  { %v199_v19 = vmax.bf16 %v135_v7, %v119_v6  ;;  %675 = vst [vmem:[%s1207_s1 + $0xd8] sm:$0xff] %v711_v12  ;;  %v375_v20 = vmax.bf16 %v367_v13, %v194_v4  ;;  %v391_v21 = vmax.bf16 %v383_v14, %v195_v5 }
  0x3a   :  { %v431_v22 = vrot.slane %v198_v15, 4  ;;  %v712_v23 = vcombine.low %v343_v8, %v359_v16  ;;  %v407_v24 = vmax.bf16 %v399_v17, %v196_v10  ;;  %v423_v25 = vmax.bf16 %v415_v18, %v197_v11 }
  0x3b   :  { %v447_v26 = vrot.slane %v199_v19, 4  ;;  %v713_v27 = vcombine.low %v375_v20, %v391_v21 }
  0x3c   :  { %v439_v28 = vmax.bf16 %v431_v22, %v198_v15  ;;  %676 = vst [vmem:[%s1207_s1 + $0xe0] sm:$0xff] %v712_v23  ;;  %v714_v29 = vcombine.low %v407_v24, %v423_v25 }
  0x3d   :  { %v455_v30 = vmax.bf16 %v447_v26, %v199_v19  ;;  %677 = vst [vmem:[%s1207_s1 + $0xe8] sm:$0xff] %v713_v27 }
  0x3e   :  { %678 = vst [vmem:[%s1207_s1 + $0xf0] sm:$0xff] %v714_v29 }
  0x3f   :  { %v715_v31 = vcombine.low %v439_v28, %v455_v30 }
  0x41   :  { %679 = vst [vmem:[%s1207_s1 + $0xf8] sm:$0xff] %v715_v31 }

// kernel: unet_forward.36
= control target key start
LH: loop header
LB: loop body
LE: loop exit
PB: predicated region body
PF: predicated region fallthrough
CT: control target
= control target key end

     0   :  { %s318_s0 = inlined_call_operand.vmem [shape: bf16[16,4096], index: 0, kind: input, shape index: {}]   ;;  %s319_s1 = inlined_call_operand.vmem [shape: bf16[16,1024], index: 1, kind: output, shape index: {}]  }
   0x1   :  { %v8_v0 = vld [vmem:[%s318_s0] sm:$0xff]  ;;  %v9_v1 = vld [vmem:[%s318_s0 + $0x8] sm:$0xff]  ;;  %v10_v5 = vld [vmem:[%s318_s0 + $0x10] sm:$0xff] }
   0x2   :  { %v16_v2 = vld [vmem:[%s318_s0 + $0x40] sm:$0xff]  ;;  %v17_v3 = vld [vmem:[%s318_s0 + $0x48] sm:$0xff]  ;;  %v11_v6 = vld [vmem:[%s318_s0 + $0x18] sm:$0xff] }
   0x3   :  { %v40_v4 = vmax.bf16 %v16_v2, %v8_v0  ;;  %v41_v7 = vmax.bf16 %v17_v3, %v9_v1  ;;  %v18_v8 = vld [vmem:[%s318_s0 + $0x50] sm:$0xff]  ;;  %v19_v9 = vld [vmem:[%s318_s0 + $0x58] sm:$0xff]  ;;  %v12_v10 = vld [vmem:[%s318_s0 + $0x20] sm:$0xff] }
   0x4   :  { %v42_v12 = vmax.bf16 %v18_v8, %v10_v5  ;;  %v43_v13 = vmax.bf16 %v19_v9, %v11_v6  ;;  %v13_v14 = vld [vmem:[%s318_s0 + $0x28] sm:$0xff]  ;;  %v20_v15 = vld [vmem:[%s318_s0 + $0x60] sm:$0xff]  ;;  %v14_v20 = vld [vmem:[%s318_s0 + $0x30] sm:$0xff] }
   0x5   :  { %v58_v11 = vrot.slane %v40_v4, 4  ;;  %v21_v16 = vld [vmem:[%s318_s0 + $0x68] sm:$0xff]  ;;  %v66_v17 = vrot.slane %v41_v7, 4  ;;  %v44_v18 = vmax.bf16 %v20_v15, %v12_v10  ;;  %v15_v21 = vld [vmem:[%s318_s0 + $0x38] sm:$0xff]  ;;  %v22_v22 = vld [vmem:[%s318_s0 + $0x70] sm:$0xff] }
   0x6   :  { %v45_v19 = vmax.bf16 %v21_v16, %v13_v14  ;;  %v74_v24 = vrot.slane %v42_v12, 4  ;;  %v82_v25 = vrot.slane %v43_v13, 4  ;;  %v23_v26 = vld [vmem:[%s318_s0 + $0x78] sm:$0xff]  ;;  %v46_v27 = vmax.bf16 %v22_v22, %v14_v20  ;;  %v24_v28 = vld [vmem:[%s318_s0 + $0x80] sm:$0xff]  ;;  %v25_v29 = vld [vmem:[%s318_s0 + $0x88] sm:$0xff] }
   0x7   :  { %v62_v23 = vmax.bf16 %v58_v11, %v40_v4  ;;  %v70_v30 = vmax.bf16 %v66_v17, %v41_v7  ;;  %v90_v31 = vrot.slane %v44_v18, 4  ;;  %v47_v33 = vmax.bf16 %v23_v26, %v15_v21  ;;  %v32_v34 = vld [vmem:[%s318_s0 + $0xc0] sm:$0xff]  ;;  %v33_v35 = vld [vmem:[%s318_s0 + $0xc8] sm:$0xff]  ;;  %v26_v36 = vld [vmem:[%s318_s0 + $0x90] sm:$0xff] }
   0x8   :  { %v98_v32 = vrot.slane %v45_v19, 4  ;;  %v78_v37 = vmax.bf16 %v74_v24, %v42_v12  ;;  %v86_v38 = vmax.bf16 %v82_v25, %v43_v13  ;;  %v106_v39 = vrot.slane %v46_v27, 4  ;;  %v27_v41 = vld [vmem:[%s318_s0 + $0x98] sm:$0xff]  ;;  %v34_v42 = vld [vmem:[%s318_s0 + $0xd0] sm:$0xff]  ;;  %v28_v48 = vld [vmem:[%s318_s0 + $0xa0] sm:$0xff] }
   0x9   :  { %v48_v40 = vmax.bf16 %v32_v34, %v24_v28  ;;  %v35_v43 = vld [vmem:[%s318_s0 + $0xd8] sm:$0xff]  ;;  %v180_v44 = vcombine.low %v62_v23, %v70_v30  ;;  %v94_v45 = vmax.bf16 %v90_v31, %v44_v18  ;;  %v114_v47 = vrot.slane %v47_v33, 4  ;;  %v29_v49 = vld [vmem:[%s318_s0 + $0xa8] sm:$0xff]  ;;  %v36_v50 = vld [vmem:[%s318_s0 + $0xe0] sm:$0xff] }
   0xa   :  { %v102_v46 = vmax.bf16 %v98_v32, %v45_v19  ;;  %v181_v51 = vcombine.low %v78_v37, %v86_v38  ;;  %v110_v52 = vmax.bf16 %v106_v39, %v46_v27  ;;  %v49_v53 = vmax.bf16 %v33_v35, %v25_v29  ;;  %v37_v55 = vld [vmem:[%s318_s0 + $0xe8] sm:$0xff]  ;;  %v30_v56 = vld [vmem:[%s318_s0 + $0xb0] sm:$0xff]  ;;  %v31_v61 = vld [vmem:[%s318_s0 + $0xb8] sm:$0xff] }
   0xb   :  { %v59_v54 = vrot.slane %v48_v40, 4  ;;  %168 = vst [vmem:[%s319_s1] sm:$0xff] %v180_v44  ;;  %v118_v58 = vmax.bf16 %v114_v47, %v47_v33  ;;  %v50_v59 = vmax.bf16 %v34_v42, %v26_v36  ;;  %v51_v60 = vmax.bf16 %v35_v43, %v27_v41  ;;  %v38_v62 = vld [vmem:[%s318_s0 + $0xf0] sm:$0xff]  ;;  %v39_v63 = vld [vmem:[%s318_s0 + $0xf8] sm:$0xff] }
   0xc   :  { %v182_v57 = vcombine.low %v94_v45, %v102_v46  ;;  %169 = vst [vmem:[%s319_s1 + $0x8] sm:$0xff] %v181_v51  ;;  %v67_v1 = vrot.slane %v49_v53, 4  ;;  %v52_v2 = vmax.bf16 %v36_v50, %v28_v48  ;;  %v53_v3 = vmax.bf16 %v37_v55, %v29_v49 }
   0xd   :  { %v63_v0 = vmax.bf16 %v59_v54, %v48_v40  ;;  %v183_v4 = vcombine.low %v110_v52, %v118_v58  ;;  %v75_v5 = vrot.slane %v50_v59, 4  ;;  %v83_v6 = vrot.slane %v51_v60, 4 }
   0xe   :  { %170 = vst [vmem:[%s319_s1 + $0x10] sm:$0xff] %v182_v57  ;;  %v54_v7 = vmax.bf16 %v38_v62, %v30_v56  ;;  %v71_v8 = vmax.bf16 %v67_v1, %v49_v53  ;;  %v91_v9 = vrot.slane %v52_v2, 4  ;;  %v99_v10 = vrot.slane %v53_v3, 4 }
   0xf   :  { %v55_v11 = vmax.bf16 %v39_v63, %v31_v61  ;;  %171 = vst [vmem:[%s319_s1 + $0x18] sm:$0xff] %v183_v4  ;;  %v79_v12 = vmax.bf16 %v75_v5, %v50_v59  ;;  %v87_v13 = vmax.bf16 %v83_v6, %v51_v60 }
  0x10   :  { %v107_v14 = vrot.slane %v54_v7, 4  ;;  %v184_v15 = vcombine.low %v63_v0, %v71_v8  ;;  %v95_v16 = vmax.bf16 %v91_v9, %v52_v2  ;;  %v103_v17 = vmax.bf16 %v99_v10, %v53_v3 }
  0x11   :  { %v115_v18 = vrot.slane %v55_v11, 4  ;;  %v185_v19 = vcombine.low %v79_v12, %v87_v13 }
  0x12   :  { %v111_v20 = vmax.bf16 %v107_v14, %v54_v7  ;;  %172 = vst [vmem:[%s319_s1 + $0x20] sm:$0xff] %v184_v15  ;;  %v186_v21 = vcombine.low %v95_v16, %v103_v17 }
  0x13   :  { %v119_v22 = vmax.bf16 %v115_v18, %v55_v11  ;;  %173 = vst [vmem:[%s319_s1 + $0x28] sm:$0xff] %v185_v19 }
  0x14   :  { %174 = vst [vmem:[%s319_s1 + $0x30] sm:$0xff] %v186_v21 }
  0x15   :  { %v187_v23 = vcombine.low %v111_v20, %v119_v22 }
  0x17   :  { %175 = vst [vmem:[%s319_s1 + $0x38] sm:$0xff] %v187_v23 }

// kernel: unet_forward.34
= control target key start
LH: loop header
LB: loop body
LE: loop exit
PB: predicated region body
PF: predicated region fallthrough
CT: control target
= control target key end

     0   :  { %s3413_s15 = smov 0   ;;  %s4060_s0 = inlined_call_operand.vmem [shape: bf16[896,128], index: 0, kind: input, shape index: {}, may-alias: {0,1}]   ;;  %s4061_s1 = inlined_call_operand.vmem [shape: bf16[896,128], index: 1, kind: input, shape index: {}, may-alias: {0,1}]   ;;  %s4062_s2 = inlined_call_operand.vmem [shape: bf16[9,128,128], index: 2, kind: input, shape index: {}]   ;;  %s4063_s3 = inlined_call_operand.vmem [shape: f32[1,128], index: 3, kind: input, shape index: {}]   ;;  %s4064_s4 = inlined_call_operand.vmem [shape: bf16[768,128], index: 4, kind: output, shape index: {}]  }
   0x1 LB: > { %s2397_s16 = sadd.s32 4294967295, %s3386_s15   ;;  %p2401_p0 = scmp.ge.s32.totalorder %s3386_s15, 1  ;;  %s3386_s15 = sphi %s3413_s15, %s14_s15  }
   0x2   : > { %p178_p1 = scmp.lt.s32.totalorder %s3386_s15, 7 }
   0x4   : > { %p179_p2 = pnand %p2401_p0, %p178_p1 }
   0x5   : > { %v3293_v0 = vld [vmem:[%s4062_s2 + $0x40] sm:$0xff] (!%p179_p2)   ;;  %s3424_s19 = sshll.u32 (!%p179_p2), %s2397_s16, 4  ;;  %v3295_v2 = vld [vmem:[%s4062_s2 + $0x48] sm:$0xff] (!%p179_p2)   ;;  %v3297_v4 = vld [vmem:[%s4062_s2 + $0x50] sm:$0xff] (!%p179_p2)   ;;  %vm382_vm0 = vsmask.f32 (!%p179_p2), 7424 }
   0x6   : > { %182 = sbr.rel (%p179_p2) target bundleno = 399 (0x18f), region = 36  ;;  %v3294_v1 = vld [vmem:[%s4062_s2 + $0x100] sm:$0xff] (!%p179_p2)   ;;  %2853 = vmatprep.subr.bf16.mxu1 (!%p179_p2), %v3293_v0  ;;  %v3296_v3 = vld [vmem:[%s4062_s2 + $0x108] sm:$0xff] (!%p179_p2)   ;;  %p211_p3 = scmp.lt.s32.totalorder (!%p179_p2), %s3424_s19, 111  ;;  %v3298_v5 = vld [vmem:[%s4062_s2 + $0x110] sm:$0xff] (!%p179_p2)   ;;  %vm775_vm2 = vcmask (!%p179_p2), 1046528  }
   0x7   : > { %2981 = vmatprep.subr.bf16.mxu0 (!%p179_p2), %v3294_v1  ;;  %2854 = vmatpush3.bf16.msra.mxu1 (!%p179_p2), %v3293_v0  ;;  %v3299_v6 = vld [vmem:[%s4062_s2 + $0x58] sm:$0xff] (!%p179_p2)   ;;  %s2642_s10 = sadd.s32 (!%p179_p2), 16, %s3424_s19  ;;  %v3301_v8 = vld [vmem:[%s4062_s2 + $0x60] sm:$0xff] (!%p179_p2)   ;;  %v3303_v10 = vld [vmem:[%s4062_s2 + $0x68] sm:$0xff] (!%p179_p2)   ;;  %vm1167_vm1 = vsmask.f32 (!%p179_p2), 6400 }
   0x8   : > { %2982 = vmatpush3.bf16.msra.mxu0 (!%p179_p2), %v3294_v1  ;;  %2855 = vmatprep.subr.bf16.mxu1 (!%p179_p2), %v3295_v2  ;;  %v3300_v7 = vld [vmem:[%s4062_s2 + $0x118] sm:$0xff] (!%p179_p2)   ;;  %v3302_v9 = vld [vmem:[%s4062_s2 + $0x120] sm:$0xff] (!%p179_p2)   ;;  %p218_p4 = scmp.lt.s32.totalorder (!%p179_p2), %s2642_s10, 111  ;;  %v3304_v11 = vld [vmem:[%s4062_s2 + $0x128] sm:$0xff] (!%p179_p2)   ;;  %vm1399_vm3 = vcmask (!%p179_p2), 1045504   ;;  %vm2023_vm5 = vcmask (!%p179_p2), 1044480  }
   0x9   : > { %2983 = vmatprep.subr.bf16.mxu0 (!%p179_p2), %v3296_v3  ;;  %v3305_v14 = vld [vmem:[%s4062_s2 + $0x70] sm:$0xff] (!%p179_p2)   ;;  %v3307_v30 = vld [vmem:[%s4062_s2 + $0x78] sm:$0xff] (!%p179_p2)   ;;  %v3312_v41 = vld [vmem:[%s4062_s2] sm:$0xff] (!%p179_p2)   ;;  %vm1791_vm4 = vsmask.f32 (!%p179_p2), 5376  ;;  %p225_p5 = scmp.lt.s32.totalorder (!%p179_p2), %s3424_s19, 95 }
   0xa   : > { %v3306_v22 = vld [vmem:[%s4062_s2 + $0x130] sm:$0xff] (!%p179_p2)   ;;  %v3308_v34 = vld [vmem:[%s4062_s2 + $0x138] sm:$0xff] (!%p179_p2)   ;;  %v3314_v46 = vld [vmem:[%s4062_s2 + $0x140] sm:$0xff] (!%p179_p2)  }
   0xb   : > { %2856 = vmatpush3.bf16.msra.mxu1 (!%p179_p2), %v3295_v2  ;;  %v3315_v55 = vld [vmem:[%s4062_s2 + $0x8] sm:$0xff] (!%p179_p2)   ;;  %v3318_v2 = vld [vmem:[%s4062_s2 + $0x10] sm:$0xff] (!%p179_p2)  }
   0xc   : > { %2984 = vmatpush3.bf16.msra.mxu0 (!%p179_p2), %v3296_v3  ;;  %2857 = vmatprep.subr.bf16.mxu1 (!%p179_p2), %v3297_v4  ;;  %v3316_v60 = vld [vmem:[%s4062_s2 + $0x148] sm:$0xff] (!%p179_p2)  }
   0xd   : > { %s212_s30 = scalar_select %p211_p3, %s3424_s19, 111  ;;  %2985 = vmatprep.subr.bf16.mxu0 %v3298_v5 }
   0xe   : > { %s4066_s10 = smov (!%p218_p4, %s2642_s10), 111  ;;  %s4068_s19 = smov (!%p225_p5, %s3424_s19), 95 }
   0xf   : > { %2858 = vmatpush3.bf16.msra.mxu1 %v3297_v4  ;;  %s2403_s9 = sshll.u32 %s212_s30, 2  ;;  %s2405_s13 = sshll.u32 %s4066_s10, 2 }
  0x10   : > { %2986 = vmatpush3.bf16.msra.mxu0 %v3298_v5  ;;  %2859 = vmatprep.subr.bf16.mxu1 %v3299_v6  ;;  %s3462_s21 = scalar_lea.vmem %s4060_s0, %s2403_s9  ;;  %s3577_s22 = scalar_lea.vmem %s4061_s1, %s2405_s13 }
  0x11   : > { %2987 = vmatprep.subr.bf16.mxu0 %v3300_v7  ;;  %v3468_v12 = vld [vmem:[%s3462_s21] sm:$0xff]   ;;  %v3471_v13 = vld [vmem:[%s3462_s21 + $0x8] sm:$0xff]   ;;  %v3477_v15 = vld [vmem:[%s3462_s21 + $0x10] sm:$0xff]  }
  0x12   : > { %v384_v16 = vshrl.u32 %v3468_v12, 16  ;;  %v386_v17 = vshll.u32 %v3468_v12, 16  ;;  %v391_v18 = vshll.u32 %v3471_v13, 16  ;;  %v395_v19 = vshrl.u32 %v3471_v13, 16  ;;  %v3495_v27 = vld [vmem:[%s3462_s21 + $0x18] sm:$0xff]   ;;  %v3520_v43 = vld [vmem:[%s3462_s21 + $0x20] sm:$0xff]  }
  0x13   : > { %2860 = vmatpush3.bf16.msra.mxu1 %v3299_v6  ;;  %v3486_v20 = vshll.u32 %v3477_v15, 16  ;;  %v3489_v21 = vshrl.u32 %v3477_v15, 16  ;;  %v3503_v33 = vshll.u32 %v3495_v27, 16  ;;  %v3509_v36 = vshrl.u32 %v3495_v27, 16  ;;  %v3532_v49 = vld [vmem:[%s3462_s21 + $0x28] sm:$0xff]   ;;  %v3556_v63 = vld [vmem:[%s3462_s21 + $0x30] sm:$0xff]  }
  0x14   : > { %2988 = vmatpush3.bf16.msra.mxu0 %v3300_v7  ;;  %2861 = vmatprep.subr.bf16.mxu1 %v3301_v8  ;;  %v388_v23 = vrot.slane %v386_v17, 1  ;;  %v393_v24 = vrot.slane %v391_v18, 1  ;;  %v1168_v25 = vrot.slane %v395_v19, 1  ;;  %v1169_v26 = vrot.slane %v391_v18, 2 }
  0x15   : > { %2989 = vmatprep.subr.bf16.mxu0 %v3302_v9  ;;  %v1171_v28 = vrot.slane %v3489_v21, 1  ;;  %v1172_v29 = vrot.slane %v3486_v20, 2  ;;  %v401_v38 = vrot.slane %v3486_v20, 1  ;;  %v1176_v39 = vrot.slane %v3503_v33, 2 }
  0x16   : > { %v389_v31 = vor.u32 %v388_v23, %v384_v16  ;;  %v1170_v32 = vor.u32 %v1169_v26, %v1168_v25  ;;  %v1175_v42 = vrot.slane %v3509_v36, 1  ;;  %v397_v44 = vor.u32 %v395_v19, %v393_v24  ;;  %v247_v23 = vld [vmem:[%s3577_s22] sm:$0xf]  ;;  %v3321_v25 = vld [vmem:[%s4062_s2 + $0x18] sm:$0xff]  }
  0x17   : > { %2862 = vmatpush3.bf16.msra.mxu1 %v3301_v8  ;;  %v1173_v35 = vor.u32 %v1172_v29, %v1171_v28  ;;  %v3526_v47 = vshll.u32 %v3520_v43, 16  ;;  %v3529_v48 = vshrl.u32 %v3520_v43, 16  ;;  %v405_v50 = vor.u32 %v3489_v21, %v401_v38  ;;  %v3572_v8 = vld [vmem:[%s3462_s21 + $0x38] sm:$0xff]  }
  0x18   : > { %2990 = vmatpush3.bf16.msra.mxu0 %v3302_v9  ;;  %2863 = vmatprep.subr.bf16.mxu1 %v3303_v10  ;;  %v394_v37 = vsel %vm382_vm0, %v389_v31, %v393_v24  ;;  %v1177_v45 = vor.u32 %v1176_v39, %v1175_v42  ;;  %v409_v51 = vrot.slane %v3503_v33, 1  ;;  %v402_v54 = vsel %vm382_vm0, %v397_v44, %v401_v38  ;;  %v3320_v9 = vld [vmem:[%s4062_s2 + $0x150] sm:$0xff]   ;;  %v3322_v26 = vld [vmem:[%s4062_s2 + $0x158] sm:$0xff]   ;;  %v3324_v44 = vld [vmem:[%s4062_s2 + $0x20] sm:$0xff]  }
  0x19   : > { %2991 = vmatprep.subr.bf16.mxu0 %v3304_v11  ;;  %2869 = vmatprep.mubr.bf16.mxu1 %v394_v37  ;;  %v1174_v40 = vsel %vm1167_vm1, %v1170_v32, %v1173_v35  ;;  %v1179_v52 = vrot.slane %v3529_v48, 1  ;;  %v1180_v53 = vrot.slane %v3526_v47, 2  ;;  %v3543_v56 = vshll.u32 %v3532_v49, 16  ;;  %v3607_v32 = vld [vmem:[%s3577_s22 + $0x8] sm:$0xf] }
  0x1a   : > { %2997 = vmatprep.mubr.bf16.mxu0 %v1174_v40  ;;  %v3546_v57 = vshrl.u32 %v3532_v49, 16  ;;  %v1178_v58 = vsel %vm1167_vm1, %v1173_v35, %v1177_v45  ;;  %v410_v0 = vsel %vm382_vm0, %v405_v50, %v409_v51  ;;  %v417_v1 = vrot.slane %v3526_v47, 1 }
  0x1b   : > { %2864 = vmatpush3.bf16.msra.mxu1 %v3303_v10  ;;  %v1181_v59 = vor.u32 %v1180_v53, %v1179_v52  ;;  %v1184_v62 = vrot.slane %v3543_v56, 2  ;;  %v413_v4 = vor.u32 %v3509_v36, %v409_v51  ;;  %v3566_v5 = vshll.u32 %v3556_v63, 16 }
  0x1c   : > { %2992 = vmatpush3.bf16.msra.mxu0 %v3304_v11  ;;  %2865 = vmatprep.subr.bf16.mxu1 %v3305_v14  ;;  %v1183_v61 = vrot.slane %v3546_v57, 1  ;;  %v3569_v6 = vshrl.u32 %v3556_v63, 16  ;;  %v425_v16 = vrot.slane %v3543_v56, 1  ;;  %v3587_v17 = vshll.u32 %v3572_v8, 16 }
  0x1d   : > { %2993 = vmatprep.subr.bf16.mxu0 %v3306_v22  ;;  %v1182_v3 = vsel %vm1167_vm1, %v1177_v45, %v1181_v59  ;;  %v1188_v11 = vrot.slane %v3566_v5, 2  ;;  %v3590_v18 = vshrl.u32 %v3572_v8, 16  ;;  %v418_v19 = vsel %vm382_vm0, %v413_v4, %v417_v1 }
  0x1e   : > { %v1185_v7 = vor.u32 %v1184_v62, %v1183_v61  ;;  %v1187_v10 = vrot.slane %v3569_v6, 1  ;;  %v1192_v29 = vrot.slane %v3587_v17, 2  ;;  %v429_v35 = vor.u32 %v3546_v57, %v425_v16 }
  0x1f   : > { %2866 = vmatpush3.bf16.msra.mxu1 %v3305_v14  ;;  %v421_v14 = vor.u32 %v3529_v48, %v417_v1  ;;  %v1191_v28 = vrot.slane %v3590_v18, 1  ;;  %v433_v37 = vrot.slane %v3566_v5, 1  ;;  %v3612_v38 = vcombine.low %v247_v23, %v247_v23 }
  0x20   : > { %2994 = vmatpush3.bf16.msra.mxu0 %v3306_v22  ;;  %2867 = vmatprep.subr.bf16.mxu1 %v3307_v30  ;;  %v1189_v22 = vor.u32 %v1188_v11, %v1187_v10  ;;  %v1186_v24 = vsel %vm1167_vm1, %v1181_v59, %v1185_v7  ;;  %v3619_v42 = vcombine.low %v3607_v32, %v3607_v32  ;;  %v3327_v59 = vld [vmem:[%s4062_s2 + $0x28] sm:$0xff]   ;;  %v3331_v10 = vld [vmem:[%s4062_s2 + $0x30] sm:$0xff]  }
  0x21   : > { %2995 = vmatprep.subr.bf16.mxu0 %v3308_v34  ;;  %v1193_v45 = vor.u32 %v1192_v29, %v1191_v28  ;;  %v447_v61 = vshll.u32 %v3612_v38, 16  ;;  %v3335_v28 = vld [vmem:[%s4062_s2 + $0x178] sm:$0xff]  }
  0x22   : > { %v1190_v39 = vsel %vm1167_vm1, %v1185_v7, %v1189_v22  ;;  %v1205_v52 = vshrl.u32 %v3619_v42, 16  ;;  %v1208_v53 = vshll.u32 %v3619_v42, 16 }
  0x23   : > { %2868 = vmatpush3.bf16.msra.mxu1 %v3307_v30  ;;  %v248_v30 = vld [vmem:[%s3577_s22 + $0x4] sm:$0xf]  ;;  %v1194_v62 = vsel %vm1167_vm1, %v1189_v22, %v1193_v45 }
  0x24   : > { %2996 = vmatpush3.bf16.msra.mxu0 %v3308_v34  ;;  %2885 = vmatprep.subr.bf16.mxu1 %v3312_v41  ;;  %v3604_v31 = vcombine.low %v247_v23, %v248_v30  ;;  %v426_v34 = vsel %vm382_vm0, %v421_v14, %v425_v16  ;;  %v1210_v1 = vrot.slane %v1208_v53, 2  ;;  %v3333_v14 = vld [vmem:[%s4062_s2 + $0x170] sm:$0xff]   ;;  %v1400_v16 = vrot.slane %v3471_v13, 2  ;;  %v3336_v30 = vld [vmem:[%s4062_s2 + $0x80] sm:$0xff]  }
  0x25   : > { %3013 = vmatprep.subr.bf16.mxu0 %v3314_v46  ;;  %v1401_v23 = vrot.slane %v3477_v15, 2 }
  0x26   : > { %2870 = vmatmul.mubr.bf16.vlgmr.msra.gmra.mrb[0].mxu1 %v402_v54  ;;  %v1196_v40 = vshrl.u32 %v3604_v31, 16  ;;  %v437_v54 = vor.u32 %v3569_v6, %v433_v37 }
  0x27   : > { %2998 = vmatmul.mubr.bf16.vlgmr.msra.gmra.mrb[0].mxu0 %v1178_v58  ;;  %2886 = vmatpush3.bf16.msra.mxu1 %v3312_v41  ;;  %v1199_v41 = vshll.u32 %v3604_v31, 16  ;;  %v434_v58 = vsel %vm382_vm0, %v429_v35, %v433_v37  ;;  %v783_v35 = vrot.slane %v3520_v43, 1  ;;  %v785_v37 = vrot.slane %v3532_v49, 1 }
  0x28   : > { %3014 = vmatpush3.bf16.msra.mxu0 %v3314_v46  ;;  %2887 = vmatprep.subr.bf16.mxu1 %v3315_v55  ;;  %v3326_v46 = vld [vmem:[%s4062_s2 + $0x160] sm:$0xff]   ;;  %v1198_v50 = vrot.slane %v1196_v40, 1 }
  0x29   : > { %3015 = vmatprep.subr.bf16.mxu0 %v3316_v60  ;;  %2873 = vmatprep.mubr.bf16.mxu1 %v410_v0  ;;  %v1201_v51 = vrot.slane %v1199_v41, 2  ;;  %v1207_v0 = vrot.slane %v1205_v52, 1  ;;  %v791_v52 = vrot.slane %v3612_v38, 1 }
  0x2a   : > { %3001 = vmatprep.mubr.bf16.mxu0 %v1182_v3 }
  0x2b   : > { %2888 = vmatpush3.bf16.msra.mxu1 %v3315_v55  ;;  %v441_v55 = vrot.slane %v3587_v17, 1  ;;  %v1211_v11 = vor.u32 %v1210_v1, %v1207_v0  ;;  %v1799_v1 = vrot.slane %v3529_v48, 2 }
  0x2c   : > { %3016 = vmatpush3.bf16.msra.mxu0 %v3316_v60  ;;  %2889 = vmatprep.subr.bf16.mxu1 %v3318_v2  ;;  %v1202_v60 = vor.u32 %v1201_v51, %v1198_v50  ;;  %v3688_v50 = vrot.slane %v3572_v8, 1 }
  0x2d   : > { %3017 = vmatprep.subr.bf16.mxu0 %v3320_v9  ;;  %v442_v3 = vsel %vm382_vm0, %v437_v54, %v441_v55  ;;  %v445_v7 = vor.u32 %v3590_v18, %v441_v55  ;;  %v1792_v54 = vrot.slane %v3489_v21, 2  ;;  %v3339_v21 = vld [vmem:[%s4062_s2 + $0x188] sm:$0xff]  }
  0x2e   : > { %2874 = vmatmul.mubr.bf16.gmra.mrb[4].mxu1 %v418_v19  ;;  %v1203_v4 = vsel %vm1167_vm1, %v1193_v45, %v1202_v60  ;;  %v776_v19 = vrot.slane %v3468_v12, 1  ;;  %v3337_v45 = vld [vmem:[%s4062_s2 + $0x180] sm:$0xff]   ;;  %v3708_v38 = vsel %vm775_vm2, %v3688_v50, %v791_v52 }
  0x2f   : > { %3002 = vmatmul.mubr.bf16.gmra.mrb[4].mxu0 %v1186_v24  ;;  %2890 = vmatpush3.bf16.msra.mxu1 %v3318_v2  ;;  %v3328_v2 = vld [vmem:[%s4062_s2 + $0x168] sm:$0xff]   ;;  %v777_v24 = vrot.slane %v3471_v13, 1 }
  0x30   : > { %3018 = vmatpush3.bf16.msra.mxu0 %v3320_v9  ;;  %2891 = vmatprep.subr.bf16.mxu1 %v3321_v25  ;;  %v449_v9 = vrot.slane %v447_v61, 1 }
  0x31   : > { %3019 = vmatprep.subr.bf16.mxu0 %v3322_v26  ;;  %2877 = vmatprep.mubr.bf16.mxu1 %v426_v34  ;;  %v3668_v29 = vsel %vm775_vm2, %v776_v19, %v777_v24  ;;  %v1402_v34 = vsel %vm1399_vm3, %v1400_v16, %v1401_v23 }
  0x32   : > { %3005 = vmatprep.mubr.bf16.mxu0 %v1190_v39  ;;  %v450_v22 = vsel %vm382_vm0, %v445_v7, %v449_v9  ;;  %v1403_v39 = vrot.slane %v3495_v27, 2  ;;  %v1804_v7 = vrot.slane %v3543_v56, 3  ;;  %v1409_v9 = vrot.slane %v3556_v63, 2  ;;  %v3343_v56 = vld [vmem:[%s4062_s2 + $0x198] sm:$0xff]  }
  0x33   : > { %2892 = vmatpush3.bf16.msra.mxu1 %v3321_v25  ;;  %v1212_v25 = vsel %vm1167_vm1, %v1202_v60, %v1211_v11  ;;  %v1795_v60 = vrot.slane %v3509_v36, 2  ;;  %v3340_v36 = vld [vmem:[%s4062_s2 + $0x90] sm:$0xff]   ;;  %v3342_v11 = vld [vmem:[%s4062_s2 + $0x98] sm:$0xff]  }
  0x34   : > { %3020 = vmatpush3.bf16.msra.mxu0 %v3322_v26  ;;  %2893 = vmatprep.subr.bf16.mxu1 %v3324_v44  ;;  %v3334_v26 = vld [vmem:[%s4062_s2 + $0x38] sm:$0xff]   ;;  %v3701_v55 = vsel %vm1399_vm3, %v1401_v23, %v1403_v39  ;;  %v1812_v23 = vrot.slane %v3587_v17, 3 }
  0x35   : > { %3021 = vmatprep.subr.bf16.mxu0 %v3326_v46 }
  0x36   : > { %2878 = vmatmul.mubr.bf16.gmra.mrb[8].mxu1 %v434_v58  ;;  %v3338_v58 = vld [vmem:[%s4062_s2 + $0x88] sm:$0xff]  }
  0x37   : > { %3006 = vmatmul.mubr.bf16.gmra.mrb[8].mxu0 %v1194_v62  ;;  %2894 = vmatpush3.bf16.msra.mxu1 %v3324_v44  ;;  %v787_v44 = vrot.slane %v3556_v63, 1  ;;  %v1796_v62 = vrot.slane %v3503_v33, 3  ;;  %v3341_v33 = vld [vmem:[%s4062_s2 + $0x190] sm:$0xff]  }
  0x38   : > { %3022 = vmatpush3.bf16.msra.mxu0 %v3326_v46  ;;  %2895 = vmatprep.subr.bf16.mxu1 %v3327_v59  ;;  %v3685_v46 = vsel %vm775_vm2, %v783_v35, %v785_v37 }
  0x39   : > { %3023 = vmatprep.subr.bf16.mxu0 %v3328_v2  ;;  %2881 = vmatprep.mubr.bf16.mxu1 %v442_v3  ;;  %v3691_v51 = vsel %vm775_vm2, %v785_v37, %v787_v44  ;;  %v3697_v53 = vsel %vm775_vm2, %v787_v44, %v3688_v50  ;;  %v1800_v3 = vrot.slane %v3526_v47, 3  ;;  %v3774_v37 = vrot.slane %v3604_v31, 2 }
  0x3a   : > { %3009 = vmatprep.mubr.bf16.mxu0 %v1203_v4  ;;  %v1803_v4 = vrot.slane %v3546_v57, 2 }
  0x3b   : > { %2896 = vmatpush3.bf16.msra.mxu1 %v3327_v59  ;;  %v1793_v59 = vrot.slane %v3486_v20, 3  ;;  %v1407_v20 = vrot.slane %v3532_v49, 2  ;;  %v1801_v48 = vor.u32 %v1800_v3, %v1799_v1 }
  0x3c   : > { %3024 = vmatpush3.bf16.msra.mxu0 %v3328_v2  ;;  %2897 = vmatprep.subr.bf16.mxu1 %v3331_v10  ;;  %v1797_v2 = vor.u32 %v1796_v62, %v1795_v60  ;;  %v1805_v57 = vor.u32 %v1804_v7, %v1803_v4  ;;  %v3351_v7 = vld [vmem:[%s4062_s2 + $0x1b8] sm:$0xff]  }
  0x3d   : > { %3025 = vmatprep.subr.bf16.mxu0 %v3333_v14  ;;  %v1794_v61 = vor.u32 %v1793_v59, %v1792_v54  ;;  %v3750_v19 = vsel %vm1399_vm3, %v1407_v20, %v1409_v9  ;;  %v983_v54 = vrot.slane %v3604_v31, 1 }
  0x3e   : > { %2882 = vmatmul.mubr.bf16.gmra.mrb[12].mxu1 %v450_v22  ;;  %v1411_v22 = vrot.slane %v3572_v8, 2  ;;  %v3786_v44 = vsel %vm1791_vm4, %v1801_v48, %v1805_v57 }
  0x3f   : > { %3010 = vmatmul.mubr.bf16.gmra.mrb[12].mxu0 %v1212_v25  ;;  %2898 = vmatpush3.bf16.msra.mxu1 %v3331_v10  ;;  %v1807_v10 = vrot.slane %v3569_v6, 2  ;;  %v1811_v6 = vrot.slane %v3590_v18, 2  ;;  %v250_v18 = vld [vmem:[%s3577_s22 + $0xc] sm:$0xf]  ;;  %v3345_v25 = vld [vmem:[%s4062_s2 + $0x1a0] sm:$0xff]  }
  0x40   : > { %3026 = vmatpush3.bf16.msra.mxu0 %v3333_v14  ;;  %2899 = vmatprep.subr.bf16.mxu1 %v3334_v26  ;;  %v1808_v14 = vrot.slane %v3566_v5, 3  ;;  %v3344_v5 = vld [vmem:[%s4062_s2 + $0xa0] sm:$0xff]   ;;  %v3768_v17 = vsel %vm1399_vm3, %v1409_v9, %v1411_v22 }
  0x41   : > { %3027 = vmatprep.subr.bf16.mxu0 %v3335_v28  ;;  %2901 = vmatprep.mubr.bf16.mxu1 %v3468_v12  ;;  %v1405_v12 = vrot.slane %v3520_v43, 2 }
  0x42   : > { %3029 = vmatprep.mubr.bf16.mxu0 %v1402_v34  ;;  %v1809_v16 = vor.u32 %v1808_v14, %v1807_v10  ;;  %v3346_v34 = vld [vmem:[%s4062_s2 + $0xa8] sm:$0xff]   ;;  %v2033_v10 = vrot.slane %v3572_v8, 3  ;;  %v2029_v14 = vrot.slane %v3532_v49, 3 }
  0x43   : > { %2900 = vmatpush3.bf16.msra.mxu1 %v3334_v26  ;;  %v3719_v0 = vsel %vm1399_vm3, %v1403_v39, %v1405_v12  ;;  %v3737_v47 = vsel %vm1399_vm3, %v1405_v12, %v1407_v20  ;;  %v1813_v26 = vor.u32 %v1812_v23, %v1811_v6  ;;  %v3777_v39 = vcombine.low %v3607_v32, %v250_v18  ;;  %v3348_v20 = vld [vmem:[%s4062_s2 + $0xb0] sm:$0xff]   ;;  %v3355_v18 = vld [vmem:[%s4062_s2 + $0x1c8] sm:$0xff]  }
  0x44   : > { %3028 = vmatpush3.bf16.msra.mxu0 %v3335_v28  ;;  %2917 = vmatprep.subr.bf16.mxu1 %v3336_v30  ;;  %v1815_v28 = vrot.slane %v1196_v40, 2  ;;  %v3780_v40 = vsel %vm1791_vm4, %v1794_v61, %v1797_v2  ;;  %v3792_v32 = vsel %vm1791_vm4, %v1805_v57, %v1809_v16  ;;  %v3811_v61 = vsel %vm775_vm2, %v3688_v50, %v983_v54 }
  0x45   : > { %3045 = vmatprep.subr.bf16.mxu0 %v3337_v45  ;;  %v3795_v52 = vsel %vm1791_vm4, %v1809_v16, %v1813_v26  ;;  %v1820_v59 = vshrl.u32 %v3777_v39, 16  ;;  %v1823_v62 = vshll.u32 %v3777_v39, 16  ;;  %v985_v50 = vrot.slane %v3619_v42, 1 }
  0x46   : > { %2902 = vmatmul.mubr.bf16.vlgmr.msra.gmra.mrb[0].mxu1 %v3471_v13  ;;  %v2035_v57 = vrot.slane %v3604_v31, 3  ;;  %v3353_v31 = vld [vmem:[%s4062_s2 + $0x1c0] sm:$0xff]   ;;  %v3356_v13 = vld [vmem:[%s4062_s2 + $0xd0] sm:$0xff]  }
  0x47   : > { %3030 = vmatmul.mubr.bf16.vlgmr.msra.gmra.mrb[0].mxu0 %v3701_v55  ;;  %2918 = vmatpush3.bf16.msra.mxu1 %v3336_v30  ;;  %v1816_v30 = vrot.slane %v1199_v41, 3  ;;  %v3783_v41 = vsel %vm1791_vm4, %v1797_v2, %v1801_v48  ;;  %v1822_v1 = vrot.slane %v1820_v59, 2  ;;  %v1825_v2 = vrot.slane %v1823_v62, 3  ;;  %v3350_v48 = vld [vmem:[%s4062_s2 + $0xb8] sm:$0xff]   ;;  %v3370_v59 = vld [vmem:[%s4062_s2 + $0x200] sm:$0xff]  }
  0x48   : > { %3046 = vmatpush3.bf16.msra.mxu0 %v3337_v45  ;;  %2919 = vmatprep.subr.bf16.mxu1 %v3338_v58  ;;  %v3347_v45 = vld [vmem:[%s4062_s2 + $0x1a8] sm:$0xff]   ;;  %v3855_v16 = vsel %vm2023_vm5, %v2033_v10, %v2035_v57 }
  0x49   : > { %3047 = vmatprep.subr.bf16.mxu0 %v3339_v21  ;;  %2905 = vmatprep.mubr.bf16.mxu1 %v3477_v15  ;;  %v1817_v12 = vor.u32 %v1816_v30, %v1815_v28  ;;  %v3823_v3 = vor.u32 %v1825_v2, %v1822_v1  ;;  %v3926_v28 = vld [vmem:[%s3577_s22 + $0x10] ss:$0 sps:$4 sm:$0xff]   ;;  %v3363_v30 = vld [vmem:[%s4062_s2 + $0x1e8] sm:$0xff]   ;;  %v3379_v2 = vld [vmem:[%s3462_s21 + $0x18] sm:$0xff]   ;;  %s2407_s22 = sshll.u32 %s4068_s19, 2 }
  0x4a   : > { %3033 = vmatprep.mubr.bf16.mxu0 %v3719_v0  ;;  %v1832_v62 = vshll.u32 %v3926_v28, 16  ;;  %v3378_v1 = vld [vmem:[%s3462_s21 + $0x10] sm:$0xff]   ;;  %s4035_s14 = scalar_lea.vmem %s4064_s4, %s2407_s22 }
  0x4b   : > { %2920 = vmatpush3.bf16.msra.mxu1 %v3338_v58  ;;  %v1415_v58 = vrot.slane %v3619_v42, 2  ;;  %v3807_v60 = vsel %vm1791_vm4, %v1813_v26, %v1817_v12  ;;  %v2031_v42 = vrot.slane %v3556_v63, 3  ;;  %v3839_v9 = vsel %vm1791_vm4, %v1817_v12, %v3823_v3  ;;  %v3367_v12 = vld [vmem:[%s4062_s2 + $0x1f0] sm:$0xff]  }
  0x4c   : > { %3048 = vmatpush3.bf16.msra.mxu0 %v3339_v21  ;;  %2921 = vmatprep.subr.bf16.mxu1 %v3340_v36  ;;  %v3804_v21 = vsel %vm1399_vm3, %v1411_v22, %v3774_v37  ;;  %v781_v22 = vrot.slane %v3495_v27, 1  ;;  %v1607_v26 = vrot.slane %v3777_v39, 2 }
  0x4d   : > { %3049 = vmatprep.subr.bf16.mxu0 %v3341_v33  ;;  %v1416_v4 = vsel %vm1399_vm3, %v3774_v37, %v1415_v58  ;;  %v3849_v6 = vsel %vm2023_vm5, %v2031_v42, %v2033_v10  ;;  %v3369_v58 = vld [vmem:[%s4062_s2 + $0x1f8] sm:$0xff]  }
  0x4e   : > { %2906 = vmatmul.mubr.bf16.gmra.mrb[4].mxu1 %v3495_v27 }
  0x4f   : > { %3034 = vmatmul.mubr.bf16.gmra.mrb[4].mxu0 %v3737_v47  ;;  %2922 = vmatpush3.bf16.msra.mxu1 %v3340_v36  ;;  %v3349_v36 = vld [vmem:[%s4062_s2 + $0x1b0] sm:$0xff]  }
  0x50   : > { %3050 = vmatpush3.bf16.msra.mxu0 %v3341_v33  ;;  %2923 = vmatprep.subr.bf16.mxu1 %v3342_v11  ;;  %v3826_v33 = vsel %vm775_vm2, %v983_v54, %v985_v50  ;;  %v3368_v54 = vld [vmem:[%s4062_s2 + $0xf8] sm:$0xff]   ;;  %v2025_v50 = vrot.slane %v3379_v2, 3 }
  0x51   : > { %3051 = vmatprep.subr.bf16.mxu0 %v3343_v56  ;;  %2909 = vmatprep.mubr.bf16.mxu1 %v3520_v43 }
  0x52   : > { %3037 = vmatprep.mubr.bf16.mxu0 %v3750_v19 }
  0x53   : > { %2924 = vmatpush3.bf16.msra.mxu1 %v3342_v11  ;;  %v2027_v11 = vrot.slane %v3520_v43, 3 }
  0x54   : > { %3052 = vmatpush3.bf16.msra.mxu0 %v3343_v56  ;;  %2925 = vmatprep.subr.bf16.mxu1 %v3344_v5  ;;  %v779_v56 = vrot.slane %v3477_v15, 1 }
  0x55   : > { %3053 = vmatprep.subr.bf16.mxu0 %v3345_v25 }
  0x56   : > { %2910 = vmatmul.mubr.bf16.gmra.mrb[8].mxu1 %v3532_v49  ;;  %v3860_v49 = vsel %vm2023_vm5, %v2027_v11, %v2029_v14  ;;  %v3879_v23 = vsel %vm775_vm2, %v777_v24, %v779_v56  ;;  %v3889_v27 = vsel %vm775_vm2, %v779_v56, %v781_v22  ;;  %v3357_v24 = vld [vmem:[%s4062_s2 + $0x1d0] sm:$0xff]  }
  0x57   : > { %3038 = vmatmul.mubr.bf16.gmra.mrb[8].mxu0 %v3768_v17  ;;  %2926 = vmatpush3.bf16.msra.mxu1 %v3344_v5  ;;  %v3872_v5 = vsel %vm2023_vm5, %v2029_v14, %v2031_v42 }
  0x58   : > { %3054 = vmatpush3.bf16.msra.mxu0 %v3345_v25  ;;  %2927 = vmatprep.subr.bf16.mxu1 %v3346_v34  ;;  %v3359_v25 = vld [vmem:[%s4062_s2 + $0x1d8] sm:$0xff]  }
  0x59   : > { %3055 = vmatprep.subr.bf16.mxu0 %v3347_v45  ;;  %2913 = vmatprep.mubr.bf16.mxu1 %v3556_v63  ;;  %v2037_v63 = vrot.slane %v3777_v39, 3 }
  0x5a   : > { %3041 = vmatprep.mubr.bf16.mxu0 %v3804_v21 }
  0x5b   : > { %2928 = vmatpush3.bf16.msra.mxu1 %v3346_v34  ;;  %v3865_v15 = vsel %vm2023_vm5, %v2035_v57, %v2037_v63  ;;  %v3365_v34 = vld [vmem:[%s4062_s2 + $0xf0] sm:$0xff]  }
  0x5c   : > { %3056 = vmatpush3.bf16.msra.mxu0 %v3347_v45  ;;  %2929 = vmatprep.subr.bf16.mxu1 %v3348_v20  ;;  %v1609_v45 = vrot.slane %v3926_v28, 2 }
  0x5d   : > { %3057 = vmatprep.subr.bf16.mxu0 %v3349_v36 }
  0x5e   : > { %2914 = vmatmul.mubr.bf16.gmra.mrb[12].mxu1 %v3572_v8  ;;  %v3352_v8 = vld [vmem:[%s4062_s2 + $0xc0] sm:$0xff]  }
  0x5f   : > { %3042 = vmatmul.mubr.bf16.gmra.mrb[12].mxu0 %v1416_v4  ;;  %2930 = vmatpush3.bf16.msra.mxu1 %v3348_v20  ;;  %v1834_v20 = vrot.slane %v1832_v62, 3 }
  0x60   : > { %3058 = vmatpush3.bf16.msra.mxu0 %v3349_v36  ;;  %2931 = vmatprep.subr.bf16.mxu1 %v3350_v48  ;;  %v2024_v36 = vrot.slane %v3378_v1, 3 }
  0x61   : > { %3059 = vmatprep.subr.bf16.mxu0 %v3351_v7  ;;  %2933 = vmatprep.mubr.bf16.mxu1 %v3668_v29  ;;  %v3354_v29 = vld [vmem:[%s4062_s2 + $0xc8] sm:$0xff]  }
  0x62   : > { %3061 = vmatprep.mubr.bf16.mxu0 %v3701_v55  ;;  %v3903_v55 = vsel %vm775_vm2, %v781_v22, %v783_v35  ;;  %v3360_v35 = vld [vmem:[%s4062_s2 + $0xe0] sm:$0xff]  }
  0x63   : > { %2932 = vmatpush3.bf16.msra.mxu1 %v3350_v48 }
  0x64   : > { %3060 = vmatpush3.bf16.msra.mxu0 %v3351_v7  ;;  %2949 = vmatprep.subr.bf16.mxu1 %v3352_v8 }
  0x65   : > { %3077 = vmatprep.subr.bf16.mxu0 %v3353_v31 }
  0x66   : > { %2934 = vmatmul.mubr.bf16.vlgmr.msra.gmra.mrb[0].mxu1 %v3879_v23 }
  0x67   : > { %3062 = vmatmul.mubr.bf16.vlgmr.msra.gmra.mrb[0].mxu0 %v3719_v0  ;;  %2950 = vmatpush3.bf16.msra.mxu1 %v3352_v8  ;;  %v3358_v0 = vld [vmem:[%s4062_s2 + $0xd8] sm:$0xff]  }
  0x68   : > { %3078 = vmatpush3.bf16.msra.mxu0 %v3353_v31  ;;  %2951 = vmatprep.subr.bf16.mxu1 %v3354_v29 }
  0x69   : > { %3079 = vmatprep.subr.bf16.mxu0 %v3355_v18  ;;  %2937 = vmatprep.mubr.bf16.mxu1 %v3889_v27 }
  0x6a   : > { %3065 = vmatprep.mubr.bf16.mxu0 %v3737_v47  ;;  %v3361_v47 = vld [vmem:[%s4062_s2 + $0x1e0] sm:$0xff]  }
  0x6b   : > { %2952 = vmatpush3.bf16.msra.mxu1 %v3354_v29 }
  0x6c   : > { %3080 = vmatpush3.bf16.msra.mxu0 %v3355_v18  ;;  %2953 = vmatprep.subr.bf16.mxu1 %v3356_v13 }
  0x6d   : > { %3081 = vmatprep.subr.bf16.mxu0 %v3357_v24 }
  0x6e   : > { %2938 = vmatmul.mubr.bf16.gmra.mrb[4].mxu1 %v3903_v55 }
  0x6f   : > { %3066 = vmatmul.mubr.bf16.gmra.mrb[4].mxu0 %v3750_v19  ;;  %2954 = vmatpush3.bf16.msra.mxu1 %v3356_v13  ;;  %v3362_v19 = vld [vmem:[%s4062_s2 + $0xe8] sm:$0xff]  }
  0x70   : > { %3082 = vmatpush3.bf16.msra.mxu0 %v3357_v24  ;;  %2955 = vmatprep.subr.bf16.mxu1 %v3358_v0 }
  0x71   : > { %3083 = vmatprep.subr.bf16.mxu0 %v3359_v25  ;;  %2941 = vmatprep.mubr.bf16.mxu1 %v3685_v46 }
  0x72   : > { %3069 = vmatprep.mubr.bf16.mxu0 %v3768_v17  ;;  %v1608_v17 = vsel %vm1399_vm3, %v3774_v37, %v1607_v26  ;;  %v1610_v37 = vsel %vm1399_vm3, %v1607_v26, %v1609_v45 }
  0x73   : > { %2956 = vmatpush3.bf16.msra.mxu1 %v3358_v0 }
  0x74   : > { %3084 = vmatpush3.bf16.msra.mxu0 %v3359_v25  ;;  %2957 = vmatprep.subr.bf16.mxu1 %v3360_v35 }
  0x75   : > { %3085 = vmatprep.subr.bf16.mxu0 %v3361_v47 }
  0x76   : > { %2942 = vmatmul.mubr.bf16.gmra.mrb[8].mxu1 %v3691_v51 }
  0x77   : > { %3070 = vmatmul.mubr.bf16.gmra.mrb[8].mxu0 %v3804_v21  ;;  %2958 = vmatpush3.bf16.msra.mxu1 %v3360_v35  ;;  %v3372_v21 = vld [vmem:[%s4062_s2 + $0x210] sm:$0xff]  }
  0x78   : > { %3086 = vmatpush3.bf16.msra.mxu0 %v3361_v47  ;;  %2959 = vmatprep.subr.bf16.mxu1 %v3362_v19 }
  0x79   : > { %3087 = vmatprep.subr.bf16.mxu0 %v3363_v30  ;;  %2945 = vmatprep.mubr.bf16.mxu1 %v3697_v53 }
  0x7a   : > { %3073 = vmatprep.mubr.bf16.mxu0 %v1608_v17 }
  0x7b   : > { %2960 = vmatpush3.bf16.msra.mxu1 %v3362_v19  ;;  %v4021_v19 = vld [vmem:[%s4063_s3] ss:$0 sm:$0xff] }
  0x7c   : > { %3088 = vmatpush3.bf16.msra.mxu0 %v3363_v30  ;;  %2961 = vmatprep.subr.bf16.mxu1 %v3365_v34 }
  0x7d   : > { %3089 = vmatprep.subr.bf16.mxu0 %v3367_v12 }
  0x7e   : > { %2946 = vmatmul.mubr.bf16.gmra.mrb[12].mxu1 %v3708_v38  ;;  %v3371_v38 = vld [vmem:[%s4062_s2 + $0x208] sm:$0xff]  }
  0x7f   : > { %3074 = vmatmul.mubr.bf16.gmra.mrb[12].mxu0 %v1610_v37  ;;  %2962 = vmatpush3.bf16.msra.mxu1 %v3365_v34 }
  0x80   : > { %3090 = vmatpush3.bf16.msra.mxu0 %v3367_v12  ;;  %2963 = vmatprep.subr.bf16.mxu1 %v3368_v54 }
  0x81   : > { %3091 = vmatprep.subr.bf16.mxu0 %v3369_v58  ;;  %2965 = vmatprep.mubr.bf16.mxu1 %v3879_v23 }
  0x82   : > { %3093 = vmatprep.mubr.bf16.mxu0 %v3780_v40  ;;  %v3373_v40 = vld [vmem:[%s4062_s2 + $0x218] sm:$0xff]  }
  0x83   : > { %2964 = vmatpush3.bf16.msra.mxu1 %v3368_v54 }
  0x84   : > { %3092 = vmatpush3.bf16.msra.mxu0 %v3369_v58  ;;  %3141 = vmatprep.subr.bf16.mxu1 %v3370_v59 }
  0x85   : > { %3109 = vmatprep.subr.bf16.mxu0 %v3370_v59 }
  0x86   : > { %2966 = vmatmul.mubr.bf16.vlgmr.msra.gmra.mrb[0].mxu1 %v3889_v27 }
  0x87   : > { %3094 = vmatmul.mubr.bf16.vlgmr.msra.gmra.mrb[0].mxu0 %v3783_v41  ;;  %3149 = vmatpush3.bf16.msra.mxu1 %v3370_v59  ;;  %v3374_v41 = vld [vmem:[%s4062_s2 + $0x220] sm:$0xff]  }
  0x88   : > { %3110 = vmatpush3.bf16.msra.mxu0 %v3370_v59  ;;  %3142 = vmatprep.subr.bf16.mxu1 %v3371_v38 }
  0x89   : > { %3111 = vmatprep.subr.bf16.mxu0 %v3371_v38  ;;  %2969 = vmatprep.mubr.bf16.mxu1 %v3903_v55 }
  0x8a   : > { %3097 = vmatprep.mubr.bf16.mxu0 %v3786_v44  ;;  %v1829_v44 = vshrl.u32 %v3926_v28, 16 }
  0x8b   : > { %3150 = vmatpush3.bf16.msra.mxu1 %v3371_v38 }
  0x8c   : > { %3112 = vmatpush3.bf16.msra.mxu0 %v3371_v38  ;;  %3143 = vmatprep.subr.bf16.mxu1 %v3372_v21 }
  0x8d   : > { %3113 = vmatprep.subr.bf16.mxu0 %v3372_v21 }
  0x8e   : > { %2970 = vmatmul.mubr.bf16.gmra.mrb[4].mxu1 %v3685_v46  ;;  %v3375_v46 = vld [vmem:[%s4062_s2 + $0x228] sm:$0xff]  }
  0x8f   : > { %3098 = vmatmul.mubr.bf16.gmra.mrb[4].mxu0 %v3792_v32  ;;  %3151 = vmatpush3.bf16.msra.mxu1 %v3372_v21  ;;  %v1831_v32 = vrot.slane %v1829_v44, 2 }
  0x90   : > { %3114 = vmatpush3.bf16.msra.mxu0 %v3372_v21  ;;  %3144 = vmatprep.subr.bf16.mxu1 %v3373_v40 }
  0x91   : > { %3115 = vmatprep.subr.bf16.mxu0 %v3373_v40  ;;  %2973 = vmatprep.mubr.bf16.mxu1 %v3691_v51  ;;  %v1835_v51 = vor.u32 %v1834_v20, %v1831_v32 }
  0x92   : > { %3101 = vmatprep.mubr.bf16.mxu0 %v3795_v52  ;;  %v3376_v52 = vld [vmem:[%s4062_s2 + $0x230] sm:$0xff]  }
  0x93   : > { %3152 = vmatpush3.bf16.msra.mxu1 %v3373_v40 }
  0x94   : > { %3116 = vmatpush3.bf16.msra.mxu0 %v3373_v40  ;;  %3145 = vmatprep.subr.bf16.mxu1 %v3374_v41 }
  0x95   : > { %3117 = vmatprep.subr.bf16.mxu0 %v3374_v41 }
  0x96   : > { %2974 = vmatmul.mubr.bf16.gmra.mrb[8].mxu1 %v3697_v53  ;;  %v1836_v53 = vsel %vm1791_vm4, %v3823_v3, %v1835_v51  ;;  %v2028_v3 = vsel %vm2023_vm5, %v2025_v50, %v2027_v11 }
  0x97   : > { %3102 = vmatmul.mubr.bf16.gmra.mrb[8].mxu0 %v3807_v60  ;;  %3153 = vmatpush3.bf16.msra.mxu1 %v3374_v41  ;;  %v3377_v60 = vld [vmem:[%s4062_s2 + $0x238] sm:$0xff]  }
  0x98   : > { %3118 = vmatpush3.bf16.msra.mxu0 %v3374_v41  ;;  %3146 = vmatprep.subr.bf16.mxu1 %v3375_v46 }
  0x99   : > { %3119 = vmatprep.subr.bf16.mxu0 %v3375_v46  ;;  %2977 = vmatprep.mubr.bf16.mxu1 %v3811_v61  ;;  %v2026_v61 = vsel %vm2023_vm5, %v2024_v36, %v2025_v50 }
  0x9a   : > { %3105 = vmatprep.mubr.bf16.mxu0 %v3839_v9 }
  0x9b   : > { %3154 = vmatpush3.bf16.msra.mxu1 %v3375_v46 }
  0x9c   : > { %3120 = vmatpush3.bf16.msra.mxu0 %v3375_v46  ;;  %3147 = vmatprep.subr.bf16.mxu1 %v3376_v52 }
  0x9d   : > { %3121 = vmatprep.subr.bf16.mxu0 %v3376_v52 }
  0x9e   : > { %2978 = vmatmul.mubr.bf16.gmra.mrb[12].mxu1 %v3826_v33  ;;  %v2039_v33 = vrot.slane %v3926_v28, 3 }
  0x9f   : > { %3106 = vmatmul.mubr.bf16.gmra.mrb[12].mxu0 %v1836_v53  ;;  %3155 = vmatpush3.bf16.msra.mxu1 %v3376_v52 }
  0xa0   : > { %3122 = vmatpush3.bf16.msra.mxu0 %v3376_v52  ;;  %3148 = vmatprep.subr.bf16.mxu1 %v3377_v60  ;;  %v2040_v4 = vsel %vm2023_vm5, %v2037_v63, %v2039_v33 }
  0xa1   : > { %3123 = vmatprep.subr.bf16.mxu0 %v3377_v60  ;;  %3125 = vmatprep.mubr.bf16.mxu0 %v2026_v61 }
  0xa2   : > { %3133 = vmatprep.mubr.bf16.mxu1 %v3849_v6 }
  0xa3   : > { %3156 = vmatpush3.bf16.msra.mxu1 %v3377_v60 }
  0xa4   : > { %3124 = vmatpush3.bf16.msra.mxu0 %v3377_v60 }
  0xa6   : > { %3134 = vmatmul.mubr.bf16.vlgmr.msra.gmra.mrb[16].mxu1 %v3855_v16 }
  0xa7   : > { %3126 = vmatmul.mubr.bf16.vlgmr.msra.gmra.mrb[0].mxu0 %v2028_v3  ;;  %3137 = vmatprep.mubr.bf16.mxu1 %v3865_v15 }
  0xa8   : > { %3129 = vmatprep.mubr.bf16.mxu0 %v3860_v49 }
  0xae   : > { %3138 = vmatmul.mubr.bf16.gmra.mrb[20].mxu1 %v2040_v4 }
  0xaf   : > { %3130 = vmatmul.mubr.bf16.gmra.mrb[4].mxu0 %v3872_v5 }
 0x159   : > { %v2967_v48 = vpop.f32.mrb[0].mxu1 }
 0x15a   : > { %v1071_v43 = vpop.f32.mrb[1].mxu1 }
 0x15b   : > { %v2968_v42 = vpop.f32.mrb[2].mxu1 }
 0x15c   : > { %v1074_v7 = vpop.f32.mrb[3].mxu1 }
 0x161   : > { %v4009_v9 = vpop.f32.mrb[4].mxu1 }
 0x162   : > { %v4011_v10 = vpop.f32.mrb[5].mxu1 }
 0x163   : > { %v4013_v11 = vpop.f32.mrb[6].mxu1 }
 0x164   : > { %v4015_v57 = vpop.f32.mrb[7].mxu1 }
 0x169   : > { %v2975_v14 = vpop.f32.mrb[8].mxu1 }
 0x16a   : > { %v3103_v56 = vpop.f32.mrb[8].mxu0  ;;  %v1103_v39 = vpop.f32.mrb[9].mxu1 }
 0x16b   : > { %v3165_v6 = vadd.f32 %v3103_v56, %v2975_v14  ;;  %v1959_v63 = vpop.f32.mrb[9].mxu0  ;;  %v2976_v8 = vpop.f32.mrb[10].mxu1 }
 0x16c   : > { %v3167_v16 = vadd.f32 %v1959_v63, %v1103_v39  ;;  %v3104_v49 = vpop.f32.mrb[10].mxu0  ;;  %v1106_v15 = vpop.f32.mrb[11].mxu1 }
 0x16d   : > { %v3169_v31 = vadd.f32 %v3104_v49, %v2976_v8  ;;  %v1962_v5 = vpop.f32.mrb[11].mxu0 }
 0x16e   : > { %v3171_v22 = vadd.f32 %v1962_v5, %v1106_v15 }
 0x171   : > { %v2979_v23 = vpop.f32.mrb[12].mxu1 }
 0x172   : > { %v3107_v29 = vpop.f32.mrb[12].mxu0  ;;  %v1119_v18 = vpop.f32.mrb[13].mxu1 }
 0x173   : > { %v3173_v27 = vadd.f32 %v3107_v29, %v2979_v23  ;;  %v1975_v13 = vpop.f32.mrb[13].mxu0  ;;  %v2980_v24 = vpop.f32.mrb[14].mxu1 }
 0x174   : > { %v3175_v55 = vadd.f32 %v1975_v13, %v1119_v18  ;;  %v3108_v0 = vpop.f32.mrb[14].mxu0  ;;  %v1122_v25 = vpop.f32.mrb[15].mxu1 }
 0x175   : > { %v3177_v35 = vadd.f32 %v3108_v0, %v2980_v24  ;;  %v1978_v47 = vpop.f32.mrb[15].mxu0 }
 0x176   : > { %v3179_v26 = vadd.f32 %v1978_v47, %v1122_v25 }
 0x179   : > { %v3135_v28 = vpop.f32.mrb[16].mxu1 }
 0x17a   : > { %v3127_v30 = vpop.f32.mrb[0].mxu0  ;;  %v3166_v17 = vadd.f32 %v3165_v6, %v3135_v28  ;;  %v2163_v34 = vpop.f32.mrb[17].mxu1 }
 0x17b   : > { %v3157_v45 = vadd.f32 %v3127_v30, %v2967_v48  ;;  %v2131_v12 = vpop.f32.mrb[1].mxu0  ;;  %v3168_v37 = vadd.f32 %v3167_v16, %v2163_v34  ;;  %v3136_v54 = vpop.f32.mrb[18].mxu1 }
 0x17c   : > { %v2227_v58 = vadd.f32 %v3166_v17, %v4021_v19  ;;  %v3158_v59 = vadd.f32 %v2131_v12, %v1071_v43  ;;  %v3128_v38 = vpop.f32.mrb[2].mxu0  ;;  %v3170_v21 = vadd.f32 %v3169_v31, %v3136_v54  ;;  %v2166_v40 = vpop.f32.mrb[19].mxu1 }
 0x17d   : > { %v2219_v41 = vadd.f32 %v3157_v45, %v4021_v19  ;;  %v2225_v44 = vadd.f32 %v3168_v37, %v4021_v19  ;;  %v3159_v62 = vadd.f32 %v3128_v38, %v2968_v42  ;;  %v2134_v46 = vpop.f32.mrb[3].mxu0  ;;  %v3172_v32 = vadd.f32 %v3171_v22, %v2166_v40 }
 0x17e   : > { %v2217_v20 = vadd.f32 %v3158_v59, %v4021_v19  ;;  %v2228_v51 = vadd.f32 %v3170_v21, %v4021_v19  ;;  %v3160_v52 = vadd.f32 %v2134_v46, %v1074_v7  ;;  %v2243_v2 = vmax.f32 %v2227_v58, 0.0 }
 0x17f   : > { %v2220_v1 = vadd.f32 %v3159_v62, %v4021_v19  ;;  %v2226_v36 = vadd.f32 %v3172_v32, %v4021_v19  ;;  %v2235_v60 = vmax.f32 %v2219_v41, 0.0  ;;  %v2241_v61 = vmax.f32 %v2225_v44, 0.0 }
 0x180   : > { %v2244_v50 = vmax.f32 %v2228_v51, 0.0  ;;  %v2218_v53 = vadd.f32 %v3160_v52, %v4021_v19  ;;  %v2233_v48 = vmax.f32 %v2217_v20, 0.0 }
 0x181   : > { %v2236_v3 = vmax.f32 %v2220_v1, 0.0  ;;  %v2242_v33 = vmax.f32 %v2226_v36, 0.0  ;;  %v3139_v4 = vpop.f32.mrb[20].mxu1 }
 0x182   : > { %v2690_v43 = vpack.c.bf16 %v2244_v50, %v2243_v2  ;;  %v2234_v42 = vmax.f32 %v2218_v53, 0.0  ;;  %v3131_v7 = vpop.f32.mrb[4].mxu0  ;;  %v3174_v14 = vadd.f32 %v3173_v27, %v3139_v4  ;;  %v2179_v56 = vpop.f32.mrb[21].mxu1 }
 0x183   : > { %v2670_v39 = vpack.c.bf16 %v2236_v3, %v2235_v60  ;;  %v2685_v6 = vpack.c.bf16 %v2242_v33, %v2241_v61  ;;  %v3161_v63 = vadd.f32 %v3131_v7, %v4009_v9  ;;  %v2147_v8 = vpop.f32.mrb[5].mxu0  ;;  %v3176_v16 = vadd.f32 %v3175_v55, %v2179_v56  ;;  %v3140_v49 = vpop.f32.mrb[22].mxu1 }
 0x184   : > { %2706 = vst [vmem:[%s4035_s14 + $0x28] sm:$0xff] %v2690_v43   ;;  %v2665_v15 = vpack.c.bf16 %v2234_v42, %v2233_v48  ;;  %v2231_v31 = vadd.f32 %v3174_v14, %v4021_v19  ;;  %v3162_v5 = vadd.f32 %v2147_v8, %v4011_v10  ;;  %v3132_v22 = vpop.f32.mrb[6].mxu0  ;;  %v3178_v23 = vadd.f32 %v3177_v35, %v3140_v49  ;;  %v2182_v29 = vpop.f32.mrb[23].mxu1 }
 0x185   : > { %2702 = vst [vmem:[%s4035_s14 + $0x8] sm:$0xff] %v2670_v39   ;;  %2705 = vst [vmem:[%s4035_s14 + $0x20] sm:$0xff] %v2685_v6   ;;  %v2223_v18 = vadd.f32 %v3161_v63, %v4021_v19  ;;  %v2229_v27 = vadd.f32 %v3176_v16, %v4021_v19  ;;  %v3163_v9 = vadd.f32 %v3132_v22, %v4013_v11  ;;  %v2150_v13 = vpop.f32.mrb[7].mxu0 }
 0x186   : > { %v3180_v24 = vadd.f32 %v3179_v26, %v2182_v29  ;;  %2666 = vst [vmem:[%s4035_s14] sm:$0xff] %v2665_v15   ;;  %v2221_v55 = vadd.f32 %v3162_v5, %v4021_v19  ;;  %v2232_v0 = vadd.f32 %v3178_v23, %v4021_v19  ;;  %v3164_v10 = vadd.f32 %v2150_v13, %v4015_v57 }
 0x187   : > { %v2224_v25 = vadd.f32 %v3163_v9, %v4021_v19  ;;  %v2247_v47 = vmax.f32 %v2231_v31, 0.0  ;;  %v2239_v26 = vmax.f32 %v2223_v18, 0.0  ;;  %v2245_v30 = vmax.f32 %v2229_v27, 0.0 }
 0x188   : > { %v2230_v35 = vadd.f32 %v3180_v24, %v4021_v19  ;;  %v2248_v28 = vmax.f32 %v2232_v0, 0.0  ;;  %v2222_v11 = vadd.f32 %v3164_v10, %v4021_v19  ;;  %v2237_v45 = vmax.f32 %v2221_v55, 0.0 }
 0x189   : > { %v2240_v17 = vmax.f32 %v2224_v25, 0.0 }
 0x18a   : > { %v2246_v34 = vmax.f32 %v2230_v35, 0.0  ;;  %v2700_v12 = vpack.c.bf16 %v2248_v28, %v2247_v47  ;;  %v2238_v37 = vmax.f32 %v2222_v11, 0.0 }
 0x18b   : > { %v2680_v54 = vpack.c.bf16 %v2240_v17, %v2239_v26 }
 0x18c   : > { %v2695_v57 = vpack.c.bf16 %v2246_v34, %v2245_v30  ;;  %2708 = vst [vmem:[%s4035_s14 + $0x38] sm:$0xff] %v2700_v12   ;;  %v2675_v58 = vpack.c.bf16 %v2238_v37, %v2237_v45 }
 0x18d   : > { %2704 = vst [vmem:[%s4035_s14 + $0x18] sm:$0xff] %v2680_v54  }
 0x18e   : > { %2707 = vst [vmem:[%s4035_s14 + $0x30] sm:$0xff] %v2695_v57   ;;  %2703 = vst [vmem:[%s4035_s14 + $0x10] sm:$0xff] %v2675_v58  }
 0x18f PF: > { %s14_s15 = sadd.s32 1, %s3386_s15  }
 0x190   : > { %p11_p6 = scmp.ge.s32.totalorder %s14_s15, 8  }
 0x192   :  { %13 = sbr.rel (!%p11_p6) target bundleno = 1 (0x1), region = 77 }

// kernel: unet_forward.39
= control target key start
LH: loop header
LB: loop body
LE: loop exit
PB: predicated region body
PF: predicated region fallthrough
CT: control target
= control target key end

     0   :  { %s96_s0 = inlined_call_operand.vmem [shape: bf16[8,2048], index: 0, kind: input, shape index: {}]   ;;  %s97_s1 = inlined_call_operand.vmem [shape: bf16[8,512], index: 1, kind: output, shape index: {}]  }
   0x1   :  { %v8_v0 = vld [vmem:[%s96_s0] sm:$0xff]  ;;  %v9_v1 = vld [vmem:[%s96_s0 + $0x8] sm:$0xff]  ;;  %v10_v5 = vld [vmem:[%s96_s0 + $0x10] sm:$0xff] }
   0x2   :  { %v12_v2 = vld [vmem:[%s96_s0 + $0x20] sm:$0xff]  ;;  %v13_v3 = vld [vmem:[%s96_s0 + $0x28] sm:$0xff]  ;;  %v11_v6 = vld [vmem:[%s96_s0 + $0x18] sm:$0xff] }
   0x3   :  { %v16_v4 = vmax.bf16 %v12_v2, %v8_v0  ;;  %v17_v7 = vmax.bf16 %v13_v3, %v9_v1  ;;  %v14_v8 = vld [vmem:[%s96_s0 + $0x30] sm:$0xff]  ;;  %v15_v9 = vld [vmem:[%s96_s0 + $0x38] sm:$0xff] }
   0x4   :  { %v18_v11 = vmax.bf16 %v14_v8, %v10_v5  ;;  %v19_v12 = vmax.bf16 %v15_v9, %v11_v6 }
   0x5   :  { %v21_v10 = vrot.slane %v16_v4, 4  ;;  %v25_v13 = vrot.slane %v17_v7, 4 }
   0x6   :  { %v29_v15 = vrot.slane %v18_v11, 4  ;;  %v33_v16 = vrot.slane %v19_v12, 4 }
   0x7   :  { %v23_v14 = vmax.bf16 %v21_v10, %v16_v4  ;;  %v27_v17 = vmax.bf16 %v25_v13, %v17_v7 }
   0x8   :  { %v31_v18 = vmax.bf16 %v29_v15, %v18_v11  ;;  %v35_v19 = vmax.bf16 %v33_v16, %v19_v12 }
   0x9   :  { %v54_v20 = vcombine.low %v23_v14, %v27_v17 }
   0xa   :  { %v55_v21 = vcombine.low %v31_v18, %v35_v19 }
   0xb   :  { %48 = vst [vmem:[%s97_s1] sm:$0xff] %v54_v20 }
   0xc   :  { %49 = vst [vmem:[%s97_s1 + $0x8] sm:$0xff] %v55_v21 }

// kernel: unet_forward.42
= control target key start
LH: loop header
LB: loop body
LE: loop exit
PB: predicated region body
PF: predicated region fallthrough
CT: control target
= control target key end

     0   :  { %s56_s0 = inlined_call_operand.vmem [shape: bf16[4,1024], index: 0, kind: input, shape index: {}]   ;;  %s57_s1 = inlined_call_operand.vmem [shape: bf16[4,256], index: 1, kind: output, shape index: {}]  }
   0x1   :  { %v8_v0 = vld [vmem:[%s56_s0] sm:$0xff]  ;;  %v9_v1 = vld [vmem:[%s56_s0 + $0x8] sm:$0xff] }
   0x2   :  { %v10_v2 = vmax.bf16 %v9_v1, %v8_v0 }
   0x4   :  { %v12_v3 = vrot.slane %v10_v2, 2  ;;  %v15_v4 = vrot.slane %v10_v2, 4  ;;  %v17_v5 = vrot.slane %v10_v2, 6 }
   0x6   :  { %v14_v6 = vmax.bf16 %v12_v3, %v10_v2  ;;  %v19_v7 = vmax.bf16 %v17_v5, %v15_v4 }
   0x8   :  { %v22_v8 = vcombine.low %v14_v6, %v19_v7 }
   0xa   :  { %36 = vst.sshfl [vmem:[%s57_s1] sm:$0x33 pattern:$0x76325410] %v22_v8 }

// kernel: unet_forward.37
= control target key start
LH: loop header
LB: loop body
LE: loop exit
PB: predicated region body
PF: predicated region fallthrough
CT: control target
= control target key end

     0   :  { %s3496_s15 = smov 0   ;;  %s4171_s0 = inlined_call_operand.vmem [shape: bf16[384,128], index: 0, kind: input, shape index: {}, may-alias: {0,1}]   ;;  %s4172_s1 = inlined_call_operand.vmem [shape: bf16[384,128], index: 1, kind: input, shape index: {}, may-alias: {0,1}]   ;;  %s4173_s2 = inlined_call_operand.vmem [shape: bf16[9,128,128], index: 2, kind: input, shape index: {}]   ;;  %s4174_s3 = inlined_call_operand.vmem [shape: f32[1,128], index: 3, kind: input, shape index: {}]   ;;  %s4175_s4 = inlined_call_operand.vmem [shape: bf16[256,128], index: 4, kind: output, shape index: {}]  }
   0x1 LB: > { %s2474_s16 = sadd.s32 4294967295, %s3469_s15   ;;  %p2478_p0 = scmp.ge.s32.totalorder %s3469_s15, 1  ;;  %s3469_s15 = sphi %s3496_s15, %s14_s15  }
   0x2   : > { %p178_p1 = scmp.lt.s32.totalorder %s3469_s15, 3 }
   0x4   : > { %p179_p2 = pnand %p2478_p0, %p178_p1 }
   0x5   : > { %v3369_v0 = vld [vmem:[%s4173_s2 + $0x40] sm:$0xff] (!%p179_p2)   ;;  %s3507_s19 = sshll.u32 (!%p179_p2), %s2474_s16, 4  ;;  %v3371_v2 = vld [vmem:[%s4173_s2 + $0x48] sm:$0xff] (!%p179_p2)   ;;  %v3373_v4 = vld [vmem:[%s4173_s2 + $0x50] sm:$0xff] (!%p179_p2)   ;;  %vm372_vm0 = vsmask.f32 (!%p179_p2), 7424 }
   0x6   : > { %182 = sbr.rel (%p179_p2) target bundleno = 400 (0x190), region = 36  ;;  %v3370_v1 = vld [vmem:[%s4173_s2 + $0x100] sm:$0xff] (!%p179_p2)   ;;  %2929 = vmatprep.subr.bf16.mxu1 (!%p179_p2), %v3369_v0  ;;  %p211_p3 = scmp.lt.s32.totalorder (!%p179_p2), %s3507_s19, 47  ;;  %v3372_v3 = vld [vmem:[%s4173_s2 + $0x108] sm:$0xff] (!%p179_p2)   ;;  %v3374_v5 = vld [vmem:[%s4173_s2 + $0x110] sm:$0xff] (!%p179_p2)   ;;  %vm1457_vm2 = vcmask (!%p179_p2), 1045504  }
   0x7   : > { %3057 = vmatprep.subr.bf16.mxu0 (!%p179_p2), %v3370_v1  ;;  %2930 = vmatpush3.bf16.msra.mxu1 (!%p179_p2), %v3369_v0  ;;  %s2718_s5 = sadd.s32 (!%p179_p2), 16, %s3507_s19  ;;  %v3375_v6 = vld [vmem:[%s4173_s2 + $0x58] sm:$0xff] (!%p179_p2)   ;;  %v3377_v8 = vld [vmem:[%s4173_s2 + $0x60] sm:$0xff] (!%p179_p2)   ;;  %v3379_v10 = vld [vmem:[%s4173_s2 + $0x68] sm:$0xff] (!%p179_p2)   ;;  %vm1190_vm1 = vsmask.f32 (!%p179_p2), 6400 }
   0x8   : > { %3058 = vmatpush3.bf16.msra.mxu0 (!%p179_p2), %v3370_v1  ;;  %2931 = vmatprep.subr.bf16.mxu1 (!%p179_p2), %v3371_v2  ;;  %v3376_v7 = vld [vmem:[%s4173_s2 + $0x118] sm:$0xff] (!%p179_p2)   ;;  %p218_p4 = scmp.lt.s32.totalorder (!%p179_p2), %s2718_s5, 47  ;;  %v3378_v9 = vld [vmem:[%s4173_s2 + $0x120] sm:$0xff] (!%p179_p2)   ;;  %v3380_v11 = vld [vmem:[%s4173_s2 + $0x128] sm:$0xff] (!%p179_p2)   ;;  %vm765_vm3 = vcmask (!%p179_p2), 1046528   ;;  %vm2100_vm5 = vcmask (!%p179_p2), 1044480  }
   0x9   : > { %3059 = vmatprep.subr.bf16.mxu0 (!%p179_p2), %v3372_v3  ;;  %v3381_v14 = vld [vmem:[%s4173_s2 + $0x70] sm:$0xff] (!%p179_p2)   ;;  %v3383_v30 = vld [vmem:[%s4173_s2 + $0x78] sm:$0xff] (!%p179_p2)   ;;  %v3390_v46 = vld [vmem:[%s4173_s2] sm:$0xff] (!%p179_p2)   ;;  %vm1868_vm4 = vsmask.f32 (!%p179_p2), 5376  ;;  %p225_p5 = scmp.lt.s32.totalorder (!%p179_p2), %s3507_s19, 31 }
   0xa   : > { %v3382_v16 = vld [vmem:[%s4173_s2 + $0x130] sm:$0xff] (!%p179_p2)   ;;  %v3384_v35 = vld [vmem:[%s4173_s2 + $0x138] sm:$0xff] (!%p179_p2)   ;;  %v3393_v53 = vld [vmem:[%s4173_s2 + $0x140] sm:$0xff] (!%p179_p2)  }
   0xb   : > { %2932 = vmatpush3.bf16.msra.mxu1 (!%p179_p2), %v3371_v2 }
   0xc   : > { %3060 = vmatpush3.bf16.msra.mxu0 (!%p179_p2), %v3372_v3  ;;  %2933 = vmatprep.subr.bf16.mxu1 (!%p179_p2), %v3373_v4  ;;  %v3394_v3 = vld [vmem:[%s4173_s2 + $0x8] sm:$0xff] (!%p179_p2)  }
   0xd   : > { %s212_s30 = scalar_select %p211_p3, %s3507_s19, 47  ;;  %3061 = vmatprep.subr.bf16.mxu0 %v3374_v5 }
   0xe   : > { %s4177_s5 = smov (!%p218_p4, %s2718_s5), 47  ;;  %s4179_s19 = smov (!%p225_p5, %s3507_s19), 31 }
   0xf   : > { %s2480_s10 = sshll.u32 %s212_s30, 2  ;;  %2934 = vmatpush3.bf16.msra.mxu1 %v3373_v4  ;;  %s2482_s26 = sshll.u32 %s4177_s5, 2 }
  0x10   : > { %3062 = vmatpush3.bf16.msra.mxu0 %v3374_v5  ;;  %2935 = vmatprep.subr.bf16.mxu1 %v3375_v6  ;;  %s3542_s18 = scalar_lea.vmem %s4171_s0, %s2480_s10  ;;  %s3688_s30 = scalar_lea.vmem %s4172_s1, %s2482_s26 }
  0x11   : > { %3063 = vmatprep.subr.bf16.mxu0 %v3376_v7  ;;  %v3553_v12 = vld [vmem:[%s3542_s18] sm:$0xff]   ;;  %v3556_v13 = vld [vmem:[%s3542_s18 + $0x8] sm:$0xff]   ;;  %v3562_v15 = vld [vmem:[%s3542_s18 + $0x10] sm:$0xff]   ;;  %s2484_s10 = sshll.u32 %s4179_s19, 2 }
  0x12   : > { %v374_v17 = vshrl.u32 %v3553_v12, 16  ;;  %v376_v18 = vshll.u32 %v3553_v12, 16  ;;  %v381_v19 = vshll.u32 %v3556_v13, 16  ;;  %v3572_v20 = vld [vmem:[%s3542_s18 + $0x4] ss:$4 sps:$4 sm:$0xff]   ;;  %v385_v28 = vshrl.u32 %v3556_v13, 16  ;;  %s4145_s13 = scalar_lea.vmem %s4175_s4, %s2484_s10 }
  0x13   : > { %2936 = vmatpush3.bf16.msra.mxu1 %v3375_v6  ;;  %v3575_v21 = vld [vmem:[%s3542_s18 + $0xc] ss:$4 sps:$4 sm:$0xff]   ;;  %v1192_v24 = vshrl.u32 %v3572_v20, 16  ;;  %v1195_v25 = vshll.u32 %v3572_v20, 16  ;;  %v389_v29 = vshll.u32 %v3562_v15, 16  ;;  %v3589_v34 = vld [vmem:[%s3542_s18 + $0x18] sm:$0xff]  }
  0x14   : > { %3064 = vmatpush3.bf16.msra.mxu0 %v3376_v7  ;;  %2937 = vmatprep.subr.bf16.mxu1 %v3377_v8  ;;  %v378_v22 = vrot.slane %v376_v18, 1  ;;  %v383_v23 = vrot.slane %v381_v19, 1  ;;  %v1200_v26 = vshrl.u32 %v3575_v21, 16  ;;  %v1203_v27 = vshll.u32 %v3575_v21, 16  ;;  %v3597_v39 = vld [vmem:[%s3542_s18 + $0x14] ss:$4 sps:$4 sm:$0xff]  }
  0x15   : > { %3065 = vmatprep.subr.bf16.mxu0 %v3378_v9  ;;  %v1194_v32 = vrot.slane %v1192_v24, 1  ;;  %v1197_v33 = vrot.slane %v1195_v25, 2  ;;  %v391_v38 = vrot.slane %v389_v29, 1  ;;  %v1209_v44 = vshrl.u32 %v3597_v39, 16  ;;  %v3610_v49 = vld [vmem:[%s3542_s18 + $0x20] sm:$0xff]   ;;  %v3628_v1 = vld [vmem:[%s3542_s18 + $0x28] sm:$0xff]  }
  0x16   : > { %v379_v31 = vor.u32 %v378_v22, %v374_v17  ;;  %v1202_v36 = vrot.slane %v1200_v26, 1  ;;  %v1205_v37 = vrot.slane %v1203_v27, 2  ;;  %v387_v43 = vor.u32 %v385_v28, %v383_v23  ;;  %v3619_v56 = vld [vmem:[%s3542_s18 + $0x1c] ss:$4 sps:$4 sm:$0xff]   ;;  %v3635_v6 = vld [vmem:[%s3542_s18 + $0x24] ss:$4 sps:$4 sm:$0xff]  }
  0x17   : > { %2938 = vmatpush3.bf16.msra.mxu1 %v3377_v8  ;;  %v1198_v41 = vor.u32 %v1197_v33, %v1194_v32  ;;  %v1212_v45 = vshll.u32 %v3597_v39, 16  ;;  %v393_v47 = vshrl.u32 %v3562_v15, 16  ;;  %v397_v48 = vshll.u32 %v3589_v34, 16  ;;  %v3395_v7 = vld [vmem:[%s4173_s2 + $0x148] sm:$0xff]   ;;  %v3398_v18 = vld [vmem:[%s4173_s2 + $0x10] sm:$0xff]  }
  0x18   : > { %3066 = vmatpush3.bf16.msra.mxu0 %v3378_v9  ;;  %2939 = vmatprep.subr.bf16.mxu1 %v3379_v10  ;;  %v384_v40 = vsel %vm372_vm0, %v379_v31, %v383_v23  ;;  %v1206_v42 = vor.u32 %v1205_v37, %v1202_v36  ;;  %v1211_v51 = vrot.slane %v1209_v44, 1  ;;  %v392_v57 = vsel %vm372_vm0, %v387_v43, %v391_v38  ;;  %v3652_v26 = vld [vmem:[%s3542_s18 + $0x30] sm:$0xff]  }
  0x19   : > { %3067 = vmatprep.subr.bf16.mxu0 %v3380_v11  ;;  %2945 = vmatprep.mubr.bf16.mxu1 %v384_v40  ;;  %v1214_v52 = vrot.slane %v1212_v45, 2  ;;  %v395_v54 = vor.u32 %v393_v47, %v391_v38  ;;  %v399_v55 = vrot.slane %v397_v48, 1  ;;  %v1877_v59 = vrot.slane %v397_v48, 3  ;;  %v3401_v31 = vld [vmem:[%s4173_s2 + $0x150] sm:$0xff]   ;;  %v3668_v38 = vld [vmem:[%s3542_s18 + $0x38] sm:$0xff]  }
  0x1a   : > { %v1207_v50 = vsel %vm1190_vm1, %v1198_v41, %v1206_v42  ;;  %v401_v60 = vshrl.u32 %v3589_v34, 16  ;;  %v1218_v62 = vshrl.u32 %v3619_v56, 16  ;;  %v1221_v63 = vshll.u32 %v3619_v56, 16  ;;  %v3660_v32 = vld [vmem:[%s3542_s18 + $0x2c] ss:$4 sps:$4 sm:$0xff]   ;;  %v3402_v40 = vld [vmem:[%s4173_s2 + $0x18] sm:$0xff]  }
  0x1b   : > { %2940 = vmatpush3.bf16.msra.mxu1 %v3379_v10  ;;  %3073 = vmatprep.mubr.bf16.mxu0 %v1207_v50  ;;  %v1215_v58 = vor.u32 %v1214_v52, %v1211_v51  ;;  %v400_v61 = vsel %vm372_vm0, %v395_v54, %v399_v55  ;;  %v405_v0 = vshll.u32 %v3610_v49, 16  ;;  %v409_v22 = vshrl.u32 %v3610_v49, 16  ;;  %v3678_v45 = vld [vmem:[%s3542_s18 + $0x34] ss:$4 sps:$4 sm:$0xff]   ;;  %v3406_v52 = vld [vmem:[%s4173_s2 + $0x20] sm:$0xff]  }
  0x1c   : > { %3068 = vmatpush3.bf16.msra.mxu0 %v3380_v11  ;;  %2941 = vmatprep.subr.bf16.mxu1 %v3381_v14  ;;  %v403_v4 = vor.u32 %v401_v60, %v399_v55  ;;  %v1876_v5 = vrot.slane %v401_v60, 2  ;;  %v1220_v8 = vrot.slane %v1218_v62, 1  ;;  %v1223_v9 = vrot.slane %v1221_v63, 2  ;;  %v3409_v62 = vld [vmem:[%s4173_s2 + $0x160] sm:$0xff]  }
  0x1d   : > { %3069 = vmatprep.subr.bf16.mxu0 %v3382_v16  ;;  %v1216_v2 = vsel %vm1190_vm1, %v1206_v42, %v1215_v58  ;;  %v407_v10 = vrot.slane %v405_v0, 1  ;;  %v1227_v11 = vshrl.u32 %v3635_v6, 16  ;;  %v413_v25 = vshll.u32 %v3628_v1, 16 }
  0x1e   : > { %v1224_v17 = vor.u32 %v1223_v9, %v1220_v8  ;;  %v417_v33 = vshrl.u32 %v3628_v1, 16  ;;  %v1236_v41 = vshrl.u32 %v3660_v32, 16  ;;  %v1239_v42 = vshll.u32 %v3660_v32, 16 }
  0x1f   : > { %2942 = vmatpush3.bf16.msra.mxu1 %v3381_v14  ;;  %v1230_v14 = vshll.u32 %v3635_v6, 16  ;;  %v1229_v23 = vrot.slane %v1227_v11, 1  ;;  %v411_v36 = vor.u32 %v409_v22, %v407_v10  ;;  %v415_v37 = vrot.slane %v413_v25, 1 }
  0x20   : > { %3070 = vmatpush3.bf16.msra.mxu0 %v3382_v16  ;;  %2943 = vmatprep.subr.bf16.mxu1 %v3383_v30  ;;  %v3644_v16 = vor.u32 %v1877_v59, %v1876_v5  ;;  %v1225_v27 = vsel %vm1190_vm1, %v1215_v58, %v1224_v17  ;;  %v421_v43 = vshll.u32 %v3652_v26, 16  ;;  %v1238_v48 = vrot.slane %v1236_v41, 1  ;;  %v248_v5 = vld [vmem:[%s3688_s30 + $0x4] sm:$0xf] }
  0x21   : > { %3071 = vmatprep.subr.bf16.mxu0 %v3384_v35  ;;  %v1232_v24 = vrot.slane %v1230_v14, 2  ;;  %v1241_v50 = vrot.slane %v1239_v42, 2  ;;  %v416_v51 = vsel %vm372_vm0, %v411_v36, %v415_v37  ;;  %v1248_v54 = vshll.u32 %v3678_v45, 16 }
  0x22   : > { %v423_v58 = vrot.slane %v421_v43, 1  ;;  %v425_v59 = vshrl.u32 %v3652_v26, 16  ;;  %v429_v63 = vshll.u32 %v3668_v38, 16  ;;  %v3717_v14 = vcombine.low %v248_v5, %v248_v5 }
  0x23   : > { %2944 = vmatpush3.bf16.msra.mxu1 %v3383_v30  ;;  %v408_v30 = vsel %vm372_vm0, %v403_v4, %v407_v10  ;;  %v1242_v55 = vor.u32 %v1241_v50, %v1238_v48 }
  0x24   : > { %3072 = vmatpush3.bf16.msra.mxu0 %v3384_v35  ;;  %2961 = vmatprep.subr.bf16.mxu1 %v3390_v46  ;;  %v1233_v35 = vor.u32 %v1232_v24, %v1229_v23  ;;  %v427_v4 = vor.u32 %v425_v59, %v423_v58  ;;  %v431_v10 = vrot.slane %v429_v63, 1  ;;  %v1266_v36 = vshll.u32 %v3717_v14, 16 }
  0x25   : > { %3089 = vmatprep.subr.bf16.mxu0 %v3393_v53 }
  0x26   : > { %2946 = vmatmul.mubr.bf16.vlgmr.msra.gmra.mrb[0].mxu1 %v392_v57  ;;  %v1234_v44 = vsel %vm1190_vm1, %v1224_v17, %v1233_v35  ;;  %v419_v57 = vor.u32 %v417_v33, %v415_v37  ;;  %v432_v37 = vsel %vm372_vm0, %v427_v4, %v431_v10  ;;  %v3419_v4 = vld [vmem:[%s4173_s2 + $0x80] sm:$0xff]  }
  0x27   : > { %3074 = vmatmul.mubr.bf16.vlgmr.msra.gmra.mrb[0].mxu0 %v1216_v2  ;;  %2962 = vmatpush3.bf16.msra.mxu1 %v3390_v46  ;;  %v3403_v46 = vld [vmem:[%s4173_s2 + $0x158] sm:$0xff]   ;;  %v247_v2 = vld [vmem:[%s3688_s30] sm:$0xf] }
  0x28   : > { %3090 = vmatpush3.bf16.msra.mxu0 %v3393_v53  ;;  %2963 = vmatprep.subr.bf16.mxu1 %v3394_v3  ;;  %v1245_v53 = vshrl.u32 %v3678_v45, 16  ;;  %v3711_v8 = vcombine.low %v247_v2, %v247_v2  ;;  %v3715_v11 = vcombine.low %v247_v2, %v248_v5  ;;  %v424_v17 = vsel %vm372_vm0, %v419_v57, %v423_v58 }
  0x29   : > { %3091 = vmatprep.subr.bf16.mxu0 %v3395_v7  ;;  %2949 = vmatprep.mubr.bf16.mxu1 %v400_v61  ;;  %v1250_v61 = vrot.slane %v1248_v54, 2  ;;  %v1458_v58 = vrot.slane %v3572_v20, 2  ;;  %v3418_v20 = vld [vmem:[%s4173_s2 + $0x178] sm:$0xff]   ;;  %v1461_v5 = vrot.slane %v3597_v39, 2 }
  0x2a   : > { %3077 = vmatprep.mubr.bf16.mxu0 %v1225_v27  ;;  %v1247_v60 = vrot.slane %v1245_v53, 1  ;;  %v437_v23 = vshll.u32 %v3711_v8, 16  ;;  %v3410_v27 = vld [vmem:[%s4173_s2 + $0x28] sm:$0xff]   ;;  %v3416_v53 = vld [vmem:[%s4173_s2 + $0x170] sm:$0xff]  }
  0x2b   : > { %2964 = vmatpush3.bf16.msra.mxu1 %v3394_v3  ;;  %v1243_v3 = vsel %vm1190_vm1, %v1233_v35, %v1242_v55  ;;  %v1263_v35 = vshrl.u32 %v3717_v14, 16 }
  0x2c   : > { %3092 = vmatpush3.bf16.msra.mxu0 %v3395_v7  ;;  %2965 = vmatprep.subr.bf16.mxu1 %v3398_v18  ;;  %v326_v7 = vunpack.c.h.bf16 %v3668_v38  ;;  %v1251_v9 = vor.u32 %v1250_v61, %v1247_v60  ;;  %v439_v41 = vrot.slane %v437_v23, 1  ;;  %v1459_v60 = vrot.slane %v3575_v21, 2 }
  0x2d   : > { %3093 = vmatprep.subr.bf16.mxu0 %v3401_v31  ;;  %v1665_v23 = vrot.slane %v3556_v13, 2 }
  0x2e   : > { %2950 = vmatmul.mubr.bf16.gmra.mrb[4].mxu1 %v408_v30  ;;  %v1252_v24 = vsel %vm1190_vm1, %v1242_v55, %v1251_v9  ;;  %v327_v30 = vunpack.c.l.bf16 %v3715_v11  ;;  %v1460_v21 = vsel %vm1457_vm2, %v1458_v58, %v1459_v60 }
  0x2f   : > { %3078 = vmatmul.mubr.bf16.gmra.mrb[4].mxu0 %v1234_v44  ;;  %2966 = vmatpush3.bf16.msra.mxu1 %v3398_v18  ;;  %v433_v18 = vshrl.u32 %v3668_v38, 16  ;;  %v1265_v44 = vrot.slane %v1263_v35, 1  ;;  %v1668_v35 = vrot.slane %v3589_v34, 2 }
  0x30   : > { %3094 = vmatpush3.bf16.msra.mxu0 %v3401_v31  ;;  %2967 = vmatprep.subr.bf16.mxu1 %v3402_v40  ;;  %v3411_v31 = vld [vmem:[%s4173_s2 + $0x168] sm:$0xff]  }
  0x31   : > { %3095 = vmatprep.subr.bf16.mxu0 %v3403_v46  ;;  %2953 = vmatprep.mubr.bf16.mxu1 %v416_v51  ;;  %v435_v42 = vor.u32 %v433_v18, %v431_v10  ;;  %v3414_v51 = vld [vmem:[%s4173_s2 + $0x30] sm:$0xff]   ;;  %v767_v10 = vrot.slane %v3556_v13, 1 }
  0x32   : > { %3081 = vmatprep.mubr.bf16.mxu0 %v1243_v3 }
  0x33   : > { %2968 = vmatpush3.bf16.msra.mxu1 %v3402_v40  ;;  %v3733_v40 = vpack.c.bf16 %v327_v30, %v326_v7  ;;  %v440_v57 = vsel %vm372_vm0, %v435_v42, %v439_v41  ;;  %v766_v7 = vrot.slane %v3553_v12, 1  ;;  %v1462_v30 = vsel %vm1457_vm2, %v1459_v60, %v1461_v5 }
  0x34   : > { %3096 = vmatpush3.bf16.msra.mxu0 %v3403_v46  ;;  %2969 = vmatprep.subr.bf16.mxu1 %v3406_v52  ;;  %v1268_v46 = vrot.slane %v1266_v36, 2  ;;  %v3422_v36 = vld [vmem:[%s4173_s2 + $0x188] sm:$0xff]   ;;  %v771_v42 = vrot.slane %v3589_v34, 1  ;;  %v775_v60 = vrot.slane %v3628_v1, 1 }
  0x35   : > { %3097 = vmatprep.subr.bf16.mxu0 %v3409_v62  ;;  %v1254_v48 = vshrl.u32 %v3733_v40, 16  ;;  %v1257_v50 = vshll.u32 %v3733_v40, 16  ;;  %v3770_v39 = vsel %vm765_vm3, %v766_v7, %v767_v10  ;;  %v3426_v7 = vld [vmem:[%s4173_s2 + $0x198] sm:$0xff]  }
  0x36   : > { %2954 = vmatmul.mubr.bf16.gmra.mrb[8].mxu1 %v424_v17  ;;  %v1269_v55 = vor.u32 %v1268_v46, %v1265_v44  ;;  %v1463_v17 = vrot.slane %v3619_v56, 2  ;;  %v3423_v44 = vld [vmem:[%s4173_s2 + $0x90] sm:$0xff]  }
  0x37   : > { %3082 = vmatmul.mubr.bf16.gmra.mrb[8].mxu0 %v1252_v24  ;;  %2970 = vmatpush3.bf16.msra.mxu1 %v3406_v52  ;;  %v1256_v52 = vrot.slane %v1254_v48, 1  ;;  %v1259_v54 = vrot.slane %v1257_v50, 2  ;;  %v1666_v24 = vrot.slane %v3562_v15, 2  ;;  %v1670_v48 = vrot.slane %v3610_v49, 2 }
  0x38   : > { %3098 = vmatpush3.bf16.msra.mxu0 %v3409_v62  ;;  %2971 = vmatprep.subr.bf16.mxu1 %v3410_v27  ;;  %v3417_v62 = vld [vmem:[%s4173_s2 + $0x38] sm:$0xff]   ;;  %v1465_v50 = vrot.slane %v3635_v6, 2 }
  0x39   : > { %3099 = vmatprep.subr.bf16.mxu0 %v3411_v31  ;;  %2957 = vmatprep.mubr.bf16.mxu1 %v432_v37  ;;  %v1260_v61 = vor.u32 %v1259_v54, %v1256_v52  ;;  %v1464_v37 = vsel %vm1457_vm2, %v1461_v5, %v1463_v17  ;;  %v3796_v46 = vsel %vm1457_vm2, %v1666_v24, %v1668_v35  ;;  %v3424_v52 = vld [vmem:[%s4173_s2 + $0x190] sm:$0xff]   ;;  %v1676_v5 = vrot.slane %v3668_v38, 2 }
  0x3a   : > { %v3808_v54 = vsel %vm1457_vm2, %v1668_v35, %v1670_v48  ;;  %v1469_v35 = vrot.slane %v3678_v45, 2 }
  0x3b   : > { %2972 = vmatpush3.bf16.msra.mxu1 %v3410_v27  ;;  %v1261_v2 = vsel %vm1190_vm1, %v1251_v9, %v1260_v61  ;;  %v1270_v3 = vsel %vm1190_vm1, %v1260_v61, %v1269_v55  ;;  %v3420_v9 = vld [vmem:[%s4173_s2 + $0x180] sm:$0xff]   ;;  %v769_v27 = vrot.slane %v3562_v15, 1  ;;  %v1672_v55 = vrot.slane %v3628_v1, 2 }
  0x3c   : > { %3100 = vmatpush3.bf16.msra.mxu0 %v3411_v31  ;;  %2973 = vmatprep.subr.bf16.mxu1 %v3414_v51  ;;  %v3779_v31 = vsel %vm1457_vm2, %v1665_v23, %v1666_v24  ;;  %v779_v23 = vrot.slane %v3668_v38, 1  ;;  %v1678_v24 = vrot.slane %v3715_v11, 2 }
  0x3d   : > { %3101 = vmatprep.subr.bf16.mxu0 %v3416_v53  ;;  %3085 = vmatprep.mubr.bf16.mxu0 %v1261_v2  ;;  %v3788_v41 = vsel %vm765_vm3, %v767_v10, %v769_v27  ;;  %v3817_v61 = vsel %vm1457_vm2, %v1670_v48, %v1672_v55  ;;  %v3425_v2 = vld [vmem:[%s4173_s2 + $0x98] sm:$0xff]   ;;  %v1869_v48 = vrot.slane %v385_v28, 2 }
  0x3e   : > { %2958 = vmatmul.mubr.bf16.gmra.mrb[12].mxu1 %v440_v57  ;;  %v1467_v57 = vrot.slane %v3660_v32, 2 }
  0x3f   : > { %2974 = vmatpush3.bf16.msra.mxu1 %v3414_v51  ;;  %3086 = vmatmul.mubr.bf16.gmra.mrb[12].mxu0 %v1270_v3  ;;  %v3801_v51 = vsel %vm765_vm3, %v769_v27, %v771_v42 }
  0x40   : > { %2975 = vmatprep.subr.bf16.mxu1 %v3417_v62  ;;  %3102 = vmatpush3.bf16.msra.mxu0 %v3416_v53  ;;  %v773_v53 = vrot.slane %v3610_v49, 1 }
  0x41   : > { %2977 = vmatprep.mubr.bf16.mxu1 %v3553_v12  ;;  %3103 = vmatprep.subr.bf16.mxu0 %v3418_v20  ;;  %v3421_v12 = vld [vmem:[%s4173_s2 + $0x88] sm:$0xff]  }
  0x42   : > { %3105 = vmatprep.mubr.bf16.mxu0 %v1460_v21  ;;  %v3813_v58 = vsel %vm765_vm3, %v771_v42, %v773_v53  ;;  %v3824_v3 = vsel %vm765_vm3, %v773_v53, %v775_v60  ;;  %v1466_v21 = vsel %vm1457_vm2, %v1463_v17, %v1465_v50  ;;  %v1471_v42 = vrot.slane %v3733_v40, 2 }
  0x43   : > { %2976 = vmatpush3.bf16.msra.mxu1 %v3417_v62  ;;  %v1674_v62 = vrot.slane %v3652_v26, 2  ;;  %v1470_v53 = vsel %vm1457_vm2, %v1467_v57, %v1469_v35 }
  0x44   : > { %2993 = vmatprep.subr.bf16.mxu1 %v3419_v4  ;;  %3104 = vmatpush3.bf16.msra.mxu0 %v3418_v20  ;;  %v777_v20 = vrot.slane %v3652_v26, 1 }
  0x45   : > { %3121 = vmatprep.subr.bf16.mxu0 %v3420_v9  ;;  %v3843_v17 = vsel %vm1457_vm2, %v1674_v62, %v1676_v5 }
  0x46   : > { %2978 = vmatmul.mubr.bf16.vlgmr.msra.gmra.mrb[0].mxu1 %v3556_v13  ;;  %v3838_v10 = vsel %vm765_vm3, %v775_v60, %v777_v20  ;;  %v3850_v27 = vsel %vm765_vm3, %v777_v20, %v779_v23  ;;  %v1472_v60 = vsel %vm1457_vm2, %v1469_v35, %v1471_v42  ;;  %v1873_v20 = vrot.slane %v389_v29, 3  ;;  %v3433_v29 = vld [vmem:[%s4173_s2 + $0xb8] sm:$0xff]  }
  0x47   : > { %2994 = vmatpush3.bf16.msra.mxu1 %v3419_v4  ;;  %2981 = vmatprep.mubr.bf16.mxu1 %v3562_v15  ;;  %v3829_v4 = vsel %vm1457_vm2, %v1672_v55, %v1674_v62  ;;  %v3430_v55 = vld [vmem:[%s4173_s2 + $0x1a8] sm:$0xff]  }
  0x48   : > { %3106 = vmatmul.mubr.bf16.vlgmr.msra.gmra.mrb[0].mxu0 %v1462_v30  ;;  %2995 = vmatprep.subr.bf16.mxu1 %v3421_v12  ;;  %v781_v30 = vrot.slane %v3711_v8, 1  ;;  %v3429_v8 = vld [vmem:[%s4173_s2 + $0xa8] sm:$0xff]  }
  0x49   : > { %3122 = vmatpush3.bf16.msra.mxu0 %v3420_v9  ;;  %3109 = vmatprep.mubr.bf16.mxu0 %v1464_v37  ;;  %v1468_v9 = vsel %vm1457_vm2, %v1465_v50, %v1467_v57  ;;  %v3428_v37 = vld [vmem:[%s4173_s2 + $0x1a0] sm:$0xff]   ;;  %v3870_v50 = vld [vmem:[%s3688_s30 + $0x8] ss:$0 sps:$4 sm:$0xff]   ;;  %v3431_v57 = vld [vmem:[%s4173_s2 + $0xb0] sm:$0xff]  }
  0x4a   : > { %3123 = vmatprep.subr.bf16.mxu0 %v3422_v36  ;;  %v1680_v28 = vrot.slane %v3870_v50, 2 }
  0x4b   : > { %2996 = vmatpush3.bf16.msra.mxu1 %v3421_v12  ;;  %v3427_v12 = vld [vmem:[%s4173_s2 + $0xa0] sm:$0xff]  }
  0x4c   : > { %2997 = vmatprep.subr.bf16.mxu1 %v3423_v44 }
  0x4d   : > { %3124 = vmatpush3.bf16.msra.mxu0 %v3422_v36  ;;  %v3855_v36 = vsel %vm1457_vm2, %v1676_v5, %v1678_v24 }
  0x4e   : > { %2982 = vmatmul.mubr.bf16.gmra.mrb[4].mxu1 %v3589_v34  ;;  %3125 = vmatprep.subr.bf16.mxu0 %v3424_v52 }
  0x4f   : > { %2998 = vmatpush3.bf16.msra.mxu1 %v3423_v44  ;;  %2985 = vmatprep.mubr.bf16.mxu1 %v3610_v49  ;;  %v3862_v44 = vsel %vm765_vm3, %v779_v23, %v781_v30  ;;  %v1884_v23 = vrot.slane %v417_v33, 2  ;;  %v1885_v30 = vrot.slane %v413_v25, 3  ;;  %v1888_v33 = vrot.slane %v425_v59, 2  ;;  %v3434_v25 = vld [vmem:[%s4173_s2 + $0x1b8] sm:$0xff]  }
  0x50   : > { %3110 = vmatmul.mubr.bf16.gmra.mrb[4].mxu0 %v1466_v21  ;;  %2999 = vmatprep.subr.bf16.mxu1 %v3425_v2  ;;  %v3891_v21 = vsel %vm1457_vm2, %v1678_v24, %v1680_v28  ;;  %v1002_v28 = vrot.slane %v3717_v14, 1 }
  0x51   : > { %3126 = vmatpush3.bf16.msra.mxu0 %v3424_v52  ;;  %3113 = vmatprep.mubr.bf16.mxu0 %v1468_v9  ;;  %v1870_v52 = vrot.slane %v381_v19, 3  ;;  %v1473_v19 = vrot.slane %v3717_v14, 2  ;;  %v1881_v9 = vrot.slane %v405_v0, 3 }
  0x52   : > { %3127 = vmatprep.subr.bf16.mxu0 %v3426_v7 }
  0x53   : > { %3000 = vmatpush3.bf16.msra.mxu1 %v3425_v2  ;;  %v1871_v62 = vor.u32 %v1870_v52, %v1869_v48  ;;  %v1872_v2 = vrot.slane %v393_v47, 2  ;;  %v3432_v47 = vld [vmem:[%s4173_s2 + $0x1b0] sm:$0xff]   ;;  %v1474_v35 = vsel %vm1457_vm2, %v1471_v42, %v1473_v19  ;;  %v1889_v48 = vrot.slane %v421_v43, 3 }
  0x54   : > { %3001 = vmatprep.subr.bf16.mxu1 %v3427_v12  ;;  %v1892_v52 = vrot.slane %v433_v18, 2  ;;  %v1906_v19 = vshrl.u32 %v3870_v50, 16 }
  0x55   : > { %3128 = vmatpush3.bf16.msra.mxu0 %v3426_v7  ;;  %v1874_v5 = vor.u32 %v1873_v20, %v1872_v2  ;;  %v1880_v7 = vrot.slane %v409_v22, 2  ;;  %v1890_v18 = vor.u32 %v1889_v48, %v1888_v33  ;;  %v3436_v2 = vld [vmem:[%s4173_s2 + $0x1c0] sm:$0xff]   ;;  %v3438_v48 = vld [vmem:[%s4173_s2 + $0x1c8] sm:$0xff]  }
  0x56   : > { %2986 = vmatmul.mubr.bf16.gmra.mrb[8].mxu1 %v3628_v1  ;;  %3129 = vmatprep.subr.bf16.mxu0 %v3428_v37 }
  0x57   : > { %3002 = vmatpush3.bf16.msra.mxu1 %v3427_v12  ;;  %2989 = vmatprep.mubr.bf16.mxu1 %v3652_v26  ;;  %v3906_v24 = vsel %vm1868_vm4, %v1871_v62, %v1874_v5  ;;  %v3910_v22 = vsel %vm1868_vm4, %v1874_v5, %v3644_v16  ;;  %v994_v12 = vrot.slane %v3635_v6, 1  ;;  %v1882_v0 = vor.u32 %v1881_v9, %v1880_v7  ;;  %v3456_v6 = vld [vmem:[%s4173_s2 + $0x220] sm:$0xff]  }
  0x58   : > { %3114 = vmatmul.mubr.bf16.gmra.mrb[8].mxu0 %v1470_v53  ;;  %3003 = vmatprep.subr.bf16.mxu1 %v3429_v8  ;;  %v998_v53 = vrot.slane %v3678_v45, 1  ;;  %v1893_v45 = vrot.slane %v429_v63, 3  ;;  %v1897_v63 = vshrl.u32 %v3715_v11, 16  ;;  %v1909_v62 = vshll.u32 %v3870_v50, 16 }
  0x59   : > { %3130 = vmatpush3.bf16.msra.mxu0 %v3428_v37  ;;  %3117 = vmatprep.mubr.bf16.mxu0 %v1472_v60  ;;  %v996_v37 = vrot.slane %v3660_v32, 1  ;;  %v3930_v32 = vsel %vm1868_vm4, %v3644_v16, %v1882_v0  ;;  %v1000_v16 = vrot.slane %v3733_v40, 1  ;;  %v1908_v7 = vrot.slane %v1906_v19, 2  ;;  %v3452_v19 = vld [vmem:[%s4173_s2 + $0x200] sm:$0xff]  }
  0x5a   : > { %3131 = vmatprep.subr.bf16.mxu0 %v3430_v55  ;;  %v1894_v60 = vor.u32 %v1893_v45, %v1892_v52  ;;  %v1899_v20 = vrot.slane %v1897_v63, 2  ;;  %v2101_v9 = vrot.slane %v3556_v13, 3  ;;  %v2106_v13 = vrot.slane %v3610_v49, 3  ;;  %v3441_v45 = vld [vmem:[%s4173_s2 + $0xd8] sm:$0xff]  }
  0x5b   : > { %3004 = vmatpush3.bf16.msra.mxu1 %v3429_v8  ;;  %v1886_v8 = vor.u32 %v1885_v30, %v1884_v23  ;;  %v3935_v43 = vsel %vm765_vm3, %v994_v12, %v996_v37  ;;  %v3944_v42 = vsel %vm765_vm3, %v996_v37, %v998_v53  ;;  %v3958_v40 = vsel %vm765_vm3, %v998_v53, %v1000_v16  ;;  %v3437_v23 = vld [vmem:[%s4173_s2 + $0xc8] sm:$0xff]  }
  0x5c   : > { %3005 = vmatprep.subr.bf16.mxu1 %v3431_v57  ;;  %v3966_v14 = vsel %vm1868_vm4, %v1890_v18, %v1894_v60  ;;  %v3969_v5 = vsel %vm765_vm3, %v1000_v16, %v1002_v28  ;;  %v2110_v37 = vrot.slane %v3652_v26, 3  ;;  %v2116_v53 = vrot.slane %v3870_v50, 3  ;;  %v3460_v16 = vld [vmem:[%s3542_s18 + $0x4] ss:$4 sps:$4 sm:$0xff]  }
  0x5d   : > { %3132 = vmatpush3.bf16.msra.mxu0 %v3430_v55  ;;  %v3941_v59 = vsel %vm1868_vm4, %v1882_v0, %v1886_v8  ;;  %v3435_v55 = vld [vmem:[%s4173_s2 + $0xc0] sm:$0xff]   ;;  %v2108_v0 = vrot.slane %v3628_v1, 3 }
  0x5e   : > { %2990 = vmatmul.mubr.bf16.gmra.mrb[12].mxu1 %v3668_v38  ;;  %3133 = vmatprep.subr.bf16.mxu0 %v3432_v47 }
  0x5f   : > { %3006 = vmatpush3.bf16.msra.mxu1 %v3431_v57  ;;  %3009 = vmatprep.mubr.bf16.mxu1 %v3770_v39  ;;  %v1900_v39 = vshll.u32 %v3715_v11, 16  ;;  %v3955_v57 = vsel %vm1868_vm4, %v1886_v8, %v1890_v18  ;;  %v2112_v8 = vrot.slane %v3668_v38, 3  ;;  %v3992_v26 = vsel %vm2100_vm5, %v2108_v0, %v2110_v37  ;;  %v3443_v18 = vld [vmem:[%s4173_s2 + $0xe0] sm:$0xff]  }
  0x60   : > { %3118 = vmatmul.mubr.bf16.gmra.mrb[12].mxu0 %v1474_v35  ;;  %3007 = vmatprep.subr.bf16.mxu1 %v3433_v29  ;;  %v2102_v35 = vrot.slane %v3562_v15, 3 }
  0x61   : > { %3134 = vmatpush3.bf16.msra.mxu0 %v3432_v47  ;;  %3137 = vmatprep.mubr.bf16.mxu0 %v3779_v31  ;;  %v1902_v31 = vrot.slane %v1900_v39, 3  ;;  %v1911_v47 = vrot.slane %v1909_v62, 3  ;;  %v3462_v39 = vld [vmem:[%s3542_s18 + $0x14] ss:$4 sps:$4 sm:$0xff]   ;;  %v992_v62 = vrot.slane %v3619_v56, 1 }
  0x62   : > { %3135 = vmatprep.subr.bf16.mxu0 %v3434_v25  ;;  %v3989_v1 = vsel %vm2100_vm5, %v2101_v9, %v2102_v35  ;;  %v990_v28 = vrot.slane %v3462_v39, 1  ;;  %v3454_v56 = vld [vmem:[%s4173_s2 + $0x210] sm:$0xff]  }
  0x63   : > { %3008 = vmatpush3.bf16.msra.mxu1 %v3433_v29  ;;  %v1903_v30 = vor.u32 %v1902_v31, %v1899_v20  ;;  %v1912_v33 = vor.u32 %v1911_v47, %v1908_v7  ;;  %v2104_v29 = vrot.slane %v3589_v34, 3  ;;  %v2114_v34 = vrot.slane %v3715_v11, 3  ;;  %v3439_v11 = vld [vmem:[%s4173_s2 + $0xd0] sm:$0xff]   ;;  %v3455_v20 = vld [vmem:[%s4173_s2 + $0x218] sm:$0xff]  }
  0x64   : > { %3025 = vmatprep.subr.bf16.mxu1 %v3435_v55 }
  0x65   : > { %3136 = vmatpush3.bf16.msra.mxu0 %v3434_v25  ;;  %v3986_v15 = vsel %vm1868_vm4, %v1894_v60, %v1903_v30  ;;  %v3997_v49 = vsel %vm1868_vm4, %v1903_v30, %v1912_v33  ;;  %v4000_v38 = vsel %vm2100_vm5, %v2102_v35, %v2104_v29  ;;  %v4014_v52 = vsel %vm2100_vm5, %v2112_v8, %v2114_v34  ;;  %v3461_v60 = vld [vmem:[%s3542_s18 + $0xc] ss:$4 sps:$4 sm:$0xff]  }
  0x66   : > { %3010 = vmatmul.mubr.bf16.vlgmr.msra.gmra.mrb[0].mxu1 %v3788_v41  ;;  %3153 = vmatprep.subr.bf16.mxu0 %v3436_v2  ;;  %v4003_v41 = vsel %vm2100_vm5, %v2110_v37, %v2112_v8  ;;  %v4017_v25 = vsel %vm2100_vm5, %v2106_v13, %v2108_v0  ;;  %v4021_v50 = vsel %vm2100_vm5, %v2114_v34, %v2116_v53 }
  0x67   : > { %3026 = vmatpush3.bf16.msra.mxu1 %v3435_v55  ;;  %3013 = vmatprep.mubr.bf16.mxu1 %v3801_v51  ;;  %v4011_v51 = vsel %vm2100_vm5, %v2104_v29, %v2106_v13  ;;  %v987_v55 = vrot.slane %v3460_v16, 1 }
  0x68   : > { %3138 = vmatmul.mubr.bf16.vlgmr.msra.gmra.mrb[0].mxu0 %v3796_v46  ;;  %3027 = vmatprep.subr.bf16.mxu1 %v3437_v23  ;;  %v3440_v46 = vld [vmem:[%s4173_s2 + $0x1d0] sm:$0xff]  }
  0x69   : > { %3154 = vmatpush3.bf16.msra.mxu0 %v3436_v2  ;;  %3141 = vmatprep.mubr.bf16.mxu0 %v3808_v54  ;;  %v3442_v54 = vld [vmem:[%s4173_s2 + $0x1d8] sm:$0xff]   ;;  %v3453_v2 = vld [vmem:[%s4173_s2 + $0x208] sm:$0xff]  }
  0x6a   : > { %3155 = vmatprep.subr.bf16.mxu0 %v3438_v48 }
  0x6b   : > { %3028 = vmatpush3.bf16.msra.mxu1 %v3437_v23 }
  0x6c   : > { %3029 = vmatprep.subr.bf16.mxu1 %v3439_v11 }
  0x6d   : > { %3156 = vmatpush3.bf16.msra.mxu0 %v3438_v48 }
  0x6e   : > { %3014 = vmatmul.mubr.bf16.gmra.mrb[4].mxu1 %v3813_v58  ;;  %3157 = vmatprep.subr.bf16.mxu0 %v3440_v46  ;;  %v3444_v58 = vld [vmem:[%s4173_s2 + $0x1e0] sm:$0xff]  }
  0x6f   : > { %3030 = vmatpush3.bf16.msra.mxu1 %v3439_v11  ;;  %3017 = vmatprep.mubr.bf16.mxu1 %v3824_v3  ;;  %v3446_v3 = vld [vmem:[%s4173_s2 + $0x1e8] sm:$0xff]  }
  0x70   : > { %3142 = vmatmul.mubr.bf16.gmra.mrb[4].mxu0 %v3817_v61  ;;  %3031 = vmatprep.subr.bf16.mxu1 %v3441_v45  ;;  %v3445_v61 = vld [vmem:[%s4173_s2 + $0xe8] sm:$0xff]  }
  0x71   : > { %3158 = vmatpush3.bf16.msra.mxu0 %v3440_v46  ;;  %3145 = vmatprep.mubr.bf16.mxu0 %v3829_v4  ;;  %v3447_v4 = vld [vmem:[%s4173_s2 + $0xf0] sm:$0xff]  }
  0x72   : > { %3159 = vmatprep.subr.bf16.mxu0 %v3442_v54 }
  0x73   : > { %3032 = vmatpush3.bf16.msra.mxu1 %v3441_v45 }
  0x74   : > { %3033 = vmatprep.subr.bf16.mxu1 %v3443_v18 }
  0x75   : > { %3160 = vmatpush3.bf16.msra.mxu0 %v3442_v54 }
  0x76   : > { %3018 = vmatmul.mubr.bf16.gmra.mrb[8].mxu1 %v3838_v10  ;;  %3161 = vmatprep.subr.bf16.mxu0 %v3444_v58  ;;  %v988_v10 = vrot.slane %v3461_v60, 1 }
  0x77   : > { %3034 = vmatpush3.bf16.msra.mxu1 %v3443_v18  ;;  %3021 = vmatprep.mubr.bf16.mxu1 %v3850_v27  ;;  %v3449_v27 = vld [vmem:[%s4173_s2 + $0x1f0] sm:$0xff]  }
  0x78   : > { %3146 = vmatmul.mubr.bf16.gmra.mrb[8].mxu0 %v3843_v17  ;;  %3035 = vmatprep.subr.bf16.mxu1 %v3445_v61  ;;  %v3450_v17 = vld [vmem:[%s4173_s2 + $0xf8] sm:$0xff]   ;;  %v989_v63 = vsel %vm765_vm3, %v987_v55, %v988_v10 }
  0x79   : > { %3162 = vmatpush3.bf16.msra.mxu0 %v3444_v58  ;;  %3149 = vmatprep.mubr.bf16.mxu0 %v3855_v36  ;;  %v3451_v36 = vld [vmem:[%s4173_s2 + $0x1f8] sm:$0xff]  }
  0x7a   : > { %3163 = vmatprep.subr.bf16.mxu0 %v3446_v3 }
  0x7b   : > { %3036 = vmatpush3.bf16.msra.mxu1 %v3445_v61 }
  0x7c   : > { %3037 = vmatprep.subr.bf16.mxu1 %v3447_v4 }
  0x7d   : > { %3164 = vmatpush3.bf16.msra.mxu0 %v3446_v3 }
  0x7e   : > { %3022 = vmatmul.mubr.bf16.gmra.mrb[12].mxu1 %v3862_v44  ;;  %3165 = vmatprep.subr.bf16.mxu0 %v3449_v27  ;;  %v991_v44 = vsel %vm765_vm3, %v988_v10, %v990_v28 }
  0x7f   : > { %3038 = vmatpush3.bf16.msra.mxu1 %v3447_v4  ;;  %3041 = vmatprep.mubr.bf16.mxu1 %v989_v63 }
  0x80   : > { %3150 = vmatmul.mubr.bf16.gmra.mrb[12].mxu0 %v3891_v21  ;;  %3039 = vmatprep.subr.bf16.mxu1 %v3450_v17  ;;  %v993_v21 = vsel %vm765_vm3, %v990_v28, %v992_v62 }
  0x81   : > { %3166 = vmatpush3.bf16.msra.mxu0 %v3449_v27  ;;  %3169 = vmatprep.mubr.bf16.mxu0 %v3906_v24  ;;  %v995_v24 = vsel %vm765_vm3, %v992_v62, %v994_v12  ;;  %v3458_v12 = vld [vmem:[%s4173_s2 + $0x230] sm:$0xff]  }
  0x82   : > { %3167 = vmatprep.subr.bf16.mxu0 %v3451_v36 }
  0x83   : > { %3040 = vmatpush3.bf16.msra.mxu1 %v3450_v17 }
  0x84   : > { %3217 = vmatprep.subr.bf16.mxu1 %v3452_v19 }
  0x85   : > { %3168 = vmatpush3.bf16.msra.mxu0 %v3451_v36 }
  0x86   : > { %3042 = vmatmul.mubr.bf16.vlgmr.msra.gmra.mrb[0].mxu1 %v991_v44  ;;  %3185 = vmatprep.subr.bf16.mxu0 %v3452_v19 }
  0x87   : > { %3225 = vmatpush3.bf16.msra.mxu1 %v3452_v19  ;;  %3045 = vmatprep.mubr.bf16.mxu1 %v993_v21 }
  0x88   : > { %3170 = vmatmul.mubr.bf16.vlgmr.msra.gmra.mrb[0].mxu0 %v3910_v22  ;;  %3218 = vmatprep.subr.bf16.mxu1 %v3453_v2  ;;  %v3457_v22 = vld [vmem:[%s4173_s2 + $0x228] sm:$0xff]  }
  0x89   : > { %3186 = vmatpush3.bf16.msra.mxu0 %v3452_v19  ;;  %3173 = vmatprep.mubr.bf16.mxu0 %v3930_v32  ;;  %v3459_v32 = vld [vmem:[%s4173_s2 + $0x238] sm:$0xff]  }
  0x8a   : > { %3187 = vmatprep.subr.bf16.mxu0 %v3453_v2 }
  0x8b   : > { %3226 = vmatpush3.bf16.msra.mxu1 %v3453_v2 }
  0x8c   : > { %3219 = vmatprep.subr.bf16.mxu1 %v3454_v56 }
  0x8d   : > { %3188 = vmatpush3.bf16.msra.mxu0 %v3453_v2 }
  0x8e   : > { %3046 = vmatmul.mubr.bf16.gmra.mrb[4].mxu1 %v995_v24  ;;  %3189 = vmatprep.subr.bf16.mxu0 %v3454_v56 }
  0x8f   : > { %3227 = vmatpush3.bf16.msra.mxu1 %v3454_v56  ;;  %3049 = vmatprep.mubr.bf16.mxu1 %v3935_v43 }
  0x90   : > { %3174 = vmatmul.mubr.bf16.gmra.mrb[4].mxu0 %v3941_v59  ;;  %3220 = vmatprep.subr.bf16.mxu1 %v3455_v20 }
  0x91   : > { %3190 = vmatpush3.bf16.msra.mxu0 %v3454_v56  ;;  %3177 = vmatprep.mubr.bf16.mxu0 %v3955_v57 }
  0x92   : > { %3191 = vmatprep.subr.bf16.mxu0 %v3455_v20 }
  0x93   : > { %3228 = vmatpush3.bf16.msra.mxu1 %v3455_v20 }
  0x94   : > { %3221 = vmatprep.subr.bf16.mxu1 %v3456_v6 }
  0x95   : > { %3192 = vmatpush3.bf16.msra.mxu0 %v3455_v20 }
  0x96   : > { %3050 = vmatmul.mubr.bf16.gmra.mrb[8].mxu1 %v3944_v42  ;;  %3193 = vmatprep.subr.bf16.mxu0 %v3456_v6 }
  0x97   : > { %3229 = vmatpush3.bf16.msra.mxu1 %v3456_v6  ;;  %3053 = vmatprep.mubr.bf16.mxu1 %v3958_v40 }
  0x98   : > { %3178 = vmatmul.mubr.bf16.gmra.mrb[8].mxu0 %v3966_v14  ;;  %3222 = vmatprep.subr.bf16.mxu1 %v3457_v22 }
  0x99   : > { %3194 = vmatpush3.bf16.msra.mxu0 %v3456_v6  ;;  %3181 = vmatprep.mubr.bf16.mxu0 %v3986_v15 }
  0x9a   : > { %3195 = vmatprep.subr.bf16.mxu0 %v3457_v22 }
  0x9b   : > { %3230 = vmatpush3.bf16.msra.mxu1 %v3457_v22 }
  0x9c   : > { %3223 = vmatprep.subr.bf16.mxu1 %v3458_v12 }
  0x9d   : > { %3196 = vmatpush3.bf16.msra.mxu0 %v3457_v22 }
  0x9e   : > { %3054 = vmatmul.mubr.bf16.gmra.mrb[12].mxu1 %v3969_v5  ;;  %3197 = vmatprep.subr.bf16.mxu0 %v3458_v12 }
  0x9f   : > { %3231 = vmatpush3.bf16.msra.mxu1 %v3458_v12  ;;  %3209 = vmatprep.mubr.bf16.mxu1 %v3992_v26 }
  0xa0   : > { %3182 = vmatmul.mubr.bf16.gmra.mrb[12].mxu0 %v3997_v49  ;;  %3224 = vmatprep.subr.bf16.mxu1 %v3459_v32 }
  0xa1   : > { %3198 = vmatpush3.bf16.msra.mxu0 %v3458_v12  ;;  %3201 = vmatprep.mubr.bf16.mxu0 %v3989_v1 }
  0xa2   : > { %3199 = vmatprep.subr.bf16.mxu0 %v3459_v32 }
  0xa3   : > { %3232 = vmatpush3.bf16.msra.mxu1 %v3459_v32 }
  0xa5   : > { %3200 = vmatpush3.bf16.msra.mxu0 %v3459_v32 }
  0xa6   : > { %3210 = vmatmul.mubr.bf16.vlgmr.msra.gmra.mrb[16].mxu1 %v4003_v41 }
  0xa7   : > { %3213 = vmatprep.mubr.bf16.mxu1 %v4014_v52 }
  0xa8   : > { %3202 = vmatmul.mubr.bf16.vlgmr.msra.gmra.mrb[0].mxu0 %v4000_v38 }
  0xa9   : > { %3205 = vmatprep.mubr.bf16.mxu0 %v4011_v51 }
  0xae   : > { %3214 = vmatmul.mubr.bf16.gmra.mrb[20].mxu1 %v4021_v50 }
  0xb0   : > { %3206 = vmatmul.mubr.bf16.gmra.mrb[4].mxu0 %v4017_v25  ;;  %v4132_v25 = vld [vmem:[%s4174_s3] ss:$0 sm:$0xff] }
 0x159   : > { %v3043_v43 = vpop.f32.mrb[0].mxu1 }
 0x15a   : > { %v1094_v59 = vpop.f32.mrb[1].mxu1 }
 0x15b   : > { %v3044_v42 = vpop.f32.mrb[2].mxu1 }
 0x15c   : > { %v1097_v57 = vpop.f32.mrb[3].mxu1 }
 0x161   : > { %v4120_v40 = vpop.f32.mrb[4].mxu1 }
 0x162   : > { %v4122_v14 = vpop.f32.mrb[5].mxu1 }
 0x163   : > { %v4124_v31 = vpop.f32.mrb[6].mxu1 }
 0x164   : > { %v4126_v5 = vpop.f32.mrb[7].mxu1 }
 0x169   : > { %v3051_v7 = vpop.f32.mrb[8].mxu1 }
 0x16a   : > { %v1126_v47 = vpop.f32.mrb[9].mxu1 }
 0x16b   : > { %v3179_v9 = vpop.f32.mrb[8].mxu0  ;;  %v3052_v23 = vpop.f32.mrb[10].mxu1 }
 0x16c   : > { %v3241_v30 = vadd.f32 %v3179_v9, %v3051_v7  ;;  %v2036_v35 = vpop.f32.mrb[9].mxu0  ;;  %v1129_v0 = vpop.f32.mrb[11].mxu1 }
 0x16d   : > { %v3243_v37 = vadd.f32 %v2036_v35, %v1126_v47  ;;  %v3180_v33 = vpop.f32.mrb[10].mxu0 }
 0x16e   : > { %v3245_v29 = vadd.f32 %v3180_v33, %v3052_v23  ;;  %v2039_v8 = vpop.f32.mrb[11].mxu0 }
 0x16f   : > { %v3247_v13 = vadd.f32 %v2039_v8, %v1129_v0 }
 0x171   : > { %v3055_v48 = vpop.f32.mrb[12].mxu1 }
 0x172   : > { %v1142_v15 = vpop.f32.mrb[13].mxu1 }
 0x173   : > { %v3183_v1 = vpop.f32.mrb[12].mxu0  ;;  %v3056_v26 = vpop.f32.mrb[14].mxu1 }
 0x174   : > { %v3249_v34 = vadd.f32 %v3183_v1, %v3055_v48  ;;  %v2052_v49 = vpop.f32.mrb[13].mxu0  ;;  %v1145_v38 = vpop.f32.mrb[15].mxu1 }
 0x175   : > { %v3251_v41 = vadd.f32 %v2052_v49, %v1142_v15  ;;  %v3184_v53 = vpop.f32.mrb[14].mxu0 }
 0x176   : > { %v3253_v11 = vadd.f32 %v3184_v53, %v3056_v26  ;;  %v2055_v51 = vpop.f32.mrb[15].mxu0 }
 0x177   : > { %v3255_v52 = vadd.f32 %v2055_v51, %v1145_v38 }
 0x179   : > { %v3211_v50 = vpop.f32.mrb[16].mxu1 }
 0x17a   : > { %v3242_v46 = vadd.f32 %v3241_v30, %v3211_v50  ;;  %v2240_v45 = vpop.f32.mrb[17].mxu1 }
 0x17b   : > { %v3203_v54 = vpop.f32.mrb[0].mxu0  ;;  %v3244_v18 = vadd.f32 %v3243_v37, %v2240_v45  ;;  %v3212_v58 = vpop.f32.mrb[18].mxu1 }
 0x17c   : > { %v3233_v61 = vadd.f32 %v3203_v54, %v3043_v43  ;;  %v2304_v3 = vadd.f32 %v3242_v46, %v4132_v25  ;;  %v2208_v4 = vpop.f32.mrb[1].mxu0  ;;  %v3246_v16 = vadd.f32 %v3245_v29, %v3212_v58  ;;  %v2243_v55 = vpop.f32.mrb[19].mxu1 }
 0x17d   : > { %v3234_v60 = vadd.f32 %v2208_v4, %v1094_v59  ;;  %v2302_v10 = vadd.f32 %v3244_v18, %v4132_v25  ;;  %v3204_v27 = vpop.f32.mrb[2].mxu0  ;;  %v3248_v17 = vadd.f32 %v3247_v13, %v2243_v55 }
 0x17e   : > { %v2296_v63 = vadd.f32 %v3233_v61, %v4132_v25  ;;  %v3235_v36 = vadd.f32 %v3204_v27, %v3044_v42  ;;  %v2305_v39 = vadd.f32 %v3246_v16, %v4132_v25  ;;  %v2211_v28 = vpop.f32.mrb[3].mxu0  ;;  %v2320_v2 = vmax.f32 %v2304_v3, 0.0 }
 0x17f   : > { %v2294_v19 = vadd.f32 %v3234_v60, %v4132_v25  ;;  %v3236_v62 = vadd.f32 %v2211_v28, %v1097_v57  ;;  %v2303_v44 = vadd.f32 %v3248_v17, %v4132_v25  ;;  %v2318_v24 = vmax.f32 %v2302_v10, 0.0 }
 0x180   : > { %v2297_v21 = vadd.f32 %v3235_v36, %v4132_v25  ;;  %v2321_v56 = vmax.f32 %v2305_v39, 0.0  ;;  %v2312_v12 = vmax.f32 %v2296_v63, 0.0 }
 0x181   : > { %v2295_v20 = vadd.f32 %v3236_v62, %v4132_v25  ;;  %v2319_v6 = vmax.f32 %v2303_v44, 0.0  ;;  %v3215_v22 = vpop.f32.mrb[20].mxu1  ;;  %v2310_v57 = vmax.f32 %v2294_v19, 0.0 }
 0x182   : > { %v2313_v32 = vmax.f32 %v2297_v21, 0.0  ;;  %v2766_v43 = vpack.c.bf16 %v2321_v56, %v2320_v2  ;;  %v3250_v59 = vadd.f32 %v3249_v34, %v3215_v22  ;;  %v2256_v42 = vpop.f32.mrb[21].mxu1 }
 0x183   : > { %v2311_v7 = vmax.f32 %v2295_v20, 0.0  ;;  %v2761_v47 = vpack.c.bf16 %v2319_v6, %v2318_v24  ;;  %v3207_v9 = vpop.f32.mrb[4].mxu0  ;;  %v3252_v23 = vadd.f32 %v3251_v41, %v2256_v42  ;;  %v3216_v30 = vpop.f32.mrb[22].mxu1 }
 0x184   : > { %v2746_v35 = vpack.c.bf16 %v2313_v32, %v2312_v12  ;;  %2782 = vst [vmem:[%s4145_s13 + $0x28] sm:$0xff] %v2766_v43   ;;  %v3237_v0 = vadd.f32 %v3207_v9, %v4120_v40  ;;  %v2308_v37 = vadd.f32 %v3250_v59, %v4132_v25  ;;  %v2224_v33 = vpop.f32.mrb[5].mxu0  ;;  %v3254_v29 = vadd.f32 %v3253_v11, %v3216_v30  ;;  %v2259_v8 = vpop.f32.mrb[23].mxu1 }
 0x185   : > { %v2741_v13 = vpack.c.bf16 %v2311_v7, %v2310_v57  ;;  %2781 = vst [vmem:[%s4145_s13 + $0x20] sm:$0xff] %v2761_v47   ;;  %v3238_v48 = vadd.f32 %v2224_v33, %v4122_v14  ;;  %v2306_v15 = vadd.f32 %v3252_v23, %v4132_v25  ;;  %v3208_v1 = vpop.f32.mrb[6].mxu0  ;;  %v3256_v26 = vadd.f32 %v3255_v52, %v2259_v8 }
 0x186   : > { %2778 = vst [vmem:[%s4145_s13 + $0x8] sm:$0xff] %v2746_v35   ;;  %v2300_v34 = vadd.f32 %v3237_v0, %v4132_v25  ;;  %v3239_v49 = vadd.f32 %v3208_v1, %v4124_v31  ;;  %v2309_v40 = vadd.f32 %v3254_v29, %v4132_v25  ;;  %v2227_v38 = vpop.f32.mrb[7].mxu0  ;;  %v2324_v11 = vmax.f32 %v2308_v37, 0.0 }
 0x187   : > { %2742 = vst [vmem:[%s4145_s13] sm:$0xff] %v2741_v13   ;;  %v2298_v41 = vadd.f32 %v3238_v48, %v4132_v25  ;;  %v3240_v53 = vadd.f32 %v2227_v38, %v4126_v5  ;;  %v2307_v14 = vadd.f32 %v3256_v26, %v4132_v25  ;;  %v2322_v50 = vmax.f32 %v2306_v15, 0.0 }
 0x188   : > { %v2301_v51 = vadd.f32 %v3239_v49, %v4132_v25  ;;  %v2325_v52 = vmax.f32 %v2309_v40, 0.0  ;;  %v2316_v45 = vmax.f32 %v2300_v34, 0.0 }
 0x189   : > { %v2299_v31 = vadd.f32 %v3240_v53, %v4132_v25  ;;  %v2323_v46 = vmax.f32 %v2307_v14, 0.0  ;;  %v2314_v58 = vmax.f32 %v2298_v41, 0.0 }
 0x18a   : > { %v2317_v54 = vmax.f32 %v2301_v51, 0.0  ;;  %v2776_v18 = vpack.c.bf16 %v2325_v52, %v2324_v11 }
 0x18b   : > { %v2315_v61 = vmax.f32 %v2299_v31, 0.0  ;;  %v2771_v3 = vpack.c.bf16 %v2323_v46, %v2322_v50 }
 0x18c   : > { %v2756_v5 = vpack.c.bf16 %v2317_v54, %v2316_v45  ;;  %2784 = vst [vmem:[%s4145_s13 + $0x38] sm:$0xff] %v2776_v18  }
 0x18d   : > { %v2751_v4 = vpack.c.bf16 %v2315_v61, %v2314_v58  ;;  %2783 = vst [vmem:[%s4145_s13 + $0x30] sm:$0xff] %v2771_v3  }
 0x18e   : > { %2780 = vst [vmem:[%s4145_s13 + $0x18] sm:$0xff] %v2756_v5  }
 0x18f   : > { %2779 = vst [vmem:[%s4145_s13 + $0x10] sm:$0xff] %v2751_v4  }
 0x190 PF: > { %s14_s15 = sadd.s32 1, %s3469_s15  }
 0x191   : > { %p11_p6 = scmp.ge.s32.totalorder %s14_s15, 4  }
 0x193   :  { %13 = sbr.rel (!%p11_p6) target bundleno = 1 (0x1), region = 77 }

// kernel: unet_forward.45
= control target key start
LH: loop header
LB: loop body
LE: loop exit
PB: predicated region body
PF: predicated region fallthrough
CT: control target
= control target key end

     0   :  { %s38_s0 = inlined_call_operand.vmem [shape: bf16[2,512], index: 0, kind: input, shape index: {}]   ;;  %s39_s1 = inlined_call_operand.vmem [shape: bf16[2,128], index: 1, kind: output, shape index: {}]  }
   0x1   :  { %v8_v0 = vld [vmem:[%s38_s0] sm:$0xf] }
   0x2   :  { %v10_v1 = vrot.slane %v8_v0, 2 }
   0x4   :  { %v12_v2 = vmax.bf16 %v10_v1, %v8_v0 }
   0x6   :  { %v14_v3 = vrot.slane %v12_v2, 1 }
   0x8   :  { %v16_v4 = vmax.bf16 %v14_v3, %v12_v2 }
   0xa   :  { %17 = vst [vmem:[%s39_s1] sm:$0x1] %v16_v4 }

// kernel: unet_forward.40
= control target key start
LH: loop header
LB: loop body
LE: loop exit
PB: predicated region body
PF: predicated region fallthrough
CT: control target
= control target key end

     0   :  { %v2476_v0 = vmov 0.0   ;;  %vm2477_vm0 = vmmov 0   ;;  %vm143_vm1 = vsmask.f32 7424  ;;  %vm88_vm2 = vcmask 1043456   ;;  %s3132_s2 = inlined_call_operand.vmem [shape: bf16[9,128,128], index: 2, kind: input, shape index: {}]   ;;  %s3133_s0 = inlined_call_operand.vmem [shape: bf16[144,128], index: 0, kind: input, shape index: {}, may-alias: {0,1}]   ;;  %s3134_s1 = inlined_call_operand.vmem [shape: bf16[144,128], index: 1, kind: input, shape index: {}, may-alias: {0,1}]   ;;  %s3135_s3 = inlined_call_operand.vmem [shape: f32[1,128], index: 3, kind: input, shape index: {}]   ;;  %s3136_s4 = inlined_call_operand.vmem [shape: bf16[72,128], index: 4, kind: output, shape index: {}]  }
   0x1   :  { %2052 = vmatprep.subr.bf16.mxu0 %v2476_v0  ;;  %2088 = vmatprep.subr.bf16.mxu1 %v2476_v0  ;;  %v2394_v1 = vld [vmem:[%s3132_s2 + $0x40] sm:$0xff]   ;;  %v2396_v3 = vld [vmem:[%s3132_s2 + $0x48] sm:$0xff]   ;;  %v2398_v5 = vld [vmem:[%s3132_s2 + $0x50] sm:$0xff]   ;;  %vm772_vm3 = vsmask.f32 4352  ;;  %vm1100_vm4 = vcmask 1045504  }
   0x2   :  { %v2395_v2 = vld [vmem:[%s3132_s2] sm:$0xff]   ;;  %2068 = vmatprep.mubr.msk.bf16.mxu0 %vm2477_vm0, %v2476_v0  ;;  %2104 = vmatprep.mubr.msk.bf16.mxu1 %vm2477_vm0, %v2476_v0  ;;  %v2397_v4 = vld [vmem:[%s3132_s2 + $0x8] sm:$0xff]   ;;  %v2399_v6 = vld [vmem:[%s3132_s2 + $0x10] sm:$0xff]   ;;  %vm450_vm5 = vcmask 1046528   ;;  %vm611_vm6 = vcmask 1044480  }
   0x3   :  { %2053 = vmatpush3.bf16.msra.mxu0 %v2394_v1  ;;  %2089 = vmatpush3.bf16.msra.mxu1 %v2395_v2  ;;  %v2400_v7 = vld [vmem:[%s3132_s2 + $0x58] sm:$0xff]   ;;  %v2402_v9 = vld [vmem:[%s3132_s2 + $0x60] sm:$0xff]   ;;  %v2555_v12 = vld [vmem:[%s3133_s0 + $0x8] sm:$0xff]   ;;  %vm1261_vm7 = vsmask.f32 5376 }
   0x4   :  { %2054 = vmatprep.subr.bf16.mxu0 %v2476_v0  ;;  %2090 = vmatprep.subr.bf16.mxu1 %v2476_v0  ;;  %v2401_v8 = vld [vmem:[%s3132_s2 + $0x18] sm:$0xff]   ;;  %v2403_v10 = vld [vmem:[%s3132_s2 + $0x20] sm:$0xff]   ;;  %v2404_v13 = vld [vmem:[%s3132_s2 + $0x68] sm:$0xff]   ;;  %v152_v16 = vshll.u32 %v2555_v12, 16  ;;  %v156_v22 = vshrl.u32 %v2555_v12, 16 }
   0x5   :  { %v2550_v11 = vld [vmem:[%s3133_s0] sm:$0xff]   ;;  %v2405_v14 = vld [vmem:[%s3132_s2 + $0x28] sm:$0xff]   ;;  %v2406_v17 = vld [vmem:[%s3132_s2 + $0x70] sm:$0xff]  }
   0x6   :  { %v147_v15 = vshll.u32 %v2550_v11, 16  ;;  %v145_v18 = vshrl.u32 %v2550_v11, 16  ;;  %v2576_v20 = vld [vmem:[%s3133_s0 + $0x10] sm:$0xff]   ;;  %v777_v21 = vrot.slane %v152_v16, 4  ;;  %v776_v24 = vrot.slane %v156_v22, 3  ;;  %v2587_v25 = vld [vmem:[%s3133_s0 + $0x18] sm:$0xff]  }
   0x7   :  { %2055 = vmatpush3.bf16.msra.mxu0 %v2396_v3  ;;  %2091 = vmatpush3.bf16.msra.mxu1 %v2397_v4  ;;  %v2407_v23 = vld [vmem:[%s3132_s2 + $0x30] sm:$0xff]   ;;  %v2408_v26 = vld [vmem:[%s3132_s2 + $0x78] sm:$0xff]   ;;  %v154_v28 = vrot.slane %v152_v16, 1  ;;  %v2412_v32 = vld [vmem:[%s3132_s2 + $0x80] sm:$0xff]   ;;  %v160_v33 = vshll.u32 %v2576_v20, 16  ;;  %v164_v40 = vshrl.u32 %v2576_v20, 16 }
   0x8   :  { %2056 = vmatprep.subr.bf16.mxu0 %v2476_v0  ;;  %2092 = vmatprep.subr.bf16.mxu1 %v2476_v0  ;;  %v149_v19 = vrot.slane %v147_v15, 1  ;;  %v2594_v29 = vor.u32 %v777_v21, %v776_v24  ;;  %v2409_v30 = vld [vmem:[%s3132_s2 + $0x38] sm:$0xff]   ;;  %v2415_v34 = vld [vmem:[%s3132_s2 + $0xc0] sm:$0xff]   ;;  %v2413_v35 = vld [vmem:[%s3132_s2 + $0x88] sm:$0xff]   ;;  %v168_v41 = vshll.u32 %v2587_v25, 16  ;;  %v773_v50 = vrot.slane %v145_v18, 3 }
   0x9   :  { %v158_v36 = vor.u32 %v156_v22, %v154_v28  ;;  %v162_v37 = vrot.slane %v160_v33, 1  ;;  %v2417_v38 = vld [vmem:[%s3132_s2 + $0xc8] sm:$0xff]   ;;  %v2416_v39 = vld [vmem:[%s3132_s2 + $0x90] sm:$0xff]   ;;  %v2423_v42 = vld [vmem:[%s3133_s0 + $0x20] ss:$0 sps:$4 sm:$0xff]   ;;  %v172_v53 = vshrl.u32 %v2587_v25, 16 }
   0xa   :  { %v150_v27 = vor.u32 %v149_v19, %v145_v18  ;;  %v2424_v44 = vld [vmem:[%s3134_s1 + $0x24] ss:$0 sps:$4 sm:$0xff]   ;;  %v2420_v45 = vld [vmem:[%s3132_s2 + $0xd0] sm:$0xff]   ;;  %v170_v47 = vrot.slane %v168_v41, 1  ;;  %v2419_v48 = vld [vmem:[%s3132_s2 + $0x98] sm:$0xff]   ;;  %v774_v55 = vrot.slane %v147_v15, 4 }
   0xb   :  { %2057 = vmatpush3.bf16.msra.mxu0 %v2398_v5  ;;  %2093 = vmatpush3.bf16.msra.mxu1 %v2399_v6  ;;  %v163_v43 = vsel %vm143_vm1, %v158_v36, %v162_v37  ;;  %v166_v46 = vor.u32 %v164_v40, %v162_v37  ;;  %v2645_v49 = vsel %vm88_vm2, %v2423_v42, %v2424_v44  ;;  %v2421_v51 = vld [vmem:[%s3132_s2 + $0xa0] sm:$0xff]   ;;  %v2422_v52 = vld [vmem:[%s3132_s2 + $0xd8] sm:$0xff]   ;;  %v780_v58 = vrot.slane %v164_v40, 3  ;;  %v2426_v1 = vld [vmem:[%s3132_s2 + $0xa8] sm:$0xff]  }
   0xc   :  { %2058 = vmatprep.subr.bf16.mxu0 %v2476_v0  ;;  %2094 = vmatprep.subr.bf16.mxu1 %v2476_v0  ;;  %v155_v31 = vsel %vm143_vm1, %v150_v27, %v154_v28  ;;  %v176_v54 = vshll.u32 %v2645_v49, 16  ;;  %v180_v57 = vshrl.u32 %v2645_v49, 16  ;;  %v2425_v59 = vld [vmem:[%s3132_s2 + $0xe0] sm:$0xff]   ;;  %v775_v60 = vor.u32 %v774_v55, %v773_v50  ;;  %v2428_v18 = vld [vmem:[%s3132_s2 + $0xb0] sm:$0xff]  }
   0xd   :  { %v171_v56 = vsel %vm143_vm1, %v166_v46, %v170_v47  ;;  %v781_v61 = vrot.slane %v160_v33, 4  ;;  %v784_v63 = vrot.slane %v172_v53, 3  ;;  %v785_v4 = vrot.slane %v168_v41, 4  ;;  %v2702_v16 = vld [vmem:[%s3133_s0 + $0x4] ss:$4 sps:$4 sm:$0xff]   ;;  %v2429_v19 = vld [vmem:[%s3132_s2 + $0xf0] sm:$0xff]  }
   0xe   :  { %v788_v62 = vrot.slane %v180_v57, 3  ;;  %v2677_v2 = vsel %vm772_vm3, %v775_v60, %v2594_v29  ;;  %v174_v5 = vor.u32 %v172_v53, %v170_v47  ;;  %v178_v6 = vrot.slane %v176_v54, 1  ;;  %v2718_v21 = vld [vmem:[%s3133_s0 + $0xc] ss:$4 sps:$4 sm:$0xff]   ;;  %v2739_v28 = vld [vmem:[%s3133_s0 + $0x14] ss:$4 sps:$4 sm:$0xff]  }
   0xf   :  { %2059 = vmatpush3.bf16.msra.mxu0 %v2400_v7  ;;  %2095 = vmatpush3.bf16.msra.mxu1 %v2401_v8  ;;  %v782_v3 = vor.u32 %v781_v61, %v780_v58  ;;  %v789_v7 = vrot.slane %v176_v54, 4  ;;  %v1101_v22 = vrot.slane %v2702_v16, 2  ;;  %v1102_v24 = vrot.slane %v2718_v21, 2  ;;  %v2432_v50 = vld [vmem:[%s3132_s2 + $0x100] sm:$0xff]   ;;  %v2435_v55 = vld [vmem:[%s3132_s2 + $0x110] sm:$0xff]  }
  0x10   :  { %2060 = vmatprep.subr.bf16.mxu0 %v2476_v0  ;;  %2096 = vmatprep.subr.bf16.mxu1 %v2476_v0  ;;  %v179_v15 = vsel %vm143_vm1, %v174_v5, %v178_v6  ;;  %v1263_v27 = vshrl.u32 %v2702_v16, 16  ;;  %v1691_v33 = vcombine.low %v2645_v49, %v2645_v49  ;;  %v451_v36 = vrot.slane %v2550_v11, 1 }
  0x11   :  { %v2686_v8 = vsel %vm772_vm3, %v2594_v29, %v782_v3  ;;  %v101_v29 = vunpack.c.l.bf16 %v2645_v49  ;;  %v1274_v41 = vshll.u32 %v2718_v21, 16  ;;  %v452_v42 = vrot.slane %v2555_v12, 1 }
  0x12   :  { %v613_v44 = vrot.slane %v2555_v12, 3  ;;  %v454_v53 = vrot.slane %v2576_v20, 1  ;;  %v615_v54 = vrot.slane %v2576_v20, 3  ;;  %v102_v60 = vunpack.c.h.bf16 %v2645_v49 }
  0x13   :  { %2061 = vmatpush3.bf16.msra.mxu0 %v2402_v9  ;;  %2097 = vmatpush3.bf16.msra.mxu1 %v2403_v10  ;;  %v786_v9 = vor.u32 %v785_v4, %v784_v63  ;;  %v2427_v10 = vld [vmem:[%s3132_s2 + $0xe8] sm:$0xff]   ;;  %v2438_v4 = vld [vmem:[%s3132_s2 + $0x150] sm:$0xff]  }
  0x14   :  { %2062 = vmatprep.subr.bf16.mxu0 %v2476_v0  ;;  %2098 = vmatprep.subr.bf16.mxu1 %v2476_v0  ;;  %v455_v61 = vsel %vm450_vm5, %v452_v42, %v454_v53 }
  0x17   :  { %2063 = vmatpush3.bf16.msra.mxu0 %v2404_v13  ;;  %2099 = vmatpush3.bf16.msra.mxu1 %v2405_v14  ;;  %v2692_v13 = vor.u32 %v789_v7, %v788_v62  ;;  %v2696_v14 = vsel %vm772_vm3, %v782_v3, %v786_v9  ;;  %v616_v62 = vsel %vm611_vm6, %v613_v44, %v615_v54  ;;  %v456_v3 = vrot.slane %v2587_v25, 1 }
  0x18   :  { %2064 = vmatprep.subr.bf16.mxu0 %v2476_v0  ;;  %2100 = vmatprep.subr.bf16.mxu1 %v2476_v0  ;;  %v617_v7 = vrot.slane %v2587_v25, 3 }
  0x1b   :  { %2065 = vmatpush3.bf16.msra.mxu0 %v2406_v17  ;;  %2101 = vmatpush3.bf16.msra.mxu1 %v2407_v23  ;;  %v2706_v17 = vsel %vm772_vm3, %v786_v9, %v2692_v13  ;;  %v2430_v23 = vld [vmem:[%s3132_s2 + $0xb8] sm:$0xff]  }
  0x1c   :  { %2066 = vmatprep.subr.bf16.mxu0 %v2476_v0  ;;  %2102 = vmatprep.subr.bf16.mxu1 %v2476_v0 }
  0x1f   :  { %2067 = vmatpush3.bf16.msra.mxu0 %v2408_v26  ;;  %2103 = vmatpush3.bf16.msra.mxu1 %v2409_v30  ;;  %v2431_v26 = vld [vmem:[%s3132_s2 + $0xf8] sm:$0xff]   ;;  %v2745_v30 = vsel %vm1100_vm4, %v1101_v22, %v1102_v24 }
  0x20   :  { %2124 = vmatprep.subr.bf16.mxu0 %v2476_v0  ;;  %2160 = vmatprep.subr.bf16.mxu1 %v2476_v0 }
  0x22   :  { %2069 = vmatmul.mubr.bf16.vlgmr.msra.gmra.mrb[0].mxu0 %v155_v31  ;;  %2105 = vmatmul.mubr.bf16.vlgmr.msra.gmra.mrb[0].mxu1 %v2550_v11  ;;  %v182_v31 = vor.u32 %v180_v57, %v178_v6  ;;  %v1460_v6 = vrot.slane %v2739_v28, 3 }
  0x23   :  { %2125 = vmatpush3.bf16.msra.mxu0 %v2412_v32  ;;  %2072 = vmatprep.mubr.msk.bf16.mxu0 %vm2477_vm0, %v2476_v0  ;;  %v1266_v32 = vshll.u32 %v2702_v16, 16 }
  0x24   :  { %2126 = vmatprep.subr.bf16.mxu0 %v2476_v0  ;;  %2108 = vmatprep.mubr.msk.bf16.mxu1 %vm2477_vm0, %v2476_v0 }
  0x25   :  { %2161 = vmatpush3.bf16.msra.mxu1 %v2415_v34  ;;  %v100_v34 = vunpack.c.h.bf16 %v2587_v25 }
  0x26   :  { %2162 = vmatprep.subr.bf16.mxu1 %v2476_v0 }
  0x27   :  { %2127 = vmatpush3.bf16.msra.mxu0 %v2413_v35  ;;  %v1271_v35 = vshrl.u32 %v2718_v21, 16  ;;  %v2755_v37 = vpack.c.bf16 %v101_v29, %v100_v34 }
  0x28   :  { %2128 = vmatprep.subr.bf16.mxu0 %v2476_v0 }
  0x29   :  { %2163 = vmatpush3.bf16.msra.mxu1 %v2417_v38  ;;  %v1265_v38 = vrot.slane %v1263_v27, 2  ;;  %v1273_v40 = vrot.slane %v1271_v35, 2  ;;  %v1289_v57 = vshrl.u32 %v2755_v37, 16  ;;  %v1292_v58 = vshll.u32 %v2755_v37, 16 }
  0x2a   :  { %2073 = vmatmul.mubr.bf16.gmra.mrb[4].mxu0 %v163_v43  ;;  %2164 = vmatprep.subr.bf16.mxu1 %v2476_v0  ;;  %v612_v43 = vrot.slane %v2550_v11, 3  ;;  %v2434_v11 = vld [vmem:[%s3132_s2 + $0x140] sm:$0xff]   ;;  %v1462_v5 = vrot.slane %v2755_v37, 3  ;;  %v1106_v9 = vrot.slane %v2755_v37, 2 }
  0x2b   :  { %2109 = vmatmul.mubr.bf16.gmra.mrb[4].mxu1 %v2555_v12  ;;  %2129 = vmatpush3.bf16.msra.mxu0 %v2416_v39  ;;  %v1268_v39 = vrot.slane %v1266_v32, 3  ;;  %v1294_v22 = vrot.slane %v1292_v58, 3  ;;  %v2440_v32 = vld [vmem:[%s3132_s2 + $0x158] sm:$0xff]   ;;  %v2450_v58 = vld [vmem:[%s3132_s2 + $0x188] sm:$0xff]  }
  0x2c   :  { %2076 = vmatprep.mubr.msk.bf16.mxu0 %vm2477_vm0, %v2476_v0  ;;  %2112 = vmatprep.mubr.msk.bf16.mxu1 %vm2477_vm0, %v2476_v0 }
  0x2d   :  { %2130 = vmatprep.subr.bf16.mxu0 %v2476_v0  ;;  %2165 = vmatpush3.bf16.msra.mxu1 %v2420_v45  ;;  %v1276_v45 = vrot.slane %v1274_v41, 3  ;;  %v1269_v46 = vor.u32 %v1268_v39, %v1265_v38  ;;  %v457_v38 = vsel %vm450_vm5, %v454_v53, %v456_v3  ;;  %v2439_v39 = vld [vmem:[%s3132_s2 + $0x120] sm:$0xff]   ;;  %v2445_v53 = vld [vmem:[%s3132_s2 + $0x170] sm:$0xff]  }
  0x2e   :  { %2166 = vmatprep.subr.bf16.mxu1 %v2476_v0 }
  0x2f   :  { %2131 = vmatpush3.bf16.msra.mxu0 %v2419_v48  ;;  %v2766_v47 = vor.u32 %v1276_v45, %v1273_v40  ;;  %v453_v48 = vsel %vm450_vm5, %v451_v36, %v452_v42  ;;  %v618_v40 = vsel %vm611_vm6, %v615_v54, %v617_v7  ;;  %v458_v45 = vrot.slane %v2645_v49, 1  ;;  %v2446_v54 = vld [vmem:[%s3132_s2 + $0x138] sm:$0xff]  }
  0x30   :  { %2132 = vmatprep.subr.bf16.mxu0 %v2476_v0 }
  0x31   :  { %2167 = vmatpush3.bf16.msra.mxu1 %v2422_v52  ;;  %v2778_v12 = vsel %vm1261_vm7, %v1269_v46, %v2766_v47  ;;  %v2433_v52 = vld [vmem:[%s3132_s2 + $0x108] sm:$0xff]  }
  0x32   :  { %2077 = vmatmul.mubr.bf16.gmra.mrb[8].mxu0 %v171_v56  ;;  %2168 = vmatprep.subr.bf16.mxu1 %v2476_v0  ;;  %v2436_v56 = vld [vmem:[%s3132_s2 + $0x148] sm:$0xff]  }
  0x33   :  { %2113 = vmatmul.mubr.bf16.gmra.mrb[8].mxu1 %v2576_v20  ;;  %2133 = vmatpush3.bf16.msra.mxu0 %v2421_v51  ;;  %v614_v51 = vsel %vm611_vm6, %v612_v43, %v613_v44  ;;  %v2472_v20 = vld [vmem:[%s3134_s1 + $0x28] sm:$0xf]   ;;  %v2441_v43 = vld [vmem:[%s3132_s2 + $0x160] sm:$0xff]  }
  0x34   :  { %2080 = vmatprep.mubr.msk.bf16.mxu0 %vm2477_vm0, %v2476_v0  ;;  %2116 = vmatprep.mubr.msk.bf16.mxu1 %vm2477_vm0, %v2476_v0  ;;  %v103_v63 = vunpack.c.l.bf16 %v2472_v20  ;;  %v2442_v46 = vld [vmem:[%s3132_s2 + $0x128] sm:$0xff]   ;;  %v2456_v20 = vld [vmem:[%s3132_s2 + $0x198] sm:$0xff]  }
  0x35   :  { %2134 = vmatprep.subr.bf16.mxu0 %v2476_v0  ;;  %2169 = vmatpush3.bf16.msra.mxu1 %v2425_v59  ;;  %v1457_v59 = vrot.slane %v2702_v16, 3 }
  0x36   :  { %2170 = vmatprep.subr.bf16.mxu1 %v2476_v0 }
  0x37   :  { %2135 = vmatpush3.bf16.msra.mxu0 %v2426_v1  ;;  %v1458_v1 = vrot.slane %v2718_v21, 3 }
  0x38   :  { %2136 = vmatprep.subr.bf16.mxu0 %v2476_v0 }
  0x39   :  { %2171 = vmatpush3.bf16.msra.mxu1 %v2427_v10  ;;  %v2817_v10 = vpack.c.bf16 %v103_v63, %v102_v60  ;;  %v2458_v60 = vld [vmem:[%s3132_s2 + $0x1a0] sm:$0xff]   ;;  %v2463_v63 = vld [vmem:[%s3132_s2 + $0x1b0] sm:$0xff]  }
  0x3a   :  { %2081 = vmatmul.mubr.bf16.gmra.mrb[12].mxu0 %v179_v15  ;;  %2172 = vmatprep.subr.bf16.mxu1 %v2476_v0  ;;  %v2820_v15 = vsel %vm611_vm6, %v1457_v59, %v1458_v1  ;;  %v2457_v59 = vld [vmem:[%s3132_s2 + $0x1d0] sm:$0xff]  }
  0x3b   :  { %2117 = vmatmul.mubr.bf16.gmra.mrb[12].mxu1 %v2587_v25  ;;  %2084 = vmatprep.mubr.msk.bf16.mxu0 %vm2477_vm0, %v2476_v0  ;;  %v2829_v25 = vsel %vm611_vm6, %v1460_v6, %v1462_v5  ;;  %v1298_v27 = vshrl.u32 %v2817_v10, 16  ;;  %v1301_v29 = vshll.u32 %v2817_v10, 16 }
  0x3c   :  { %2120 = vmatprep.mubr.msk.bf16.mxu1 %vm2477_vm0, %v2476_v0  ;;  %2137 = vmatpush3.bf16.msra.mxu0 %v2428_v18  ;;  %v2437_v18 = vld [vmem:[%s3132_s2 + $0x118] sm:$0xff]  }
  0x3d   :  { %2173 = vmatpush3.bf16.msra.mxu1 %v2429_v19  ;;  %2138 = vmatprep.subr.bf16.mxu0 %v2476_v0  ;;  %v1291_v19 = vrot.slane %v1289_v57, 2  ;;  %v1300_v34 = vrot.slane %v1298_v27, 2  ;;  %v1303_v35 = vrot.slane %v1301_v29, 3  ;;  %v2452_v57 = vld [vmem:[%s3132_s2 + $0x1c0] sm:$0xff]   ;;  %v2475_v29 = vld [vmem:[%s3132_s2 + $0x238] sm:$0xff]  }
  0x3e   :  { %2174 = vmatprep.subr.bf16.mxu1 %v2476_v0 }
  0x3f   :  { %v2862_v41 = vor.u32 %v1294_v22, %v1291_v19  ;;  %v2864_v42 = vor.u32 %v1303_v35, %v1300_v34  ;;  %v1104_v19 = vrot.slane %v2739_v28, 2 }
  0x40   :  { %2139 = vmatpush3.bf16.msra.mxu0 %v2430_v23  ;;  %v2826_v23 = vsel %vm611_vm6, %v1458_v1, %v1460_v6  ;;  %v2464_v1 = vld [vmem:[%s3132_s2 + $0x1f0] sm:$0xff]   ;;  %v1283_v6 = vshll.u32 %v2739_v28, 16 }
  0x41   :  { %2175 = vmatpush3.bf16.msra.mxu1 %v2431_v26  ;;  %2196 = vmatprep.subr.bf16.mxu0 %v2476_v0  ;;  %v1108_v26 = vrot.slane %v2817_v10, 2  ;;  %v2873_v44 = vsel %vm1261_vm7, %v2862_v41, %v2864_v42 }
  0x42   :  { %2085 = vmatmul.mubr.bf16.gmra.mrb[16].mxu0 %v182_v31  ;;  %2232 = vmatprep.subr.bf16.mxu1 %v2476_v0  ;;  %v1464_v31 = vrot.slane %v2817_v10, 3 }
  0x43   :  { %2121 = vmatmul.mubr.bf16.gmra.mrb[16].mxu1 %v1691_v33  ;;  %2140 = vmatprep.mubr.msk.bf16.mxu0 %vm2477_vm0, %v2476_v0  ;;  %v2849_v33 = vsel %vm1100_vm4, %v1106_v9, %v1108_v26 }
  0x44   :  { %2176 = vmatprep.mubr.msk.bf16.mxu1 %vm2477_vm0, %v2476_v0  ;;  %v2854_v36 = vsel %vm611_vm6, %v1462_v5, %v1464_v31  ;;  %v1280_v5 = vshrl.u32 %v2739_v28, 16 }
  0x4a   :  { %2141 = vmatmul.mubr.bf16.vlgmr.msra.gmra.mrb[20].mxu0 %v453_v48  ;;  %v619_v48 = vrot.slane %v2645_v49, 3 }
  0x4b   :  { %2177 = vmatmul.mubr.bf16.vlgmr.msra.gmra.mrb[20].mxu1 %v614_v51  ;;  %2197 = vmatpush3.bf16.msra.mxu0 %v2432_v50  ;;  %v2443_v50 = vld [vmem:[%s3132_s2 + $0x168] sm:$0xff]   ;;  %v459_v51 = vsel %vm450_vm5, %v456_v3, %v458_v45  ;;  %v2465_v3 = vld [vmem:[%s3132_s2 + $0x1b8] sm:$0xff]  }
  0x4c   :  { %2198 = vmatprep.subr.bf16.mxu0 %v2476_v0  ;;  %2144 = vmatprep.mubr.msk.bf16.mxu0 %vm2477_vm0, %v2476_v0 }
  0x4d   :  { %2180 = vmatprep.mubr.msk.bf16.mxu1 %vm2477_vm0, %v2476_v0  ;;  %2233 = vmatpush3.bf16.msra.mxu1 %v2434_v11  ;;  %v620_v11 = vsel %vm611_vm6, %v617_v7, %v619_v48  ;;  %v1282_v7 = vrot.slane %v1280_v5, 2 }
  0x4e   :  { %2234 = vmatprep.subr.bf16.mxu1 %v2476_v0 }
  0x4f   :  { %2199 = vmatpush3.bf16.msra.mxu0 %v2433_v52  ;;  %v2444_v52 = vld [vmem:[%s3132_s2 + $0x130] sm:$0xff]  }
  0x50   :  { %2200 = vmatprep.subr.bf16.mxu0 %v2476_v0 }
  0x51   :  { %2235 = vmatpush3.bf16.msra.mxu1 %v2436_v56  ;;  %v2449_v56 = vld [vmem:[%s3132_s2 + $0x180] sm:$0xff]  }
  0x52   :  { %2145 = vmatmul.mubr.bf16.gmra.mrb[24].mxu0 %v455_v61  ;;  %2236 = vmatprep.subr.bf16.mxu1 %v2476_v0  ;;  %v2460_v61 = vld [vmem:[%s3132_s2 + $0x1e0] sm:$0xff]  }
  0x53   :  { %2181 = vmatmul.mubr.bf16.gmra.mrb[24].mxu1 %v616_v62  ;;  %2201 = vmatpush3.bf16.msra.mxu0 %v2435_v55  ;;  %v2447_v55 = vld [vmem:[%s3132_s2 + $0x178] sm:$0xff]   ;;  %v2461_v62 = vld [vmem:[%s3132_s2 + $0x1a8] sm:$0xff]  }
  0x54   :  { %2148 = vmatprep.mubr.msk.bf16.mxu0 %vm2477_vm0, %v2476_v0  ;;  %2184 = vmatprep.mubr.msk.bf16.mxu1 %vm2477_vm0, %v2476_v0 }
  0x55   :  { %2202 = vmatprep.subr.bf16.mxu0 %v2476_v0  ;;  %2237 = vmatpush3.bf16.msra.mxu1 %v2438_v4  ;;  %v1796_v4 = vcombine.high %v2645_v49, %v2645_v49  ;;  %v2467_v49 = vld [vmem:[%s3132_s2 + $0x200] sm:$0xff]  }
  0x56   :  { %2238 = vmatprep.subr.bf16.mxu1 %v2476_v0 }
  0x57   :  { %2203 = vmatpush3.bf16.msra.mxu0 %v2437_v18  ;;  %v1285_v18 = vrot.slane %v1283_v6, 3 }
  0x58   :  { %2204 = vmatprep.subr.bf16.mxu0 %v2476_v0 }
  0x59   :  { %2239 = vmatpush3.bf16.msra.mxu1 %v2440_v32  ;;  %v1286_v22 = vor.u32 %v1285_v18, %v1282_v7 }
  0x5a   :  { %2149 = vmatmul.mubr.bf16.gmra.mrb[28].mxu0 %v457_v38  ;;  %2240 = vmatprep.subr.bf16.mxu1 %v2476_v0 }
  0x5b   :  { %2185 = vmatmul.mubr.bf16.gmra.mrb[28].mxu1 %v618_v40  ;;  %2205 = vmatpush3.bf16.msra.mxu0 %v2439_v39  ;;  %v1296_v27 = vsel %vm1261_vm7, %v1286_v22, %v2862_v41 }
  0x5c   :  { %2152 = vmatprep.mubr.msk.bf16.mxu0 %vm2477_vm0, %v2476_v0  ;;  %2188 = vmatprep.mubr.msk.bf16.mxu1 %vm2477_vm0, %v2476_v0 }
  0x5d   :  { %2206 = vmatprep.subr.bf16.mxu0 %v2476_v0  ;;  %2241 = vmatpush3.bf16.msra.mxu1 %v2441_v43 }
  0x5e   :  { %2242 = vmatprep.subr.bf16.mxu1 %v2476_v0 }
  0x5f   :  { %2207 = vmatpush3.bf16.msra.mxu0 %v2442_v46 }
  0x60   :  { %2208 = vmatprep.subr.bf16.mxu0 %v2476_v0 }
  0x61   :  { %2243 = vmatpush3.bf16.msra.mxu1 %v2443_v50 }
  0x62   :  { %2153 = vmatmul.mubr.bf16.gmra.mrb[32].mxu0 %v459_v51  ;;  %2244 = vmatprep.subr.bf16.mxu1 %v2476_v0 }
  0x63   :  { %2189 = vmatmul.mubr.bf16.gmra.mrb[32].mxu1 %v620_v11  ;;  %2156 = vmatprep.mubr.msk.bf16.mxu0 %vm2477_vm0, %v2476_v0 }
  0x64   :  { %2192 = vmatprep.mubr.msk.bf16.mxu1 %vm2477_vm0, %v2476_v0  ;;  %2209 = vmatpush3.bf16.msra.mxu0 %v2444_v52 }
  0x65   :  { %2245 = vmatpush3.bf16.msra.mxu1 %v2445_v53  ;;  %2210 = vmatprep.subr.bf16.mxu0 %v2476_v0 }
  0x66   :  { %2246 = vmatprep.subr.bf16.mxu1 %v2476_v0 }
  0x68   :  { %2211 = vmatpush3.bf16.msra.mxu0 %v2446_v54 }
  0x69   :  { %2247 = vmatpush3.bf16.msra.mxu1 %v2447_v55  ;;  %2268 = vmatprep.subr.bf16.mxu0 %v2476_v0 }
  0x6a   :  { %2157 = vmatmul.mubr.bf16.gmra.mrb[36].mxu0 %v458_v45  ;;  %2304 = vmatprep.subr.bf16.mxu1 %v2476_v0 }
  0x6b   :  { %2193 = vmatmul.mubr.bf16.gmra.mrb[36].mxu1 %v619_v48  ;;  %2212 = vmatprep.mubr.msk.bf16.mxu0 %vm2477_vm0, %v2476_v0 }
  0x6c   :  { %2248 = vmatprep.mubr.msk.bf16.mxu1 %vm2477_vm0, %v2476_v0 }
  0x72   :  { %2213 = vmatmul.mubr.bf16.vlgmr.msra.gmra.mrb[40].mxu0 %v2677_v2  ;;  %v2454_v2 = vld [vmem:[%s3132_s2 + $0x1c8] sm:$0xff]  }
  0x73   :  { %2249 = vmatmul.mubr.bf16.vlgmr.msra.gmra.mrb[40].mxu1 %v2702_v16  ;;  %2269 = vmatpush3.bf16.msra.mxu0 %v2449_v56  ;;  %v2453_v16 = vld [vmem:[%s3132_s2 + $0x190] sm:$0xff]  }
  0x74   :  { %2270 = vmatprep.subr.bf16.mxu0 %v2476_v0  ;;  %2216 = vmatprep.mubr.msk.bf16.mxu0 %vm2477_vm0, %v2476_v0 }
  0x75   :  { %2252 = vmatprep.mubr.msk.bf16.mxu1 %vm2477_vm0, %v2476_v0  ;;  %2305 = vmatpush3.bf16.msra.mxu1 %v2452_v57 }
  0x76   :  { %2306 = vmatprep.subr.bf16.mxu1 %v2476_v0 }
  0x77   :  { %2271 = vmatpush3.bf16.msra.mxu0 %v2450_v58 }
  0x78   :  { %2272 = vmatprep.subr.bf16.mxu0 %v2476_v0 }
  0x79   :  { %2307 = vmatpush3.bf16.msra.mxu1 %v2454_v2 }
  0x7a   :  { %2217 = vmatmul.mubr.bf16.gmra.mrb[44].mxu0 %v2686_v8  ;;  %2308 = vmatprep.subr.bf16.mxu1 %v2476_v0  ;;  %v2459_v8 = vld [vmem:[%s3132_s2 + $0x1d8] sm:$0xff]  }
  0x7b   :  { %2253 = vmatmul.mubr.bf16.gmra.mrb[44].mxu1 %v2718_v21  ;;  %2273 = vmatpush3.bf16.msra.mxu0 %v2453_v16  ;;  %v2470_v21 = vld [vmem:[%s3132_s2 + $0x218] sm:$0xff]  }
  0x7c   :  { %2220 = vmatprep.mubr.msk.bf16.mxu0 %vm2477_vm0, %v2476_v0  ;;  %2256 = vmatprep.mubr.msk.bf16.mxu1 %vm2477_vm0, %v2476_v0 }
  0x7d   :  { %2274 = vmatprep.subr.bf16.mxu0 %v2476_v0  ;;  %2309 = vmatpush3.bf16.msra.mxu1 %v2457_v59 }
  0x7e   :  { %2310 = vmatprep.subr.bf16.mxu1 %v2476_v0 }
  0x7f   :  { %2275 = vmatpush3.bf16.msra.mxu0 %v2456_v20 }
  0x80   :  { %2276 = vmatprep.subr.bf16.mxu0 %v2476_v0 }
  0x81   :  { %2311 = vmatpush3.bf16.msra.mxu1 %v2459_v8 }
  0x82   :  { %2221 = vmatmul.mubr.bf16.gmra.mrb[48].mxu0 %v2696_v14  ;;  %2312 = vmatprep.subr.bf16.mxu1 %v2476_v0  ;;  %v2462_v14 = vld [vmem:[%s3132_s2 + $0x1e8] sm:$0xff]  }
  0x83   :  { %2257 = vmatmul.mubr.bf16.gmra.mrb[48].mxu1 %v2739_v28  ;;  %2277 = vmatpush3.bf16.msra.mxu0 %v2458_v60  ;;  %v2469_v28 = vld [vmem:[%s3132_s2 + $0x210] sm:$0xff]  }
  0x84   :  { %2224 = vmatprep.mubr.msk.bf16.mxu0 %vm2477_vm0, %v2476_v0  ;;  %2260 = vmatprep.mubr.msk.bf16.mxu1 %vm2477_vm0, %v2476_v0 }
  0x85   :  { %2278 = vmatprep.subr.bf16.mxu0 %v2476_v0  ;;  %2313 = vmatpush3.bf16.msra.mxu1 %v2460_v61 }
  0x86   :  { %2314 = vmatprep.subr.bf16.mxu1 %v2476_v0 }
  0x87   :  { %2279 = vmatpush3.bf16.msra.mxu0 %v2461_v62 }
  0x88   :  { %2280 = vmatprep.subr.bf16.mxu0 %v2476_v0 }
  0x89   :  { %2315 = vmatpush3.bf16.msra.mxu1 %v2462_v14 }
  0x8a   :  { %2225 = vmatmul.mubr.bf16.gmra.mrb[52].mxu0 %v2706_v17  ;;  %2316 = vmatprep.subr.bf16.mxu1 %v2476_v0  ;;  %v2466_v17 = vld [vmem:[%s3132_s2 + $0x1f8] sm:$0xff]  }
  0x8b   :  { %2261 = vmatmul.mubr.bf16.gmra.mrb[52].mxu1 %v2755_v37  ;;  %2228 = vmatprep.mubr.msk.bf16.mxu0 %vm2477_vm0, %v2476_v0  ;;  %v2473_v37 = vld [vmem:[%s3132_s2 + $0x228] sm:$0xff]  }
  0x8c   :  { %2264 = vmatprep.mubr.msk.bf16.mxu1 %vm2477_vm0, %v2476_v0  ;;  %2281 = vmatpush3.bf16.msra.mxu0 %v2463_v63 }
  0x8d   :  { %2317 = vmatpush3.bf16.msra.mxu1 %v2464_v1  ;;  %2282 = vmatprep.subr.bf16.mxu0 %v2476_v0 }
  0x8e   :  { %2318 = vmatprep.subr.bf16.mxu1 %v2476_v0 }
  0x90   :  { %2283 = vmatpush3.bf16.msra.mxu0 %v2465_v3 }
  0x91   :  { %2319 = vmatpush3.bf16.msra.mxu1 %v2466_v17  ;;  %2340 = vmatprep.subr.bf16.mxu0 %v2476_v0 }
  0x92   :  { %2229 = vmatmul.mubr.bf16.gmra.mrb[56].mxu0 %v2692_v13  ;;  %2376 = vmatprep.subr.bf16.mxu1 %v2476_v0  ;;  %v2468_v13 = vld [vmem:[%s3132_s2 + $0x208] sm:$0xff]  }
  0x93   :  { %2265 = vmatmul.mubr.bf16.gmra.mrb[56].mxu1 %v1796_v4  ;;  %2284 = vmatprep.mubr.msk.bf16.mxu0 %vm2477_vm0, %v2476_v0 }
  0x94   :  { %2320 = vmatprep.mubr.msk.bf16.mxu1 %vm2477_vm0, %v2476_v0 }
  0x9a   :  { %2285 = vmatmul.mubr.bf16.vlgmr.msra.gmra.mrb[60].mxu0 %v2745_v30  ;;  %v1105_v30 = vsel %vm1100_vm4, %v1102_v24, %v1104_v19  ;;  %v1107_v24 = vsel %vm1100_vm4, %v1104_v19, %v1106_v9  ;;  %v2474_v9 = vld [vmem:[%s3132_s2 + $0x230] sm:$0xff]  }
  0x9b   :  { %2321 = vmatmul.mubr.bf16.vlgmr.msra.gmra.mrb[60].mxu1 %v2778_v12  ;;  %2341 = vmatpush3.bf16.msra.mxu0 %v2467_v49  ;;  %v1287_v12 = vsel %vm1261_vm7, %v2766_v47, %v1286_v22  ;;  %v2471_v47 = vld [vmem:[%s3132_s2 + $0x220] sm:$0xff]  }
  0x9c   :  { %2342 = vmatprep.subr.bf16.mxu0 %v2476_v0  ;;  %2288 = vmatprep.mubr.msk.bf16.mxu0 %vm2477_vm0, %v2476_v0 }
  0x9d   :  { %2324 = vmatprep.mubr.msk.bf16.mxu1 %vm2477_vm0, %v2476_v0  ;;  %2384 = vmatpush3.bf16.msra.mxu1 %v2467_v49 }
  0x9e   :  { %2377 = vmatprep.subr.bf16.mxu1 %v2476_v0 }
  0x9f   :  { %2343 = vmatpush3.bf16.msra.mxu0 %v2468_v13 }
  0xa0   :  { %2344 = vmatprep.subr.bf16.mxu0 %v2476_v0 }
  0xa1   :  { %2385 = vmatpush3.bf16.msra.mxu1 %v2468_v13 }
  0xa2   :  { %2289 = vmatmul.mubr.bf16.gmra.mrb[64].mxu0 %v1105_v30  ;;  %2378 = vmatprep.subr.bf16.mxu1 %v2476_v0 }
  0xa3   :  { %2325 = vmatmul.mubr.bf16.gmra.mrb[64].mxu1 %v1287_v12  ;;  %2345 = vmatpush3.bf16.msra.mxu0 %v2469_v28 }
  0xa4   :  { %2292 = vmatprep.mubr.msk.bf16.mxu0 %vm2477_vm0, %v2476_v0  ;;  %2328 = vmatprep.mubr.msk.bf16.mxu1 %vm2477_vm0, %v2476_v0 }
  0xa5   :  { %2346 = vmatprep.subr.bf16.mxu0 %v2476_v0  ;;  %2386 = vmatpush3.bf16.msra.mxu1 %v2469_v28 }
  0xa6   :  { %2379 = vmatprep.subr.bf16.mxu1 %v2476_v0 }
  0xa7   :  { %2347 = vmatpush3.bf16.msra.mxu0 %v2470_v21 }
  0xa8   :  { %2348 = vmatprep.subr.bf16.mxu0 %v2476_v0 }
  0xa9   :  { %2387 = vmatpush3.bf16.msra.mxu1 %v2470_v21 }
  0xaa   :  { %2293 = vmatmul.mubr.bf16.gmra.mrb[68].mxu0 %v1107_v24  ;;  %2380 = vmatprep.subr.bf16.mxu1 %v2476_v0 }
  0xab   :  { %2329 = vmatmul.mubr.bf16.gmra.mrb[68].mxu1 %v1296_v27  ;;  %2349 = vmatpush3.bf16.msra.mxu0 %v2471_v47 }
  0xac   :  { %2296 = vmatprep.mubr.msk.bf16.mxu0 %vm2477_vm0, %v2476_v0  ;;  %2332 = vmatprep.mubr.msk.bf16.mxu1 %vm2477_vm0, %v2476_v0 }
  0xad   :  { %2388 = vmatpush3.bf16.msra.mxu1 %v2471_v47  ;;  %2350 = vmatprep.subr.bf16.mxu0 %v2476_v0 }
  0xae   :  { %2381 = vmatprep.subr.bf16.mxu1 %v2476_v0 }
  0xaf   :  { %2351 = vmatpush3.bf16.msra.mxu0 %v2473_v37 }
  0xb0   :  { %2352 = vmatprep.subr.bf16.mxu0 %v2476_v0 }
  0xb1   :  { %2389 = vmatpush3.bf16.msra.mxu1 %v2473_v37 }
  0xb2   :  { %2297 = vmatmul.mubr.bf16.gmra.mrb[72].mxu0 %v2849_v33  ;;  %2382 = vmatprep.subr.bf16.mxu1 %v2476_v0 }
  0xb3   :  { %2333 = vmatmul.mubr.bf16.gmra.mrb[72].mxu1 %v2873_v44  ;;  %2300 = vmatprep.mubr.msk.bf16.mxu0 %vm2477_vm0, %v2476_v0 }
  0xb4   :  { %2336 = vmatprep.mubr.msk.bf16.mxu1 %vm2477_vm0, %v2476_v0  ;;  %2353 = vmatpush3.bf16.msra.mxu0 %v2474_v9 }
  0xb5   :  { %2390 = vmatpush3.bf16.msra.mxu1 %v2474_v9  ;;  %2354 = vmatprep.subr.bf16.mxu0 %v2476_v0 }
  0xb6   :  { %2383 = vmatprep.subr.bf16.mxu1 %v2476_v0 }
  0xb8   :  { %2355 = vmatpush3.bf16.msra.mxu0 %v2475_v29 }
  0xb9   :  { %2391 = vmatpush3.bf16.msra.mxu1 %v2475_v29 }
  0xba   :  { %2301 = vmatmul.mubr.bf16.gmra.mrb[76].mxu0 %v1108_v26 }
  0xbb   :  { %2337 = vmatmul.mubr.bf16.gmra.mrb[76].mxu1 %v2864_v42  ;;  %2356 = vmatprep.mubr.msk.bf16.mxu0 %vm2477_vm0, %v2476_v0 }
  0xbc   :  { %2368 = vmatprep.mubr.msk.bf16.mxu1 %vm2477_vm0, %v2476_v0 }
  0xc2   :  { %2357 = vmatmul.mubr.bf16.vlgmr.msra.gmra.mrb[80].mxu0 %v2820_v15 }
  0xc3   :  { %2369 = vmatmul.mubr.bf16.vlgmr.msra.gmra.mrb[80].mxu1 %v2854_v36  ;;  %2360 = vmatprep.mubr.msk.bf16.mxu0 %vm2477_vm0, %v2476_v0 }
  0xc4   :  { %2372 = vmatprep.mubr.msk.bf16.mxu1 %vm2477_vm0, %v2476_v0 }
  0xca   :  { %2361 = vmatmul.mubr.bf16.gmra.mrb[84].mxu0 %v2826_v23 }
  0xcb   :  { %2373 = vmatmul.mubr.bf16.gmra.mrb[84].mxu1 %v1464_v31  ;;  %2364 = vmatprep.mubr.msk.bf16.mxu0 %vm2477_vm0, %v2476_v0 }
  0xd2   :  { %2365 = vmatmul.mubr.bf16.gmra.mrb[88].mxu0 %v2829_v25 }
  0xf5   :  { %v270_v26 = vpop.f32.mrb[0].mxu0  ;;  %v390_v15 = vpop.f32.mrb[0].mxu1 }
  0xf6   :  { %v2070_v32 = vpop.f32.mrb[1].mxu0  ;;  %v391_v33 = vadd.f32 %v390_v15, %v270_v26  ;;  %v2106_v34 = vpop.f32.mrb[1].mxu1 }
  0xf7   :  { %v273_v35 = vpop.f32.mrb[2].mxu0  ;;  %v393_v36 = vpop.f32.mrb[2].mxu1 }
  0xf8   :  { %v2071_v38 = vpop.f32.mrb[3].mxu0  ;;  %v394_v39 = vadd.f32 %v393_v36, %v273_v35  ;;  %v2107_v40 = vpop.f32.mrb[3].mxu1 }
  0xfd   :  { %v278_v41 = vpop.f32.mrb[4].mxu0 }
  0xfe   :  { %v398_v23 = vpop.f32.mrb[4].mxu1  ;;  %v2074_v42 = vpop.f32.mrb[5].mxu0 }
  0xff   :  { %v399_v10 = vadd.f32 %v398_v23, %v278_v41  ;;  %v2110_v31 = vpop.f32.mrb[5].mxu1  ;;  %v281_v43 = vpop.f32.mrb[6].mxu0 }
 0x100   :  { %v401_v44 = vpop.f32.mrb[6].mxu1  ;;  %v2075_v0 = vpop.f32.mrb[7].mxu0 }
 0x101   :  { %v402_v45 = vadd.f32 %v401_v44, %v281_v43  ;;  %v2111_v25 = vpop.f32.mrb[7].mxu1 }
 0x105   :  { %v286_v46 = vpop.f32.mrb[8].mxu0 }
 0x106   :  { %v406_v48 = vpop.f32.mrb[8].mxu1  ;;  %v2078_v50 = vpop.f32.mrb[9].mxu0 }
 0x107   :  { %v407_v51 = vadd.f32 %v406_v48, %v286_v46  ;;  %v2114_v11 = vpop.f32.mrb[9].mxu1  ;;  %v289_v52 = vpop.f32.mrb[10].mxu0 }
 0x108   :  { %v409_v53 = vpop.f32.mrb[10].mxu1  ;;  %v2079_v54 = vpop.f32.mrb[11].mxu0 }
 0x109   :  { %v410_v55 = vadd.f32 %v409_v53, %v289_v52  ;;  %v2115_v56 = vpop.f32.mrb[11].mxu1 }
 0x10d   :  { %v294_v57 = vpop.f32.mrb[12].mxu0 }
 0x10e   :  { %v414_v58 = vpop.f32.mrb[12].mxu1  ;;  %v2082_v2 = vpop.f32.mrb[13].mxu0 }
 0x10f   :  { %v415_v16 = vadd.f32 %v414_v58, %v294_v57  ;;  %v2118_v59 = vpop.f32.mrb[13].mxu1  ;;  %v297_v20 = vpop.f32.mrb[14].mxu0 }
 0x110   :  { %v417_v8 = vpop.f32.mrb[14].mxu1  ;;  %v2083_v60 = vpop.f32.mrb[15].mxu0 }
 0x111   :  { %v418_v61 = vadd.f32 %v417_v8, %v297_v20  ;;  %v2119_v62 = vpop.f32.mrb[15].mxu1 }
 0x115   :  { %v302_v14 = vpop.f32.mrb[16].mxu0 }
 0x116   :  { %v2086_v63 = vpop.f32.mrb[17].mxu0  ;;  %v422_v1 = vpop.f32.mrb[16].mxu1 }
 0x117   :  { %v423_v3 = vadd.f32 %v422_v1, %v302_v14  ;;  %v305_v17 = vpop.f32.mrb[18].mxu0  ;;  %v2122_v4 = vpop.f32.mrb[17].mxu1 }
 0x118   :  { %v2087_v5 = vpop.f32.mrb[19].mxu0  ;;  %v425_v6 = vpop.f32.mrb[18].mxu1 }
 0x119   :  { %v2123_v49 = vpop.f32.mrb[19].mxu1 }
 0x11d   :  { %v547_v7 = vpop.f32.mrb[20].mxu0 }
 0x11e   :  { %v585_v18 = vadd.f32 %v547_v7, %v391_v33  ;;  %v2142_v13 = vpop.f32.mrb[21].mxu0  ;;  %v708_v19 = vpop.f32.mrb[20].mxu1 }
 0x11f   :  { %v550_v22 = vpop.f32.mrb[22].mxu0  ;;  %v2178_v30 = vpop.f32.mrb[21].mxu1 }
 0x120   :  { %v586_v28 = vadd.f32 %v550_v22, %v394_v39  ;;  %v746_v12 = vadd.f32 %v708_v19, %v585_v18  ;;  %v2143_v21 = vpop.f32.mrb[23].mxu0  ;;  %v711_v24 = vpop.f32.mrb[22].mxu1 }
 0x121   :  { %v2179_v47 = vpop.f32.mrb[23].mxu1 }
 0x122   :  { %v747_v27 = vadd.f32 %v711_v24, %v586_v28 }
 0x125   :  { %v555_v37 = vpop.f32.mrb[24].mxu0 }
 0x126   :  { %v587_v9 = vadd.f32 %v555_v37, %v399_v10  ;;  %v2146_v29 = vpop.f32.mrb[25].mxu0  ;;  %v716_v26 = vpop.f32.mrb[24].mxu1 }
 0x127   :  { %v558_v15 = vpop.f32.mrb[26].mxu0  ;;  %v2182_v32 = vpop.f32.mrb[25].mxu1 }
 0x128   :  { %v588_v34 = vadd.f32 %v558_v15, %v402_v45  ;;  %v748_v35 = vadd.f32 %v716_v26, %v587_v9  ;;  %v2147_v36 = vpop.f32.mrb[27].mxu0  ;;  %v719_v33 = vpop.f32.mrb[26].mxu1 }
 0x129   :  { %v2183_v38 = vpop.f32.mrb[27].mxu1 }
 0x12a   :  { %v749_v40 = vadd.f32 %v719_v33, %v588_v34 }
 0x12d   :  { %v563_v41 = vpop.f32.mrb[28].mxu0 }
 0x12e   :  { %v589_v23 = vadd.f32 %v563_v41, %v407_v51  ;;  %v2150_v39 = vpop.f32.mrb[29].mxu0  ;;  %v724_v42 = vpop.f32.mrb[28].mxu1 }
 0x12f   :  { %v566_v31 = vpop.f32.mrb[30].mxu0  ;;  %v2186_v43 = vpop.f32.mrb[29].mxu1 }
 0x130   :  { %v590_v44 = vadd.f32 %v566_v31, %v410_v55  ;;  %v750_v0 = vadd.f32 %v724_v42, %v589_v23  ;;  %v2151_v25 = vpop.f32.mrb[31].mxu0  ;;  %v727_v10 = vpop.f32.mrb[30].mxu1 }
 0x131   :  { %v2187_v46 = vpop.f32.mrb[31].mxu1 }
 0x132   :  { %v751_v48 = vadd.f32 %v727_v10, %v590_v44 }
 0x135   :  { %v571_v50 = vpop.f32.mrb[32].mxu0 }
 0x136   :  { %v591_v11 = vadd.f32 %v571_v50, %v415_v16  ;;  %v2154_v45 = vpop.f32.mrb[33].mxu0  ;;  %v732_v52 = vpop.f32.mrb[32].mxu1 }
 0x137   :  { %v574_v53 = vpop.f32.mrb[34].mxu0  ;;  %v2190_v54 = vpop.f32.mrb[33].mxu1 }
 0x138   :  { %v592_v56 = vadd.f32 %v574_v53, %v418_v61  ;;  %v752_v57 = vadd.f32 %v732_v52, %v591_v11  ;;  %v2155_v58 = vpop.f32.mrb[35].mxu0  ;;  %v735_v51 = vpop.f32.mrb[34].mxu1 }
 0x139   :  { %v2191_v2 = vpop.f32.mrb[35].mxu1 }
 0x13a   :  { %v753_v59 = vadd.f32 %v735_v51, %v592_v56 }
 0x13d   :  { %v579_v20 = vpop.f32.mrb[36].mxu0 }
 0x13e   :  { %v593_v8 = vadd.f32 %v579_v20, %v423_v3  ;;  %v2158_v55 = vpop.f32.mrb[37].mxu0  ;;  %v740_v60 = vpop.f32.mrb[36].mxu1 }
 0x13f   :  { %v582_v62 = vpop.f32.mrb[38].mxu0  ;;  %v2194_v14 = vpop.f32.mrb[37].mxu1 }
 0x140   :  { %v754_v63 = vadd.f32 %v740_v60, %v593_v8  ;;  %v2159_v1 = vpop.f32.mrb[39].mxu0  ;;  %v743_v17 = vpop.f32.mrb[38].mxu1 }
 0x141   :  { %v2195_v16 = vpop.f32.mrb[39].mxu1 }
 0x145   :  { %v879_v4 = vpop.f32.mrb[40].mxu0 }
 0x146   :  { %v917_v5 = vadd.f32 %v879_v4, %v746_v12  ;;  %v2214_v6 = vpop.f32.mrb[41].mxu0  ;;  %v1030_v49 = vpop.f32.mrb[40].mxu1 }
 0x147   :  { %v882_v61 = vpop.f32.mrb[42].mxu0  ;;  %v2250_v7 = vpop.f32.mrb[41].mxu1 }
 0x148   :  { %v918_v18 = vadd.f32 %v882_v61, %v747_v27  ;;  %v1068_v13 = vadd.f32 %v1030_v49, %v917_v5  ;;  %v2215_v19 = vpop.f32.mrb[43].mxu0  ;;  %v1033_v22 = vpop.f32.mrb[42].mxu1 }
 0x149   :  { %v2251_v30 = vpop.f32.mrb[43].mxu1 }
 0x14a   :  { %v1069_v3 = vadd.f32 %v1033_v22, %v918_v18 }
 0x14d   :  { %v887_v28 = vpop.f32.mrb[44].mxu0 }
 0x14e   :  { %v919_v21 = vadd.f32 %v887_v28, %v748_v35  ;;  %v2218_v24 = vpop.f32.mrb[45].mxu0  ;;  %v1038_v47 = vpop.f32.mrb[44].mxu1 }
 0x14f   :  { %v890_v37 = vpop.f32.mrb[46].mxu0  ;;  %v2254_v9 = vpop.f32.mrb[45].mxu1 }
 0x150   :  { %v920_v29 = vadd.f32 %v890_v37, %v749_v40  ;;  %v1070_v26 = vadd.f32 %v1038_v47, %v919_v21  ;;  %v2219_v15 = vpop.f32.mrb[47].mxu0  ;;  %v1041_v12 = vpop.f32.mrb[46].mxu1 }
 0x151   :  { %v2255_v32 = vpop.f32.mrb[47].mxu1 }
 0x152   :  { %v1071_v34 = vadd.f32 %v1041_v12, %v920_v29 }
 0x155   :  { %v895_v36 = vpop.f32.mrb[48].mxu0 }
 0x156   :  { %v921_v33 = vadd.f32 %v895_v36, %v750_v0  ;;  %v2222_v27 = vpop.f32.mrb[49].mxu0  ;;  %v1046_v38 = vpop.f32.mrb[48].mxu1 }
 0x157   :  { %v898_v41 = vpop.f32.mrb[50].mxu0  ;;  %v2258_v23 = vpop.f32.mrb[49].mxu1 }
 0x158   :  { %v922_v39 = vadd.f32 %v898_v41, %v751_v48  ;;  %v1072_v42 = vadd.f32 %v1046_v38, %v921_v33  ;;  %v2223_v31 = vpop.f32.mrb[51].mxu0  ;;  %v1049_v35 = vpop.f32.mrb[50].mxu1 }
 0x159   :  { %v2259_v43 = vpop.f32.mrb[51].mxu1 }
 0x15a   :  { %v1073_v44 = vadd.f32 %v1049_v35, %v922_v39 }
 0x15d   :  { %v903_v25 = vpop.f32.mrb[52].mxu0 }
 0x15e   :  { %v923_v10 = vadd.f32 %v903_v25, %v752_v57  ;;  %v2226_v40 = vpop.f32.mrb[53].mxu0  ;;  %v1054_v46 = vpop.f32.mrb[52].mxu1 }
 0x15f   :  { %v906_v50 = vpop.f32.mrb[54].mxu0  ;;  %v2262_v11 = vpop.f32.mrb[53].mxu1 }
 0x160   :  { %v924_v45 = vadd.f32 %v906_v50, %v753_v59  ;;  %v1074_v52 = vadd.f32 %v1054_v46, %v923_v10  ;;  %v2227_v53 = vpop.f32.mrb[55].mxu0  ;;  %v1057_v0 = vpop.f32.mrb[54].mxu1 }
 0x161   :  { %v2263_v54 = vpop.f32.mrb[55].mxu1 }
 0x162   :  { %v1075_v56 = vadd.f32 %v1057_v0, %v924_v45 }
 0x165   :  { %v911_v58 = vpop.f32.mrb[56].mxu0 }
 0x166   :  { %v925_v51 = vadd.f32 %v911_v58, %v754_v63  ;;  %v2230_v48 = vpop.f32.mrb[57].mxu0  ;;  %v1062_v2 = vpop.f32.mrb[56].mxu1 }
 0x167   :  { %v914_v20 = vpop.f32.mrb[58].mxu0  ;;  %v2266_v8 = vpop.f32.mrb[57].mxu1 }
 0x168   :  { %v1076_v55 = vadd.f32 %v1062_v2, %v925_v51  ;;  %v2231_v60 = vpop.f32.mrb[59].mxu0  ;;  %v1065_v62 = vpop.f32.mrb[58].mxu1 }
 0x169   :  { %v2267_v57 = vpop.f32.mrb[59].mxu1 }
 0x16d   :  { %v1197_v14 = vpop.f32.mrb[60].mxu0 }
 0x16e   :  { %v1235_v1 = vadd.f32 %v1197_v14, %v1068_v13  ;;  %v2286_v17 = vpop.f32.mrb[61].mxu0  ;;  %v1393_v16 = vpop.f32.mrb[60].mxu1 }
 0x16f   :  { %v1200_v59 = vpop.f32.mrb[62].mxu0  ;;  %v2322_v4 = vpop.f32.mrb[61].mxu1 }
 0x170   :  { %v1236_v5 = vadd.f32 %v1200_v59, %v1069_v3  ;;  %v1431_v6 = vadd.f32 %v1393_v16, %v1235_v1  ;;  %v2287_v49 = vpop.f32.mrb[63].mxu0  ;;  %v1396_v61 = vpop.f32.mrb[62].mxu1 }
 0x171   :  { %v2323_v7 = vpop.f32.mrb[63].mxu1 }
 0x172   :  { %v1432_v63 = vadd.f32 %v1396_v61, %v1236_v5 }
 0x175   :  { %v1205_v18 = vpop.f32.mrb[64].mxu0 }
 0x176   :  { %v1237_v19 = vadd.f32 %v1205_v18, %v1070_v26  ;;  %v2290_v22 = vpop.f32.mrb[65].mxu0  ;;  %v1401_v30 = vpop.f32.mrb[64].mxu1 }
 0x177   :  { %v1208_v28 = vpop.f32.mrb[66].mxu0  ;;  %v2326_v21 = vpop.f32.mrb[65].mxu1 }
 0x178   :  { %v1238_v24 = vadd.f32 %v1208_v28, %v1071_v34  ;;  %v3102_v47 = vadd.f32 %v1401_v30, %v1237_v19  ;;  %v2291_v13 = vpop.f32.mrb[67].mxu0  ;;  %v1404_v37 = vpop.f32.mrb[66].mxu1 }
 0x179   :  { %v2327_v9 = vpop.f32.mrb[67].mxu1 }
 0x17a   :  { %v3104_v29 = vadd.f32 %v1404_v37, %v1238_v24 }
 0x17d   :  { %v1213_v3 = vpop.f32.mrb[68].mxu0 }
 0x17e   :  { %v1239_v15 = vadd.f32 %v1213_v3, %v1072_v42  ;;  %v2294_v12 = vpop.f32.mrb[69].mxu0  ;;  %v1409_v32 = vpop.f32.mrb[68].mxu1 }
 0x17f   :  { %v1216_v36 = vpop.f32.mrb[70].mxu0  ;;  %v2330_v33 = vpop.f32.mrb[69].mxu1 }
 0x180   :  { %v1240_v27 = vadd.f32 %v1216_v36, %v1073_v44  ;;  %v3106_v26 = vadd.f32 %v1409_v32, %v1239_v15  ;;  %v2295_v38 = vpop.f32.mrb[71].mxu0  ;;  %v1412_v41 = vpop.f32.mrb[70].mxu1 }
 0x181   :  { %v2331_v23 = vpop.f32.mrb[71].mxu1 }
 0x182   :  { %v3108_v34 = vadd.f32 %v1412_v41, %v1240_v27 }
 0x185   :  { %v1221_v39 = vpop.f32.mrb[72].mxu0 }
 0x186   :  { %v1241_v31 = vadd.f32 %v1221_v39, %v1074_v52  ;;  %v2298_v35 = vpop.f32.mrb[73].mxu0  ;;  %v1417_v43 = vpop.f32.mrb[72].mxu1 }
 0x187   :  { %v1224_v25 = vpop.f32.mrb[74].mxu0  ;;  %v2334_v10 = vpop.f32.mrb[73].mxu1 }
 0x188   :  { %v1242_v40 = vadd.f32 %v1224_v25, %v1075_v56  ;;  %v1437_v42 = vadd.f32 %v1417_v43, %v1241_v31  ;;  %v2299_v46 = vpop.f32.mrb[75].mxu0  ;;  %v1420_v50 = vpop.f32.mrb[74].mxu1  ;;  %v1893_v56 = vld [vmem:[%s3135_s3] ss:$0 sm:$0xff] }
 0x189   :  { %v2335_v11 = vpop.f32.mrb[75].mxu1 }
 0x18a   :  { %v1438_v45 = vadd.f32 %v1420_v50, %v1242_v40 }
 0x18d   :  { %v1229_v44 = vpop.f32.mrb[76].mxu0 }
 0x18e   :  { %v1243_v53 = vadd.f32 %v1229_v44, %v1076_v55  ;;  %v2302_v0 = vpop.f32.mrb[77].mxu0  ;;  %v1425_v54 = vpop.f32.mrb[76].mxu1 }
 0x18f   :  { %v1232_v58 = vpop.f32.mrb[78].mxu0  ;;  %v2338_v51 = vpop.f32.mrb[77].mxu1 }
 0x190   :  { %v1439_v48 = vadd.f32 %v1425_v54, %v1243_v53  ;;  %v2303_v2 = vpop.f32.mrb[79].mxu0  ;;  %v1428_v20 = vpop.f32.mrb[78].mxu1 }
 0x191   :  { %v2339_v52 = vpop.f32.mrb[79].mxu1 }
 0x195   :  { %v1553_v8 = vpop.f32.mrb[80].mxu0 }
 0x196   :  { %v1591_v60 = vadd.f32 %v1553_v8, %v1431_v6  ;;  %v1577_v62 = vpop.f32.mrb[80].mxu1  ;;  %v2358_v57 = vpop.f32.mrb[81].mxu0 }
 0x197   :  { %v1597_v14 = vadd.f32 %v1577_v62, %v1437_v42  ;;  %v2370_v1 = vpop.f32.mrb[81].mxu1  ;;  %v1556_v17 = vpop.f32.mrb[82].mxu0 }
 0x198   :  { %v1607_v55 = vadd.f32 %v1893_v56, %v1591_v60  ;;  %v1592_v16 = vadd.f32 %v1556_v17, %v1432_v63  ;;  %v1580_v59 = vpop.f32.mrb[82].mxu1  ;;  %v2359_v4 = vpop.f32.mrb[83].mxu0 }
 0x199   :  { %v1613_v5 = vadd.f32 %v1893_v56, %v1597_v14  ;;  %v1598_v49 = vadd.f32 %v1580_v59, %v1438_v45  ;;  %v2371_v61 = vpop.f32.mrb[83].mxu1 }
 0x19a   :  { %v1608_v7 = vadd.f32 %v1893_v56, %v1592_v16  ;;  %v1616_v19 = vmax.f32 %v1607_v55, 0.0 }
 0x19b   :  { %v1614_v18 = vadd.f32 %v1893_v56, %v1598_v49  ;;  %v1622_v30 = vmax.f32 %v1613_v5, 0.0 }
 0x19c   :  { %v1617_v22 = vmax.f32 %v1608_v7, 0.0 }
 0x19d   :  { %v1623_v28 = vmax.f32 %v1614_v18, 0.0  ;;  %v1561_v21 = vpop.f32.mrb[84].mxu0 }
 0x19e   :  { %v1915_v6 = vpack.c.bf16 %v1617_v22, %v1616_v19  ;;  %v1593_v24 = vadd.f32 %v1561_v21, %v3102_v47  ;;  %v1585_v13 = vpop.f32.mrb[84].mxu1  ;;  %v2362_v37 = vpop.f32.mrb[85].mxu0 }
 0x19f   :  { %v1930_v9 = vpack.c.bf16 %v1623_v28, %v1622_v30  ;;  %v1599_v3 = vadd.f32 %v1585_v13, %v1439_v48  ;;  %v1564_v63 = vpop.f32.mrb[86].mxu0  ;;  %v2374_v15 = vpop.f32.mrb[85].mxu1 }
 0x1a0   :  { %1916 = vst [vmem:[%s3136_s4] sm:$0xff] %v1915_v6   ;;  %v1609_v12 = vadd.f32 %v1893_v56, %v1593_v24  ;;  %v1594_v32 = vadd.f32 %v1564_v63, %v3104_v29  ;;  %v2363_v36 = vpop.f32.mrb[87].mxu0  ;;  %v1588_v33 = vpop.f32.mrb[86].mxu1 }
 0x1a1   :  { %1934 = vst [vmem:[%s3136_s4 + $0x18] sm:$0xff] %v1930_v9   ;;  %v1615_v47 = vadd.f32 %v1893_v56, %v1599_v3  ;;  %v2375_v27 = vpop.f32.mrb[87].mxu1 }
 0x1a2   :  { %v1610_v38 = vadd.f32 %v1893_v56, %v1594_v32  ;;  %v1618_v23 = vmax.f32 %v1609_v12, 0.0 }
 0x1a3   :  { %v1624_v41 = vmax.f32 %v1615_v47, 0.0 }
 0x1a4   :  { %v1619_v39 = vmax.f32 %v1610_v38, 0.0 }
 0x1a5   :  { %v1911_v31 = vpack.c.bf16 %v1624_v41, %v1624_v41  ;;  %v1569_v35 = vpop.f32.mrb[88].mxu0 }
 0x1a6   :  { %v1920_v43 = vpack.c.bf16 %v1619_v39, %v1618_v23  ;;  %v1595_v25 = vadd.f32 %v1569_v35, %v3106_v26  ;;  %v2366_v10 = vpop.f32.mrb[89].mxu0 }
 0x1a7   :  { %1670 = vst [vmem:[%s3136_s4 + $0x20] sm:$0xf] %v1911_v31  ;;  %v1572_v29 = vpop.f32.mrb[90].mxu0 }
 0x1a8   :  { %1932 = vst [vmem:[%s3136_s4 + $0x8] sm:$0xff] %v1920_v43   ;;  %v1611_v40 = vadd.f32 %v1893_v56, %v1595_v25  ;;  %v1596_v42 = vadd.f32 %v1572_v29, %v3108_v34  ;;  %v2367_v46 = vpop.f32.mrb[91].mxu0 }
 0x1aa   :  { %v1612_v50 = vadd.f32 %v1893_v56, %v1596_v42  ;;  %v1620_v11 = vmax.f32 %v1611_v40, 0.0 }
 0x1ac   :  { %v1621_v45 = vmax.f32 %v1612_v50, 0.0 }
 0x1ae   :  { %v1925_v44 = vpack.c.bf16 %v1621_v45, %v1620_v11 }
 0x1b0   :  { %1933 = vst [vmem:[%s3136_s4 + $0x10] sm:$0xff] %v1925_v44  }

// kernel: unet_forward.46
= control target key start
LH: loop header
LB: loop body
LE: loop exit
PB: predicated region body
PF: predicated region fallthrough
CT: control target
= control target key end

     0   :  { %v419_v1 = vmov 0   ;;  %v50_v34 = vlaneseq  ;;  %s548_s1 = inlined_call_operand.vmem [shape: bf16[128,512], index: 1, kind: input, shape index: {}]   ;;  %s549_s0 = inlined_call_operand.vmem [shape: bf16[8,128], index: 0, kind: input, shape index: {}]   ;;  %s550_s2 = inlined_call_operand.vmem [shape: f32[1,512], index: 2, kind: input, shape index: {}]   ;;  %s551_s3 = inlined_call_operand.vmem [shape: bf16[8,512], index: 3, kind: output, shape index: {}]  }
   0x1   :  { %v371_v0 = vld [vmem:[%s548_s1 + $0x4] ss:$16 sps:$4 sm:$0xff]   ;;  %262 = vmatprep.mubr.bf16.mxu0 %v419_v1  ;;  %303 = vmatprep.mubr.bf16.mxu1 %v419_v1  ;;  %v373_v2 = vld [vmem:[%s548_s1 + $0xc] ss:$16 sps:$4 sm:$0xff]   ;;  %v375_v3 = vld [vmem:[%s548_s1] ss:$16 sps:$4 sm:$0xff]  }
   0x2   :  { %230 = vmatprep.subr.bf16.mxu0 %v371_v0  ;;  %v376_v4 = vld [vmem:[%s548_s1 + $0x8] ss:$16 sps:$4 sm:$0xff]   ;;  %271 = vmatprep.subr.bf16.mxu1 %v373_v2  ;;  %v377_v5 = vld [vmem:[%s548_s1 + $0x24] ss:$16 sps:$4 sm:$0xff]   ;;  %v379_v6 = vld [vmem:[%s548_s1 + $0x2c] ss:$16 sps:$4 sm:$0xff]  }
   0x3   :  { %231 = vmatpush1.bf16.msra.mxu0 %v375_v3  ;;  %272 = vmatpush1.bf16.msra.mxu1 %v376_v4  ;;  %v381_v7 = vld [vmem:[%s548_s1 + $0x20] ss:$16 sps:$4 sm:$0xff]   ;;  %v382_v8 = vld [vmem:[%s548_s1 + $0x28] ss:$16 sps:$4 sm:$0xff]   ;;  %v383_v9 = vld [vmem:[%s548_s1 + $0x44] ss:$16 sps:$4 sm:$0xff]  }
   0x4   :  { %232 = vmatprep.subr.bf16.mxu0 %v377_v5  ;;  %273 = vmatprep.subr.bf16.mxu1 %v379_v6  ;;  %v385_v10 = vld [vmem:[%s548_s1 + $0x4c] ss:$16 sps:$4 sm:$0xff]   ;;  %v387_v11 = vld [vmem:[%s548_s1 + $0x40] ss:$16 sps:$4 sm:$0xff]   ;;  %v388_v12 = vld [vmem:[%s548_s1 + $0x48] ss:$16 sps:$4 sm:$0xff]  }
   0x5   :  { %v389_v13 = vld [vmem:[%s548_s1 + $0x64] ss:$16 sps:$4 sm:$0xff]   ;;  %v391_v14 = vld [vmem:[%s548_s1 + $0x6c] ss:$16 sps:$4 sm:$0xff]   ;;  %v393_v15 = vld [vmem:[%s548_s1 + $0x60] ss:$16 sps:$4 sm:$0xff]  }
   0x6   :  { %v394_v16 = vld [vmem:[%s548_s1 + $0x68] ss:$16 sps:$4 sm:$0xff]   ;;  %v395_v17 = vld [vmem:[%s548_s1 + $0x84] ss:$16 sps:$4 sm:$0xff]   ;;  %v397_v18 = vld [vmem:[%s548_s1 + $0x8c] ss:$16 sps:$4 sm:$0xff]  }
   0x7   :  { %233 = vmatpush1.bf16.msra.mxu0 %v381_v7  ;;  %274 = vmatpush1.bf16.msra.mxu1 %v382_v8  ;;  %v399_v19 = vld [vmem:[%s548_s1 + $0x80] ss:$16 sps:$4 sm:$0xff]   ;;  %v400_v20 = vld [vmem:[%s548_s1 + $0x88] ss:$16 sps:$4 sm:$0xff]   ;;  %v401_v21 = vld [vmem:[%s548_s1 + $0xa4] ss:$16 sps:$4 sm:$0xff]  }
   0x8   :  { %234 = vmatprep.subr.bf16.mxu0 %v383_v9  ;;  %275 = vmatprep.subr.bf16.mxu1 %v385_v10  ;;  %v403_v22 = vld [vmem:[%s548_s1 + $0xac] ss:$16 sps:$4 sm:$0xff]   ;;  %v405_v23 = vld [vmem:[%s548_s1 + $0xa0] ss:$16 sps:$4 sm:$0xff]   ;;  %v406_v24 = vld [vmem:[%s548_s1 + $0xa8] ss:$16 sps:$4 sm:$0xff]  }
   0x9   :  { %v407_v25 = vld [vmem:[%s548_s1 + $0xc4] ss:$16 sps:$4 sm:$0xff]   ;;  %v409_v26 = vld [vmem:[%s548_s1 + $0xcc] ss:$16 sps:$4 sm:$0xff]   ;;  %v411_v27 = vld [vmem:[%s548_s1 + $0xc0] ss:$16 sps:$4 sm:$0xff]  }
   0xa   :  { %v412_v28 = vld [vmem:[%s548_s1 + $0xc8] ss:$16 sps:$4 sm:$0xff]   ;;  %v413_v29 = vld [vmem:[%s548_s1 + $0xe4] ss:$16 sps:$4 sm:$0xff]   ;;  %v415_v30 = vld [vmem:[%s548_s1 + $0xec] ss:$16 sps:$4 sm:$0xff]  }
   0xb   :  { %235 = vmatpush1.bf16.msra.mxu0 %v387_v11  ;;  %276 = vmatpush1.bf16.msra.mxu1 %v388_v12  ;;  %v417_v31 = vld [vmem:[%s548_s1 + $0xe0] ss:$16 sps:$4 sm:$0xff]   ;;  %v418_v32 = vld [vmem:[%s548_s1 + $0xe8] ss:$16 sps:$4 sm:$0xff]   ;;  %v51_v35 = vshrl.u32 %v50_v34, 7 }
   0xc   :  { %236 = vmatprep.subr.bf16.mxu0 %v389_v13  ;;  %277 = vmatprep.subr.bf16.mxu1 %v391_v14  ;;  %v15_v33 = vld [vmem:[%s549_s0] sm:$0xf] }
   0xd   :  { %v52_v36 = vsub.s32 0, %v51_v35  ;;  %v60_v37 = vsub.s32 2, %v51_v35  ;;  %v48_v38 = vld [vmem:[%s550_s2] sm:$0xf]  ;;  %v56_v39 = vsub.s32 1, %v51_v35  ;;  %v64_v40 = vsub.s32 3, %v51_v35 }
   0xf   :  { %237 = vmatpush1.bf16.msra.mxu0 %v393_v15  ;;  %278 = vmatpush1.bf16.msra.mxu1 %v394_v16  ;;  %v53_v41 = vrot.slane %v48_v38, %v52_v36  ;;  %v61_v42 = vrot.slane %v48_v38, %v60_v37  ;;  %v57_v43 = vrot.slane %v48_v38, %v56_v39 }
  0x10   :  { %238 = vmatprep.subr.bf16.mxu0 %v395_v17  ;;  %279 = vmatprep.subr.bf16.mxu1 %v397_v18  ;;  %v65_v44 = vrot.slane %v48_v38, %v64_v40 }
  0x13   :  { %239 = vmatpush1.bf16.msra.mxu0 %v399_v19  ;;  %280 = vmatpush1.bf16.msra.mxu1 %v400_v20 }
  0x14   :  { %240 = vmatprep.subr.bf16.mxu0 %v401_v21  ;;  %281 = vmatprep.subr.bf16.mxu1 %v403_v22 }
  0x17   :  { %241 = vmatpush1.bf16.msra.mxu0 %v405_v23  ;;  %282 = vmatpush1.bf16.msra.mxu1 %v406_v24 }
  0x18   :  { %242 = vmatprep.subr.bf16.mxu0 %v407_v25  ;;  %283 = vmatprep.subr.bf16.mxu1 %v409_v26 }
  0x1b   :  { %243 = vmatpush1.bf16.msra.mxu0 %v411_v27  ;;  %284 = vmatpush1.bf16.msra.mxu1 %v412_v28 }
  0x1c   :  { %244 = vmatprep.subr.bf16.mxu0 %v413_v29  ;;  %285 = vmatprep.subr.bf16.mxu1 %v415_v30 }
  0x1f   :  { %245 = vmatpush1.bf16.msra.mxu0 %v417_v31  ;;  %286 = vmatpush1.bf16.msra.mxu1 %v418_v32 }
  0x22   :  { %263 = vmatmul.mubr.bf16.vlgmr.msra.gmra.mrb[0].mxu0 %v15_v33  ;;  %304 = vmatmul.mubr.bf16.vlgmr.msra.gmra.mrb[0].mxu1 %v15_v33 }
  0xf5   :  { %v264_v45 = vpop.f32.mrb[0].mxu0  ;;  %v305_v46 = vpop.f32.mrb[0].mxu1 }
  0xf6   :  { %v265_v47 = vadd.f32 %v264_v45, %v53_v41  ;;  %v306_v48 = vadd.f32 %v305_v46, %v61_v42  ;;  %v266_v49 = vpop.f32.mrb[1].mxu0  ;;  %v307_v50 = vpop.f32.mrb[1].mxu1 }
  0xf7   :  { %v267_v51 = vadd.f32 %v266_v49, %v57_v43  ;;  %v308_v52 = vadd.f32 %v307_v50, %v65_v44  ;;  %v268_v53 = vpop.f32.mrb[2].mxu0  ;;  %v309_v54 = vpop.f32.mrb[2].mxu1 }
  0xf8   :  { %v269_v55 = vpop.f32.mrb[3].mxu0  ;;  %v310_v56 = vpop.f32.mrb[3].mxu1 }
  0xf9   :  { %v368_v57 = vpack.c.bf16 %v267_v51, %v265_v47  ;;  %v369_v58 = vpack.c.bf16 %v308_v52, %v306_v48 }
  0xfb   :  { %328 = vst [vmem:[%s551_s3] sm:$0xff] %v368_v57  ;;  %329 = vst [vmem:[%s551_s3 + $0x8] sm:$0xff] %v369_v58 }

// kernel: unet_forward.43
= control target key start
LH: loop header
LB: loop body
LE: loop exit
PB: predicated region body
PF: predicated region fallthrough
CT: control target
= control target key end

     0   :  { %vm106_vm0 = vsmask.f32 7424  ;;  %vm595_vm1 = vsmask.f32 5376  ;;  %vm729_vm2 = vcmask 1044480   ;;  %vm469_vm3 = vcmask 1045504   ;;  %s2226_s2 = inlined_call_operand.vmem [shape: bf16[9,128,128], index: 2, kind: input, shape index: {}]   ;;  %s2227_s0 = inlined_call_operand.vmem [shape: bf16[64,128], index: 0, kind: input, shape index: {}, may-alias: {0,1}]   ;;  %s2228_s1 = inlined_call_operand.vmem [shape: bf16[64,128], index: 1, kind: input, shape index: {}, may-alias: {0,1}]   ;;  %s2229_s3 = inlined_call_operand.vmem [shape: f32[1,128], index: 3, kind: input, shape index: {}]   ;;  %s2230_s4 = inlined_call_operand.vmem [shape: bf16[32,128], index: 4, kind: output, shape index: {}]  }
   0x1   :  { %v1803_v0 = vld [vmem:[%s2226_s2 + $0x40] sm:$0xff]   ;;  %v1805_v2 = vld [vmem:[%s2226_s2 + $0x48] sm:$0xff]   ;;  %v1807_v4 = vld [vmem:[%s2226_s2 + $0x50] sm:$0xff]   ;;  %vm343_vm4 = vcmask 1046528  }
   0x2   :  { %v1804_v1 = vld [vmem:[%s2226_s2 + $0x100] sm:$0xff]   ;;  %1591 = vmatprep.subr.bf16.mxu1 %v1803_v0  ;;  %v1806_v3 = vld [vmem:[%s2226_s2 + $0x108] sm:$0xff]   ;;  %v1808_v5 = vld [vmem:[%s2226_s2 + $0x110] sm:$0xff]  }
   0x3   :  { %1671 = vmatprep.subr.bf16.mxu0 %v1804_v1  ;;  %1592 = vmatpush3.bf16.msra.mxu1 %v1803_v0  ;;  %v1809_v6 = vld [vmem:[%s2226_s2 + $0x58] sm:$0xff]   ;;  %v1811_v8 = vld [vmem:[%s2226_s2 + $0x60] sm:$0xff]   ;;  %v1813_v10 = vld [vmem:[%s2226_s2 + $0x68] sm:$0xff]  }
   0x4   :  { %1672 = vmatpush3.bf16.msra.mxu0 %v1804_v1  ;;  %1593 = vmatprep.subr.bf16.mxu1 %v1805_v2  ;;  %v1810_v7 = vld [vmem:[%s2226_s2 + $0x118] sm:$0xff]   ;;  %v1812_v9 = vld [vmem:[%s2226_s2 + $0x120] sm:$0xff]   ;;  %v1814_v11 = vld [vmem:[%s2226_s2 + $0x128] sm:$0xff]  }
   0x5   :  { %1673 = vmatprep.subr.bf16.mxu0 %v1806_v3  ;;  %v1945_v12 = vld [vmem:[%s2227_s0] sm:$0xff]   ;;  %v1950_v13 = vld [vmem:[%s2227_s0 + $0x8] sm:$0xff]   ;;  %v1815_v14 = vld [vmem:[%s2226_s2 + $0x70] sm:$0xff]  }
   0x6   :  { %v108_v15 = vshrl.u32 %v1945_v12, 16  ;;  %v110_v16 = vshll.u32 %v1945_v12, 16  ;;  %v115_v17 = vshll.u32 %v1950_v13, 16  ;;  %v119_v18 = vshrl.u32 %v1950_v13, 16  ;;  %v1816_v19 = vld [vmem:[%s2226_s2 + $0x130] sm:$0xff]   ;;  %v1817_v30 = vld [vmem:[%s2226_s2 + $0x78] sm:$0xff]  }
   0x7   :  { %1594 = vmatpush3.bf16.msra.mxu1 %v1805_v2  ;;  %v1965_v20 = vld [vmem:[%s2228_s1 + $0x10] sm:$0xf]  ;;  %v1818_v31 = vld [vmem:[%s2226_s2 + $0x138] sm:$0xff]   ;;  %v1821_v41 = vld [vmem:[%s2226_s2] sm:$0xff]   ;;  %v730_v45 = vrot.slane %v1945_v12, 3  ;;  %v731_v46 = vrot.slane %v1950_v13, 3  ;;  %v67_v1 = vunpack.c.h.bf16 %v1950_v13 }
   0x8   :  { %1674 = vmatpush3.bf16.msra.mxu0 %v1806_v3  ;;  %1595 = vmatprep.subr.bf16.mxu1 %v1807_v4  ;;  %v112_v21 = vrot.slane %v110_v16, 1  ;;  %v117_v22 = vrot.slane %v115_v17, 1  ;;  %v596_v23 = vrot.slane %v108_v15, 2  ;;  %v597_v24 = vrot.slane %v110_v16, 3  ;;  %v1822_v43 = vld [vmem:[%s2226_s2 + $0x140] sm:$0xff]   ;;  %v1824_v48 = vld [vmem:[%s2226_s2 + $0x8] sm:$0xff]  }
   0x9   :  { %1675 = vmatprep.subr.bf16.mxu0 %v1808_v5  ;;  %v599_v25 = vrot.slane %v119_v18, 2  ;;  %v600_v26 = vrot.slane %v115_v17, 3  ;;  %v1969_v27 = vcombine.low %v1965_v20, %v1965_v20  ;;  %v1825_v49 = vld [vmem:[%s2226_s2 + $0x148] sm:$0xff]   ;;  %v732_v50 = vsel %vm729_vm2, %v730_v45, %v731_v46  ;;  %v1826_v51 = vld [vmem:[%s2226_s2 + $0x10] sm:$0xff]   ;;  %v1828_v53 = vld [vmem:[%s2226_s2 + $0x18] sm:$0xff]  }
   0xa   :  { %v113_v28 = vor.u32 %v112_v21, %v108_v15  ;;  %v598_v29 = vor.u32 %v597_v24, %v596_v23  ;;  %v121_v39 = vor.u32 %v119_v18, %v117_v22  ;;  %v1827_v52 = vld [vmem:[%s2226_s2 + $0x150] sm:$0xff]   ;;  %v1829_v54 = vld [vmem:[%s2226_s2 + $0x158] sm:$0xff]   ;;  %v1830_v55 = vld [vmem:[%s2226_s2 + $0x20] sm:$0xff]   ;;  %v470_v2 = vrot.slane %v1945_v12, 2 }
   0xb   :  { %1596 = vmatpush3.bf16.msra.mxu1 %v1807_v4  ;;  %v601_v32 = vor.u32 %v600_v26, %v599_v25  ;;  %v123_v33 = vshll.u32 %v1969_v27, 16  ;;  %v603_v34 = vshrl.u32 %v1969_v27, 16  ;;  %v1831_v56 = vld [vmem:[%s2226_s2 + $0x160] sm:$0xff]   ;;  %v1832_v57 = vld [vmem:[%s2226_s2 + $0x28] sm:$0xff]   ;;  %v1834_v59 = vld [vmem:[%s2226_s2 + $0x30] sm:$0xff]   ;;  %v473_v63 = vrot.slane %v1969_v27, 2 }
   0xc   :  { %1676 = vmatpush3.bf16.msra.mxu0 %v1808_v5  ;;  %1597 = vmatprep.subr.bf16.mxu1 %v1809_v6  ;;  %v118_v35 = vsel %vm106_vm0, %v113_v28, %v117_v22  ;;  %v1833_v58 = vld [vmem:[%s2226_s2 + $0x168] sm:$0xff]   ;;  %v1835_v60 = vld [vmem:[%s2226_s2 + $0x170] sm:$0xff]   ;;  %v1836_v3 = vld [vmem:[%s2226_s2 + $0x38] sm:$0xff]   ;;  %v471_v4 = vrot.slane %v1950_v13, 2  ;;  %v344_v16 = vrot.slane %v1945_v12, 1  ;;  %v345_v22 = vrot.slane %v1950_v13, 1 }
   0xd   :  { %1677 = vmatprep.subr.bf16.mxu0 %v1810_v7  ;;  %1607 = vmatprep.mubr.bf16.mxu1 %v118_v35  ;;  %v602_v36 = vsel %vm595_vm1, %v598_v29, %v601_v32  ;;  %v605_v37 = vrot.slane %v603_v34, 2  ;;  %v606_v38 = vrot.slane %v123_v33, 3  ;;  %v125_v40 = vrot.slane %v123_v33, 1  ;;  %v2034_v61 = vld [vmem:[%s2227_s0 + $0x4] ss:$4 sps:$4 sm:$0xff]   ;;  %v1850_v45 = vld [vmem:[%s2226_s2 + $0xb0] sm:$0xff]  }
   0xe   :  { %1687 = vmatprep.mubr.bf16.mxu0 %v602_v36  ;;  %v1273_v62 = vld [vmem:[%s2228_s1 + $0x14] sm:$0xf]  ;;  %v1838_v15 = vld [vmem:[%s2226_s2 + $0x80] sm:$0xff]   ;;  %v1840_v26 = vld [vmem:[%s2226_s2 + $0x88] sm:$0xff]  }
   0xf   :  { %1598 = vmatpush3.bf16.msra.mxu1 %v1809_v6  ;;  %v607_v42 = vor.u32 %v606_v38, %v605_v37  ;;  %v126_v44 = vsel %vm106_vm0, %v121_v39, %v125_v40  ;;  %v1276_v0 = vcombine.low %v1965_v20, %v1273_v62  ;;  %v1485_v5 = vcombine.low %v1273_v62, %v1273_v62  ;;  %v1837_v6 = vld [vmem:[%s2226_s2 + $0x178] sm:$0xff]   ;;  %v1839_v20 = vld [vmem:[%s2226_s2 + $0x180] sm:$0xff]   ;;  %v1841_v29 = vld [vmem:[%s2226_s2 + $0x188] sm:$0xff]  }
  0x10   :  { %1678 = vmatpush3.bf16.msra.mxu0 %v1810_v7  ;;  %1599 = vmatprep.subr.bf16.mxu1 %v1811_v8  ;;  %v733_v7 = vrot.slane %v1969_v27, 3  ;;  %v1842_v36 = vld [vmem:[%s2226_s2 + $0x90] sm:$0xff]   ;;  %v1844_v39 = vld [vmem:[%s2226_s2 + $0x98] sm:$0xff]  }
  0x11   :  { %1679 = vmatprep.subr.bf16.mxu0 %v1812_v9  ;;  %v608_v47 = vsel %vm595_vm1, %v601_v32, %v607_v42  ;;  %v346_v32 = vsel %vm343_vm4, %v344_v16, %v345_v22  ;;  %v1122_v35 = vrot.slane %v1485_v5, 1  ;;  %v1843_v37 = vld [vmem:[%s2226_s2 + $0x190] sm:$0xff]   ;;  %v1845_v40 = vld [vmem:[%s2226_s2 + $0x198] sm:$0xff]   ;;  %v1847_v42 = vld [vmem:[%s2226_s2 + $0x1a0] sm:$0xff]  }
  0x12   :  { %v734_v25 = vsel %vm729_vm2, %v731_v46, %v733_v7  ;;  %v1851_v46 = vld [vmem:[%s2226_s2 + $0x1b0] sm:$0xff]   ;;  %v1877_v7 = vld [vmem:[%s2226_s2 + $0x220] sm:$0xff]  }
  0x13   :  { %1600 = vmatpush3.bf16.msra.mxu1 %v1811_v8  ;;  %v68_v8 = vunpack.c.l.bf16 %v1276_v0  ;;  %v1868_v62 = vld [vmem:[%s2226_s2 + $0xf0] sm:$0xff]   ;;  %v1870_v0 = vld [vmem:[%s2226_s2 + $0xf8] sm:$0xff]  }
  0x14   :  { %1680 = vmatpush3.bf16.msra.mxu0 %v1812_v9  ;;  %1601 = vmatprep.subr.bf16.mxu1 %v1813_v10  ;;  %v2051_v9 = vsel %vm469_vm3, %v470_v2, %v471_v4  ;;  %v1872_v2 = vld [vmem:[%s2226_s2 + $0x200] sm:$0xff]  }
  0x15   :  { %1681 = vmatprep.subr.bf16.mxu0 %v1814_v11  ;;  %v2061_v17 = vpack.c.bf16 %v68_v8, %v67_v1  ;;  %v1871_v1 = vld [vmem:[%s2226_s2 + $0x1f8] sm:$0xff]   ;;  %v1878_v8 = vld [vmem:[%s2226_s2 + $0x228] sm:$0xff]  }
  0x17   :  { %1602 = vmatpush3.bf16.msra.mxu1 %v1813_v10  ;;  %v2053_v10 = vsel %vm469_vm3, %v471_v4, %v473_v63  ;;  %v984_v21 = vshll.u32 %v2061_v17, 16  ;;  %v988_v24 = vshrl.u32 %v2061_v17, 16  ;;  %v1120_v33 = vrot.slane %v2061_v17, 1  ;;  %v1869_v63 = vld [vmem:[%s2226_s2 + $0x1f0] sm:$0xff]   ;;  %v1874_v4 = vld [vmem:[%s2226_s2 + $0x208] sm:$0xff]  }
  0x18   :  { %1682 = vmatpush3.bf16.msra.mxu0 %v1814_v11  ;;  %1603 = vmatprep.subr.bf16.mxu1 %v1815_v14  ;;  %v977_v11 = vshrl.u32 %v2034_v61, 16 }
  0x19   :  { %1683 = vmatprep.subr.bf16.mxu0 %v1816_v19  ;;  %v2098_v38 = vsel %vm343_vm4, %v1120_v33, %v1122_v35 }
  0x1b   :  { %1604 = vmatpush3.bf16.msra.mxu1 %v1815_v14  ;;  %v979_v14 = vshll.u32 %v2034_v61, 16 }
  0x1c   :  { %1684 = vmatpush3.bf16.msra.mxu0 %v1816_v19  ;;  %1605 = vmatprep.subr.bf16.mxu1 %v1817_v30  ;;  %v992_v19 = vshll.u32 %v1485_v5, 16 }
  0x1d   :  { %1685 = vmatprep.subr.bf16.mxu0 %v1818_v31  ;;  %v981_v18 = vrot.slane %v979_v14, 1 }
  0x1e   :  { %v994_v28 = vrot.slane %v992_v19, 1 }
  0x1f   :  { %1606 = vmatpush3.bf16.msra.mxu1 %v1817_v30  ;;  %v982_v23 = vor.u32 %v981_v18, %v977_v11  ;;  %v1479_v18 = vld [vmem:[%s2229_s3] ss:$0 sm:$0xff] }
  0x20   :  { %1686 = vmatpush3.bf16.msra.mxu0 %v1818_v31  ;;  %1611 = vmatprep.subr.bf16.mxu1 %v1821_v41 }
  0x21   :  { %1691 = vmatprep.subr.bf16.mxu0 %v1822_v43 }
  0x22   :  { %1608 = vmatmul.mubr.bf16.vlgmr.msra.gmra.mrb[0].mxu1 %v126_v44  ;;  %v1849_v44 = vld [vmem:[%s2226_s2 + $0x1a8] sm:$0xff]  }
  0x23   :  { %1612 = vmatpush3.bf16.msra.mxu1 %v1821_v41  ;;  %1688 = vmatmul.mubr.bf16.vlgmr.msra.gmra.mrb[0].mxu0 %v608_v47  ;;  %v1846_v41 = vld [vmem:[%s2226_s2 + $0xa0] sm:$0xff]   ;;  %v1852_v47 = vld [vmem:[%s2226_s2 + $0xb8] sm:$0xff]  }
  0x24   :  { %1692 = vmatpush3.bf16.msra.mxu0 %v1822_v43  ;;  %1613 = vmatprep.subr.bf16.mxu1 %v1824_v48  ;;  %v1848_v43 = vld [vmem:[%s2226_s2 + $0xa8] sm:$0xff]  }
  0x25   :  { %1693 = vmatprep.subr.bf16.mxu0 %v1825_v49  ;;  %1627 = vmatprep.mubr.bf16.mxu1 %v1945_v12  ;;  %v986_v12 = vrot.slane %v984_v21, 1 }
  0x26   :  { %1707 = vmatprep.mubr.bf16.mxu0 %v732_v50  ;;  %v1854_v50 = vld [vmem:[%s2226_s2 + $0xc0] sm:$0xff]  }
  0x27   :  { %1614 = vmatpush3.bf16.msra.mxu1 %v1824_v48  ;;  %v2079_v30 = vsel %vm106_vm0, %v982_v23, %v986_v12  ;;  %v990_v31 = vor.u32 %v988_v24, %v986_v12  ;;  %v1853_v48 = vld [vmem:[%s2226_s2 + $0x1b8] sm:$0xff]  }
  0x28   :  { %1694 = vmatpush3.bf16.msra.mxu0 %v1825_v49  ;;  %1615 = vmatprep.subr.bf16.mxu1 %v1826_v51  ;;  %v347_v49 = vrot.slane %v1969_v27, 1  ;;  %v1858_v27 = vld [vmem:[%s2226_s2 + $0xc8] sm:$0xff]  }
  0x29   :  { %1695 = vmatprep.subr.bf16.mxu0 %v1827_v52  ;;  %v2087_v34 = vsel %vm106_vm0, %v990_v31, %v994_v28 }
  0x2b   :  { %1616 = vmatpush3.bf16.msra.mxu1 %v1826_v51  ;;  %v1856_v51 = vld [vmem:[%s2226_s2 + $0x1c0] sm:$0xff]  }
  0x2c   :  { %1696 = vmatpush3.bf16.msra.mxu0 %v1827_v52  ;;  %1617 = vmatprep.subr.bf16.mxu1 %v1828_v53  ;;  %v348_v52 = vsel %vm343_vm4, %v345_v22, %v347_v49 }
  0x2d   :  { %1697 = vmatprep.subr.bf16.mxu0 %v1829_v54 }
  0x2f   :  { %1618 = vmatpush3.bf16.msra.mxu1 %v1828_v53  ;;  %v1859_v53 = vld [vmem:[%s2226_s2 + $0x1c8] sm:$0xff]  }
  0x30   :  { %1698 = vmatpush3.bf16.msra.mxu0 %v1829_v54  ;;  %1619 = vmatprep.subr.bf16.mxu1 %v1830_v55  ;;  %v1861_v54 = vld [vmem:[%s2226_s2 + $0x1d0] sm:$0xff]  }
  0x31   :  { %1699 = vmatprep.subr.bf16.mxu0 %v1831_v56 }
  0x33   :  { %1620 = vmatpush3.bf16.msra.mxu1 %v1830_v55  ;;  %v1862_v55 = vld [vmem:[%s2226_s2 + $0xd8] sm:$0xff]  }
  0x34   :  { %1700 = vmatpush3.bf16.msra.mxu0 %v1831_v56  ;;  %1621 = vmatprep.subr.bf16.mxu1 %v1832_v57  ;;  %v1863_v56 = vld [vmem:[%s2226_s2 + $0x1d8] sm:$0xff]  }
  0x35   :  { %1701 = vmatprep.subr.bf16.mxu0 %v1833_v58 }
  0x37   :  { %1622 = vmatpush3.bf16.msra.mxu1 %v1832_v57  ;;  %v1864_v57 = vld [vmem:[%s2226_s2 + $0xe0] sm:$0xff]  }
  0x38   :  { %1702 = vmatpush3.bf16.msra.mxu0 %v1833_v58  ;;  %1623 = vmatprep.subr.bf16.mxu1 %v1834_v59  ;;  %v1865_v58 = vld [vmem:[%s2226_s2 + $0x1e0] sm:$0xff]  }
  0x39   :  { %1703 = vmatprep.subr.bf16.mxu0 %v1835_v60 }
  0x3b   :  { %1624 = vmatpush3.bf16.msra.mxu1 %v1834_v59  ;;  %v1866_v59 = vld [vmem:[%s2226_s2 + $0xe8] sm:$0xff]  }
  0x3c   :  { %1704 = vmatpush3.bf16.msra.mxu0 %v1835_v60  ;;  %1625 = vmatprep.subr.bf16.mxu1 %v1836_v3  ;;  %v1867_v60 = vld [vmem:[%s2226_s2 + $0x1e8] sm:$0xff]  }
  0x3d   :  { %1705 = vmatprep.subr.bf16.mxu0 %v1837_v6 }
  0x3f   :  { %1626 = vmatpush3.bf16.msra.mxu1 %v1836_v3  ;;  %v1119_v3 = vrot.slane %v2034_v61, 1 }
  0x40   :  { %1706 = vmatpush3.bf16.msra.mxu0 %v1837_v6  ;;  %1631 = vmatprep.subr.bf16.mxu1 %v1838_v15  ;;  %v1876_v6 = vld [vmem:[%s2226_s2 + $0x218] sm:$0xff]  }
  0x41   :  { %1711 = vmatprep.subr.bf16.mxu0 %v1839_v20  ;;  %v1121_v5 = vsel %vm343_vm4, %v1119_v3, %v1120_v33 }
  0x42   :  { %1628 = vmatmul.mubr.bf16.vlgmr.msra.gmra.mrb[0].mxu1 %v1950_v13  ;;  %v1860_v13 = vld [vmem:[%s2226_s2 + $0xd0] sm:$0xff]  }
  0x43   :  { %1632 = vmatpush3.bf16.msra.mxu1 %v1838_v15  ;;  %1708 = vmatmul.mubr.bf16.vlgmr.msra.gmra.mrb[0].mxu0 %v734_v25 }
  0x44   :  { %1712 = vmatpush3.bf16.msra.mxu0 %v1839_v20  ;;  %1633 = vmatprep.subr.bf16.mxu1 %v1840_v26 }
  0x45   :  { %1713 = vmatprep.subr.bf16.mxu0 %v1841_v29  ;;  %1647 = vmatprep.mubr.bf16.mxu1 %v346_v32 }
  0x46   :  { %1727 = vmatprep.mubr.bf16.mxu0 %v2034_v61  ;;  %v1875_v61 = vld [vmem:[%s2226_s2 + $0x210] sm:$0xff]  }
  0x47   :  { %1634 = vmatpush3.bf16.msra.mxu1 %v1840_v26 }
  0x48   :  { %1714 = vmatpush3.bf16.msra.mxu0 %v1841_v29  ;;  %1635 = vmatprep.subr.bf16.mxu1 %v1842_v36 }
  0x49   :  { %1715 = vmatprep.subr.bf16.mxu0 %v1843_v37 }
  0x4b   :  { %1636 = vmatpush3.bf16.msra.mxu1 %v1842_v36 }
  0x4c   :  { %1716 = vmatpush3.bf16.msra.mxu0 %v1843_v37  ;;  %1637 = vmatprep.subr.bf16.mxu1 %v1844_v39 }
  0x4d   :  { %1717 = vmatprep.subr.bf16.mxu0 %v1845_v40 }
  0x4f   :  { %1638 = vmatpush3.bf16.msra.mxu1 %v1844_v39 }
  0x50   :  { %1718 = vmatpush3.bf16.msra.mxu0 %v1845_v40  ;;  %1639 = vmatprep.subr.bf16.mxu1 %v1846_v41 }
  0x51   :  { %1719 = vmatprep.subr.bf16.mxu0 %v1847_v42 }
  0x53   :  { %1640 = vmatpush3.bf16.msra.mxu1 %v1846_v41 }
  0x54   :  { %1720 = vmatpush3.bf16.msra.mxu0 %v1847_v42  ;;  %1641 = vmatprep.subr.bf16.mxu1 %v1848_v43 }
  0x55   :  { %1721 = vmatprep.subr.bf16.mxu0 %v1849_v44 }
  0x57   :  { %1642 = vmatpush3.bf16.msra.mxu1 %v1848_v43 }
  0x58   :  { %1722 = vmatpush3.bf16.msra.mxu0 %v1849_v44  ;;  %1643 = vmatprep.subr.bf16.mxu1 %v1850_v45 }
  0x59   :  { %1723 = vmatprep.subr.bf16.mxu0 %v1851_v46 }
  0x5b   :  { %1644 = vmatpush3.bf16.msra.mxu1 %v1850_v45 }
  0x5c   :  { %1724 = vmatpush3.bf16.msra.mxu0 %v1851_v46  ;;  %1645 = vmatprep.subr.bf16.mxu1 %v1852_v47 }
  0x5d   :  { %1725 = vmatprep.subr.bf16.mxu0 %v1853_v48 }
  0x5f   :  { %1646 = vmatpush3.bf16.msra.mxu1 %v1852_v47 }
  0x60   :  { %1726 = vmatpush3.bf16.msra.mxu0 %v1853_v48  ;;  %1651 = vmatprep.subr.bf16.mxu1 %v1854_v50 }
  0x61   :  { %1731 = vmatprep.subr.bf16.mxu0 %v1856_v51 }
  0x62   :  { %1648 = vmatmul.mubr.bf16.vlgmr.msra.gmra.mrb[0].mxu1 %v348_v52 }
  0x63   :  { %1652 = vmatpush3.bf16.msra.mxu1 %v1854_v50  ;;  %1728 = vmatmul.mubr.bf16.vlgmr.msra.gmra.mrb[0].mxu0 %v2061_v17 }
  0x64   :  { %1732 = vmatpush3.bf16.msra.mxu0 %v1856_v51  ;;  %1653 = vmatprep.subr.bf16.mxu1 %v1858_v27 }
  0x65   :  { %1733 = vmatprep.subr.bf16.mxu0 %v1859_v53  ;;  %1667 = vmatprep.mubr.bf16.mxu1 %v2051_v9  ;;  %v1879_v9 = vld [vmem:[%s2226_s2 + $0x230] sm:$0xff]  }
  0x66   :  { %1747 = vmatprep.mubr.bf16.mxu0 %v2079_v30 }
  0x67   :  { %1654 = vmatpush3.bf16.msra.mxu1 %v1858_v27 }
  0x68   :  { %1734 = vmatpush3.bf16.msra.mxu0 %v1859_v53  ;;  %1655 = vmatprep.subr.bf16.mxu1 %v1860_v13 }
  0x69   :  { %1735 = vmatprep.subr.bf16.mxu0 %v1861_v54 }
  0x6b   :  { %1656 = vmatpush3.bf16.msra.mxu1 %v1860_v13 }
  0x6c   :  { %1736 = vmatpush3.bf16.msra.mxu0 %v1861_v54  ;;  %1657 = vmatprep.subr.bf16.mxu1 %v1862_v55 }
  0x6d   :  { %1737 = vmatprep.subr.bf16.mxu0 %v1863_v56 }
  0x6f   :  { %1658 = vmatpush3.bf16.msra.mxu1 %v1862_v55 }
  0x70   :  { %1738 = vmatpush3.bf16.msra.mxu0 %v1863_v56  ;;  %1659 = vmatprep.subr.bf16.mxu1 %v1864_v57 }
  0x71   :  { %1739 = vmatprep.subr.bf16.mxu0 %v1865_v58 }
  0x73   :  { %1660 = vmatpush3.bf16.msra.mxu1 %v1864_v57 }
  0x74   :  { %1740 = vmatpush3.bf16.msra.mxu0 %v1865_v58  ;;  %1661 = vmatprep.subr.bf16.mxu1 %v1866_v59 }
  0x75   :  { %1741 = vmatprep.subr.bf16.mxu0 %v1867_v60 }
  0x77   :  { %1662 = vmatpush3.bf16.msra.mxu1 %v1866_v59 }
  0x78   :  { %1742 = vmatpush3.bf16.msra.mxu0 %v1867_v60  ;;  %1663 = vmatprep.subr.bf16.mxu1 %v1868_v62 }
  0x79   :  { %1743 = vmatprep.subr.bf16.mxu0 %v1869_v63 }
  0x7b   :  { %1664 = vmatpush3.bf16.msra.mxu1 %v1868_v62 }
  0x7c   :  { %1744 = vmatpush3.bf16.msra.mxu0 %v1869_v63  ;;  %1665 = vmatprep.subr.bf16.mxu1 %v1870_v0 }
  0x7d   :  { %1745 = vmatprep.subr.bf16.mxu0 %v1871_v1 }
  0x7f   :  { %1666 = vmatpush3.bf16.msra.mxu1 %v1870_v0 }
  0x80   :  { %1746 = vmatpush3.bf16.msra.mxu0 %v1871_v1 }
  0x81   :  { %1751 = vmatprep.subr.bf16.mxu0 %v1872_v2 }
  0x82   :  { %1668 = vmatmul.mubr.bf16.vlgmr.msra.gmra.mrb[0].mxu1 %v2053_v10  ;;  %v1880_v10 = vld [vmem:[%s2226_s2 + $0x238] sm:$0xff]  }
  0x83   :  { %1748 = vmatmul.mubr.bf16.vlgmr.msra.gmra.mrb[0].mxu0 %v2087_v34 }
  0x84   :  { %1752 = vmatpush3.bf16.msra.mxu0 %v1872_v2  ;;  %1767 = vmatprep.mubr.bf16.mxu0 %v1121_v5 }
  0x85   :  { %1753 = vmatprep.subr.bf16.mxu0 %v1874_v4 }
  0x88   :  { %1754 = vmatpush3.bf16.msra.mxu0 %v1874_v4 }
  0x89   :  { %1755 = vmatprep.subr.bf16.mxu0 %v1875_v61 }
  0x8c   :  { %1756 = vmatpush3.bf16.msra.mxu0 %v1875_v61 }
  0x8d   :  { %1757 = vmatprep.subr.bf16.mxu0 %v1876_v6 }
  0x90   :  { %1758 = vmatpush3.bf16.msra.mxu0 %v1876_v6 }
  0x91   :  { %1759 = vmatprep.subr.bf16.mxu0 %v1877_v7 }
  0x94   :  { %1760 = vmatpush3.bf16.msra.mxu0 %v1877_v7 }
  0x95   :  { %1761 = vmatprep.subr.bf16.mxu0 %v1878_v8 }
  0x98   :  { %1762 = vmatpush3.bf16.msra.mxu0 %v1878_v8 }
  0x99   :  { %1763 = vmatprep.subr.bf16.mxu0 %v1879_v9 }
  0x9c   :  { %1764 = vmatpush3.bf16.msra.mxu0 %v1879_v9 }
  0x9d   :  { %1765 = vmatprep.subr.bf16.mxu0 %v1880_v10 }
  0xa0   :  { %1766 = vmatpush3.bf16.msra.mxu0 %v1880_v10 }
  0xa3   :  { %1768 = vmatmul.mubr.bf16.vlgmr.msra.gmra.mrb[0].mxu0 %v2098_v38 }
 0x155   :  { %v1669_v11 = vpop.f32.mrb[0].mxu1 }
 0x156   :  { %v559_v14 = vpop.f32.mrb[1].mxu1 }
 0x157   :  { %v1670_v15 = vpop.f32.mrb[2].mxu1 }
 0x158   :  { %v562_v16 = vpop.f32.mrb[3].mxu1 }
 0x176   :  { %v1769_v17 = vpop.f32.mrb[0].mxu0 }
 0x177   :  { %v1771_v19 = vadd.f32 %v1769_v17, %v1669_v11  ;;  %v1208_v20 = vpop.f32.mrb[1].mxu0 }
 0x178   :  { %v1772_v21 = vadd.f32 %v1208_v20, %v559_v14  ;;  %v1770_v22 = vpop.f32.mrb[2].mxu0 }
 0x179   :  { %v1236_v23 = vadd.f32 %v1771_v19, %v1479_v18  ;;  %v1773_v24 = vadd.f32 %v1770_v22, %v1670_v15  ;;  %v1211_v12 = vpop.f32.mrb[3].mxu0 }
 0x17a   :  { %v1234_v25 = vadd.f32 %v1772_v21, %v1479_v18  ;;  %v1774_v26 = vadd.f32 %v1211_v12, %v562_v16 }
 0x17b   :  { %v1237_v28 = vadd.f32 %v1773_v24, %v1479_v18  ;;  %v1240_v30 = vmax.f32 %v1236_v23, 0.0 }
 0x17c   :  { %v1235_v29 = vadd.f32 %v1774_v26, %v1479_v18  ;;  %v1238_v32 = vmax.f32 %v1234_v25, 0.0 }
 0x17d   :  { %v1241_v31 = vmax.f32 %v1237_v28, 0.0 }
 0x17e   :  { %v1239_v33 = vmax.f32 %v1235_v29, 0.0 }
 0x17f   :  { %v1498_v34 = vpack.c.bf16 %v1241_v31, %v1240_v30 }
 0x180   :  { %v1493_v35 = vpack.c.bf16 %v1239_v33, %v1238_v32 }
 0x181   :  { %1500 = vst [vmem:[%s2230_s4 + $0x8] sm:$0xff] %v1498_v34  }
 0x182   :  { %1494 = vst [vmem:[%s2230_s4] sm:$0xff] %v1493_v35  }

// kernel: unet_forward.52
= control target key start
LH: loop header
LB: loop body
LE: loop exit
PB: predicated region body
PF: predicated region fallthrough
CT: control target
= control target key end

     0   :  { %v512_v1 = vmov 0   ;;  %v53_v35 = vlaneseq  ;;  %s666_s1 = inlined_call_operand.vmem [shape: bf16[128,512], index: 1, kind: input, shape index: {}]   ;;  %s667_s0 = inlined_call_operand.vmem [shape: bf16[32,128], index: 0, kind: input, shape index: {}]   ;;  %s668_s2 = inlined_call_operand.vmem [shape: f32[1,512], index: 2, kind: input, shape index: {}]   ;;  %s669_s3 = inlined_call_operand.vmem [shape: bf16[32,512], index: 3, kind: output, shape index: {}]  }
   0x1   :  { %v462_v0 = vld [vmem:[%s666_s1 + $0x4] ss:$16 sps:$4 sm:$0xff]   ;;  %277 = vmatprep.mubr.bf16.mxu0 %v512_v1  ;;  %330 = vmatprep.mubr.bf16.mxu1 %v512_v1  ;;  %v464_v2 = vld [vmem:[%s666_s1 + $0xc] ss:$16 sps:$4 sm:$0xff]   ;;  %v466_v3 = vld [vmem:[%s666_s1] ss:$16 sps:$4 sm:$0xff]  }
   0x2   :  { %245 = vmatprep.subr.bf16.mxu0 %v462_v0  ;;  %v467_v4 = vld [vmem:[%s666_s1 + $0x8] ss:$16 sps:$4 sm:$0xff]   ;;  %298 = vmatprep.subr.bf16.mxu1 %v464_v2  ;;  %v468_v5 = vld [vmem:[%s666_s1 + $0x24] ss:$16 sps:$4 sm:$0xff]   ;;  %v470_v6 = vld [vmem:[%s666_s1 + $0x2c] ss:$16 sps:$4 sm:$0xff]  }
   0x3   :  { %246 = vmatpush1.bf16.msra.mxu0 %v466_v3  ;;  %299 = vmatpush1.bf16.msra.mxu1 %v467_v4  ;;  %v472_v7 = vld [vmem:[%s666_s1 + $0x20] ss:$16 sps:$4 sm:$0xff]   ;;  %v473_v8 = vld [vmem:[%s666_s1 + $0x28] ss:$16 sps:$4 sm:$0xff]   ;;  %v474_v9 = vld [vmem:[%s666_s1 + $0x44] ss:$16 sps:$4 sm:$0xff]  }
   0x4   :  { %247 = vmatprep.subr.bf16.mxu0 %v468_v5  ;;  %300 = vmatprep.subr.bf16.mxu1 %v470_v6  ;;  %v476_v10 = vld [vmem:[%s666_s1 + $0x4c] ss:$16 sps:$4 sm:$0xff]   ;;  %v478_v11 = vld [vmem:[%s666_s1 + $0x40] ss:$16 sps:$4 sm:$0xff]   ;;  %v479_v12 = vld [vmem:[%s666_s1 + $0x48] ss:$16 sps:$4 sm:$0xff]  }
   0x5   :  { %v480_v13 = vld [vmem:[%s666_s1 + $0x64] ss:$16 sps:$4 sm:$0xff]   ;;  %v482_v14 = vld [vmem:[%s666_s1 + $0x6c] ss:$16 sps:$4 sm:$0xff]   ;;  %v484_v15 = vld [vmem:[%s666_s1 + $0x60] ss:$16 sps:$4 sm:$0xff]  }
   0x6   :  { %v485_v16 = vld [vmem:[%s666_s1 + $0x68] ss:$16 sps:$4 sm:$0xff]   ;;  %v486_v17 = vld [vmem:[%s666_s1 + $0x84] ss:$16 sps:$4 sm:$0xff]   ;;  %v488_v18 = vld [vmem:[%s666_s1 + $0x8c] ss:$16 sps:$4 sm:$0xff]  }
   0x7   :  { %248 = vmatpush1.bf16.msra.mxu0 %v472_v7  ;;  %301 = vmatpush1.bf16.msra.mxu1 %v473_v8  ;;  %v490_v19 = vld [vmem:[%s666_s1 + $0x80] ss:$16 sps:$4 sm:$0xff]   ;;  %v491_v20 = vld [vmem:[%s666_s1 + $0x88] ss:$16 sps:$4 sm:$0xff]   ;;  %v492_v21 = vld [vmem:[%s666_s1 + $0xa4] ss:$16 sps:$4 sm:$0xff]  }
   0x8   :  { %249 = vmatprep.subr.bf16.mxu0 %v474_v9  ;;  %302 = vmatprep.subr.bf16.mxu1 %v476_v10  ;;  %v494_v22 = vld [vmem:[%s666_s1 + $0xac] ss:$16 sps:$4 sm:$0xff]   ;;  %v496_v23 = vld [vmem:[%s666_s1 + $0xa0] ss:$16 sps:$4 sm:$0xff]   ;;  %v497_v24 = vld [vmem:[%s666_s1 + $0xa8] ss:$16 sps:$4 sm:$0xff]  }
   0x9   :  { %v498_v25 = vld [vmem:[%s666_s1 + $0xc4] ss:$16 sps:$4 sm:$0xff]   ;;  %v500_v26 = vld [vmem:[%s666_s1 + $0xcc] ss:$16 sps:$4 sm:$0xff]   ;;  %v502_v27 = vld [vmem:[%s666_s1 + $0xc0] ss:$16 sps:$4 sm:$0xff]  }
   0xa   :  { %v503_v28 = vld [vmem:[%s666_s1 + $0xc8] ss:$16 sps:$4 sm:$0xff]   ;;  %v504_v29 = vld [vmem:[%s666_s1 + $0xe4] ss:$16 sps:$4 sm:$0xff]   ;;  %v506_v30 = vld [vmem:[%s666_s1 + $0xec] ss:$16 sps:$4 sm:$0xff]  }
   0xb   :  { %250 = vmatpush1.bf16.msra.mxu0 %v478_v11  ;;  %303 = vmatpush1.bf16.msra.mxu1 %v479_v12  ;;  %v508_v31 = vld [vmem:[%s666_s1 + $0xe0] ss:$16 sps:$4 sm:$0xff]   ;;  %v509_v32 = vld [vmem:[%s666_s1 + $0xe8] ss:$16 sps:$4 sm:$0xff]   ;;  %v54_v36 = vshrl.u32 %v53_v35, 7 }
   0xc   :  { %251 = vmatprep.subr.bf16.mxu0 %v480_v13  ;;  %304 = vmatprep.subr.bf16.mxu1 %v482_v14  ;;  %v510_v33 = vld [vmem:[%s667_s0] sm:$0xff]   ;;  %v511_v34 = vld [vmem:[%s667_s0 + $0x8] sm:$0xff]  }
   0xd   :  { %v55_v37 = vsub.s32 0, %v54_v36  ;;  %v63_v38 = vsub.s32 2, %v54_v36  ;;  %v51_v39 = vld [vmem:[%s668_s2] sm:$0xf]  ;;  %v59_v40 = vsub.s32 1, %v54_v36  ;;  %v67_v41 = vsub.s32 3, %v54_v36 }
   0xf   :  { %252 = vmatpush1.bf16.msra.mxu0 %v484_v15  ;;  %305 = vmatpush1.bf16.msra.mxu1 %v485_v16  ;;  %v56_v42 = vrot.slane %v51_v39, %v55_v37  ;;  %v64_v43 = vrot.slane %v51_v39, %v63_v38  ;;  %v60_v44 = vrot.slane %v51_v39, %v59_v40 }
  0x10   :  { %253 = vmatprep.subr.bf16.mxu0 %v486_v17  ;;  %306 = vmatprep.subr.bf16.mxu1 %v488_v18  ;;  %v68_v45 = vrot.slane %v51_v39, %v67_v41 }
  0x13   :  { %254 = vmatpush1.bf16.msra.mxu0 %v490_v19  ;;  %307 = vmatpush1.bf16.msra.mxu1 %v491_v20 }
  0x14   :  { %255 = vmatprep.subr.bf16.mxu0 %v492_v21  ;;  %308 = vmatprep.subr.bf16.mxu1 %v494_v22 }
  0x17   :  { %256 = vmatpush1.bf16.msra.mxu0 %v496_v23  ;;  %309 = vmatpush1.bf16.msra.mxu1 %v497_v24 }
  0x18   :  { %257 = vmatprep.subr.bf16.mxu0 %v498_v25  ;;  %310 = vmatprep.subr.bf16.mxu1 %v500_v26 }
  0x1b   :  { %258 = vmatpush1.bf16.msra.mxu0 %v502_v27  ;;  %311 = vmatpush1.bf16.msra.mxu1 %v503_v28 }
  0x1c   :  { %259 = vmatprep.subr.bf16.mxu0 %v504_v29  ;;  %312 = vmatprep.subr.bf16.mxu1 %v506_v30 }
  0x1f   :  { %260 = vmatpush1.bf16.msra.mxu0 %v508_v31  ;;  %313 = vmatpush1.bf16.msra.mxu1 %v509_v32 }
  0x22   :  { %278 = vmatmul.mubr.bf16.vlgmr.msra.gmra.mrb[0].mxu0 %v510_v33  ;;  %331 = vmatmul.mubr.bf16.vlgmr.msra.gmra.mrb[0].mxu1 %v510_v33 }
  0x23   :  { %287 = vmatprep.mubr.bf16.mxu0 %v512_v1  ;;  %340 = vmatprep.mubr.bf16.mxu1 %v512_v1 }
  0x2a   :  { %288 = vmatmul.mubr.bf16.gmra.mrb[4].mxu0 %v511_v34  ;;  %341 = vmatmul.mubr.bf16.gmra.mrb[4].mxu1 %v511_v34 }
  0xf5   :  { %v279_v46 = vpop.f32.mrb[0].mxu0  ;;  %v332_v47 = vpop.f32.mrb[0].mxu1 }
  0xf6   :  { %v280_v48 = vadd.f32 %v279_v46, %v56_v42  ;;  %v333_v49 = vadd.f32 %v332_v47, %v64_v43  ;;  %v281_v50 = vpop.f32.mrb[1].mxu0  ;;  %v334_v51 = vpop.f32.mrb[1].mxu1 }
  0xf7   :  { %v282_v52 = vadd.f32 %v281_v50, %v60_v44  ;;  %v335_v53 = vadd.f32 %v334_v51, %v68_v45  ;;  %v283_v54 = vpop.f32.mrb[2].mxu0  ;;  %v336_v55 = vpop.f32.mrb[2].mxu1 }
  0xf8   :  { %v284_v56 = vadd.f32 %v283_v54, %v56_v42  ;;  %v337_v57 = vadd.f32 %v336_v55, %v64_v43  ;;  %v285_v58 = vpop.f32.mrb[3].mxu0  ;;  %v338_v59 = vpop.f32.mrb[3].mxu1 }
  0xf9   :  { %v453_v60 = vpack.c.bf16 %v282_v52, %v280_v48  ;;  %v454_v61 = vpack.c.bf16 %v335_v53, %v333_v49  ;;  %v286_v62 = vadd.f32 %v285_v58, %v60_v44  ;;  %v339_v63 = vadd.f32 %v338_v59, %v68_v45 }
  0xfb   :  { %399 = vst [vmem:[%s669_s3] sm:$0xff] %v453_v60  ;;  %400 = vst [vmem:[%s669_s3 + $0x8] sm:$0xff] %v454_v61  ;;  %v455_v0 = vpack.c.bf16 %v286_v62, %v284_v56  ;;  %v456_v1 = vpack.c.bf16 %v339_v63, %v337_v57 }
  0xfd   :  { %401 = vst [vmem:[%s669_s3 + $0x10] sm:$0xff] %v455_v0  ;;  %402 = vst [vmem:[%s669_s3 + $0x18] sm:$0xff] %v456_v1  ;;  %v289_v2 = vpop.f32.mrb[4].mxu0  ;;  %v342_v3 = vpop.f32.mrb[4].mxu1 }
  0xfe   :  { %v290_v4 = vadd.f32 %v289_v2, %v56_v42  ;;  %v343_v5 = vadd.f32 %v342_v3, %v64_v43  ;;  %v291_v6 = vpop.f32.mrb[5].mxu0  ;;  %v344_v7 = vpop.f32.mrb[5].mxu1 }
  0xff   :  { %v292_v8 = vadd.f32 %v291_v6, %v60_v44  ;;  %v345_v9 = vadd.f32 %v344_v7, %v68_v45  ;;  %v293_v10 = vpop.f32.mrb[6].mxu0  ;;  %v346_v11 = vpop.f32.mrb[6].mxu1 }
 0x100   :  { %v294_v12 = vadd.f32 %v293_v10, %v56_v42  ;;  %v347_v13 = vadd.f32 %v346_v11, %v64_v43  ;;  %v295_v14 = vpop.f32.mrb[7].mxu0  ;;  %v348_v15 = vpop.f32.mrb[7].mxu1 }
 0x101   :  { %v457_v16 = vpack.c.bf16 %v292_v8, %v290_v4  ;;  %v458_v17 = vpack.c.bf16 %v345_v9, %v343_v5  ;;  %v296_v18 = vadd.f32 %v295_v14, %v60_v44  ;;  %v349_v19 = vadd.f32 %v348_v15, %v68_v45 }
 0x103   :  { %403 = vst [vmem:[%s669_s3 + $0x20] sm:$0xff] %v457_v16  ;;  %404 = vst [vmem:[%s669_s3 + $0x28] sm:$0xff] %v458_v17  ;;  %v459_v20 = vpack.c.bf16 %v296_v18, %v294_v12  ;;  %v460_v21 = vpack.c.bf16 %v349_v19, %v347_v13 }
 0x105   :  { %405 = vst [vmem:[%s669_s3 + $0x30] sm:$0xff] %v459_v20  ;;  %406 = vst [vmem:[%s669_s3 + $0x38] sm:$0xff] %v460_v21 }

// kernel: unet_forward.55
= control target key start
LH: loop header
LB: loop body
LE: loop exit
PB: predicated region body
PF: predicated region fallthrough
CT: control target
= control target key end

     0   :  { %v908_v1 = vmov 0   ;;  %v65_v41 = vlaneseq  ;;  %s1236_s1 = inlined_call_operand.vmem [shape: bf16[128,512], index: 1, kind: input, shape index: {}]   ;;  %s1237_s0 = inlined_call_operand.vmem [shape: bf16[128,128], index: 0, kind: input, shape index: {}]   ;;  %s1238_s2 = inlined_call_operand.vmem [shape: f32[1,512], index: 2, kind: input, shape index: {}]   ;;  %s1239_s3 = inlined_call_operand.vmem [shape: bf16[128,512], index: 3, kind: output, shape index: {}]  }
   0x1   :  { %v852_v0 = vld [vmem:[%s1236_s1 + $0x4] ss:$16 sps:$4 sm:$0xff]   ;;  %325 = vmatprep.mubr.bf16.mxu0 %v908_v1  ;;  %438 = vmatprep.mubr.bf16.mxu1 %v908_v1  ;;  %v854_v2 = vld [vmem:[%s1236_s1 + $0xc] ss:$16 sps:$4 sm:$0xff]   ;;  %v856_v3 = vld [vmem:[%s1236_s1] ss:$16 sps:$4 sm:$0xff]  }
   0x2   :  { %293 = vmatprep.subr.bf16.mxu0 %v852_v0  ;;  %v857_v4 = vld [vmem:[%s1236_s1 + $0x8] ss:$16 sps:$4 sm:$0xff]   ;;  %406 = vmatprep.subr.bf16.mxu1 %v854_v2  ;;  %v858_v5 = vld [vmem:[%s1236_s1 + $0x24] ss:$16 sps:$4 sm:$0xff]   ;;  %v860_v6 = vld [vmem:[%s1236_s1 + $0x2c] ss:$16 sps:$4 sm:$0xff]  }
   0x3   :  { %294 = vmatpush1.bf16.msra.mxu0 %v856_v3  ;;  %407 = vmatpush1.bf16.msra.mxu1 %v857_v4  ;;  %v862_v7 = vld [vmem:[%s1236_s1 + $0x20] ss:$16 sps:$4 sm:$0xff]   ;;  %v863_v8 = vld [vmem:[%s1236_s1 + $0x28] ss:$16 sps:$4 sm:$0xff]   ;;  %v864_v9 = vld [vmem:[%s1236_s1 + $0x44] ss:$16 sps:$4 sm:$0xff]  }
   0x4   :  { %295 = vmatprep.subr.bf16.mxu0 %v858_v5  ;;  %408 = vmatprep.subr.bf16.mxu1 %v860_v6  ;;  %v866_v10 = vld [vmem:[%s1236_s1 + $0x4c] ss:$16 sps:$4 sm:$0xff]   ;;  %v868_v11 = vld [vmem:[%s1236_s1 + $0x40] ss:$16 sps:$4 sm:$0xff]   ;;  %v869_v12 = vld [vmem:[%s1236_s1 + $0x48] ss:$16 sps:$4 sm:$0xff]  }
   0x5   :  { %v870_v13 = vld [vmem:[%s1236_s1 + $0x64] ss:$16 sps:$4 sm:$0xff]   ;;  %v872_v14 = vld [vmem:[%s1236_s1 + $0x6c] ss:$16 sps:$4 sm:$0xff]   ;;  %v874_v15 = vld [vmem:[%s1236_s1 + $0x60] ss:$16 sps:$4 sm:$0xff]  }
   0x6   :  { %v875_v16 = vld [vmem:[%s1236_s1 + $0x68] ss:$16 sps:$4 sm:$0xff]   ;;  %v876_v17 = vld [vmem:[%s1236_s1 + $0x84] ss:$16 sps:$4 sm:$0xff]   ;;  %v878_v18 = vld [vmem:[%s1236_s1 + $0x8c] ss:$16 sps:$4 sm:$0xff]  }
   0x7   :  { %296 = vmatpush1.bf16.msra.mxu0 %v862_v7  ;;  %409 = vmatpush1.bf16.msra.mxu1 %v863_v8  ;;  %v880_v19 = vld [vmem:[%s1236_s1 + $0x80] ss:$16 sps:$4 sm:$0xff]   ;;  %v881_v20 = vld [vmem:[%s1236_s1 + $0x88] ss:$16 sps:$4 sm:$0xff]   ;;  %v882_v21 = vld [vmem:[%s1236_s1 + $0xa4] ss:$16 sps:$4 sm:$0xff]  }
   0x8   :  { %297 = vmatprep.subr.bf16.mxu0 %v864_v9  ;;  %410 = vmatprep.subr.bf16.mxu1 %v866_v10  ;;  %v884_v22 = vld [vmem:[%s1236_s1 + $0xac] ss:$16 sps:$4 sm:$0xff]   ;;  %v886_v23 = vld [vmem:[%s1236_s1 + $0xa0] ss:$16 sps:$4 sm:$0xff]   ;;  %v887_v24 = vld [vmem:[%s1236_s1 + $0xa8] ss:$16 sps:$4 sm:$0xff]  }
   0x9   :  { %v888_v25 = vld [vmem:[%s1236_s1 + $0xc4] ss:$16 sps:$4 sm:$0xff]   ;;  %v890_v26 = vld [vmem:[%s1236_s1 + $0xcc] ss:$16 sps:$4 sm:$0xff]   ;;  %v892_v27 = vld [vmem:[%s1236_s1 + $0xc0] ss:$16 sps:$4 sm:$0xff]  }
   0xa   :  { %v893_v28 = vld [vmem:[%s1236_s1 + $0xc8] ss:$16 sps:$4 sm:$0xff]   ;;  %v894_v29 = vld [vmem:[%s1236_s1 + $0xe4] ss:$16 sps:$4 sm:$0xff]   ;;  %v896_v30 = vld [vmem:[%s1236_s1 + $0xec] ss:$16 sps:$4 sm:$0xff]  }
   0xb   :  { %298 = vmatpush1.bf16.msra.mxu0 %v868_v11  ;;  %411 = vmatpush1.bf16.msra.mxu1 %v869_v12  ;;  %v898_v31 = vld [vmem:[%s1236_s1 + $0xe0] ss:$16 sps:$4 sm:$0xff]   ;;  %v899_v32 = vld [vmem:[%s1236_s1 + $0xe8] ss:$16 sps:$4 sm:$0xff]   ;;  %v66_v42 = vshrl.u32 %v65_v41, 7 }
   0xc   :  { %299 = vmatprep.subr.bf16.mxu0 %v870_v13  ;;  %412 = vmatprep.subr.bf16.mxu1 %v872_v14  ;;  %v900_v33 = vld [vmem:[%s1237_s0] sm:$0xff]   ;;  %v901_v34 = vld [vmem:[%s1237_s0 + $0x8] sm:$0xff]   ;;  %v902_v35 = vld [vmem:[%s1237_s0 + $0x10] sm:$0xff]  }
   0xd   :  { %v903_v36 = vld [vmem:[%s1237_s0 + $0x18] sm:$0xff]   ;;  %v904_v37 = vld [vmem:[%s1237_s0 + $0x20] sm:$0xff]   ;;  %v905_v38 = vld [vmem:[%s1237_s0 + $0x28] sm:$0xff]   ;;  %v67_v43 = vsub.s32 0, %v66_v42  ;;  %v75_v44 = vsub.s32 2, %v66_v42  ;;  %v71_v46 = vsub.s32 1, %v66_v42 }
   0xe   :  { %v906_v39 = vld [vmem:[%s1237_s0 + $0x30] sm:$0xff]   ;;  %v907_v40 = vld [vmem:[%s1237_s0 + $0x38] sm:$0xff]   ;;  %v63_v45 = vld [vmem:[%s1238_s2] sm:$0xf]  ;;  %v79_v47 = vsub.s32 3, %v66_v42 }
   0xf   :  { %300 = vmatpush1.bf16.msra.mxu0 %v874_v15  ;;  %413 = vmatpush1.bf16.msra.mxu1 %v875_v16  ;;  %v1068_v48 = vrot.slane %v63_v45, %v67_v43  ;;  %v1070_v49 = vrot.slane %v63_v45, %v75_v44  ;;  %v1072_v50 = vrot.slane %v63_v45, %v71_v46 }
  0x10   :  { %301 = vmatprep.subr.bf16.mxu0 %v876_v17  ;;  %414 = vmatprep.subr.bf16.mxu1 %v878_v18  ;;  %v1074_v51 = vrot.slane %v63_v45, %v79_v47 }
  0x13   :  { %302 = vmatpush1.bf16.msra.mxu0 %v880_v19  ;;  %415 = vmatpush1.bf16.msra.mxu1 %v881_v20 }
  0x14   :  { %303 = vmatprep.subr.bf16.mxu0 %v882_v21  ;;  %416 = vmatprep.subr.bf16.mxu1 %v884_v22 }
  0x17   :  { %304 = vmatpush1.bf16.msra.mxu0 %v886_v23  ;;  %417 = vmatpush1.bf16.msra.mxu1 %v887_v24 }
  0x18   :  { %305 = vmatprep.subr.bf16.mxu0 %v888_v25  ;;  %418 = vmatprep.subr.bf16.mxu1 %v890_v26 }
  0x1b   :  { %306 = vmatpush1.bf16.msra.mxu0 %v892_v27  ;;  %419 = vmatpush1.bf16.msra.mxu1 %v893_v28 }
  0x1c   :  { %307 = vmatprep.subr.bf16.mxu0 %v894_v29  ;;  %420 = vmatprep.subr.bf16.mxu1 %v896_v30 }
  0x1f   :  { %308 = vmatpush1.bf16.msra.mxu0 %v898_v31  ;;  %421 = vmatpush1.bf16.msra.mxu1 %v899_v32 }
  0x22   :  { %326 = vmatmul.mubr.bf16.vlgmr.msra.gmra.mrb[0].mxu0 %v900_v33  ;;  %439 = vmatmul.mubr.bf16.vlgmr.msra.gmra.mrb[0].mxu1 %v900_v33 }
  0x23   :  { %335 = vmatprep.mubr.bf16.mxu0 %v908_v1  ;;  %448 = vmatprep.mubr.bf16.mxu1 %v908_v1 }
  0x2a   :  { %336 = vmatmul.mubr.bf16.gmra.mrb[4].mxu0 %v901_v34  ;;  %449 = vmatmul.mubr.bf16.gmra.mrb[4].mxu1 %v901_v34 }
  0x2b   :  { %345 = vmatprep.mubr.bf16.mxu0 %v908_v1  ;;  %458 = vmatprep.mubr.bf16.mxu1 %v908_v1 }
  0x32   :  { %346 = vmatmul.mubr.bf16.gmra.mrb[8].mxu0 %v902_v35  ;;  %459 = vmatmul.mubr.bf16.gmra.mrb[8].mxu1 %v902_v35 }
  0x33   :  { %355 = vmatprep.mubr.bf16.mxu0 %v908_v1  ;;  %468 = vmatprep.mubr.bf16.mxu1 %v908_v1 }
  0x3a   :  { %356 = vmatmul.mubr.bf16.gmra.mrb[12].mxu0 %v903_v36  ;;  %469 = vmatmul.mubr.bf16.gmra.mrb[12].mxu1 %v903_v36 }
  0x3b   :  { %365 = vmatprep.mubr.bf16.mxu0 %v908_v1  ;;  %478 = vmatprep.mubr.bf16.mxu1 %v908_v1 }
  0x42   :  { %366 = vmatmul.mubr.bf16.gmra.mrb[16].mxu0 %v904_v37  ;;  %479 = vmatmul.mubr.bf16.gmra.mrb[16].mxu1 %v904_v37 }
  0x43   :  { %375 = vmatprep.mubr.bf16.mxu0 %v908_v1  ;;  %488 = vmatprep.mubr.bf16.mxu1 %v908_v1 }
  0x4a   :  { %376 = vmatmul.mubr.bf16.gmra.mrb[20].mxu0 %v905_v38  ;;  %489 = vmatmul.mubr.bf16.gmra.mrb[20].mxu1 %v905_v38 }
  0x4b   :  { %385 = vmatprep.mubr.bf16.mxu0 %v908_v1  ;;  %498 = vmatprep.mubr.bf16.mxu1 %v908_v1 }
  0x52   :  { %386 = vmatmul.mubr.bf16.gmra.mrb[24].mxu0 %v906_v39  ;;  %499 = vmatmul.mubr.bf16.gmra.mrb[24].mxu1 %v906_v39 }
  0x53   :  { %395 = vmatprep.mubr.bf16.mxu0 %v908_v1  ;;  %508 = vmatprep.mubr.bf16.mxu1 %v908_v1 }
  0x5a   :  { %396 = vmatmul.mubr.bf16.gmra.mrb[28].mxu0 %v907_v40  ;;  %509 = vmatmul.mubr.bf16.gmra.mrb[28].mxu1 %v907_v40 }
  0xf5   :  { %v327_v52 = vpop.f32.mrb[0].mxu0  ;;  %v440_v53 = vpop.f32.mrb[0].mxu1 }
  0xf6   :  { %v328_v54 = vadd.f32 %v327_v52, %v1068_v48  ;;  %v441_v55 = vadd.f32 %v440_v53, %v1070_v49  ;;  %v329_v56 = vpop.f32.mrb[1].mxu0  ;;  %v442_v57 = vpop.f32.mrb[1].mxu1 }
  0xf7   :  { %v330_v58 = vadd.f32 %v329_v56, %v1072_v50  ;;  %v443_v59 = vadd.f32 %v442_v57, %v1074_v51  ;;  %v331_v60 = vpop.f32.mrb[2].mxu0  ;;  %v444_v61 = vpop.f32.mrb[2].mxu1 }
  0xf8   :  { %v332_v62 = vadd.f32 %v331_v60, %v1068_v48  ;;  %v445_v63 = vadd.f32 %v444_v61, %v1070_v49  ;;  %v333_v0 = vpop.f32.mrb[3].mxu0  ;;  %v446_v1 = vpop.f32.mrb[3].mxu1 }
  0xf9   :  { %v819_v2 = vpack.c.bf16 %v330_v58, %v328_v54  ;;  %v820_v3 = vpack.c.bf16 %v443_v59, %v441_v55  ;;  %v334_v4 = vadd.f32 %v333_v0, %v1072_v50  ;;  %v447_v5 = vadd.f32 %v446_v1, %v1074_v51 }
  0xfb   :  { %711 = vst [vmem:[%s1239_s3] sm:$0xff] %v819_v2  ;;  %712 = vst [vmem:[%s1239_s3 + $0x8] sm:$0xff] %v820_v3  ;;  %v821_v6 = vpack.c.bf16 %v334_v4, %v332_v62  ;;  %v822_v7 = vpack.c.bf16 %v447_v5, %v445_v63 }
  0xfd   :  { %713 = vst [vmem:[%s1239_s3 + $0x10] sm:$0xff] %v821_v6  ;;  %714 = vst [vmem:[%s1239_s3 + $0x18] sm:$0xff] %v822_v7  ;;  %v337_v8 = vpop.f32.mrb[4].mxu0  ;;  %v450_v9 = vpop.f32.mrb[4].mxu1 }
  0xfe   :  { %v338_v10 = vadd.f32 %v337_v8, %v1068_v48  ;;  %v451_v11 = vadd.f32 %v450_v9, %v1070_v49  ;;  %v339_v12 = vpop.f32.mrb[5].mxu0  ;;  %v452_v13 = vpop.f32.mrb[5].mxu1 }
  0xff   :  { %v340_v14 = vadd.f32 %v339_v12, %v1072_v50  ;;  %v453_v15 = vadd.f32 %v452_v13, %v1074_v51  ;;  %v341_v16 = vpop.f32.mrb[6].mxu0  ;;  %v454_v17 = vpop.f32.mrb[6].mxu1 }
 0x100   :  { %v342_v18 = vadd.f32 %v341_v16, %v1068_v48  ;;  %v455_v19 = vadd.f32 %v454_v17, %v1070_v49  ;;  %v343_v20 = vpop.f32.mrb[7].mxu0  ;;  %v456_v21 = vpop.f32.mrb[7].mxu1 }
 0x101   :  { %v823_v22 = vpack.c.bf16 %v340_v14, %v338_v10  ;;  %v824_v23 = vpack.c.bf16 %v453_v15, %v451_v11  ;;  %v344_v24 = vadd.f32 %v343_v20, %v1072_v50  ;;  %v457_v25 = vadd.f32 %v456_v21, %v1074_v51 }
 0x103   :  { %715 = vst [vmem:[%s1239_s3 + $0x20] sm:$0xff] %v823_v22  ;;  %716 = vst [vmem:[%s1239_s3 + $0x28] sm:$0xff] %v824_v23  ;;  %v825_v26 = vpack.c.bf16 %v344_v24, %v342_v18  ;;  %v826_v27 = vpack.c.bf16 %v457_v25, %v455_v19 }
 0x105   :  { %717 = vst [vmem:[%s1239_s3 + $0x30] sm:$0xff] %v825_v26  ;;  %718 = vst [vmem:[%s1239_s3 + $0x38] sm:$0xff] %v826_v27  ;;  %v347_v28 = vpop.f32.mrb[8].mxu0  ;;  %v460_v29 = vpop.f32.mrb[8].mxu1 }
 0x106   :  { %v348_v30 = vadd.f32 %v347_v28, %v1068_v48  ;;  %v461_v31 = vadd.f32 %v460_v29, %v1070_v49  ;;  %v349_v32 = vpop.f32.mrb[9].mxu0  ;;  %v462_v33 = vpop.f32.mrb[9].mxu1 }
 0x107   :  { %v350_v34 = vadd.f32 %v349_v32, %v1072_v50  ;;  %v463_v35 = vadd.f32 %v462_v33, %v1074_v51  ;;  %v351_v36 = vpop.f32.mrb[10].mxu0  ;;  %v464_v37 = vpop.f32.mrb[10].mxu1 }
 0x108   :  { %v352_v38 = vadd.f32 %v351_v36, %v1068_v48  ;;  %v465_v39 = vadd.f32 %v464_v37, %v1070_v49  ;;  %v353_v40 = vpop.f32.mrb[11].mxu0  ;;  %v466_v41 = vpop.f32.mrb[11].mxu1 }
 0x109   :  { %v827_v42 = vpack.c.bf16 %v350_v34, %v348_v30  ;;  %v828_v43 = vpack.c.bf16 %v463_v35, %v461_v31  ;;  %v354_v44 = vadd.f32 %v353_v40, %v1072_v50  ;;  %v467_v45 = vadd.f32 %v466_v41, %v1074_v51 }
 0x10b   :  { %719 = vst [vmem:[%s1239_s3 + $0x40] sm:$0xff] %v827_v42  ;;  %720 = vst [vmem:[%s1239_s3 + $0x48] sm:$0xff] %v828_v43  ;;  %v829_v46 = vpack.c.bf16 %v354_v44, %v352_v38  ;;  %v830_v47 = vpack.c.bf16 %v467_v45, %v465_v39 }
 0x10d   :  { %721 = vst [vmem:[%s1239_s3 + $0x50] sm:$0xff] %v829_v46  ;;  %722 = vst [vmem:[%s1239_s3 + $0x58] sm:$0xff] %v830_v47  ;;  %v357_v52 = vpop.f32.mrb[12].mxu0  ;;  %v470_v53 = vpop.f32.mrb[12].mxu1 }
 0x10e   :  { %v358_v54 = vadd.f32 %v357_v52, %v1068_v48  ;;  %v471_v55 = vadd.f32 %v470_v53, %v1070_v49  ;;  %v359_v56 = vpop.f32.mrb[13].mxu0  ;;  %v472_v57 = vpop.f32.mrb[13].mxu1 }
 0x10f   :  { %v360_v58 = vadd.f32 %v359_v56, %v1072_v50  ;;  %v473_v59 = vadd.f32 %v472_v57, %v1074_v51  ;;  %v361_v60 = vpop.f32.mrb[14].mxu0  ;;  %v474_v61 = vpop.f32.mrb[14].mxu1 }
 0x110   :  { %v362_v62 = vadd.f32 %v361_v60, %v1068_v48  ;;  %v475_v63 = vadd.f32 %v474_v61, %v1070_v49  ;;  %v363_v0 = vpop.f32.mrb[15].mxu0  ;;  %v476_v1 = vpop.f32.mrb[15].mxu1 }
 0x111   :  { %v831_v2 = vpack.c.bf16 %v360_v58, %v358_v54  ;;  %v832_v3 = vpack.c.bf16 %v473_v59, %v471_v55  ;;  %v364_v4 = vadd.f32 %v363_v0, %v1072_v50  ;;  %v477_v5 = vadd.f32 %v476_v1, %v1074_v51 }
 0x113   :  { %723 = vst [vmem:[%s1239_s3 + $0x60] sm:$0xff] %v831_v2  ;;  %724 = vst [vmem:[%s1239_s3 + $0x68] sm:$0xff] %v832_v3  ;;  %v833_v6 = vpack.c.bf16 %v364_v4, %v362_v62  ;;  %v834_v7 = vpack.c.bf16 %v477_v5, %v475_v63 }
 0x115   :  { %725 = vst [vmem:[%s1239_s3 + $0x70] sm:$0xff] %v833_v6  ;;  %726 = vst [vmem:[%s1239_s3 + $0x78] sm:$0xff] %v834_v7  ;;  %v367_v8 = vpop.f32.mrb[16].mxu0  ;;  %v480_v9 = vpop.f32.mrb[16].mxu1 }
 0x116   :  { %v368_v10 = vadd.f32 %v367_v8, %v1068_v48  ;;  %v481_v11 = vadd.f32 %v480_v9, %v1070_v49  ;;  %v369_v12 = vpop.f32.mrb[17].mxu0  ;;  %v482_v13 = vpop.f32.mrb[17].mxu1 }
 0x117   :  { %v370_v14 = vadd.f32 %v369_v12, %v1072_v50  ;;  %v483_v15 = vadd.f32 %v482_v13, %v1074_v51  ;;  %v371_v16 = vpop.f32.mrb[18].mxu0  ;;  %v484_v17 = vpop.f32.mrb[18].mxu1 }
 0x118   :  { %v372_v18 = vadd.f32 %v371_v16, %v1068_v48  ;;  %v485_v19 = vadd.f32 %v484_v17, %v1070_v49  ;;  %v373_v20 = vpop.f32.mrb[19].mxu0  ;;  %v486_v21 = vpop.f32.mrb[19].mxu1 }
 0x119   :  { %v835_v22 = vpack.c.bf16 %v370_v14, %v368_v10  ;;  %v836_v23 = vpack.c.bf16 %v483_v15, %v481_v11  ;;  %v374_v24 = vadd.f32 %v373_v20, %v1072_v50  ;;  %v487_v25 = vadd.f32 %v486_v21, %v1074_v51 }
 0x11b   :  { %727 = vst [vmem:[%s1239_s3 + $0x80] sm:$0xff] %v835_v22  ;;  %728 = vst [vmem:[%s1239_s3 + $0x88] sm:$0xff] %v836_v23  ;;  %v837_v26 = vpack.c.bf16 %v374_v24, %v372_v18  ;;  %v838_v27 = vpack.c.bf16 %v487_v25, %v485_v19 }
 0x11d   :  { %729 = vst [vmem:[%s1239_s3 + $0x90] sm:$0xff] %v837_v26  ;;  %730 = vst [vmem:[%s1239_s3 + $0x98] sm:$0xff] %v838_v27  ;;  %v377_v28 = vpop.f32.mrb[20].mxu0  ;;  %v490_v29 = vpop.f32.mrb[20].mxu1 }
 0x11e   :  { %v378_v30 = vadd.f32 %v377_v28, %v1068_v48  ;;  %v491_v31 = vadd.f32 %v490_v29, %v1070_v49  ;;  %v379_v32 = vpop.f32.mrb[21].mxu0  ;;  %v492_v33 = vpop.f32.mrb[21].mxu1 }
 0x11f   :  { %v380_v34 = vadd.f32 %v379_v32, %v1072_v50  ;;  %v493_v35 = vadd.f32 %v492_v33, %v1074_v51  ;;  %v381_v36 = vpop.f32.mrb[22].mxu0  ;;  %v494_v37 = vpop.f32.mrb[22].mxu1 }
 0x120   :  { %v382_v38 = vadd.f32 %v381_v36, %v1068_v48  ;;  %v495_v39 = vadd.f32 %v494_v37, %v1070_v49  ;;  %v383_v40 = vpop.f32.mrb[23].mxu0  ;;  %v496_v41 = vpop.f32.mrb[23].mxu1 }
 0x121   :  { %v839_v42 = vpack.c.bf16 %v380_v34, %v378_v30  ;;  %v840_v43 = vpack.c.bf16 %v493_v35, %v491_v31  ;;  %v384_v44 = vadd.f32 %v383_v40, %v1072_v50  ;;  %v497_v45 = vadd.f32 %v496_v41, %v1074_v51 }
 0x123   :  { %731 = vst [vmem:[%s1239_s3 + $0xa0] sm:$0xff] %v839_v42  ;;  %732 = vst [vmem:[%s1239_s3 + $0xa8] sm:$0xff] %v840_v43  ;;  %v841_v46 = vpack.c.bf16 %v384_v44, %v382_v38  ;;  %v842_v47 = vpack.c.bf16 %v497_v45, %v495_v39 }
 0x125   :  { %733 = vst [vmem:[%s1239_s3 + $0xb0] sm:$0xff] %v841_v46  ;;  %734 = vst [vmem:[%s1239_s3 + $0xb8] sm:$0xff] %v842_v47  ;;  %v387_v52 = vpop.f32.mrb[24].mxu0  ;;  %v500_v53 = vpop.f32.mrb[24].mxu1 }
 0x126   :  { %v388_v54 = vadd.f32 %v387_v52, %v1068_v48  ;;  %v501_v55 = vadd.f32 %v500_v53, %v1070_v49  ;;  %v389_v56 = vpop.f32.mrb[25].mxu0  ;;  %v502_v57 = vpop.f32.mrb[25].mxu1 }
 0x127   :  { %v390_v58 = vadd.f32 %v389_v56, %v1072_v50  ;;  %v503_v59 = vadd.f32 %v502_v57, %v1074_v51  ;;  %v391_v60 = vpop.f32.mrb[26].mxu0  ;;  %v504_v61 = vpop.f32.mrb[26].mxu1 }
 0x128   :  { %v392_v62 = vadd.f32 %v391_v60, %v1068_v48  ;;  %v505_v63 = vadd.f32 %v504_v61, %v1070_v49  ;;  %v393_v0 = vpop.f32.mrb[27].mxu0  ;;  %v506_v1 = vpop.f32.mrb[27].mxu1 }
 0x129   :  { %v843_v2 = vpack.c.bf16 %v390_v58, %v388_v54  ;;  %v844_v3 = vpack.c.bf16 %v503_v59, %v501_v55  ;;  %v394_v4 = vadd.f32 %v393_v0, %v1072_v50  ;;  %v507_v5 = vadd.f32 %v506_v1, %v1074_v51 }
 0x12b   :  { %735 = vst [vmem:[%s1239_s3 + $0xc0] sm:$0xff] %v843_v2  ;;  %736 = vst [vmem:[%s1239_s3 + $0xc8] sm:$0xff] %v844_v3  ;;  %v845_v6 = vpack.c.bf16 %v394_v4, %v392_v62  ;;  %v846_v7 = vpack.c.bf16 %v507_v5, %v505_v63 }
 0x12d   :  { %737 = vst [vmem:[%s1239_s3 + $0xd0] sm:$0xff] %v845_v6  ;;  %738 = vst [vmem:[%s1239_s3 + $0xd8] sm:$0xff] %v846_v7  ;;  %v397_v8 = vpop.f32.mrb[28].mxu0  ;;  %v510_v9 = vpop.f32.mrb[28].mxu1 }
 0x12e   :  { %v398_v10 = vadd.f32 %v397_v8, %v1068_v48  ;;  %v511_v11 = vadd.f32 %v510_v9, %v1070_v49  ;;  %v399_v12 = vpop.f32.mrb[29].mxu0  ;;  %v512_v13 = vpop.f32.mrb[29].mxu1 }
 0x12f   :  { %v400_v14 = vadd.f32 %v399_v12, %v1072_v50  ;;  %v513_v15 = vadd.f32 %v512_v13, %v1074_v51  ;;  %v401_v16 = vpop.f32.mrb[30].mxu0  ;;  %v514_v17 = vpop.f32.mrb[30].mxu1 }
 0x130   :  { %v402_v18 = vadd.f32 %v401_v16, %v1068_v48  ;;  %v515_v19 = vadd.f32 %v514_v17, %v1070_v49  ;;  %v403_v20 = vpop.f32.mrb[31].mxu0  ;;  %v516_v21 = vpop.f32.mrb[31].mxu1 }
 0x131   :  { %v847_v22 = vpack.c.bf16 %v400_v14, %v398_v10  ;;  %v848_v23 = vpack.c.bf16 %v513_v15, %v511_v11  ;;  %v404_v24 = vadd.f32 %v403_v20, %v1072_v50  ;;  %v517_v25 = vadd.f32 %v516_v21, %v1074_v51 }
 0x133   :  { %739 = vst [vmem:[%s1239_s3 + $0xe0] sm:$0xff] %v847_v22  ;;  %740 = vst [vmem:[%s1239_s3 + $0xe8] sm:$0xff] %v848_v23  ;;  %v849_v26 = vpack.c.bf16 %v404_v24, %v402_v18  ;;  %v850_v48 = vpack.c.bf16 %v517_v25, %v515_v19 }
 0x135   :  { %741 = vst [vmem:[%s1239_s3 + $0xf0] sm:$0xff] %v849_v26  ;;  %742 = vst [vmem:[%s1239_s3 + $0xf8] sm:$0xff] %v850_v48 }

// kernel: unet_forward.58
= control target key start
LH: loop header
LB: loop body
LE: loop exit
PB: predicated region body
PF: predicated region fallthrough
CT: control target
= control target key end

     0   :  { %s1174_s12 = smov 0   ;;  %s1426_s0 = inlined_call_operand.vmem [shape: bf16[512,128], index: 0, kind: input, shape index: {}]   ;;  %s1427_s1 = inlined_call_operand.vmem [shape: bf16[128,512], index: 1, kind: input, shape index: {}]   ;;  %s1428_s2 = inlined_call_operand.vmem [shape: f32[1,512], index: 2, kind: input, shape index: {}]   ;;  %s1429_s3 = inlined_call_operand.vmem [shape: bf16[512,512], index: 3, kind: output, shape index: {}]  }
   0x1 LB: > { %s963_s13 = sadd.s32 4294967295, %s1151_s12   ;;  %p967_p0 = scmp.ge.s32.totalorder %s1151_s12, 1  ;;  %s1151_s12 = sphi %s1174_s12, %s13_s12  }
   0x2   : > { %p138_p1 = scmp.lt.s32.totalorder %s1151_s12, 5 }
   0x4   : > { %p139_p2 = pnand %p967_p0, %p138_p1 }
   0x5   : > { %v1089_v0 = vld [vmem:[%s1427_s1 + $0x4] ss:$16 sps:$4 sm:$0xff] (!%p139_p2)   ;;  %v1091_v1 = vld [vmem:[%s1427_s1 + $0xc] ss:$16 sps:$4 sm:$0xff] (!%p139_p2)   ;;  %v1153_v2 = vmov (!%p139_p2), 0   ;;  %s968_s5 = sshll.u32 (!%p139_p2), %s963_s13, 4  ;;  %v227_v41 = vlaneseq (!%p139_p2) }
   0x6   : > { %142 = sbr.rel (%p139_p2) target bundleno = 315 (0x13b), region = 32  ;;  %487 = vmatprep.mubr.bf16.mxu0 (!%p139_p2), %v1153_v2  ;;  %600 = vmatprep.mubr.bf16.mxu1 (!%p139_p2), %v1153_v2  ;;  %v1093_v3 = vld [vmem:[%s1427_s1] ss:$16 sps:$4 sm:$0xff] (!%p139_p2)   ;;  %v1094_v4 = vld [vmem:[%s1427_s1 + $0x8] ss:$16 sps:$4 sm:$0xff] (!%p139_p2)   ;;  %p164_p3 = scmp.lt.s32.totalorder (!%p139_p2), %s968_s5, 63 }
   0x7   : > { %455 = vmatprep.subr.bf16.mxu0 (!%p139_p2), %v1089_v0  ;;  %568 = vmatprep.subr.bf16.mxu1 (!%p139_p2), %v1091_v1  ;;  %v1095_v5 = vld [vmem:[%s1427_s1 + $0x24] ss:$16 sps:$4 sm:$0xff] (!%p139_p2)   ;;  %v1097_v6 = vld [vmem:[%s1427_s1 + $0x2c] ss:$16 sps:$4 sm:$0xff] (!%p139_p2)   ;;  %v1099_v7 = vld [vmem:[%s1427_s1 + $0x20] ss:$16 sps:$4 sm:$0xff] (!%p139_p2)  }
   0x8   : > { %456 = vmatpush1.bf16.msra.mxu0 (!%p139_p2), %v1093_v3  ;;  %569 = vmatpush1.bf16.msra.mxu1 (!%p139_p2), %v1094_v4  ;;  %v1100_v8 = vld [vmem:[%s1427_s1 + $0x28] ss:$16 sps:$4 sm:$0xff] (!%p139_p2)   ;;  %v1101_v9 = vld [vmem:[%s1427_s1 + $0x44] ss:$16 sps:$4 sm:$0xff] (!%p139_p2)   ;;  %v1103_v10 = vld [vmem:[%s1427_s1 + $0x4c] ss:$16 sps:$4 sm:$0xff] (!%p139_p2)  }
   0x9   : > { %457 = vmatprep.subr.bf16.mxu0 (!%p139_p2), %v1095_v5  ;;  %570 = vmatprep.subr.bf16.mxu1 (!%p139_p2), %v1097_v6  ;;  %v1105_v11 = vld [vmem:[%s1427_s1 + $0x40] ss:$16 sps:$4 sm:$0xff] (!%p139_p2)   ;;  %v1106_v12 = vld [vmem:[%s1427_s1 + $0x48] ss:$16 sps:$4 sm:$0xff] (!%p139_p2)   ;;  %v1107_v13 = vld [vmem:[%s1427_s1 + $0x64] ss:$16 sps:$4 sm:$0xff] (!%p139_p2)  }
   0xa   : > { %v1109_v14 = vld [vmem:[%s1427_s1 + $0x6c] ss:$16 sps:$4 sm:$0xff] (!%p139_p2)   ;;  %v1111_v15 = vld [vmem:[%s1427_s1 + $0x60] ss:$16 sps:$4 sm:$0xff] (!%p139_p2)   ;;  %v1112_v16 = vld [vmem:[%s1427_s1 + $0x68] ss:$16 sps:$4 sm:$0xff] (!%p139_p2)  }
   0xb   : > { %v1113_v17 = vld [vmem:[%s1427_s1 + $0x84] ss:$16 sps:$4 sm:$0xff] (!%p139_p2)   ;;  %v1115_v18 = vld [vmem:[%s1427_s1 + $0x8c] ss:$16 sps:$4 sm:$0xff] (!%p139_p2)   ;;  %v1117_v19 = vld [vmem:[%s1427_s1 + $0x80] ss:$16 sps:$4 sm:$0xff] (!%p139_p2)  }
   0xc   : > { %458 = vmatpush1.bf16.msra.mxu0 (!%p139_p2), %v1099_v7  ;;  %571 = vmatpush1.bf16.msra.mxu1 (!%p139_p2), %v1100_v8  ;;  %v1118_v20 = vld [vmem:[%s1427_s1 + $0x88] ss:$16 sps:$4 sm:$0xff] (!%p139_p2)   ;;  %v1119_v21 = vld [vmem:[%s1427_s1 + $0xa4] ss:$16 sps:$4 sm:$0xff] (!%p139_p2)   ;;  %v1121_v22 = vld [vmem:[%s1427_s1 + $0xac] ss:$16 sps:$4 sm:$0xff] (!%p139_p2)  }
   0xd   : > { %459 = vmatprep.subr.bf16.mxu0 %v1101_v9  ;;  %572 = vmatprep.subr.bf16.mxu1 %v1103_v10  ;;  %s1431_s5 = smov (!%p164_p3, %s968_s5), 63  ;;  %v1123_v23 = vld [vmem:[%s1427_s1 + $0xa0] ss:$16 sps:$4 sm:$0xff]   ;;  %v1124_v24 = vld [vmem:[%s1427_s1 + $0xa8] ss:$16 sps:$4 sm:$0xff]   ;;  %v228_v42 = vshrl.u32 %v227_v41, 7 }
   0xe   : > { %s969_s7 = sshll.u32 %s1431_s5, 2  ;;  %v1125_v25 = vld [vmem:[%s1427_s1 + $0xc4] ss:$16 sps:$4 sm:$0xff]   ;;  %v1127_v26 = vld [vmem:[%s1427_s1 + $0xcc] ss:$16 sps:$4 sm:$0xff]   ;;  %s1047_s8 = sshll.u32 %s1431_s5, 4 }
   0xf   : > { %s1265_s17 = scalar_lea.vmem %s1426_s0, %s969_s7  ;;  %v1129_v27 = vld [vmem:[%s1427_s1 + $0xc0] ss:$16 sps:$4 sm:$0xff]   ;;  %v1130_v28 = vld [vmem:[%s1427_s1 + $0xc8] ss:$16 sps:$4 sm:$0xff]   ;;  %v1131_v29 = vld [vmem:[%s1427_s1 + $0xe4] ss:$16 sps:$4 sm:$0xff]   ;;  %s1329_s11 = scalar_lea.vmem %s1429_s3, %s1047_s8 }
  0x10   : > { %460 = vmatpush1.bf16.msra.mxu0 %v1105_v11  ;;  %573 = vmatpush1.bf16.msra.mxu1 %v1106_v12  ;;  %v1133_v30 = vld [vmem:[%s1427_s1 + $0xec] ss:$16 sps:$4 sm:$0xff]   ;;  %v1135_v31 = vld [vmem:[%s1427_s1 + $0xe0] ss:$16 sps:$4 sm:$0xff]   ;;  %v1136_v32 = vld [vmem:[%s1427_s1 + $0xe8] ss:$16 sps:$4 sm:$0xff]  }
  0x11   : > { %461 = vmatprep.subr.bf16.mxu0 %v1107_v13  ;;  %574 = vmatprep.subr.bf16.mxu1 %v1109_v14  ;;  %v1137_v33 = vld [vmem:[%s1265_s17] sm:$0xff]   ;;  %v1138_v34 = vld [vmem:[%s1265_s17 + $0x8] sm:$0xff]   ;;  %v1139_v35 = vld [vmem:[%s1265_s17 + $0x10] sm:$0xff]   ;;  %v229_v43 = vsub.s32 0, %v228_v42  ;;  %v237_v44 = vsub.s32 2, %v228_v42  ;;  %v233_v46 = vsub.s32 1, %v228_v42 }
  0x12   : > { %v1140_v36 = vld [vmem:[%s1265_s17 + $0x18] sm:$0xff]   ;;  %v1141_v37 = vld [vmem:[%s1265_s17 + $0x20] sm:$0xff]   ;;  %v1142_v38 = vld [vmem:[%s1265_s17 + $0x28] sm:$0xff]   ;;  %v241_v47 = vsub.s32 3, %v228_v42 }
  0x13   : > { %v1143_v39 = vld [vmem:[%s1265_s17 + $0x30] sm:$0xff]   ;;  %v1144_v40 = vld [vmem:[%s1265_s17 + $0x38] sm:$0xff]   ;;  %v225_v45 = vld [vmem:[%s1428_s2] sm:$0xf] }
  0x14   : > { %462 = vmatpush1.bf16.msra.mxu0 %v1111_v15  ;;  %575 = vmatpush1.bf16.msra.mxu1 %v1112_v16  ;;  %v1313_v48 = vrot.slane %v225_v45, %v229_v43  ;;  %v1315_v49 = vrot.slane %v225_v45, %v237_v44  ;;  %v1317_v50 = vrot.slane %v225_v45, %v233_v46 }
  0x15   : > { %463 = vmatprep.subr.bf16.mxu0 %v1113_v17  ;;  %576 = vmatprep.subr.bf16.mxu1 %v1115_v18  ;;  %v1319_v51 = vrot.slane %v225_v45, %v241_v47 }
  0x18   : > { %464 = vmatpush1.bf16.msra.mxu0 %v1117_v19  ;;  %577 = vmatpush1.bf16.msra.mxu1 %v1118_v20 }
  0x19   : > { %465 = vmatprep.subr.bf16.mxu0 %v1119_v21  ;;  %578 = vmatprep.subr.bf16.mxu1 %v1121_v22 }
  0x1c   : > { %466 = vmatpush1.bf16.msra.mxu0 %v1123_v23  ;;  %579 = vmatpush1.bf16.msra.mxu1 %v1124_v24 }
  0x1d   : > { %467 = vmatprep.subr.bf16.mxu0 %v1125_v25  ;;  %580 = vmatprep.subr.bf16.mxu1 %v1127_v26 }
  0x20   : > { %468 = vmatpush1.bf16.msra.mxu0 %v1129_v27  ;;  %581 = vmatpush1.bf16.msra.mxu1 %v1130_v28 }
  0x21   : > { %469 = vmatprep.subr.bf16.mxu0 %v1131_v29  ;;  %582 = vmatprep.subr.bf16.mxu1 %v1133_v30 }
  0x24   : > { %470 = vmatpush1.bf16.msra.mxu0 %v1135_v31  ;;  %583 = vmatpush1.bf16.msra.mxu1 %v1136_v32 }
  0x27   : > { %488 = vmatmul.mubr.bf16.vlgmr.msra.gmra.mrb[0].mxu0 %v1137_v33  ;;  %601 = vmatmul.mubr.bf16.vlgmr.msra.gmra.mrb[0].mxu1 %v1137_v33 }
  0x28   : > { %497 = vmatprep.mubr.bf16.mxu0 %v1153_v2  ;;  %610 = vmatprep.mubr.bf16.mxu1 %v1153_v2 }
  0x2f   : > { %498 = vmatmul.mubr.bf16.gmra.mrb[4].mxu0 %v1138_v34  ;;  %611 = vmatmul.mubr.bf16.gmra.mrb[4].mxu1 %v1138_v34 }
  0x30   : > { %507 = vmatprep.mubr.bf16.mxu0 %v1153_v2  ;;  %620 = vmatprep.mubr.bf16.mxu1 %v1153_v2 }
  0x37   : > { %508 = vmatmul.mubr.bf16.gmra.mrb[8].mxu0 %v1139_v35  ;;  %621 = vmatmul.mubr.bf16.gmra.mrb[8].mxu1 %v1139_v35 }
  0x38   : > { %517 = vmatprep.mubr.bf16.mxu0 %v1153_v2  ;;  %630 = vmatprep.mubr.bf16.mxu1 %v1153_v2 }
  0x3f   : > { %518 = vmatmul.mubr.bf16.gmra.mrb[12].mxu0 %v1140_v36  ;;  %631 = vmatmul.mubr.bf16.gmra.mrb[12].mxu1 %v1140_v36 }
  0x40   : > { %527 = vmatprep.mubr.bf16.mxu0 %v1153_v2  ;;  %640 = vmatprep.mubr.bf16.mxu1 %v1153_v2 }
  0x47   : > { %528 = vmatmul.mubr.bf16.gmra.mrb[16].mxu0 %v1141_v37  ;;  %641 = vmatmul.mubr.bf16.gmra.mrb[16].mxu1 %v1141_v37 }
  0x48   : > { %537 = vmatprep.mubr.bf16.mxu0 %v1153_v2  ;;  %650 = vmatprep.mubr.bf16.mxu1 %v1153_v2 }
  0x4f   : > { %538 = vmatmul.mubr.bf16.gmra.mrb[20].mxu0 %v1142_v38  ;;  %651 = vmatmul.mubr.bf16.gmra.mrb[20].mxu1 %v1142_v38 }
  0x50   : > { %547 = vmatprep.mubr.bf16.mxu0 %v1153_v2  ;;  %660 = vmatprep.mubr.bf16.mxu1 %v1153_v2 }
  0x57   : > { %548 = vmatmul.mubr.bf16.gmra.mrb[24].mxu0 %v1143_v39  ;;  %661 = vmatmul.mubr.bf16.gmra.mrb[24].mxu1 %v1143_v39 }
  0x58   : > { %557 = vmatprep.mubr.bf16.mxu0 %v1153_v2  ;;  %670 = vmatprep.mubr.bf16.mxu1 %v1153_v2 }
  0x5f   : > { %558 = vmatmul.mubr.bf16.gmra.mrb[28].mxu0 %v1144_v40  ;;  %671 = vmatmul.mubr.bf16.gmra.mrb[28].mxu1 %v1144_v40 }
  0xfa   : > { %v489_v52 = vpop.f32.mrb[0].mxu0  ;;  %v602_v53 = vpop.f32.mrb[0].mxu1 }
  0xfb   : > { %v490_v54 = vadd.f32 %v489_v52, %v1313_v48  ;;  %v603_v55 = vadd.f32 %v602_v53, %v1315_v49  ;;  %v491_v56 = vpop.f32.mrb[1].mxu0  ;;  %v604_v57 = vpop.f32.mrb[1].mxu1 }
  0xfc   : > { %v492_v58 = vadd.f32 %v491_v56, %v1317_v50  ;;  %v605_v59 = vadd.f32 %v604_v57, %v1319_v51  ;;  %v493_v60 = vpop.f32.mrb[2].mxu0  ;;  %v606_v61 = vpop.f32.mrb[2].mxu1 }
  0xfd   : > { %v494_v62 = vadd.f32 %v493_v60, %v1313_v48  ;;  %v607_v63 = vadd.f32 %v606_v61, %v1315_v49  ;;  %v495_v0 = vpop.f32.mrb[3].mxu0  ;;  %v608_v1 = vpop.f32.mrb[3].mxu1 }
  0xfe   : > { %v1048_v2 = vpack.c.bf16 %v492_v58, %v490_v54  ;;  %v1049_v3 = vpack.c.bf16 %v605_v59, %v603_v55  ;;  %v496_v4 = vadd.f32 %v495_v0, %v1317_v50  ;;  %v609_v5 = vadd.f32 %v608_v1, %v1319_v51 }
 0x100   : > { %873 = vst [vmem:[%s1329_s11] sm:$0xff] %v1048_v2  ;;  %874 = vst [vmem:[%s1329_s11 + $0x8] sm:$0xff] %v1049_v3  ;;  %v1050_v6 = vpack.c.bf16 %v496_v4, %v494_v62  ;;  %v1051_v7 = vpack.c.bf16 %v609_v5, %v607_v63 }
 0x102   : > { %875 = vst [vmem:[%s1329_s11 + $0x10] sm:$0xff] %v1050_v6  ;;  %876 = vst [vmem:[%s1329_s11 + $0x18] sm:$0xff] %v1051_v7  ;;  %v499_v8 = vpop.f32.mrb[4].mxu0  ;;  %v612_v9 = vpop.f32.mrb[4].mxu1 }
 0x103   : > { %v500_v10 = vadd.f32 %v499_v8, %v1313_v48  ;;  %v613_v11 = vadd.f32 %v612_v9, %v1315_v49  ;;  %v501_v12 = vpop.f32.mrb[5].mxu0  ;;  %v614_v13 = vpop.f32.mrb[5].mxu1 }
 0x104   : > { %v502_v14 = vadd.f32 %v501_v12, %v1317_v50  ;;  %v615_v15 = vadd.f32 %v614_v13, %v1319_v51  ;;  %v503_v16 = vpop.f32.mrb[6].mxu0  ;;  %v616_v17 = vpop.f32.mrb[6].mxu1 }
 0x105   : > { %v504_v18 = vadd.f32 %v503_v16, %v1313_v48  ;;  %v617_v19 = vadd.f32 %v616_v17, %v1315_v49  ;;  %v505_v20 = vpop.f32.mrb[7].mxu0  ;;  %v618_v21 = vpop.f32.mrb[7].mxu1 }
 0x106   : > { %v1052_v22 = vpack.c.bf16 %v502_v14, %v500_v10  ;;  %v1053_v23 = vpack.c.bf16 %v615_v15, %v613_v11  ;;  %v506_v24 = vadd.f32 %v505_v20, %v1317_v50  ;;  %v619_v25 = vadd.f32 %v618_v21, %v1319_v51 }
 0x108   : > { %877 = vst [vmem:[%s1329_s11 + $0x20] sm:$0xff] %v1052_v22  ;;  %878 = vst [vmem:[%s1329_s11 + $0x28] sm:$0xff] %v1053_v23  ;;  %v1054_v26 = vpack.c.bf16 %v506_v24, %v504_v18  ;;  %v1055_v27 = vpack.c.bf16 %v619_v25, %v617_v19 }
 0x10a   : > { %879 = vst [vmem:[%s1329_s11 + $0x30] sm:$0xff] %v1054_v26  ;;  %880 = vst [vmem:[%s1329_s11 + $0x38] sm:$0xff] %v1055_v27  ;;  %v509_v28 = vpop.f32.mrb[8].mxu0  ;;  %v622_v29 = vpop.f32.mrb[8].mxu1 }
 0x10b   : > { %v510_v30 = vadd.f32 %v509_v28, %v1313_v48  ;;  %v623_v31 = vadd.f32 %v622_v29, %v1315_v49  ;;  %v511_v32 = vpop.f32.mrb[9].mxu0  ;;  %v624_v33 = vpop.f32.mrb[9].mxu1 }
 0x10c   : > { %v512_v34 = vadd.f32 %v511_v32, %v1317_v50  ;;  %v625_v35 = vadd.f32 %v624_v33, %v1319_v51  ;;  %v513_v36 = vpop.f32.mrb[10].mxu0  ;;  %v626_v37 = vpop.f32.mrb[10].mxu1 }
 0x10d   : > { %v514_v38 = vadd.f32 %v513_v36, %v1313_v48  ;;  %v627_v39 = vadd.f32 %v626_v37, %v1315_v49  ;;  %v515_v40 = vpop.f32.mrb[11].mxu0  ;;  %v628_v41 = vpop.f32.mrb[11].mxu1 }
 0x10e   : > { %v1056_v42 = vpack.c.bf16 %v512_v34, %v510_v30  ;;  %v1057_v43 = vpack.c.bf16 %v625_v35, %v623_v31  ;;  %v516_v44 = vadd.f32 %v515_v40, %v1317_v50  ;;  %v629_v45 = vadd.f32 %v628_v41, %v1319_v51 }
 0x110   : > { %881 = vst [vmem:[%s1329_s11 + $0x40] sm:$0xff] %v1056_v42  ;;  %882 = vst [vmem:[%s1329_s11 + $0x48] sm:$0xff] %v1057_v43  ;;  %v1058_v46 = vpack.c.bf16 %v516_v44, %v514_v38  ;;  %v1059_v47 = vpack.c.bf16 %v629_v45, %v627_v39 }
 0x112   : > { %883 = vst [vmem:[%s1329_s11 + $0x50] sm:$0xff] %v1058_v46  ;;  %884 = vst [vmem:[%s1329_s11 + $0x58] sm:$0xff] %v1059_v47  ;;  %v519_v52 = vpop.f32.mrb[12].mxu0  ;;  %v632_v53 = vpop.f32.mrb[12].mxu1 }
 0x113   : > { %v520_v54 = vadd.f32 %v519_v52, %v1313_v48  ;;  %v633_v55 = vadd.f32 %v632_v53, %v1315_v49  ;;  %v521_v56 = vpop.f32.mrb[13].mxu0  ;;  %v634_v57 = vpop.f32.mrb[13].mxu1 }
 0x114   : > { %v522_v58 = vadd.f32 %v521_v56, %v1317_v50  ;;  %v635_v59 = vadd.f32 %v634_v57, %v1319_v51  ;;  %v523_v60 = vpop.f32.mrb[14].mxu0  ;;  %v636_v61 = vpop.f32.mrb[14].mxu1 }
 0x115   : > { %v524_v62 = vadd.f32 %v523_v60, %v1313_v48  ;;  %v637_v63 = vadd.f32 %v636_v61, %v1315_v49  ;;  %v525_v0 = vpop.f32.mrb[15].mxu0  ;;  %v638_v1 = vpop.f32.mrb[15].mxu1 }
 0x116   : > { %v1060_v2 = vpack.c.bf16 %v522_v58, %v520_v54  ;;  %v1061_v3 = vpack.c.bf16 %v635_v59, %v633_v55  ;;  %v526_v4 = vadd.f32 %v525_v0, %v1317_v50  ;;  %v639_v5 = vadd.f32 %v638_v1, %v1319_v51 }
 0x118   : > { %885 = vst [vmem:[%s1329_s11 + $0x60] sm:$0xff] %v1060_v2  ;;  %886 = vst [vmem:[%s1329_s11 + $0x68] sm:$0xff] %v1061_v3  ;;  %v1062_v6 = vpack.c.bf16 %v526_v4, %v524_v62  ;;  %v1063_v7 = vpack.c.bf16 %v639_v5, %v637_v63 }
 0x11a   : > { %887 = vst [vmem:[%s1329_s11 + $0x70] sm:$0xff] %v1062_v6  ;;  %888 = vst [vmem:[%s1329_s11 + $0x78] sm:$0xff] %v1063_v7  ;;  %v529_v8 = vpop.f32.mrb[16].mxu0  ;;  %v642_v9 = vpop.f32.mrb[16].mxu1 }
 0x11b   : > { %v530_v10 = vadd.f32 %v529_v8, %v1313_v48  ;;  %v643_v11 = vadd.f32 %v642_v9, %v1315_v49  ;;  %v531_v12 = vpop.f32.mrb[17].mxu0  ;;  %v644_v13 = vpop.f32.mrb[17].mxu1 }
 0x11c   : > { %v532_v14 = vadd.f32 %v531_v12, %v1317_v50  ;;  %v645_v15 = vadd.f32 %v644_v13, %v1319_v51  ;;  %v533_v16 = vpop.f32.mrb[18].mxu0  ;;  %v646_v17 = vpop.f32.mrb[18].mxu1 }
 0x11d   : > { %v534_v18 = vadd.f32 %v533_v16, %v1313_v48  ;;  %v647_v19 = vadd.f32 %v646_v17, %v1315_v49  ;;  %v535_v20 = vpop.f32.mrb[19].mxu0  ;;  %v648_v21 = vpop.f32.mrb[19].mxu1 }
 0x11e   : > { %v1064_v22 = vpack.c.bf16 %v532_v14, %v530_v10  ;;  %v1065_v23 = vpack.c.bf16 %v645_v15, %v643_v11  ;;  %v536_v24 = vadd.f32 %v535_v20, %v1317_v50  ;;  %v649_v25 = vadd.f32 %v648_v21, %v1319_v51 }
 0x120   : > { %889 = vst [vmem:[%s1329_s11 + $0x80] sm:$0xff] %v1064_v22  ;;  %890 = vst [vmem:[%s1329_s11 + $0x88] sm:$0xff] %v1065_v23  ;;  %v1066_v26 = vpack.c.bf16 %v536_v24, %v534_v18  ;;  %v1067_v27 = vpack.c.bf16 %v649_v25, %v647_v19 }
 0x122   : > { %891 = vst [vmem:[%s1329_s11 + $0x90] sm:$0xff] %v1066_v26  ;;  %892 = vst [vmem:[%s1329_s11 + $0x98] sm:$0xff] %v1067_v27  ;;  %v539_v28 = vpop.f32.mrb[20].mxu0  ;;  %v652_v29 = vpop.f32.mrb[20].mxu1 }
 0x123   : > { %v540_v30 = vadd.f32 %v539_v28, %v1313_v48  ;;  %v653_v31 = vadd.f32 %v652_v29, %v1315_v49  ;;  %v541_v32 = vpop.f32.mrb[21].mxu0  ;;  %v654_v33 = vpop.f32.mrb[21].mxu1 }
 0x124   : > { %v542_v34 = vadd.f32 %v541_v32, %v1317_v50  ;;  %v655_v35 = vadd.f32 %v654_v33, %v1319_v51  ;;  %v543_v36 = vpop.f32.mrb[22].mxu0  ;;  %v656_v37 = vpop.f32.mrb[22].mxu1 }
 0x125   : > { %v544_v38 = vadd.f32 %v543_v36, %v1313_v48  ;;  %v657_v39 = vadd.f32 %v656_v37, %v1315_v49  ;;  %v545_v40 = vpop.f32.mrb[23].mxu0  ;;  %v658_v41 = vpop.f32.mrb[23].mxu1 }
 0x126   : > { %v1068_v42 = vpack.c.bf16 %v542_v34, %v540_v30  ;;  %v1069_v43 = vpack.c.bf16 %v655_v35, %v653_v31  ;;  %v546_v44 = vadd.f32 %v545_v40, %v1317_v50  ;;  %v659_v45 = vadd.f32 %v658_v41, %v1319_v51 }
 0x128   : > { %893 = vst [vmem:[%s1329_s11 + $0xa0] sm:$0xff] %v1068_v42  ;;  %894 = vst [vmem:[%s1329_s11 + $0xa8] sm:$0xff] %v1069_v43  ;;  %v1070_v46 = vpack.c.bf16 %v546_v44, %v544_v38  ;;  %v1071_v47 = vpack.c.bf16 %v659_v45, %v657_v39 }
 0x12a   : > { %895 = vst [vmem:[%s1329_s11 + $0xb0] sm:$0xff] %v1070_v46  ;;  %896 = vst [vmem:[%s1329_s11 + $0xb8] sm:$0xff] %v1071_v47  ;;  %v549_v52 = vpop.f32.mrb[24].mxu0  ;;  %v662_v53 = vpop.f32.mrb[24].mxu1 }
 0x12b   : > { %v550_v54 = vadd.f32 %v549_v52, %v1313_v48  ;;  %v663_v55 = vadd.f32 %v662_v53, %v1315_v49  ;;  %v551_v56 = vpop.f32.mrb[25].mxu0  ;;  %v664_v57 = vpop.f32.mrb[25].mxu1 }
 0x12c   : > { %v552_v58 = vadd.f32 %v551_v56, %v1317_v50  ;;  %v665_v59 = vadd.f32 %v664_v57, %v1319_v51  ;;  %v553_v60 = vpop.f32.mrb[26].mxu0  ;;  %v666_v61 = vpop.f32.mrb[26].mxu1 }
 0x12d   : > { %v554_v62 = vadd.f32 %v553_v60, %v1313_v48  ;;  %v667_v63 = vadd.f32 %v666_v61, %v1315_v49  ;;  %v555_v0 = vpop.f32.mrb[27].mxu0  ;;  %v668_v1 = vpop.f32.mrb[27].mxu1 }
 0x12e   : > { %v1072_v2 = vpack.c.bf16 %v552_v58, %v550_v54  ;;  %v1073_v3 = vpack.c.bf16 %v665_v59, %v663_v55  ;;  %v556_v4 = vadd.f32 %v555_v0, %v1317_v50  ;;  %v669_v5 = vadd.f32 %v668_v1, %v1319_v51 }
 0x130   : > { %897 = vst [vmem:[%s1329_s11 + $0xc0] sm:$0xff] %v1072_v2  ;;  %898 = vst [vmem:[%s1329_s11 + $0xc8] sm:$0xff] %v1073_v3  ;;  %v1074_v6 = vpack.c.bf16 %v556_v4, %v554_v62  ;;  %v1075_v7 = vpack.c.bf16 %v669_v5, %v667_v63 }
 0x132   : > { %899 = vst [vmem:[%s1329_s11 + $0xd0] sm:$0xff] %v1074_v6  ;;  %900 = vst [vmem:[%s1329_s11 + $0xd8] sm:$0xff] %v1075_v7  ;;  %v559_v8 = vpop.f32.mrb[28].mxu0  ;;  %v672_v9 = vpop.f32.mrb[28].mxu1 }
 0x133   : > { %v560_v10 = vadd.f32 %v559_v8, %v1313_v48  ;;  %v673_v11 = vadd.f32 %v672_v9, %v1315_v49  ;;  %v561_v12 = vpop.f32.mrb[29].mxu0  ;;  %v674_v13 = vpop.f32.mrb[29].mxu1 }
 0x134   : > { %v562_v14 = vadd.f32 %v561_v12, %v1317_v50  ;;  %v675_v15 = vadd.f32 %v674_v13, %v1319_v51  ;;  %v563_v16 = vpop.f32.mrb[30].mxu0  ;;  %v676_v17 = vpop.f32.mrb[30].mxu1 }
 0x135   : > { %v564_v18 = vadd.f32 %v563_v16, %v1313_v48  ;;  %v677_v19 = vadd.f32 %v676_v17, %v1315_v49  ;;  %v565_v20 = vpop.f32.mrb[31].mxu0  ;;  %v678_v21 = vpop.f32.mrb[31].mxu1 }
 0x136   : > { %v1076_v22 = vpack.c.bf16 %v562_v14, %v560_v10  ;;  %v1077_v23 = vpack.c.bf16 %v675_v15, %v673_v11  ;;  %v566_v24 = vadd.f32 %v565_v20, %v1317_v50  ;;  %v679_v25 = vadd.f32 %v678_v21, %v1319_v51 }
 0x138   : > { %901 = vst [vmem:[%s1329_s11 + $0xe0] sm:$0xff] %v1076_v22  ;;  %902 = vst [vmem:[%s1329_s11 + $0xe8] sm:$0xff] %v1077_v23  ;;  %v1078_v26 = vpack.c.bf16 %v566_v24, %v564_v18  ;;  %v1079_v27 = vpack.c.bf16 %v679_v25, %v677_v19 }
 0x13a   : > { %903 = vst [vmem:[%s1329_s11 + $0xf0] sm:$0xff] %v1078_v26  ;;  %904 = vst [vmem:[%s1329_s11 + $0xf8] sm:$0xff] %v1079_v27 }
 0x13b PF: > { %s13_s12 = sadd.s32 1, %s1151_s12  }
 0x13c   : > { %p10_p4 = scmp.ge.s32.totalorder %s13_s12, 6  }
 0x13e   :  { %12 = sbr.rel (!%p10_p4) target bundleno = 1 (0x1), region = 62 }

// kernel: unet_forward.61
= control target key start
LH: loop header
LB: loop body
LE: loop exit
PB: predicated region body
PF: predicated region fallthrough
CT: control target
= control target key end

     0   :  { %s3600_s15 = smov 0   ;;  %s4244_s0 = inlined_call_operand.vmem [shape: bf16[2560,128], index: 0, kind: input, shape index: {}, may-alias: {0,1}]   ;;  %s4245_s1 = inlined_call_operand.vmem [shape: bf16[2560,128], index: 1, kind: input, shape index: {}, may-alias: {0,1}]   ;;  %s4246_s2 = inlined_call_operand.vmem [shape: bf16[9,128,128], index: 2, kind: input, shape index: {}]   ;;  %s4247_s3 = inlined_call_operand.vmem [shape: f32[1,128], index: 3, kind: input, shape index: {}]   ;;  %s4248_s4 = inlined_call_operand.vmem [shape: bf16[2432,128], index: 4, kind: output, shape index: {}]  }
   0x1 LB: > { %s2517_s16 = sadd.s32 4294967295, %s3573_s15   ;;  %p2521_p0 = scmp.ge.s32.totalorder %s3573_s15, 1  ;;  %s3573_s15 = sphi %s3600_s15, %s14_s15  }
   0x2   : > { %p178_p1 = scmp.lt.s32.totalorder %s3573_s15, 20 }
   0x4   : > { %p179_p2 = pnand %p2521_p0, %p178_p1 }
   0x5   : > { %v3415_v0 = vld [vmem:[%s4246_s2 + $0x40] sm:$0xff] (!%p179_p2)   ;;  %s3611_s19 = sshll.u32 (!%p179_p2), %s2517_s16, 4  ;;  %v3417_v2 = vld [vmem:[%s4246_s2 + $0x48] sm:$0xff] (!%p179_p2)   ;;  %v3419_v4 = vld [vmem:[%s4246_s2 + $0x50] sm:$0xff] (!%p179_p2)   ;;  %vm402_vm0 = vsmask.f32 (!%p179_p2), 7424 }
   0x6   : > { %182 = sbr.rel (%p179_p2) target bundleno = 440 (0x1b8), region = 36  ;;  %v3416_v1 = vld [vmem:[%s4246_s2 + $0x100] sm:$0xff] (!%p179_p2)   ;;  %2975 = vmatprep.subr.bf16.mxu1 (!%p179_p2), %v3415_v0  ;;  %v3418_v3 = vld [vmem:[%s4246_s2 + $0x108] sm:$0xff] (!%p179_p2)   ;;  %p211_p3 = scmp.lt.s32.totalorder (!%p179_p2), %s3611_s19, 319  ;;  %v3420_v5 = vld [vmem:[%s4246_s2 + $0x110] sm:$0xff] (!%p179_p2)   ;;  %vm1429_vm2 = vcmask (!%p179_p2), 1045504  }
   0x7   : > { %3103 = vmatprep.subr.bf16.mxu0 (!%p179_p2), %v3416_v1  ;;  %2976 = vmatpush3.bf16.msra.mxu1 (!%p179_p2), %v3415_v0  ;;  %v3421_v6 = vld [vmem:[%s4246_s2 + $0x58] sm:$0xff] (!%p179_p2)   ;;  %s2764_s7 = sadd.s32 (!%p179_p2), 16, %s3611_s19  ;;  %v3423_v8 = vld [vmem:[%s4246_s2 + $0x60] sm:$0xff] (!%p179_p2)   ;;  %v3425_v10 = vld [vmem:[%s4246_s2 + $0x68] sm:$0xff] (!%p179_p2)   ;;  %vm1192_vm1 = vsmask.f32 (!%p179_p2), 6400 }
   0x8   : > { %3104 = vmatpush3.bf16.msra.mxu0 (!%p179_p2), %v3416_v1  ;;  %2977 = vmatprep.subr.bf16.mxu1 (!%p179_p2), %v3417_v2  ;;  %v3422_v7 = vld [vmem:[%s4246_s2 + $0x118] sm:$0xff] (!%p179_p2)   ;;  %p218_p4 = scmp.lt.s32.totalorder (!%p179_p2), %s2764_s7, 319  ;;  %v3424_v9 = vld [vmem:[%s4246_s2 + $0x120] sm:$0xff] (!%p179_p2)   ;;  %v3426_v11 = vld [vmem:[%s4246_s2 + $0x128] sm:$0xff] (!%p179_p2)   ;;  %vm795_vm3 = vcmask (!%p179_p2), 1046528   ;;  %vm2063_vm5 = vcmask (!%p179_p2), 1044480  }
   0x9   : > { %3105 = vmatprep.subr.bf16.mxu0 (!%p179_p2), %v3418_v3  ;;  %v3427_v14 = vld [vmem:[%s4246_s2 + $0x70] sm:$0xff] (!%p179_p2)   ;;  %v3429_v32 = vld [vmem:[%s4246_s2 + $0x78] sm:$0xff] (!%p179_p2)   ;;  %v3435_v44 = vld [vmem:[%s4246_s2] sm:$0xff] (!%p179_p2)   ;;  %vm1826_vm4 = vsmask.f32 (!%p179_p2), 5376  ;;  %p225_p5 = scmp.lt.s32.totalorder (!%p179_p2), %s3611_s19, 303 }
   0xa   : > { %v3428_v19 = vld [vmem:[%s4246_s2 + $0x130] sm:$0xff] (!%p179_p2)   ;;  %v3430_v36 = vld [vmem:[%s4246_s2 + $0x138] sm:$0xff] (!%p179_p2)   ;;  %v3437_v48 = vld [vmem:[%s4246_s2 + $0x140] sm:$0xff] (!%p179_p2)  }
   0xb   : > { %2978 = vmatpush3.bf16.msra.mxu1 (!%p179_p2), %v3417_v2  ;;  %v3438_v56 = vld [vmem:[%s4246_s2 + $0x8] sm:$0xff] (!%p179_p2)  }
   0xc   : > { %3106 = vmatpush3.bf16.msra.mxu0 (!%p179_p2), %v3418_v3  ;;  %2979 = vmatprep.subr.bf16.mxu1 (!%p179_p2), %v3419_v4  ;;  %v3439_v62 = vld [vmem:[%s4246_s2 + $0x148] sm:$0xff] (!%p179_p2)   ;;  %v3441_v3 = vld [vmem:[%s4246_s2 + $0x10] sm:$0xff] (!%p179_p2)  }
   0xd   : > { %s212_s30 = scalar_select %p211_p3, %s3611_s19, 319  ;;  %3107 = vmatprep.subr.bf16.mxu0 %v3420_v5 }
   0xe   : > { %s4250_s7 = smov (!%p218_p4, %s2764_s7), 319  ;;  %s4252_s19 = smov (!%p225_p5, %s3611_s19), 303 }
   0xf   : > { %2980 = vmatpush3.bf16.msra.mxu1 %v3419_v4  ;;  %s2523_s10 = sshll.u32 %s212_s30, 2  ;;  %s2525_s11 = sshll.u32 %s4250_s7, 2 }
  0x10   : > { %3108 = vmatpush3.bf16.msra.mxu0 %v3420_v5  ;;  %2981 = vmatprep.subr.bf16.mxu1 %v3421_v6  ;;  %s3649_s21 = scalar_lea.vmem %s4244_s0, %s2523_s10  ;;  %s3740_s18 = scalar_lea.vmem %s4245_s1, %s2525_s11 }
  0x11   : > { %3109 = vmatprep.subr.bf16.mxu0 %v3422_v7  ;;  %v3657_v12 = vld [vmem:[%s3649_s21] sm:$0xff]   ;;  %v3660_v13 = vld [vmem:[%s3649_s21 + $0x8] sm:$0xff]   ;;  %v3669_v18 = vld [vmem:[%s3649_s21 + $0x10] sm:$0xff]  }
  0x12   : > { %v404_v15 = vshrl.u32 %v3657_v12, 16  ;;  %v406_v16 = vshll.u32 %v3657_v12, 16  ;;  %v411_v17 = vshll.u32 %v3660_v13, 16  ;;  %v3675_v20 = vld [vmem:[%s3649_s21 + $0x18] sm:$0xff]   ;;  %v419_v23 = vshll.u32 %v3669_v18, 16  ;;  %v3683_v28 = vld [vmem:[%s3649_s21 + $0x20] sm:$0xff]  }
  0x13   : > { %2982 = vmatpush3.bf16.msra.mxu1 %v3421_v6  ;;  %v423_v24 = vshrl.u32 %v3669_v18, 16  ;;  %v427_v25 = vshll.u32 %v3675_v20, 16  ;;  %v431_v26 = vshrl.u32 %v3675_v20, 16  ;;  %v415_v27 = vshrl.u32 %v3660_v13, 16  ;;  %v3704_v46 = vld [vmem:[%s3649_s21 + $0x28] sm:$0xff]   ;;  %v3718_v54 = vld [vmem:[%s3649_s21 + $0x30] sm:$0xff]  }
  0x14   : > { %3110 = vmatpush3.bf16.msra.mxu0 %v3422_v7  ;;  %2983 = vmatprep.subr.bf16.mxu1 %v3423_v8  ;;  %v408_v21 = vrot.slane %v406_v16, 1  ;;  %v413_v22 = vrot.slane %v411_v17, 1  ;;  %v1194_v31 = vrot.slane %v419_v23, 2  ;;  %v3689_v35 = vshll.u32 %v3683_v28, 16  ;;  %v3750_v7 = vld [vmem:[%s3649_s21 + $0x38] sm:$0xff]  }
  0x15   : > { %3111 = vmatprep.subr.bf16.mxu0 %v3424_v9  ;;  %v1193_v30 = vrot.slane %v423_v24, 1  ;;  %v1196_v33 = vrot.slane %v431_v26, 1  ;;  %v1197_v34 = vrot.slane %v427_v25, 2  ;;  %v3696_v39 = vshrl.u32 %v3683_v28, 16 }
  0x16   : > { %v409_v29 = vor.u32 %v408_v21, %v404_v15  ;;  %v1201_v41 = vrot.slane %v3689_v35, 2  ;;  %v417_v42 = vor.u32 %v415_v27, %v413_v22  ;;  %v421_v43 = vrot.slane %v419_v23, 1  ;;  %v3445_v23 = vld [vmem:[%s4246_s2 + $0x158] sm:$0xff]  }
  0x17   : > { %2984 = vmatpush3.bf16.msra.mxu1 %v3423_v8  ;;  %v1195_v38 = vor.u32 %v1194_v31, %v1193_v30  ;;  %v1198_v40 = vor.u32 %v1197_v34, %v1196_v33  ;;  %v1200_v45 = vrot.slane %v3696_v39, 1  ;;  %v3712_v50 = vshll.u32 %v3704_v46, 16  ;;  %v3780_v30 = vld [vmem:[%s3740_s18 + $0x8] sm:$0xff]  }
  0x18   : > { %3112 = vmatpush3.bf16.msra.mxu0 %v3424_v9  ;;  %2985 = vmatprep.subr.bf16.mxu1 %v3425_v10  ;;  %v414_v37 = vsel %vm402_vm0, %v409_v29, %v413_v22  ;;  %v3715_v51 = vshrl.u32 %v3704_v46, 16  ;;  %v425_v52 = vor.u32 %v423_v24, %v421_v43  ;;  %v429_v53 = vrot.slane %v427_v25, 1  ;;  %v3443_v9 = vld [vmem:[%s4246_s2 + $0x150] sm:$0xff]   ;;  %v3444_v22 = vld [vmem:[%s4246_s2 + $0x18] sm:$0xff]  }
  0x19   : > { %3113 = vmatprep.subr.bf16.mxu0 %v3426_v11  ;;  %2991 = vmatprep.mubr.bf16.mxu1 %v414_v37  ;;  %v1199_v47 = vsel %vm1192_vm1, %v1195_v38, %v1198_v40  ;;  %v1202_v49 = vor.u32 %v1201_v41, %v1200_v45  ;;  %v422_v55 = vsel %vm402_vm0, %v417_v42, %v421_v43  ;;  %v1205_v58 = vrot.slane %v3712_v50, 2  ;;  %v3795_v43 = vld [vmem:[%s3740_s18 + $0x10] sm:$0xf] }
  0x1a   : > { %3119 = vmatprep.mubr.bf16.mxu0 %v1199_v47  ;;  %v1204_v57 = vrot.slane %v3715_v51, 1  ;;  %v3728_v60 = vshll.u32 %v3718_v54, 16  ;;  %v3731_v61 = vshrl.u32 %v3718_v54, 16  ;;  %v437_v0 = vrot.slane %v3689_v35, 1 }
  0x1b   : > { %2986 = vmatpush3.bf16.msra.mxu1 %v3425_v10  ;;  %v1203_v59 = vsel %vm1192_vm1, %v1198_v40, %v1202_v49  ;;  %v430_v1 = vsel %vm402_vm0, %v425_v52, %v429_v53  ;;  %v433_v2 = vor.u32 %v431_v26, %v429_v53  ;;  %v247_v10 = vld [vmem:[%s3740_s18] sm:$0xf]  ;;  %v3761_v15 = vshrl.u32 %v3750_v7, 16 }
  0x1c   : > { %3114 = vmatpush3.bf16.msra.mxu0 %v3426_v11  ;;  %2987 = vmatprep.subr.bf16.mxu1 %v3427_v14  ;;  %v1206_v63 = vor.u32 %v1205_v58, %v1204_v57  ;;  %v1208_v4 = vrot.slane %v3731_v61, 1  ;;  %v1209_v5 = vrot.slane %v3728_v60, 2  ;;  %v248_v11 = vld [vmem:[%s3740_s18 + $0x4] sm:$0xf]  ;;  %v445_v21 = vrot.slane %v3712_v50, 1 }
  0x1d   : > { %3115 = vmatprep.subr.bf16.mxu0 %v3428_v19  ;;  %v3763_v16 = vcombine.low %v247_v10, %v248_v11  ;;  %v438_v17 = vsel %vm402_vm0, %v433_v2, %v437_v0  ;;  %v1212_v24 = vrot.slane %v3761_v15, 1  ;;  %v1229_v37 = vshll.u32 %v3780_v30, 16  ;;  %v3449_v52 = vld [vmem:[%s4246_s2 + $0x160] sm:$0xff]   ;;  %v3456_v11 = vld [vmem:[%s4246_s2 + $0x170] sm:$0xff]  }
  0x1e   : > { %v1207_v6 = vsel %vm1192_vm1, %v1202_v49, %v1206_v63  ;;  %v1210_v8 = vor.u32 %v1209_v5, %v1208_v4  ;;  %v449_v40 = vor.u32 %v3715_v51, %v445_v21  ;;  %v453_v41 = vrot.slane %v3728_v60, 1 }
  0x1f   : > { %2988 = vmatpush3.bf16.msra.mxu1 %v3427_v14  ;;  %v3758_v14 = vshll.u32 %v3750_v7, 16  ;;  %v1217_v26 = vshrl.u32 %v3763_v16, 16  ;;  %v1220_v27 = vshll.u32 %v3763_v16, 16  ;;  %v3792_v42 = vcombine.low %v247_v10, %v247_v10 }
  0x20   : > { %3116 = vmatpush3.bf16.msra.mxu0 %v3428_v19  ;;  %2989 = vmatprep.subr.bf16.mxu1 %v3429_v32  ;;  %v441_v19 = vor.u32 %v3696_v39, %v437_v0  ;;  %v1211_v29 = vsel %vm1192_vm1, %v1206_v63, %v1210_v8  ;;  %v3806_v49 = vcombine.low %v3795_v43, %v3795_v43 }
  0x21   : > { %3117 = vmatprep.subr.bf16.mxu0 %v3430_v36  ;;  %v1213_v25 = vrot.slane %v3758_v14, 2  ;;  %v1222_v33 = vrot.slane %v1220_v27, 2  ;;  %v461_v53 = vrot.slane %v3758_v14, 1  ;;  %v454_v58 = vsel %vm402_vm0, %v449_v40, %v453_v41 }
  0x22   : > { %v446_v34 = vsel %vm402_vm0, %v441_v19, %v445_v21  ;;  %v1238_v57 = vshll.u32 %v3806_v49, 16  ;;  %v467_v63 = vshll.u32 %v3792_v42, 16  ;;  %v1431_v21 = vrot.slane %v3675_v20, 2 }
  0x23   : > { %2990 = vmatpush3.bf16.msra.mxu1 %v3429_v32  ;;  %v1214_v31 = vor.u32 %v1213_v25, %v1212_v24  ;;  %v1219_v32 = vrot.slane %v1217_v26, 1  ;;  %v3457_v24 = vld [vmem:[%s4246_s2 + $0x38] sm:$0xff]   ;;  %v797_v25 = vrot.slane %v3660_v13, 1 }
  0x24   : > { %3118 = vmatpush3.bf16.msra.mxu0 %v3430_v36  ;;  %3007 = vmatprep.subr.bf16.mxu1 %v3435_v44  ;;  %v1226_v36 = vshrl.u32 %v3780_v30, 16  ;;  %v1240_v2 = vrot.slane %v1238_v57, 2  ;;  %v3461_v57 = vld [vmem:[%s4246_s2 + $0x88] sm:$0xff]  }
  0x25   : > { %3135 = vmatprep.subr.bf16.mxu0 %v3437_v48  ;;  %v1215_v38 = vsel %vm1192_vm1, %v1210_v8, %v1214_v31  ;;  %v1223_v45 = vor.u32 %v1222_v33, %v1219_v32  ;;  %v469_v8 = vrot.slane %v467_v63, 1  ;;  %v801_v33 = vrot.slane %v3675_v20, 1 }
  0x26   : > { %2992 = vmatmul.mubr.bf16.vlgmr.msra.gmra.mrb[0].mxu1 %v422_v55  ;;  %v1228_v47 = vrot.slane %v1226_v36, 1  ;;  %v457_v55 = vor.u32 %v3731_v61, %v453_v41  ;;  %v1433_v41 = vrot.slane %v3683_v28, 2  ;;  %v1828_v63 = vrot.slane %v3689_v35, 3  ;;  %v3463_v35 = vld [vmem:[%s4246_s2 + $0x90] sm:$0xff]  }
  0x27   : > { %3120 = vmatmul.mubr.bf16.vlgmr.msra.gmra.mrb[0].mxu0 %v1203_v59  ;;  %3008 = vmatpush3.bf16.msra.mxu1 %v3435_v44  ;;  %v3447_v44 = vld [vmem:[%s4246_s2 + $0x20] sm:$0xff]   ;;  %v3450_v59 = vld [vmem:[%s4246_s2 + $0x28] sm:$0xff]   ;;  %v1224_v0 = vsel %vm1192_vm1, %v1214_v31, %v1223_v45  ;;  %v799_v31 = vrot.slane %v3669_v18, 1 }
  0x28   : > { %3136 = vmatpush3.bf16.msra.mxu0 %v3437_v48  ;;  %3009 = vmatprep.subr.bf16.mxu1 %v3438_v56  ;;  %v1231_v48 = vrot.slane %v1229_v37, 2  ;;  %v462_v4 = vsel %vm402_vm0, %v457_v55, %v461_v53 }
  0x29   : > { %3137 = vmatprep.subr.bf16.mxu0 %v3439_v62  ;;  %2995 = vmatprep.mubr.bf16.mxu1 %v430_v1  ;;  %v3855_v40 = vsel %vm795_vm3, %v797_v25, %v799_v31 }
  0x2a   : > { %3123 = vmatprep.mubr.bf16.mxu0 %v1207_v6  ;;  %v465_v6 = vor.u32 %v3761_v15, %v461_v53  ;;  %v1435_v53 = vrot.slane %v3704_v46, 2 }
  0x2b   : > { %3010 = vmatpush3.bf16.msra.mxu1 %v3438_v56  ;;  %v1235_v56 = vshrl.u32 %v3806_v49, 16 }
  0x2c   : > { %3138 = vmatpush3.bf16.msra.mxu0 %v3439_v62  ;;  %3011 = vmatprep.subr.bf16.mxu1 %v3441_v3  ;;  %v1232_v62 = vor.u32 %v1231_v48, %v1228_v47  ;;  %v470_v19 = vsel %vm402_vm0, %v465_v6, %v469_v8  ;;  %v3460_v47 = vld [vmem:[%s4246_s2 + $0x180] sm:$0xff]   ;;  %v807_v48 = vrot.slane %v3718_v54, 1  ;;  %v1439_v6 = vrot.slane %v3750_v7, 2 }
  0x2d   : > { %3139 = vmatprep.subr.bf16.mxu0 %v3443_v9  ;;  %v1237_v1 = vrot.slane %v1235_v56, 1  ;;  %v1434_v56 = vsel %vm1429_vm2, %v1431_v21, %v1433_v41 }
  0x2e   : > { %2996 = vmatmul.mubr.bf16.gmra.mrb[4].mxu1 %v438_v17  ;;  %v1233_v5 = vsel %vm1192_vm1, %v1223_v45, %v1232_v62  ;;  %v1430_v17 = vrot.slane %v3669_v18, 2  ;;  %v805_v45 = vrot.slane %v3704_v46, 1 }
  0x2f   : > { %3124 = vmatmul.mubr.bf16.gmra.mrb[4].mxu0 %v1211_v29  ;;  %3012 = vmatpush3.bf16.msra.mxu1 %v3441_v3  ;;  %v3451_v3 = vld [vmem:[%s4246_s2 + $0x168] sm:$0xff]   ;;  %v1241_v10 = vor.u32 %v1240_v2, %v1237_v1  ;;  %v3458_v29 = vld [vmem:[%s4246_s2 + $0x178] sm:$0xff]   ;;  %v3899_v1 = vsel %vm1429_vm2, %v1433_v41, %v1435_v53 }
  0x30   : > { %3140 = vmatpush3.bf16.msra.mxu0 %v3443_v9  ;;  %3013 = vmatprep.subr.bf16.mxu1 %v3444_v22  ;;  %v3454_v9 = vld [vmem:[%s4246_s2 + $0x30] sm:$0xff]   ;;  %v3876_v55 = vsel %vm795_vm3, %v805_v45, %v807_v48 }
  0x31   : > { %3141 = vmatprep.subr.bf16.mxu0 %v3445_v23  ;;  %2999 = vmatprep.mubr.bf16.mxu1 %v446_v34  ;;  %v1432_v34 = vsel %vm1429_vm2, %v1430_v17, %v1431_v21  ;;  %v1441_v17 = vrot.slane %v3763_v16, 2  ;;  %v1847_v21 = vrot.slane %v1229_v37, 3 }
  0x32   : > { %3127 = vmatprep.mubr.bf16.mxu0 %v1215_v38  ;;  %v3459_v38 = vld [vmem:[%s4246_s2 + $0x80] sm:$0xff]  }
  0x33   : > { %3014 = vmatpush3.bf16.msra.mxu1 %v3444_v22  ;;  %v796_v22 = vrot.slane %v3657_v12, 1 }
  0x34   : > { %3142 = vmatpush3.bf16.msra.mxu0 %v3445_v23  ;;  %3015 = vmatprep.subr.bf16.mxu1 %v3447_v44  ;;  %v1242_v23 = vsel %vm1192_vm1, %v1232_v62, %v1241_v10  ;;  %v3462_v62 = vld [vmem:[%s4246_s2 + $0x188] sm:$0xff]  }
  0x35   : > { %3143 = vmatprep.subr.bf16.mxu0 %v3449_v52  ;;  %v3847_v32 = vsel %vm795_vm3, %v796_v22, %v797_v25  ;;  %v1005_v22 = vrot.slane %v3763_v16, 1 }
  0x36   : > { %3000 = vmatmul.mubr.bf16.gmra.mrb[8].mxu1 %v454_v58 }
  0x37   : > { %3128 = vmatmul.mubr.bf16.gmra.mrb[8].mxu0 %v1224_v0  ;;  %3016 = vmatpush3.bf16.msra.mxu1 %v3447_v44  ;;  %v3861_v44 = vsel %vm795_vm3, %v799_v31, %v801_v33  ;;  %v1830_v0 = vrot.slane %v3715_v51, 2  ;;  %v3464_v51 = vld [vmem:[%s4246_s2 + $0x190] sm:$0xff]   ;;  %v3469_v31 = vld [vmem:[%s4246_s2 + $0xa8] sm:$0xff]  }
  0x38   : > { %3144 = vmatpush3.bf16.msra.mxu0 %v3449_v52  ;;  %3017 = vmatprep.subr.bf16.mxu1 %v3450_v59  ;;  %v3870_v52 = vrot.slane %v3750_v7, 1 }
  0x39   : > { %3145 = vmatprep.subr.bf16.mxu0 %v3451_v3  ;;  %3003 = vmatprep.mubr.bf16.mxu1 %v462_v4 }
  0x3a   : > { %3131 = vmatprep.mubr.bf16.mxu0 %v1233_v5  ;;  %v3885_v58 = vsel %vm795_vm3, %v807_v48, %v3870_v52  ;;  %v1835_v5 = vrot.slane %v3728_v60, 3  ;;  %v1842_v60 = vrot.slane %v1217_v26, 2  ;;  %v3954_v37 = vsel %vm795_vm3, %v3870_v52, %v1005_v22 }
  0x3b   : > { %3018 = vmatpush3.bf16.msra.mxu1 %v3450_v59  ;;  %v1827_v59 = vrot.slane %v3696_v39, 2  ;;  %v1437_v39 = vrot.slane %v3718_v54, 2 }
  0x3c   : > { %3146 = vmatpush3.bf16.msra.mxu0 %v3451_v3  ;;  %3019 = vmatprep.subr.bf16.mxu1 %v3454_v9  ;;  %v1831_v3 = vrot.slane %v3712_v50, 3  ;;  %v1838_v50 = vrot.slane %v3761_v15, 2  ;;  %v3466_v15 = vld [vmem:[%s4246_s2 + $0x198] sm:$0xff]  }
  0x3d   : > { %3147 = vmatprep.subr.bf16.mxu0 %v3456_v11  ;;  %v1829_v2 = vor.u32 %v1828_v63, %v1827_v59  ;;  %v3934_v26 = vsel %vm1429_vm2, %v1437_v39, %v1439_v6 }
  0x3e   : > { %3004 = vmatmul.mubr.bf16.gmra.mrb[12].mxu1 %v470_v19  ;;  %v1832_v4 = vor.u32 %v1831_v3, %v1830_v0 }
  0x3f   : > { %3132 = vmatmul.mubr.bf16.gmra.mrb[12].mxu0 %v1242_v23  ;;  %3020 = vmatpush3.bf16.msra.mxu1 %v3454_v9  ;;  %v3465_v9 = vld [vmem:[%s4246_s2 + $0x98] sm:$0xff]   ;;  %v3949_v23 = vrot.slane %v3780_v30, 2 }
  0x40   : > { %3148 = vmatpush3.bf16.msra.mxu0 %v3456_v11  ;;  %3021 = vmatprep.subr.bf16.mxu1 %v3457_v24  ;;  %v1846_v11 = vrot.slane %v1226_v36, 2  ;;  %v3468_v36 = vld [vmem:[%s4246_s2 + $0x1a0] sm:$0xff]  }
  0x41   : > { %3149 = vmatprep.subr.bf16.mxu0 %v3458_v29  ;;  %3023 = vmatprep.mubr.bf16.mxu1 %v3657_v12  ;;  %v811_v12 = vrot.slane %v3792_v42, 1 }
  0x42   : > { %3151 = vmatprep.mubr.bf16.mxu0 %v1432_v34  ;;  %v1848_v25 = vor.u32 %v1847_v21, %v1846_v11  ;;  %v3470_v34 = vld [vmem:[%s4246_s2 + $0x1a8] sm:$0xff]   ;;  %v803_v11 = vrot.slane %v3683_v28, 1 }
  0x43   : > { %3022 = vmatpush3.bf16.msra.mxu1 %v3457_v24  ;;  %v3893_v42 = vsel %vm795_vm3, %v3870_v52, %v811_v12  ;;  %v252_v24 = vld [vmem:[%s3740_s18 + $0x14] sm:$0xf] }
  0x44   : > { %3150 = vmatpush3.bf16.msra.mxu0 %v3458_v29  ;;  %3039 = vmatprep.subr.bf16.mxu1 %v3459_v38  ;;  %v3957_v29 = vsel %vm1429_vm2, %v1439_v6, %v1441_v17  ;;  %v3967_v41 = vcombine.low %v3795_v43, %v252_v24  ;;  %v2071_v6 = vrot.slane %v3763_v16, 3  ;;  %v2069_v16 = vrot.slane %v3750_v7, 3  ;;  %v4104_v24 = vld [vmem:[%s3740_s18 + $0x20] ss:$0 sps:$4 sm:$0xff]  }
  0x45   : > { %3167 = vmatprep.subr.bf16.mxu0 %v3460_v47 }
  0x46   : > { %3024 = vmatmul.mubr.bf16.vlgmr.msra.gmra.mrb[0].mxu1 %v3660_v13  ;;  %v1834_v13 = vrot.slane %v3731_v61, 2  ;;  %v1839_v61 = vrot.slane %v3758_v14, 3  ;;  %v1843_v14 = vrot.slane %v1220_v27, 3  ;;  %v3467_v27 = vld [vmem:[%s4246_s2 + $0xa0] sm:$0xff]   ;;  %v1854_v59 = vshll.u32 %v3967_v41, 16 }
  0x47   : > { %3152 = vmatmul.mubr.bf16.vlgmr.msra.gmra.mrb[0].mxu0 %v1434_v56  ;;  %3040 = vmatpush3.bf16.msra.mxu1 %v3459_v38  ;;  %v1445_v38 = vrot.slane %v3806_v49, 2  ;;  %v1851_v56 = vshrl.u32 %v3967_v41, 16 }
  0x48   : > { %3168 = vmatpush3.bf16.msra.mxu0 %v3460_v47  ;;  %3041 = vmatprep.subr.bf16.mxu1 %v3461_v57  ;;  %v1836_v8 = vor.u32 %v1835_v5, %v1834_v13  ;;  %v1840_v10 = vor.u32 %v1839_v61, %v1838_v50  ;;  %v1844_v19 = vor.u32 %v1843_v14, %v1842_v60  ;;  %v1856_v0 = vrot.slane %v1854_v59, 3  ;;  %v3478_v14 = vld [vmem:[%s4246_s2 + $0x1c8] sm:$0xff]  }
  0x49   : > { %3169 = vmatprep.subr.bf16.mxu0 %v3462_v62  ;;  %3027 = vmatprep.mubr.bf16.mxu1 %v3669_v18  ;;  %v3917_v18 = vsel %vm1429_vm2, %v1435_v53, %v1437_v39  ;;  %v3971_v47 = vsel %vm1826_vm4, %v1829_v2, %v1832_v4  ;;  %v3982_v53 = vsel %vm1429_vm2, %v1441_v17, %v3949_v23  ;;  %v1853_v63 = vrot.slane %v1851_v56, 2  ;;  %v3479_v17 = vld [vmem:[%s4246_s2 + $0xd0] sm:$0xff]   ;;  %v3493_v56 = vld [vmem:[%s4246_s2 + $0x1f8] sm:$0xff]  }
  0x4a   : > { %3155 = vmatprep.mubr.bf16.mxu0 %v3899_v1  ;;  %v3974_v48 = vsel %vm1826_vm4, %v1832_v4, %v1836_v8  ;;  %v3977_v52 = vsel %vm1826_vm4, %v1836_v8, %v1840_v10  ;;  %v3985_v43 = vsel %vm1826_vm4, %v1840_v10, %v1844_v19  ;;  %v3988_v12 = vsel %vm1826_vm4, %v1844_v19, %v1848_v25  ;;  %v3475_v8 = vld [vmem:[%s4246_s2 + $0xc0] sm:$0xff]   ;;  %v3480_v19 = vld [vmem:[%s4246_s2 + $0x1d0] sm:$0xff]  }
  0x4b   : > { %3042 = vmatpush3.bf16.msra.mxu1 %v3461_v57  ;;  %v3471_v57 = vld [vmem:[%s4246_s2 + $0xb0] sm:$0xff]   ;;  %v1007_v39 = vrot.slane %v3780_v30, 1  ;;  %v1009_v2 = vrot.slane %v3806_v49, 1  ;;  %v1446_v3 = vsel %vm1429_vm2, %v3949_v23, %v1445_v38  ;;  %v4007_v13 = vor.u32 %v1856_v0, %v1853_v63 }
  0x4c   : > { %3170 = vmatpush3.bf16.msra.mxu0 %v3462_v62  ;;  %3043 = vmatprep.subr.bf16.mxu1 %v3463_v35  ;;  %v3472_v62 = vld [vmem:[%s4246_s2 + $0x1b0] sm:$0xff]   ;;  %v2065_v50 = vrot.slane %v3704_v46, 3  ;;  %v2073_v61 = vrot.slane %v3780_v30, 3  ;;  %v2075_v60 = vrot.slane %v3967_v41, 3  ;;  %v1869_v0 = vshrl.u32 %v4104_v24, 16 }
  0x4d   : > { %3171 = vmatprep.subr.bf16.mxu0 %v3464_v51  ;;  %v4013_v4 = vsel %vm795_vm3, %v1005_v22, %v1007_v39  ;;  %v4016_v49 = vsel %vm795_vm3, %v1007_v39, %v1009_v2  ;;  %v4021_v5 = vsel %vm1826_vm4, %v1848_v25, %v4007_v13  ;;  %v3486_v22 = vld [vmem:[%s4246_s2 + $0xe8] sm:$0xff]   ;;  %v1872_v39 = vshll.u32 %v4104_v24, 16 }
  0x4e   : > { %3028 = vmatmul.mubr.bf16.gmra.mrb[4].mxu1 %v3675_v20  ;;  %v4038_v10 = vsel %vm2063_vm5, %v2071_v6, %v2073_v61  ;;  %v4048_v30 = vsel %vm2063_vm5, %v2073_v61, %v2075_v60  ;;  %v4087_v20 = vld [vmem:[%s3740_s18 + $0x18] sm:$0xff]   ;;  %v3487_v25 = vld [vmem:[%s4246_s2 + $0x1e8] sm:$0xff]   ;;  %v1871_v2 = vrot.slane %v1869_v0, 2  ;;  %s2527_s18 = sshll.u32 %s4252_s19, 2 }
  0x4f   : > { %3156 = vmatmul.mubr.bf16.gmra.mrb[4].mxu0 %v3917_v18  ;;  %3044 = vmatpush3.bf16.msra.mxu1 %v3463_v35  ;;  %v3473_v35 = vld [vmem:[%s4246_s2 + $0xb8] sm:$0xff]   ;;  %v1641_v21 = vrot.slane %v4087_v20, 2  ;;  %v1863_v59 = vshll.u32 %v4087_v20, 16  ;;  %s4231_s7 = scalar_lea.vmem %s4248_s4, %s2527_s18 }
  0x50   : > { %3172 = vmatpush3.bf16.msra.mxu0 %v3464_v51  ;;  %3045 = vmatprep.subr.bf16.mxu1 %v3465_v9  ;;  %v3474_v51 = vld [vmem:[%s4246_s2 + $0x1b8] sm:$0xff]  }
  0x51   : > { %3173 = vmatprep.subr.bf16.mxu0 %v3466_v15  ;;  %3031 = vmatprep.mubr.bf16.mxu1 %v3683_v28  ;;  %v804_v28 = vsel %vm795_vm3, %v801_v33, %v803_v11  ;;  %v3483_v33 = vld [vmem:[%s4246_s2 + $0xe0] sm:$0xff]   ;;  %v1865_v63 = vrot.slane %v1863_v59, 3 }
  0x52   : > { %3159 = vmatprep.mubr.bf16.mxu0 %v3934_v26 }
  0x53   : > { %3046 = vmatpush3.bf16.msra.mxu1 %v3465_v9  ;;  %v2067_v9 = vrot.slane %v3718_v54, 3 }
  0x54   : > { %3174 = vmatpush3.bf16.msra.mxu0 %v3466_v15  ;;  %3047 = vmatprep.subr.bf16.mxu1 %v3467_v27  ;;  %v3476_v15 = vld [vmem:[%s4246_s2 + $0x1c0] sm:$0xff]  }
  0x55   : > { %3175 = vmatprep.subr.bf16.mxu0 %v3468_v36 }
  0x56   : > { %3032 = vmatmul.mubr.bf16.gmra.mrb[8].mxu1 %v3704_v46  ;;  %v2079_v46 = vrot.slane %v4104_v24, 3 }
  0x57   : > { %3160 = vmatmul.mubr.bf16.gmra.mrb[8].mxu0 %v3957_v29  ;;  %3048 = vmatpush3.bf16.msra.mxu1 %v3467_v27  ;;  %v1639_v27 = vrot.slane %v3967_v41, 2 }
  0x58   : > { %3176 = vmatpush3.bf16.msra.mxu0 %v3468_v36  ;;  %3049 = vmatprep.subr.bf16.mxu1 %v3469_v31 }
  0x59   : > { %3177 = vmatprep.subr.bf16.mxu0 %v3470_v34  ;;  %3035 = vmatprep.mubr.bf16.mxu1 %v3718_v54  ;;  %v4043_v54 = vsel %vm2063_vm5, %v2065_v50, %v2067_v9  ;;  %v1640_v36 = vsel %vm1429_vm2, %v3949_v23, %v1639_v27  ;;  %v3489_v23 = vld [vmem:[%s4246_s2 + $0xf0] sm:$0xff]  }
  0x5a   : > { %3163 = vmatprep.mubr.bf16.mxu0 %v3982_v53 }
  0x5b   : > { %3050 = vmatpush3.bf16.msra.mxu1 %v3469_v31  ;;  %v1643_v31 = vrot.slane %v4104_v24, 2 }
  0x5c   : > { %3178 = vmatpush3.bf16.msra.mxu0 %v3470_v34  ;;  %3051 = vmatprep.subr.bf16.mxu1 %v3471_v57  ;;  %v3491_v34 = vld [vmem:[%s4246_s2 + $0x1f0] sm:$0xff]  }
  0x5d   : > { %3179 = vmatprep.subr.bf16.mxu0 %v3472_v62  ;;  %v1644_v38 = vsel %vm1429_vm2, %v1641_v21, %v1643_v31  ;;  %v4200_v31 = vld [vmem:[%s4247_s3] ss:$0 sm:$0xff] }
  0x5e   : > { %3036 = vmatmul.mubr.bf16.gmra.mrb[12].mxu1 %v3750_v7  ;;  %v4054_v7 = vsel %vm2063_vm5, %v2069_v16, %v2071_v6 }
  0x5f   : > { %3164 = vmatmul.mubr.bf16.gmra.mrb[12].mxu0 %v1446_v3  ;;  %3052 = vmatpush3.bf16.msra.mxu1 %v3471_v57  ;;  %v3494_v57 = vld [vmem:[%s4246_s2 + $0x200] sm:$0xff]   ;;  %v1874_v3 = vrot.slane %v1872_v39, 3 }
  0x60   : > { %3180 = vmatpush3.bf16.msra.mxu0 %v3472_v62  ;;  %3053 = vmatprep.subr.bf16.mxu1 %v3473_v35 }
  0x61   : > { %3181 = vmatprep.subr.bf16.mxu0 %v3474_v51  ;;  %3055 = vmatprep.mubr.bf16.mxu1 %v3847_v32  ;;  %v4051_v32 = vsel %vm2063_vm5, %v2067_v9, %v2069_v16 }
  0x62   : > { %3183 = vmatprep.mubr.bf16.mxu0 %v3899_v1  ;;  %v3477_v1 = vld [vmem:[%s4246_s2 + $0xc8] sm:$0xff]  }
  0x63   : > { %3054 = vmatpush3.bf16.msra.mxu1 %v3473_v35  ;;  %v3500_v35 = vld [vmem:[%s4246_s2 + $0x230] sm:$0xff]  }
  0x64   : > { %3182 = vmatpush3.bf16.msra.mxu0 %v3474_v51  ;;  %3071 = vmatprep.subr.bf16.mxu1 %v3475_v8  ;;  %v3566_v51 = vld [vmem:[%s3649_s21 + $0x20] sm:$0xff]  }
  0x65   : > { %3199 = vmatprep.subr.bf16.mxu0 %v3476_v15  ;;  %v2064_v6 = vrot.slane %v3566_v51, 3 }
  0x66   : > { %3056 = vmatmul.mubr.bf16.vlgmr.msra.gmra.mrb[0].mxu1 %v3855_v40  ;;  %v3481_v40 = vld [vmem:[%s4246_s2 + $0xd8] sm:$0xff]  }
  0x67   : > { %3184 = vmatmul.mubr.bf16.vlgmr.msra.gmra.mrb[0].mxu0 %v3917_v18  ;;  %3072 = vmatpush3.bf16.msra.mxu1 %v3475_v8  ;;  %v3482_v18 = vld [vmem:[%s4246_s2 + $0x1d8] sm:$0xff]  }
  0x68   : > { %3200 = vmatpush3.bf16.msra.mxu0 %v3476_v15  ;;  %3073 = vmatprep.subr.bf16.mxu1 %v3477_v1 }
  0x69   : > { %3201 = vmatprep.subr.bf16.mxu0 %v3478_v14  ;;  %3059 = vmatprep.mubr.bf16.mxu1 %v3861_v44 }
  0x6a   : > { %3187 = vmatprep.mubr.bf16.mxu0 %v3934_v26  ;;  %v806_v26 = vsel %vm795_vm3, %v803_v11, %v805_v45  ;;  %v3485_v45 = vld [vmem:[%s4246_s2 + $0x1e0] sm:$0xff]  }
  0x6b   : > { %3074 = vmatpush3.bf16.msra.mxu1 %v3477_v1 }
  0x6c   : > { %3202 = vmatpush3.bf16.msra.mxu0 %v3478_v14  ;;  %3075 = vmatprep.subr.bf16.mxu1 %v3479_v17 }
  0x6d   : > { %3203 = vmatprep.subr.bf16.mxu0 %v3480_v19 }
  0x6e   : > { %3060 = vmatmul.mubr.bf16.gmra.mrb[4].mxu1 %v804_v28 }
  0x6f   : > { %3188 = vmatmul.mubr.bf16.gmra.mrb[4].mxu0 %v3957_v29  ;;  %3076 = vmatpush3.bf16.msra.mxu1 %v3479_v17  ;;  %v1642_v29 = vsel %vm1429_vm2, %v1639_v27, %v1641_v21 }
  0x70   : > { %3204 = vmatpush3.bf16.msra.mxu0 %v3480_v19  ;;  %3077 = vmatprep.subr.bf16.mxu1 %v3481_v40 }
  0x71   : > { %3205 = vmatprep.subr.bf16.mxu0 %v3482_v18  ;;  %3063 = vmatprep.mubr.bf16.mxu1 %v806_v26 }
  0x72   : > { %3191 = vmatprep.mubr.bf16.mxu0 %v3982_v53  ;;  %v3492_v53 = vld [vmem:[%s4246_s2 + $0xf8] sm:$0xff]  }
  0x73   : > { %3078 = vmatpush3.bf16.msra.mxu1 %v3481_v40 }
  0x74   : > { %3206 = vmatpush3.bf16.msra.mxu0 %v3482_v18  ;;  %3079 = vmatprep.subr.bf16.mxu1 %v3483_v33 }
  0x75   : > { %3207 = vmatprep.subr.bf16.mxu0 %v3485_v45 }
  0x76   : > { %3064 = vmatmul.mubr.bf16.gmra.mrb[8].mxu1 %v3876_v55 }
  0x77   : > { %3192 = vmatmul.mubr.bf16.gmra.mrb[8].mxu0 %v1640_v36  ;;  %3080 = vmatpush3.bf16.msra.mxu1 %v3483_v33 }
  0x78   : > { %3208 = vmatpush3.bf16.msra.mxu0 %v3485_v45  ;;  %3081 = vmatprep.subr.bf16.mxu1 %v3486_v22 }
  0x79   : > { %3209 = vmatprep.subr.bf16.mxu0 %v3487_v25  ;;  %3067 = vmatprep.mubr.bf16.mxu1 %v3885_v58 }
  0x7a   : > { %3195 = vmatprep.mubr.bf16.mxu0 %v1642_v29 }
  0x7b   : > { %3082 = vmatpush3.bf16.msra.mxu1 %v3486_v22 }
  0x7c   : > { %3210 = vmatpush3.bf16.msra.mxu0 %v3487_v25  ;;  %3083 = vmatprep.subr.bf16.mxu1 %v3489_v23 }
  0x7d   : > { %3211 = vmatprep.subr.bf16.mxu0 %v3491_v34 }
  0x7e   : > { %3068 = vmatmul.mubr.bf16.gmra.mrb[12].mxu1 %v3893_v42  ;;  %v3495_v42 = vld [vmem:[%s4246_s2 + $0x208] sm:$0xff]  }
  0x7f   : > { %3196 = vmatmul.mubr.bf16.gmra.mrb[12].mxu0 %v1644_v38  ;;  %3084 = vmatpush3.bf16.msra.mxu1 %v3489_v23 }
  0x80   : > { %3212 = vmatpush3.bf16.msra.mxu0 %v3491_v34  ;;  %3085 = vmatprep.subr.bf16.mxu1 %v3492_v53 }
  0x81   : > { %3213 = vmatprep.subr.bf16.mxu0 %v3493_v56  ;;  %3087 = vmatprep.mubr.bf16.mxu1 %v3861_v44  ;;  %v3496_v44 = vld [vmem:[%s4246_s2 + $0x210] sm:$0xff]  }
  0x82   : > { %3215 = vmatprep.mubr.bf16.mxu0 %v3971_v47  ;;  %v1860_v47 = vshrl.u32 %v4087_v20, 16 }
  0x83   : > { %3086 = vmatpush3.bf16.msra.mxu1 %v3492_v53 }
  0x84   : > { %3214 = vmatpush3.bf16.msra.mxu0 %v3493_v56  ;;  %3263 = vmatprep.subr.bf16.mxu1 %v3494_v57  ;;  %v1862_v62 = vrot.slane %v1860_v47, 2 }
  0x85   : > { %3231 = vmatprep.subr.bf16.mxu0 %v3494_v57 }
  0x86   : > { %3088 = vmatmul.mubr.bf16.vlgmr.msra.gmra.mrb[0].mxu1 %v804_v28 }
  0x87   : > { %3216 = vmatmul.mubr.bf16.vlgmr.msra.gmra.mrb[0].mxu0 %v3974_v48  ;;  %3271 = vmatpush3.bf16.msra.mxu1 %v3494_v57  ;;  %v3497_v48 = vld [vmem:[%s4246_s2 + $0x218] sm:$0xff]  }
  0x88   : > { %3232 = vmatpush3.bf16.msra.mxu0 %v3494_v57  ;;  %3264 = vmatprep.subr.bf16.mxu1 %v3495_v42 }
  0x89   : > { %3233 = vmatprep.subr.bf16.mxu0 %v3495_v42  ;;  %3091 = vmatprep.mubr.bf16.mxu1 %v806_v26 }
  0x8a   : > { %3219 = vmatprep.mubr.bf16.mxu0 %v3977_v52  ;;  %v3498_v52 = vld [vmem:[%s4246_s2 + $0x220] sm:$0xff]  }
  0x8b   : > { %3272 = vmatpush3.bf16.msra.mxu1 %v3495_v42 }
  0x8c   : > { %3234 = vmatpush3.bf16.msra.mxu0 %v3495_v42  ;;  %3265 = vmatprep.subr.bf16.mxu1 %v3496_v44 }
  0x8d   : > { %3235 = vmatprep.subr.bf16.mxu0 %v3496_v44 }
  0x8e   : > { %3092 = vmatmul.mubr.bf16.gmra.mrb[4].mxu1 %v3876_v55  ;;  %v1866_v55 = vor.u32 %v1865_v63, %v1862_v62 }
  0x8f   : > { %3220 = vmatmul.mubr.bf16.gmra.mrb[4].mxu0 %v3985_v43  ;;  %3273 = vmatpush3.bf16.msra.mxu1 %v3496_v44  ;;  %v3499_v43 = vld [vmem:[%s4246_s2 + $0x228] sm:$0xff]  }
  0x90   : > { %3236 = vmatpush3.bf16.msra.mxu0 %v3496_v44  ;;  %3266 = vmatprep.subr.bf16.mxu1 %v3497_v48 }
  0x91   : > { %3237 = vmatprep.subr.bf16.mxu0 %v3497_v48  ;;  %3095 = vmatprep.mubr.bf16.mxu1 %v3885_v58  ;;  %v1867_v58 = vsel %vm1826_vm4, %v4007_v13, %v1866_v55  ;;  %v3501_v13 = vld [vmem:[%s4246_s2 + $0x238] sm:$0xff]  }
  0x92   : > { %3223 = vmatprep.mubr.bf16.mxu0 %v3988_v12  ;;  %v1875_v12 = vor.u32 %v1874_v3, %v1871_v2 }
  0x93   : > { %3274 = vmatpush3.bf16.msra.mxu1 %v3497_v48 }
  0x94   : > { %3238 = vmatpush3.bf16.msra.mxu0 %v3497_v48  ;;  %3267 = vmatprep.subr.bf16.mxu1 %v3498_v52 }
  0x95   : > { %3239 = vmatprep.subr.bf16.mxu0 %v3498_v52 }
  0x96   : > { %3096 = vmatmul.mubr.bf16.gmra.mrb[8].mxu1 %v3954_v37  ;;  %v1876_v37 = vsel %vm1826_vm4, %v1866_v55, %v1875_v12 }
  0x97   : > { %3224 = vmatmul.mubr.bf16.gmra.mrb[8].mxu0 %v4021_v5  ;;  %3275 = vmatpush3.bf16.msra.mxu1 %v3498_v52  ;;  %v2066_v5 = vsel %vm2063_vm5, %v2064_v6, %v2065_v50 }
  0x98   : > { %3240 = vmatpush3.bf16.msra.mxu0 %v3498_v52  ;;  %3268 = vmatprep.subr.bf16.mxu1 %v3499_v43 }
  0x99   : > { %3241 = vmatprep.subr.bf16.mxu0 %v3499_v43  ;;  %3099 = vmatprep.mubr.bf16.mxu1 %v4013_v4  ;;  %v2077_v4 = vrot.slane %v4087_v20, 3 }
  0x9a   : > { %3227 = vmatprep.mubr.bf16.mxu0 %v1867_v58 }
  0x9b   : > { %3276 = vmatpush3.bf16.msra.mxu1 %v3499_v43  ;;  %v2080_v50 = vsel %vm2063_vm5, %v2077_v4, %v2079_v46 }
  0x9c   : > { %3242 = vmatpush3.bf16.msra.mxu0 %v3499_v43  ;;  %3269 = vmatprep.subr.bf16.mxu1 %v3500_v35 }
  0x9d   : > { %3243 = vmatprep.subr.bf16.mxu0 %v3500_v35 }
  0x9e   : > { %3100 = vmatmul.mubr.bf16.gmra.mrb[12].mxu1 %v4016_v49  ;;  %v2078_v49 = vsel %vm2063_vm5, %v2075_v60, %v2077_v4 }
  0x9f   : > { %3228 = vmatmul.mubr.bf16.gmra.mrb[12].mxu0 %v1876_v37  ;;  %3277 = vmatpush3.bf16.msra.mxu1 %v3500_v35 }
  0xa0   : > { %3244 = vmatpush3.bf16.msra.mxu0 %v3500_v35  ;;  %3270 = vmatprep.subr.bf16.mxu1 %v3501_v13 }
  0xa1   : > { %3245 = vmatprep.subr.bf16.mxu0 %v3501_v13  ;;  %3247 = vmatprep.mubr.bf16.mxu0 %v2066_v5 }
  0xa2   : > { %3255 = vmatprep.mubr.bf16.mxu1 %v4038_v10 }
  0xa3   : > { %3278 = vmatpush3.bf16.msra.mxu1 %v3501_v13 }
  0xa4   : > { %3246 = vmatpush3.bf16.msra.mxu0 %v3501_v13 }
  0xa6   : > { %3256 = vmatmul.mubr.bf16.vlgmr.msra.gmra.mrb[16].mxu1 %v4048_v30 }
  0xa7   : > { %3248 = vmatmul.mubr.bf16.vlgmr.msra.gmra.mrb[0].mxu0 %v4043_v54  ;;  %3259 = vmatprep.mubr.bf16.mxu1 %v2078_v49 }
  0xa8   : > { %3251 = vmatprep.mubr.bf16.mxu0 %v4051_v32 }
  0xae   : > { %3260 = vmatmul.mubr.bf16.gmra.mrb[20].mxu1 %v2080_v50 }
  0xaf   : > { %3252 = vmatmul.mubr.bf16.gmra.mrb[4].mxu0 %v4054_v7 }
 0x159   : > { %v3089_v8 = vpop.f32.mrb[0].mxu1 }
 0x15a   : > { %v1096_v61 = vpop.f32.mrb[1].mxu1 }
 0x15b   : > { %v3090_v9 = vpop.f32.mrb[2].mxu1 }
 0x15c   : > { %v1099_v41 = vpop.f32.mrb[3].mxu1 }
 0x161   : > { %v4185_v15 = vpop.f32.mrb[4].mxu1 }
 0x162   : > { %v4187_v60 = vpop.f32.mrb[5].mxu1 }
 0x163   : > { %v4189_v16 = vpop.f32.mrb[6].mxu1 }
 0x164   : > { %v4191_v10 = vpop.f32.mrb[7].mxu1 }
 0x169   : > { %v3097_v54 = vpop.f32.mrb[8].mxu1 }
 0x16a   : > { %v3225_v30 = vpop.f32.mrb[8].mxu0  ;;  %v1128_v32 = vpop.f32.mrb[9].mxu1 }
 0x16b   : > { %v3287_v1 = vadd.f32 %v3225_v30, %v3097_v54  ;;  %v1999_v14 = vpop.f32.mrb[9].mxu0  ;;  %v3098_v11 = vpop.f32.mrb[10].mxu1 }
 0x16c   : > { %v3289_v17 = vadd.f32 %v1999_v14, %v1128_v32  ;;  %v3226_v7 = vpop.f32.mrb[10].mxu0  ;;  %v1131_v19 = vpop.f32.mrb[11].mxu1 }
 0x16d   : > { %v3291_v28 = vadd.f32 %v3226_v7, %v3098_v11  ;;  %v2002_v40 = vpop.f32.mrb[11].mxu0 }
 0x16e   : > { %v3293_v18 = vadd.f32 %v2002_v40, %v1131_v19 }
 0x171   : > { %v3101_v26 = vpop.f32.mrb[12].mxu1 }
 0x172   : > { %v3229_v20 = vpop.f32.mrb[12].mxu0  ;;  %v1144_v33 = vpop.f32.mrb[13].mxu1 }
 0x173   : > { %v3295_v27 = vadd.f32 %v3229_v20, %v3101_v26  ;;  %v2015_v45 = vpop.f32.mrb[13].mxu0  ;;  %v3102_v21 = vpop.f32.mrb[14].mxu1 }
 0x174   : > { %v3297_v36 = vadd.f32 %v2015_v45, %v1144_v33  ;;  %v3230_v22 = vpop.f32.mrb[14].mxu0  ;;  %v1147_v24 = vpop.f32.mrb[15].mxu1 }
 0x175   : > { %v4193_v25 = vadd.f32 %v3230_v22, %v3102_v21  ;;  %v2018_v29 = vpop.f32.mrb[15].mxu0 }
 0x176   : > { %v4195_v23 = vadd.f32 %v2018_v29, %v1147_v24 }
 0x179   : > { %v3257_v34 = vpop.f32.mrb[16].mxu1 }
 0x17a   : > { %v3249_v38 = vpop.f32.mrb[0].mxu0  ;;  %v3288_v53 = vadd.f32 %v3287_v1, %v3257_v34  ;;  %v2203_v56 = vpop.f32.mrb[17].mxu1 }
 0x17b   : > { %v3279_v57 = vadd.f32 %v3249_v38, %v3089_v8  ;;  %v2171_v42 = vpop.f32.mrb[1].mxu0  ;;  %v3290_v44 = vadd.f32 %v3289_v17, %v2203_v56  ;;  %v3258_v47 = vpop.f32.mrb[18].mxu1 }
 0x17c   : > { %v2267_v59 = vadd.f32 %v3288_v53, %v4200_v31  ;;  %v3280_v48 = vadd.f32 %v2171_v42, %v1096_v61  ;;  %v3250_v62 = vpop.f32.mrb[2].mxu0  ;;  %v3292_v63 = vadd.f32 %v3291_v28, %v3258_v47  ;;  %v2206_v52 = vpop.f32.mrb[19].mxu1 }
 0x17d   : > { %v2259_v0 = vadd.f32 %v3279_v57, %v4200_v31  ;;  %v2265_v39 = vadd.f32 %v3290_v44, %v4200_v31  ;;  %v3281_v55 = vadd.f32 %v3250_v62, %v3090_v9  ;;  %v2174_v43 = vpop.f32.mrb[3].mxu0  ;;  %v3294_v2 = vadd.f32 %v3293_v18, %v2206_v52 }
 0x17e   : > { %v2283_v3 = vsub.f32 0.0, %v2267_v59  ;;  %v2257_v58 = vadd.f32 %v3280_v48, %v4200_v31  ;;  %v2268_v12 = vadd.f32 %v3292_v63, %v4200_v31  ;;  %v3282_v35 = vadd.f32 %v2174_v43, %v1099_v41 }
 0x17f   : > { %v2275_v51 = vsub.f32 0.0, %v2259_v0  ;;  %v2281_v6 = vsub.f32 0.0, %v2265_v39  ;;  %v2260_v37 = vadd.f32 %v3281_v55, %v4200_v31  ;;  %v2266_v13 = vadd.f32 %v3294_v2, %v4200_v31 }
 0x180   : > { %v2309_v5 = vmul.f32 1.442695, %v2283_v3  ;;  %v2273_v4 = vsub.f32 0.0, %v2257_v58  ;;  %v2284_v49 = vsub.f32 0.0, %v2268_v12  ;;  %v2258_v46 = vadd.f32 %v3282_v35, %v4200_v31 }
 0x181   : > { %v2293_v50 = vmul.f32 1.442695, %v2275_v51  ;;  %v2305_v8 = vmul.f32 1.442695, %v2281_v6  ;;  %v2276_v61 = vsub.f32 0.0, %v2260_v37  ;;  %v2282_v9 = vsub.f32 0.0, %v2266_v13 }
 0x182   : > { %3502 = vpow2.f32 %v2309_v5  ;;  %v2289_v54 = vmul.f32 1.442695, %v2273_v4  ;;  %v2311_v30 = vmul.f32 1.442695, %v2284_v49  ;;  %v2274_v32 = vsub.f32 0.0, %v2258_v46  ;;  %v3253_v41 = vpop.f32.mrb[4].mxu0 }
 0x183   : > { %3504 = vpow2.f32 %v2293_v50  ;;  %v2295_v1 = vmul.f32 1.442695, %v2276_v61  ;;  %v2307_v14 = vmul.f32 1.442695, %v2282_v9  ;;  %v3283_v11 = vadd.f32 %v3253_v41, %v4185_v15  ;;  %v3261_v17 = vpop.f32.mrb[20].mxu1  ;;  %v2187_v7 = vpop.f32.mrb[5].mxu0 }
 0x184   : > { %3506 = vpow2.f32 %v2289_v54  ;;  %v2291_v19 = vmul.f32 1.442695, %v2274_v32  ;;  %v3296_v28 = vadd.f32 %v3295_v27, %v3261_v17  ;;  %v3284_v40 = vadd.f32 %v2187_v7, %v4187_v60  ;;  %v2219_v18 = vpop.f32.mrb[21].mxu1  ;;  %v3254_v26 = vpop.f32.mrb[6].mxu0 }
 0x185   : > { %3508 = vpow2.f32 %v2305_v8  ;;  %v2263_v20 = vadd.f32 %v3283_v11, %v4200_v31  ;;  %v3298_v33 = vadd.f32 %v3297_v36, %v2219_v18  ;;  %v3285_v45 = vadd.f32 %v3254_v26, %v4189_v16  ;;  %v3262_v21 = vpop.f32.mrb[22].mxu1  ;;  %v2190_v22 = vpop.f32.mrb[7].mxu0 }
 0x186   : > { %3510 = vpow2.f32 %v2295_v1  ;;  %v2271_v15 = vadd.f32 %v3296_v28, %v4200_v31  ;;  %v2261_v24 = vadd.f32 %v3284_v40, %v4200_v31  ;;  %v3300_v29 = vadd.f32 %v4193_v25, %v3262_v21  ;;  %v2222_v27 = vpop.f32.mrb[23].mxu1 }
 0x187   : > { %3512 = vpow2.f32 %v2311_v30  ;;  %v2279_v60 = vsub.f32 0.0, %v2263_v20  ;;  %v2269_v34 = vadd.f32 %v3298_v33, %v4200_v31  ;;  %v3286_v42 = vadd.f32 %v2190_v22, %v4191_v10 }
 0x188   : > { %3514 = vpow2.f32 %v2291_v19  ;;  %v2287_v38 = vsub.f32 0.0, %v2271_v15  ;;  %v2277_v53 = vsub.f32 0.0, %v2261_v24  ;;  %v2264_v47 = vadd.f32 %v3285_v45, %v4200_v31 }
 0x189   : > { %3516 = vpow2.f32 %v2307_v14  ;;  %v2301_v36 = vmul.f32 1.442695, %v2279_v60  ;;  %v2285_v16 = vsub.f32 0.0, %v2269_v34  ;;  %v3302_v25 = vadd.f32 %v4195_v23, %v2222_v27 }
 0x18a   : > { %v2317_v56 = vmul.f32 1.442695, %v2287_v38  ;;  %v2297_v57 = vmul.f32 1.442695, %v2277_v53  ;;  %v2280_v55 = vsub.f32 0.0, %v2264_v47  ;;  %v2272_v2 = vadd.f32 %v3300_v29, %v4200_v31 }
 0x18b   : > { %3518 = vpow2.f32 %v2301_v36  ;;  %v2313_v44 = vmul.f32 1.442695, %v2285_v16  ;;  %v2262_v58 = vadd.f32 %v3286_v42, %v4200_v31  ;;  %v2270_v51 = vadd.f32 %v3302_v25, %v4200_v31 }
 0x18c   : > { %v3503_v59 = vpop.eup %3502  ;;  %3520 = vpow2.f32 %v2317_v56  ;;  %v2303_v13 = vmul.f32 1.442695, %v2280_v55  ;;  %v2288_v4 = vsub.f32 0.0, %v2272_v2 }
 0x18d   : > { %v3505_v48 = vpop.eup %3504  ;;  %v2331_v62 = vadd.f32 1.0, %v3503_v59  ;;  %3522 = vpow2.f32 %v2297_v57  ;;  %v2278_v46 = vsub.f32 0.0, %v2262_v58  ;;  %v2286_v8 = vsub.f32 0.0, %v2270_v51 }
 0x18e   : > { %v3507_v63 = vpop.eup %3506  ;;  %v2323_v52 = vadd.f32 1.0, %v3505_v48  ;;  %3524 = vpow2.f32 %v2313_v44  ;;  %v2319_v54 = vmul.f32 1.442695, %v2288_v4 }
 0x18f   : > { %v3509_v0 = vpop.eup %3508  ;;  %3526 = vrcp.f32 %v2331_v62  ;;  %v2321_v39 = vadd.f32 1.0, %v3507_v63  ;;  %v2299_v30 = vmul.f32 1.442695, %v2278_v46  ;;  %v2315_v41 = vmul.f32 1.442695, %v2286_v8 }
 0x190   : > { %v3511_v10 = vpop.eup %3510  ;;  %3528 = vrcp.f32 %v2323_v52  ;;  %v2329_v43 = vadd.f32 1.0, %v3509_v0 }
 0x191   : > { %v3513_v3 = vpop.eup %3512  ;;  %3530 = vrcp.f32 %v2321_v39  ;;  %v2324_v23 = vadd.f32 1.0, %v3511_v10 }
 0x192   : > { %v3515_v12 = vpop.eup %3514  ;;  %3532 = vrcp.f32 %v2329_v43  ;;  %v2332_v35 = vadd.f32 1.0, %v3513_v3 }
 0x193   : > { %v3517_v6 = vpop.eup %3516  ;;  %3534 = vrcp.f32 %v2324_v23  ;;  %v2322_v37 = vadd.f32 1.0, %v3515_v12 }
 0x194   : > { %3536 = vrcp.f32 %v2332_v35  ;;  %v2330_v5 = vadd.f32 1.0, %v3517_v6 }
 0x195   : > { %v3519_v49 = vpop.eup %3518  ;;  %3538 = vrcp.f32 %v2322_v37 }
 0x196   : > { %v3521_v50 = vpop.eup %3520  ;;  %3540 = vrcp.f32 %v2330_v5  ;;  %v2327_v40 = vadd.f32 1.0, %v3519_v49 }
 0x197   : > { %v3523_v61 = vpop.eup %3522  ;;  %3542 = vpow2.f32 %v2303_v13  ;;  %v2335_v45 = vadd.f32 1.0, %v3521_v50 }
 0x198   : > { %v3525_v9 = vpop.eup %3524  ;;  %3544 = vpow2.f32 %v2319_v54  ;;  %v2325_v22 = vadd.f32 1.0, %v3523_v61 }
 0x199   : > { %v3527_v31 = vpop.eup %3526  ;;  %3546 = vpow2.f32 %v2299_v30  ;;  %v2333_v15 = vadd.f32 1.0, %v3525_v9 }
 0x19a   : > { %v3529_v32 = vpop.eup %3528  ;;  %3548 = vpow2.f32 %v2315_v41 }
 0x19b   : > { %v3531_v1 = vpop.eup %3530  ;;  %3550 = vrcp.f32 %v2327_v40 }
 0x19c   : > { %v3533_v14 = vpop.eup %3532 }
 0x19d   : > { %v3535_v11 = vpop.eup %3534 }
 0x19e   : > { %v3537_v17 = vpop.eup %3536  ;;  %v2792_v7 = vpack.c.bf16 %v3535_v11, %v3529_v32 }
 0x19f   : > { %v3539_v19 = vpop.eup %3538  ;;  %v2812_v28 = vpack.c.bf16 %v3537_v17, %v3527_v31 }
 0x1a0   : > { %v3541_v18 = vpop.eup %3540  ;;  %2824 = vst [vmem:[%s4231_s7 + $0x8] sm:$0xff] %v2792_v7   ;;  %v2787_v26 = vpack.c.bf16 %v3539_v19, %v3531_v1 }
 0x1a1   : > { %v3543_v20 = vpop.eup %3542  ;;  %2828 = vst [vmem:[%s4231_s7 + $0x28] sm:$0xff] %v2812_v28   ;;  %v2807_v33 = vpack.c.bf16 %v3541_v18, %v3533_v14 }
 0x1a2   : > { %2788 = vst [vmem:[%s4231_s7] sm:$0xff] %v2787_v26   ;;  %v2328_v21 = vadd.f32 1.0, %v3543_v20  ;;  %v3545_v24 = vpop.eup %3544 }
 0x1a3   : > { %2827 = vst [vmem:[%s4231_s7 + $0x20] sm:$0xff] %v2807_v33   ;;  %v3547_v29 = vpop.eup %3546  ;;  %v2336_v27 = vadd.f32 1.0, %v3545_v24 }
 0x1a4   : > { %3552 = vrcp.f32 %v2328_v21  ;;  %v3549_v60 = vpop.eup %3548  ;;  %v2326_v34 = vadd.f32 1.0, %v3547_v29 }
 0x1a5   : > { %3554 = vrcp.f32 %v2335_v45  ;;  %v2334_v38 = vadd.f32 1.0, %v3549_v60  ;;  %v3551_v53 = vpop.eup %3550 }
 0x1a6   : > { %3556 = vrcp.f32 %v2325_v22 }
 0x1a7   : > { %3558 = vrcp.f32 %v2333_v15 }
 0x1a8   : > { %3560 = vrcp.f32 %v2336_v27 }
 0x1a9   : > { %3562 = vrcp.f32 %v2326_v34 }
 0x1aa   : > { %3564 = vrcp.f32 %v2334_v38 }
 0x1ae   : > { %v3553_v36 = vpop.eup %3552 }
 0x1af   : > { %v2802_v16 = vpack.c.bf16 %v3553_v36, %v3551_v53  ;;  %v3555_v56 = vpop.eup %3554 }
 0x1b0   : > { %v3557_v57 = vpop.eup %3556 }
 0x1b1   : > { %2826 = vst [vmem:[%s4231_s7 + $0x18] sm:$0xff] %v2802_v16   ;;  %v3559_v42 = vpop.eup %3558 }
 0x1b2   : > { %v3561_v44 = vpop.eup %3560 }
 0x1b3   : > { %v3563_v47 = vpop.eup %3562  ;;  %v2822_v25 = vpack.c.bf16 %v3561_v44, %v3555_v56 }
 0x1b4   : > { %v3565_v59 = vpop.eup %3564  ;;  %v2797_v48 = vpack.c.bf16 %v3563_v47, %v3557_v57 }
 0x1b5   : > { %2830 = vst [vmem:[%s4231_s7 + $0x38] sm:$0xff] %v2822_v25   ;;  %v2817_v62 = vpack.c.bf16 %v3565_v59, %v3559_v42 }
 0x1b6   : > { %2825 = vst [vmem:[%s4231_s7 + $0x10] sm:$0xff] %v2797_v48  }
 0x1b7   : > { %2829 = vst [vmem:[%s4231_s7 + $0x30] sm:$0xff] %v2817_v62  }
 0x1b8 PF: > { %s14_s15 = sadd.s32 1, %s3573_s15  }
 0x1b9   : > { %p11_p6 = scmp.ge.s32.totalorder %s14_s15, 21  }
 0x1bb   :  { %13 = sbr.rel (!%p11_p6) target bundleno = 1 (0x1), region = 77 }

</bundles_post_ra>
